<compile_context>
chip_gen: v7x
topology: tpu7x:2x2x1
jax: 0.10.0
libtpu: 0.0.40
codegen_flags: <defaults>
</compile_context>

<pallas_src>
import numpy as np

import jax
import jax.numpy as jnp
from jax.experimental import pallas as pl
from jax.experimental.pallas import tpu as pltpu

BN_EPS = 1e-5


def _vmem_limit():
    """96 MiB on v5e/v6e (128 MiB physical), 48 MiB on v7x (64 MiB physical)."""
    try:
        cap = int(pltpu.get_tpu_info().vmem_capacity_bytes)
    except Exception:
        return 48 * 1024 * 1024
    return min(cap * 3 // 4, 100 * 1024 * 1024)


def _pick_tile(hw, bytes_per_pos, budget=4 * 1024 * 1024, max_tile=8192):
    """Largest lane-tile (multiple of 128) that divides hw and fits the byte budget."""
    cap = min(hw, max_tile, max(128, budget // max(bytes_per_pos, 1)))
    for t in range(cap - cap % 128, 0, -128):
        if hw % t == 0:
            return t
    return hw  # awkward hw: single full-width block (always layout-legal)


def _tap_masks(h, w):
    """Per-tap validity masks over the flattened H*W lane axis (zero at padding taps)."""
    hw = h * w
    rr = np.arange(hw) // w
    jj = np.arange(hw) % w

    def build(k):
        kk = k // 2
        m = np.zeros((k * k, hw), np.float32)
        for dy in range(k):
            for dx in range(k):
                r2 = rr + dy - kk
                j2 = jj + dx - kk
                m[dy * k + dx] = ((r2 >= 0) & (r2 < h) & (j2 >= 0) & (j2 < w))
        return jnp.asarray(m, jnp.float32)

    return build(3), build(5)


# -----------------------------------------------------------------------------
# Kernel 1: conv1+conv2 + four fused ELAN stages + ChannelAttention pooling
# -----------------------------------------------------------------------------
def _make_stages_kernel(h, w, c):
    hw = h * w

    def silu(v):
        return v * jax.nn.sigmoid(v)

    def shift_lanes(v, off):
        # shifted[:, p] = v[:, p + off]; out-of-range lanes become zero (and are masked
        # anyway).  Lowers to XLU lane shifts, keeping the taps lane-dense (the perf-review
        # "packed layout + roll" request expressed as slice+concat for exact semantics).
        if off == 0:
            return v
        pad = jnp.zeros((v.shape[0], abs(off)), v.dtype)
        if off > 0:
            return jnp.concatenate([v[:, off:], pad], axis=1)
        return jnp.concatenate([pad, v[:, :off]], axis=1)

    def kernel(x_ref, w12_ref, b12_ref, m3_ref, m25_ref,
               w3_ref, b3_ref, wdw_ref, bdw_ref, wpw_ref, bpw_ref,
               br_ref, pool_ref):
        m3 = m3_ref[...]                                     # (9, hw)  f32
        m25 = m25_ref[...]                                   # (25, hw) f32

        # ---- conv1 | conv2 : one (2c, c1) x (c1, hw) MXU dot, bias + SiLU (f32 epilogue) --
        x = x_ref[0].astype(jnp.bfloat16)                    # (c1, hw)
        y12 = jnp.dot(w12_ref[...], x, preferred_element_type=jnp.float32)
        y12 = silu(y12 + b12_ref[...])                       # (2c, hw) f32
        out1, out2 = y12[:c], y12[c:]

        def one_stage(s, xin):
            w3_s, b3_s = w3_ref[s], b3_ref[s]
            wdw_s, bdw_s = wdw_ref[s], bdw_ref[s]
            wpw_s, bpw_s = wpw_ref[s], bpw_ref[s]

            # ConvModule 3x3: im2col fused into ONE K=9c dot (taps stacked on sublanes).
            taps = []
            for t in range(9):
                dy, dx = divmod(t, 3)
                off = (dy - 1) * w + (dx - 1)
                taps.append(shift_lanes(xin, off) * m3[t:t + 1])
            taps = jnp.concatenate(taps, axis=0).astype(jnp.bfloat16)        # (9c, hw)
            y = silu(jnp.dot(w3_s, taps, preferred_element_type=jnp.float32)
                     + b3_s)                                                  # (c, hw)

            # DepthwiseSeparableConv: 5x5 depthwise as 25 lane-dense VPU MACs + BN + SiLU.
            acc = jnp.zeros((c, hw), jnp.float32)
            for t in range(25):
                dy, dx = divmod(t, 5)
                off = (dy - 2) * w + (dx - 2)
                acc = acc + (shift_lanes(y, off) * m25[t:t + 1]) * wdw_s[:, t:t + 1]
            z = silu(acc + bdw_s)

            # pointwise 1x1 + BN + SiLU, DS internal skip (+y), ELAN identity (+xin).
            zz = silu(jnp.dot(wpw_s, z.astype(jnp.bfloat16),
                              preferred_element_type=jnp.float32) + bpw_s)
            return zz + y + xin

        outs = [out1, out2]
        cur = out2
        for s in range(4):
            cur = one_stage(s, cur)
            outs.append(cur)

        cat = jnp.concatenate(outs, axis=0)                  # (6c, hw) f32, never hits HBM
        br_ref[0] = cat.astype(br_ref.dtype)                 # bf16 branches for conv11
        pool_ref[0] = jnp.mean(cat, axis=1, keepdims=True)   # ChannelAttention avg-pool

    return kernel


def _run_stages(x3, p, m3, m25, h, w):
    n, c1, hw = x3.shape
    c = p['st_b3'].shape[1]
    cc = 6 * c

    flops = 2 * n * hw * (2 * c * c1 + 4 * (9 * c * c + 25 * c + c * c + 2 * c))
    bytes_accessed = 4 * n * c1 * hw + 2 * n * cc * hw + 4 * n * cc

    def full(shape):
        return pl.BlockSpec(shape, lambda i, _nd=len(shape): (0,) * _nd)

    return pl.pallas_call(
        _make_stages_kernel(h, w, c),
        out_shape=(jax.ShapeDtypeStruct((n, cc, hw), jnp.bfloat16),
                   jax.ShapeDtypeStruct((n, cc, 1), jnp.float32)),
        grid=(n,),
        in_specs=[
            pl.BlockSpec((1, c1, hw), lambda i: (i, 0, 0)),
            full((2 * c, c1)),
            full((2 * c, 1)),
            full((9, hw)),
            full((25, hw)),
            full((4, c, 9 * c)),
            full((4, c, 1)),
            full((4, c, 25)),
            full((4, c, 1)),
            full((4, c, c)),
            full((4, c, 1)),
        ],
        out_specs=(
            pl.BlockSpec((1, cc, hw), lambda i: (i, 0, 0)),
            pl.BlockSpec((1, cc, 1), lambda i: (i, 0, 0)),
        ),
        compiler_params=pltpu.CompilerParams(
            dimension_semantics=("parallel",),
            vmem_limit_bytes=_vmem_limit()),
        cost_estimate=pl.CostEstimate(flops=flops, transcendentals=14 * n * hw * c,
                                      bytes_accessed=bytes_accessed),
    )(x3, p['w12'], p['b12'], m3, m25,
      p['st_w3'], p['st_b3'], p['st_wdw'], p['st_bdw'], p['st_wpw'], p['st_bpw'])


# -----------------------------------------------------------------------------
# Kernel 2: ChannelAttention gate pre-folded into conv11 weights; one K=6c_ dot per tile
# -----------------------------------------------------------------------------
def _attn_conv11_kernel(br_ref, w_ref, b_ref, o_ref):
    y = jnp.dot(w_ref[0], br_ref[0], preferred_element_type=jnp.float32)   # (c2, T)
    y = y + b_ref[...]
    o_ref[0] = (y * jax.nn.sigmoid(y)).astype(o_ref.dtype)                 # SiLU epilogue


def _run_attn_conv11(branches, w_sc, b11):
    n, cc, hw = branches.shape
    c2 = w_sc.shape[1]
    t = _pick_tile(hw, bytes_per_pos=2 * cc + 4 * c2)

    flops = 2 * n * hw * cc * c2
    bytes_accessed = n * hw * (2 * cc + 4 * c2) + 2 * n * c2 * cc

    return pl.pallas_call(
        _attn_conv11_kernel,
        out_shape=jax.ShapeDtypeStruct((n, c2, hw), jnp.float32),
        grid=(n, hw // t),
        in_specs=[
            pl.BlockSpec((1, cc, t), lambda i, j: (i, 0, j)),
            pl.BlockSpec((1, c2, cc), lambda i, j: (i, 0, 0)),
            pl.BlockSpec((c2, 1), lambda i, j: (0, 0)),
        ],
        out_specs=pl.BlockSpec((1, c2, t), lambda i, j: (i, 0, j)),
        compiler_params=pltpu.CompilerParams(
            dimension_semantics=("parallel", "parallel"),
            vmem_limit_bytes=_vmem_limit()),
        cost_estimate=pl.CostEstimate(flops=flops, transcendentals=n * hw * c2,
                                      bytes_accessed=bytes_accessed),
    )(branches, w_sc, b11)


# -----------------------------------------------------------------------------
# Forward pass
# -----------------------------------------------------------------------------
def elan_depth_m_forward(x, p):
    n, c1, h, w = x.shape
    hw = h * w
    c2 = p['w11'].shape[0]

    x3 = x.reshape(n, c1, hw)
    m3, m25 = _tap_masks(h, w)

    branches, pooled = _run_stages(x3, p, m3, m25, h, w)    # (N,6c_,HW) bf16, (N,6c_,1) f32

    # ChannelAttention gate: avg-pool -> 1x1 fc -> Hardsigmoid; folded into conv11 weights.
    gate_in = pooled[:, :, 0] @ p['attn_w'] + p['attn_b']
    gate = jnp.clip(gate_in / 6.0 + 0.5, 0.0, 1.0)                        # (N, 6c_)
    w_sc = (p['w11'][None, :, :] * gate[:, None, :]).astype(jnp.bfloat16)  # (N, c2, 6c_)

    out = _run_attn_conv11(branches, w_sc, p['b11'])                       # (N, c2, HW) f32
    return out.reshape(n, c2, h, w)


# -----------------------------------------------------------------------------
# Deterministic synthetic parameters (eval-mode BN folded into the conv weights)
# -----------------------------------------------------------------------------
def make_params(key, c1, c2, hidden_ratio=0.5):
    c_ = int(c2 * hidden_ratio)
    keys = iter(jax.random.split(key, 128))
    nrm = lambda *s: jax.random.normal(next(keys), s, jnp.float32)

    def bn_fold(c):
        gamma = 1.0 + 0.1 * nrm(c)
        beta = 0.1 * nrm(c)
        mean = 0.1 * nrm(c)
        var = 1.0 + jnp.abs(nrm(c))
        scale = gamma / jnp.sqrt(var + BN_EPS)
        return scale, beta - mean * scale

    def conv1x1(cin, cout):
        wgt = nrm(cout, cin) / cin ** 0.5
        s, b = bn_fold(cout)
        return wgt * s[:, None], b[:, None]

    def conv3x3(cin, cout):
        wgt = nrm(cout, 3, 3, cin) / (9 * cin) ** 0.5
        s, b = bn_fold(cout)
        wgt = (wgt * s[:, None, None, None]).reshape(cout, 9 * cin)   # K = (dy*3+dx)*cin + ci
        return wgt, b[:, None]

    def dw5x5(c):
        wgt = nrm(c, 5, 5) / 5.0
        s, b = bn_fold(c)
        return (wgt * s[:, None, None]).reshape(c, 25), b[:, None]

    w1, b1 = conv1x1(c1, c_)
    w2, b2 = conv1x1(c1, c_)

    st_w3, st_b3, st_wdw, st_bdw, st_wpw, st_bpw = [], [], [], [], [], []
    for _ in range(4):
        w3, b3 = conv3x3(c_, c_)
        wd, bd = dw5x5(c_)
        wp, bp = conv1x1(c_, c_)
        st_w3.append(w3); st_b3.append(b3); st_wdw.append(wd)
        st_bdw.append(bd); st_wpw.append(wp); st_bpw.append(bp)

    w11, b11 = conv1x1(6 * c_, c2)

    return dict(
        w12=jnp.concatenate([w1, w2], axis=0).astype(jnp.bfloat16),   # conv1 | conv2 fused
        b12=jnp.concatenate([b1, b2], axis=0),
        st_w3=jnp.stack(st_w3).astype(jnp.bfloat16),                  # (4, c_, 9c_)
        st_b3=jnp.stack(st_b3),                                       # (4, c_, 1)
        st_wdw=jnp.stack(st_wdw),                                     # (4, c_, 25)  (VPU path)
        st_bdw=jnp.stack(st_bdw),
        st_wpw=jnp.stack(st_wpw).astype(jnp.bfloat16),                # (4, c_, c_)
        st_bpw=jnp.stack(st_bpw),
        w11=w11,                                                      # (c2, 6c_) f32 (gate folded per batch)
        b11=b11,                                                      # (c2, 1)
        attn_w=nrm(6 * c_, 6 * c_) / (6 * c_) ** 0.5,
        attn_b=0.1 * nrm(6 * c_),
    )


if __name__ == "__main__":
    key = jax.random.PRNGKey(0)
    kx, kp = jax.random.split(key)

    N, H, W = 2, 16, 16
    C1, C2 = 16, 16                       # c_ = 8, ELAN concat width = 48
    x = jax.random.normal(kx, (N, C1, H, W), jnp.float32)     # NCHW, like the PyTorch module
    params = make_params(kp, C1, C2)

    fwd = jax.jit(elan_depth_m_forward)
    out = fwd(x, params)
    jax.block_until_ready(out)

    assert out.shape == (N, C2, H, W), out.shape
    assert bool(jnp.all(jnp.isfinite(out)))
    print("KERNEL_OK")
</pallas_src>

<mosaic_0001>
module attributes {stable_mosaic.version = 11 : i64} {
  func.func @kernel(%arg0: i32, %arg1: memref<1x16x256xf32, #tpu.memory_space<vmem>>, %arg2: memref<16x16xbf16, #tpu.memory_space<vmem>>, %arg3: memref<16x1xf32, #tpu.memory_space<vmem>>, %arg4: memref<9x256xf32, #tpu.memory_space<vmem>>, %arg5: memref<25x256xf32, #tpu.memory_space<vmem>>, %arg6: memref<4x8x72xbf16, #tpu.memory_space<vmem>>, %arg7: memref<4x8x1xf32, #tpu.memory_space<vmem>>, %arg8: memref<4x8x25xf32, #tpu.memory_space<vmem>>, %arg9: memref<4x8x1xf32, #tpu.memory_space<vmem>>, %arg10: memref<4x8x8xbf16, #tpu.memory_space<vmem>>, %arg11: memref<4x8x1xf32, #tpu.memory_space<vmem>>, %arg12: memref<1x48x256xbf16, #tpu.memory_space<vmem>>, %arg13: memref<1x48x1xf32, #tpu.memory_space<vmem>>) attributes {dimension_semantics = [#tpu.dimension_semantics<parallel>], iteration_bounds = array<i64: 2>, scalar_prefetch = 0 : i64, scratch_operands = 0 : i64, tpu.core_type = #tpu.core_type<tc>, window_params = [{transform_indices = @transform_0, window_bounds = array<i64: 1, 16, 256>}, {pipeline_mode = #tpu.pipeline_mode<synchronous>, transform_indices = @transform_1, window_bounds = array<i64: 16, 16>}, {pipeline_mode = #tpu.pipeline_mode<synchronous>, transform_indices = @transform_2, window_bounds = array<i64: 16, 1>}, {pipeline_mode = #tpu.pipeline_mode<synchronous>, transform_indices = @transform_3, window_bounds = array<i64: 9, 256>}, {pipeline_mode = #tpu.pipeline_mode<synchronous>, transform_indices = @transform_4, window_bounds = array<i64: 25, 256>}, {pipeline_mode = #tpu.pipeline_mode<synchronous>, transform_indices = @transform_5, window_bounds = array<i64: 4, 8, 72>}, {pipeline_mode = #tpu.pipeline_mode<synchronous>, transform_indices = @transform_6, window_bounds = array<i64: 4, 8, 1>}, {pipeline_mode = #tpu.pipeline_mode<synchronous>, transform_indices = @transform_7, window_bounds = array<i64: 4, 8, 25>}, {pipeline_mode = #tpu.pipeline_mode<synchronous>, transform_indices = @transform_8, window_bounds = array<i64: 4, 8, 1>}, {pipeline_mode = #tpu.pipeline_mode<synchronous>, transform_indices = @transform_9, window_bounds = array<i64: 4, 8, 8>}, {pipeline_mode = #tpu.pipeline_mode<synchronous>, transform_indices = @transform_10, window_bounds = array<i64: 4, 8, 1>}, {transform_indices = @transform_11, window_bounds = array<i64: 1, 48, 256>}, {transform_indices = @transform_12, window_bounds = array<i64: 1, 48, 1>}]} {
    %c0 = arith.constant 0 : index
    %c0_0 = arith.constant 0 : index
    %0 = vector.load %arg4[%c0, %c0_0] : memref<9x256xf32, #tpu.memory_space<vmem>>, vector<9x256xf32>
    %c0_1 = arith.constant 0 : index
    %c0_2 = arith.constant 0 : index
    %1 = vector.load %arg5[%c0_1, %c0_2] : memref<25x256xf32, #tpu.memory_space<vmem>>, vector<25x256xf32>
    %c0_3 = arith.constant 0 : index
    %c0_4 = arith.constant 0 : index
    %c0_5 = arith.constant 0 : index
    %2 = vector.load %arg1[%c0_3, %c0_4, %c0_5] : memref<1x16x256xf32, #tpu.memory_space<vmem>>, vector<1x16x256xf32>
    %3 = vector.shape_cast %2 : vector<1x16x256xf32> to vector<16x256xf32>
    %4 = arith.truncf %3 : vector<16x256xf32> to vector<16x256xbf16>
    %c0_6 = arith.constant 0 : index
    %c0_7 = arith.constant 0 : index
    %5 = vector.load %arg2[%c0_6, %c0_7] : memref<16x16xbf16, #tpu.memory_space<vmem>>, vector<16x16xbf16>
    %cst = arith.constant dense<0.000000e+00> : vector<16x256xf32>
    %6 = tpu.matmul %5, %4, %cst {dimension_numbers = #tpu.dot_dimension_numbers<[1], [0], [0], [1], [0, 0, 1, 1], [], []>} : vector<16x16xbf16>, vector<16x256xbf16>, vector<16x256xf32> -> vector<16x256xf32>
    %c0_8 = arith.constant 0 : index
    %c0_9 = arith.constant 0 : index
    %7 = vector.load %arg3[%c0_8, %c0_9] : memref<16x1xf32, #tpu.memory_space<vmem>>, vector<16x1xf32>
    %8 = vector.broadcast %7 : vector<16x1xf32> to vector<16x256xf32>
    %9 = arith.addf %6, %8 : vector<16x256xf32>
    %10 = arith.negf %9 : vector<16x256xf32>
    %11 = math.exp %10 : vector<16x256xf32>
    %cst_10 = arith.constant 1.000000e+00 : f32
    %12 = vector.broadcast %cst_10 : f32 to vector<16x256xf32>
    %13 = arith.addf %12, %11 : vector<16x256xf32>
    %14 = arith.divf %12, %13 : vector<16x256xf32>
    %15 = arith.mulf %9, %14 : vector<16x256xf32>
    %16 = vector.extract_strided_slice %15 {offsets = [0, 0], sizes = [8, 256], strides = [1, 1]} : vector<16x256xf32> to vector<8x256xf32>
    %17 = vector.extract_strided_slice %15 {offsets = [8, 0], sizes = [8, 256], strides = [1, 1]} : vector<16x256xf32> to vector<8x256xf32>
    %c0_11 = arith.constant 0 : index
    %c0_12 = arith.constant 0 : index
    %c0_13 = arith.constant 0 : index
    %18 = vector.load %arg6[%c0_11, %c0_12, %c0_13] : memref<4x8x72xbf16, #tpu.memory_space<vmem>>, vector<1x8x72xbf16>
    %19 = vector.shape_cast %18 : vector<1x8x72xbf16> to vector<8x72xbf16>
    %c0_14 = arith.constant 0 : index
    %c0_15 = arith.constant 0 : index
    %c0_16 = arith.constant 0 : index
    %20 = vector.load %arg7[%c0_14, %c0_15, %c0_16] : memref<4x8x1xf32, #tpu.memory_space<vmem>>, vector<1x8x1xf32>
    %21 = vector.shape_cast %20 : vector<1x8x1xf32> to vector<8x1xf32>
    %c0_17 = arith.constant 0 : index
    %c0_18 = arith.constant 0 : index
    %c0_19 = arith.constant 0 : index
    %22 = vector.load %arg8[%c0_17, %c0_18, %c0_19] : memref<4x8x25xf32, #tpu.memory_space<vmem>>, vector<1x8x25xf32>
    %23 = vector.shape_cast %22 : vector<1x8x25xf32> to vector<8x25xf32>
    %c0_20 = arith.constant 0 : index
    %c0_21 = arith.constant 0 : index
    %c0_22 = arith.constant 0 : index
    %24 = vector.load %arg9[%c0_20, %c0_21, %c0_22] : memref<4x8x1xf32, #tpu.memory_space<vmem>>, vector<1x8x1xf32>
    %25 = vector.shape_cast %24 : vector<1x8x1xf32> to vector<8x1xf32>
    %c0_23 = arith.constant 0 : index
    %c0_24 = arith.constant 0 : index
    %c0_25 = arith.constant 0 : index
    %26 = vector.load %arg10[%c0_23, %c0_24, %c0_25] : memref<4x8x8xbf16, #tpu.memory_space<vmem>>, vector<1x8x8xbf16>
    %27 = vector.shape_cast %26 : vector<1x8x8xbf16> to vector<8x8xbf16>
    %c0_26 = arith.constant 0 : index
    %c0_27 = arith.constant 0 : index
    %c0_28 = arith.constant 0 : index
    %28 = vector.load %arg11[%c0_26, %c0_27, %c0_28] : memref<4x8x1xf32, #tpu.memory_space<vmem>>, vector<1x8x1xf32>
    %29 = vector.shape_cast %28 : vector<1x8x1xf32> to vector<8x1xf32>
    %cst_29 = arith.constant 0.000000e+00 : f32
    %30 = vector.broadcast %cst_29 : f32 to vector<8x17xf32>
    %31 = vector.extract_strided_slice %17 {offsets = [0, 0], sizes = [8, 239], strides = [1, 1]} : vector<8x256xf32> to vector<8x239xf32>
    %32 = tpu.concatenate %30, %31 in 1 : vector<8x17xf32>, vector<8x239xf32> -> vector<8x256xf32>
    %33 = vector.extract_strided_slice %0 {offsets = [0, 0], sizes = [1, 256], strides = [1, 1]} : vector<9x256xf32> to vector<1x256xf32>
    %34 = vector.broadcast %33 : vector<1x256xf32> to vector<8x256xf32>
    %35 = arith.mulf %32, %34 : vector<8x256xf32>
    %cst_30 = arith.constant 0.000000e+00 : f32
    %36 = vector.broadcast %cst_30 : f32 to vector<8x16xf32>
    %37 = vector.extract_strided_slice %17 {offsets = [0, 0], sizes = [8, 240], strides = [1, 1]} : vector<8x256xf32> to vector<8x240xf32>
    %38 = tpu.concatenate %36, %37 in 1 : vector<8x16xf32>, vector<8x240xf32> -> vector<8x256xf32>
    %39 = vector.extract_strided_slice %0 {offsets = [1, 0], sizes = [1, 256], strides = [1, 1]} : vector<9x256xf32> to vector<1x256xf32>
    %40 = vector.broadcast %39 : vector<1x256xf32> to vector<8x256xf32>
    %41 = arith.mulf %38, %40 : vector<8x256xf32>
    %cst_31 = arith.constant 0.000000e+00 : f32
    %42 = vector.broadcast %cst_31 : f32 to vector<8x15xf32>
    %43 = vector.extract_strided_slice %17 {offsets = [0, 0], sizes = [8, 241], strides = [1, 1]} : vector<8x256xf32> to vector<8x241xf32>
    %44 = tpu.concatenate %42, %43 in 1 : vector<8x15xf32>, vector<8x241xf32> -> vector<8x256xf32>
    %45 = vector.extract_strided_slice %0 {offsets = [2, 0], sizes = [1, 256], strides = [1, 1]} : vector<9x256xf32> to vector<1x256xf32>
    %46 = vector.broadcast %45 : vector<1x256xf32> to vector<8x256xf32>
    %47 = arith.mulf %44, %46 : vector<8x256xf32>
    %cst_32 = arith.constant 0.000000e+00 : f32
    %48 = vector.broadcast %cst_32 : f32 to vector<8x1xf32>
    %49 = vector.extract_strided_slice %17 {offsets = [0, 0], sizes = [8, 255], strides = [1, 1]} : vector<8x256xf32> to vector<8x255xf32>
    %50 = tpu.concatenate %48, %49 in 1 : vector<8x1xf32>, vector<8x255xf32> -> vector<8x256xf32>
    %51 = vector.extract_strided_slice %0 {offsets = [3, 0], sizes = [1, 256], strides = [1, 1]} : vector<9x256xf32> to vector<1x256xf32>
    %52 = vector.broadcast %51 : vector<1x256xf32> to vector<8x256xf32>
    %53 = arith.mulf %50, %52 : vector<8x256xf32>
    %54 = vector.extract_strided_slice %0 {offsets = [4, 0], sizes = [1, 256], strides = [1, 1]} : vector<9x256xf32> to vector<1x256xf32>
    %55 = vector.broadcast %54 : vector<1x256xf32> to vector<8x256xf32>
    %56 = arith.mulf %17, %55 : vector<8x256xf32>
    %cst_33 = arith.constant 0.000000e+00 : f32
    %57 = vector.broadcast %cst_33 : f32 to vector<8x1xf32>
    %58 = vector.extract_strided_slice %17 {offsets = [0, 1], sizes = [8, 255], strides = [1, 1]} : vector<8x256xf32> to vector<8x255xf32>
    %59 = tpu.concatenate %58, %57 in 1 : vector<8x255xf32>, vector<8x1xf32> -> vector<8x256xf32>
    %60 = vector.extract_strided_slice %0 {offsets = [5, 0], sizes = [1, 256], strides = [1, 1]} : vector<9x256xf32> to vector<1x256xf32>
    %61 = vector.broadcast %60 : vector<1x256xf32> to vector<8x256xf32>
    %62 = arith.mulf %59, %61 : vector<8x256xf32>
    %cst_34 = arith.constant 0.000000e+00 : f32
    %63 = vector.broadcast %cst_34 : f32 to vector<8x15xf32>
    %64 = vector.extract_strided_slice %17 {offsets = [0, 15], sizes = [8, 241], strides = [1, 1]} : vector<8x256xf32> to vector<8x241xf32>
    %65 = tpu.concatenate %64, %63 in 1 : vector<8x241xf32>, vector<8x15xf32> -> vector<8x256xf32>
    %66 = vector.extract_strided_slice %0 {offsets = [6, 0], sizes = [1, 256], strides = [1, 1]} : vector<9x256xf32> to vector<1x256xf32>
    %67 = vector.broadcast %66 : vector<1x256xf32> to vector<8x256xf32>
    %68 = arith.mulf %65, %67 : vector<8x256xf32>
    %cst_35 = arith.constant 0.000000e+00 : f32
    %69 = vector.broadcast %cst_35 : f32 to vector<8x16xf32>
    %70 = vector.extract_strided_slice %17 {offsets = [0, 16], sizes = [8, 240], strides = [1, 1]} : vector<8x256xf32> to vector<8x240xf32>
    %71 = tpu.concatenate %70, %69 in 1 : vector<8x240xf32>, vector<8x16xf32> -> vector<8x256xf32>
    %72 = vector.extract_strided_slice %0 {offsets = [7, 0], sizes = [1, 256], strides = [1, 1]} : vector<9x256xf32> to vector<1x256xf32>
    %73 = vector.broadcast %72 : vector<1x256xf32> to vector<8x256xf32>
    %74 = arith.mulf %71, %73 : vector<8x256xf32>
    %cst_36 = arith.constant 0.000000e+00 : f32
    %75 = vector.broadcast %cst_36 : f32 to vector<8x17xf32>
    %76 = vector.extract_strided_slice %17 {offsets = [0, 17], sizes = [8, 239], strides = [1, 1]} : vector<8x256xf32> to vector<8x239xf32>
    %77 = tpu.concatenate %76, %75 in 1 : vector<8x239xf32>, vector<8x17xf32> -> vector<8x256xf32>
    %78 = vector.extract_strided_slice %0 {offsets = [8, 0], sizes = [1, 256], strides = [1, 1]} : vector<9x256xf32> to vector<1x256xf32>
    %79 = vector.broadcast %78 : vector<1x256xf32> to vector<8x256xf32>
    %80 = arith.mulf %77, %79 : vector<8x256xf32>
    %81 = tpu.concatenate %35, %41, %47, %53, %56, %62, %68, %74, %80 in 0 : vector<8x256xf32>, vector<8x256xf32>, vector<8x256xf32>, vector<8x256xf32>, vector<8x256xf32>, vector<8x256xf32>, vector<8x256xf32>, vector<8x256xf32>, vector<8x256xf32> -> vector<72x256xf32>
    %82 = arith.truncf %81 : vector<72x256xf32> to vector<72x256xbf16>
    %cst_37 = arith.constant dense<0.000000e+00> : vector<8x256xf32>
    %83 = tpu.matmul %19, %82, %cst_37 {dimension_numbers = #tpu.dot_dimension_numbers<[1], [0], [0], [1], [0, 0, 1, 1], [], []>} : vector<8x72xbf16>, vector<72x256xbf16>, vector<8x256xf32> -> vector<8x256xf32>
    %84 = vector.broadcast %21 : vector<8x1xf32> to vector<8x256xf32>
    %85 = arith.addf %83, %84 : vector<8x256xf32>
    %86 = arith.negf %85 : vector<8x256xf32>
    %87 = math.exp %86 : vector<8x256xf32>
    %cst_38 = arith.constant 1.000000e+00 : f32
    %88 = vector.broadcast %cst_38 : f32 to vector<8x256xf32>
    %89 = arith.addf %88, %87 : vector<8x256xf32>
    %90 = arith.divf %88, %89 : vector<8x256xf32>
    %91 = arith.mulf %85, %90 : vector<8x256xf32>
    %cst_39 = arith.constant 0.000000e+00 : f32
    %92 = vector.broadcast %cst_39 : f32 to vector<8x256xf32>
    %cst_40 = arith.constant 0.000000e+00 : f32
    %93 = vector.broadcast %cst_40 : f32 to vector<8x34xf32>
    %94 = vector.extract_strided_slice %91 {offsets = [0, 0], sizes = [8, 222], strides = [1, 1]} : vector<8x256xf32> to vector<8x222xf32>
    %95 = tpu.concatenate %93, %94 in 1 : vector<8x34xf32>, vector<8x222xf32> -> vector<8x256xf32>
    %96 = vector.extract_strided_slice %1 {offsets = [0, 0], sizes = [1, 256], strides = [1, 1]} : vector<25x256xf32> to vector<1x256xf32>
    %97 = vector.broadcast %96 : vector<1x256xf32> to vector<8x256xf32>
    %98 = arith.mulf %95, %97 : vector<8x256xf32>
    %99 = vector.extract_strided_slice %23 {offsets = [0, 0], sizes = [8, 1], strides = [1, 1]} : vector<8x25xf32> to vector<8x1xf32>
    %100 = vector.broadcast %99 : vector<8x1xf32> to vector<8x256xf32>
    %101 = arith.mulf %98, %100 : vector<8x256xf32>
    %102 = arith.addf %92, %101 : vector<8x256xf32>
    %cst_41 = arith.constant 0.000000e+00 : f32
    %103 = vector.broadcast %cst_41 : f32 to vector<8x33xf32>
    %104 = vector.extract_strided_slice %91 {offsets = [0, 0], sizes = [8, 223], strides = [1, 1]} : vector<8x256xf32> to vector<8x223xf32>
    %105 = tpu.concatenate %103, %104 in 1 : vector<8x33xf32>, vector<8x223xf32> -> vector<8x256xf32>
    %106 = vector.extract_strided_slice %1 {offsets = [1, 0], sizes = [1, 256], strides = [1, 1]} : vector<25x256xf32> to vector<1x256xf32>
    %107 = vector.broadcast %106 : vector<1x256xf32> to vector<8x256xf32>
    %108 = arith.mulf %105, %107 : vector<8x256xf32>
    %109 = vector.extract_strided_slice %23 {offsets = [0, 1], sizes = [8, 1], strides = [1, 1]} : vector<8x25xf32> to vector<8x1xf32>
    %110 = vector.broadcast %109 : vector<8x1xf32> to vector<8x256xf32>
    %111 = arith.mulf %108, %110 : vector<8x256xf32>
    %112 = arith.addf %102, %111 : vector<8x256xf32>
    %cst_42 = arith.constant 0.000000e+00 : f32
    %113 = vector.broadcast %cst_42 : f32 to vector<8x32xf32>
    %114 = vector.extract_strided_slice %91 {offsets = [0, 0], sizes = [8, 224], strides = [1, 1]} : vector<8x256xf32> to vector<8x224xf32>
    %115 = tpu.concatenate %113, %114 in 1 : vector<8x32xf32>, vector<8x224xf32> -> vector<8x256xf32>
    %116 = vector.extract_strided_slice %1 {offsets = [2, 0], sizes = [1, 256], strides = [1, 1]} : vector<25x256xf32> to vector<1x256xf32>
    %117 = vector.broadcast %116 : vector<1x256xf32> to vector<8x256xf32>
    %118 = arith.mulf %115, %117 : vector<8x256xf32>
    %119 = vector.extract_strided_slice %23 {offsets = [0, 2], sizes = [8, 1], strides = [1, 1]} : vector<8x25xf32> to vector<8x1xf32>
    %120 = vector.broadcast %119 : vector<8x1xf32> to vector<8x256xf32>
    %121 = arith.mulf %118, %120 : vector<8x256xf32>
    %122 = arith.addf %112, %121 : vector<8x256xf32>
    %cst_43 = arith.constant 0.000000e+00 : f32
    %123 = vector.broadcast %cst_43 : f32 to vector<8x31xf32>
    %124 = vector.extract_strided_slice %91 {offsets = [0, 0], sizes = [8, 225], strides = [1, 1]} : vector<8x256xf32> to vector<8x225xf32>
    %125 = tpu.concatenate %123, %124 in 1 : vector<8x31xf32>, vector<8x225xf32> -> vector<8x256xf32>
    %126 = vector.extract_strided_slice %1 {offsets = [3, 0], sizes = [1, 256], strides = [1, 1]} : vector<25x256xf32> to vector<1x256xf32>
    %127 = vector.broadcast %126 : vector<1x256xf32> to vector<8x256xf32>
    %128 = arith.mulf %125, %127 : vector<8x256xf32>
    %129 = vector.extract_strided_slice %23 {offsets = [0, 3], sizes = [8, 1], strides = [1, 1]} : vector<8x25xf32> to vector<8x1xf32>
    %130 = vector.broadcast %129 : vector<8x1xf32> to vector<8x256xf32>
    %131 = arith.mulf %128, %130 : vector<8x256xf32>
    %132 = arith.addf %122, %131 : vector<8x256xf32>
    %cst_44 = arith.constant 0.000000e+00 : f32
    %133 = vector.broadcast %cst_44 : f32 to vector<8x30xf32>
    %134 = vector.extract_strided_slice %91 {offsets = [0, 0], sizes = [8, 226], strides = [1, 1]} : vector<8x256xf32> to vector<8x226xf32>
    %135 = tpu.concatenate %133, %134 in 1 : vector<8x30xf32>, vector<8x226xf32> -> vector<8x256xf32>
    %136 = vector.extract_strided_slice %1 {offsets = [4, 0], sizes = [1, 256], strides = [1, 1]} : vector<25x256xf32> to vector<1x256xf32>
    %137 = vector.broadcast %136 : vector<1x256xf32> to vector<8x256xf32>
    %138 = arith.mulf %135, %137 : vector<8x256xf32>
    %139 = vector.extract_strided_slice %23 {offsets = [0, 4], sizes = [8, 1], strides = [1, 1]} : vector<8x25xf32> to vector<8x1xf32>
    %140 = vector.broadcast %139 : vector<8x1xf32> to vector<8x256xf32>
    %141 = arith.mulf %138, %140 : vector<8x256xf32>
    %142 = arith.addf %132, %141 : vector<8x256xf32>
    %cst_45 = arith.constant 0.000000e+00 : f32
    %143 = vector.broadcast %cst_45 : f32 to vector<8x18xf32>
    %144 = vector.extract_strided_slice %91 {offsets = [0, 0], sizes = [8, 238], strides = [1, 1]} : vector<8x256xf32> to vector<8x238xf32>
    %145 = tpu.concatenate %143, %144 in 1 : vector<8x18xf32>, vector<8x238xf32> -> vector<8x256xf32>
    %146 = vector.extract_strided_slice %1 {offsets = [5, 0], sizes = [1, 256], strides = [1, 1]} : vector<25x256xf32> to vector<1x256xf32>
    %147 = vector.broadcast %146 : vector<1x256xf32> to vector<8x256xf32>
    %148 = arith.mulf %145, %147 : vector<8x256xf32>
    %149 = vector.extract_strided_slice %23 {offsets = [0, 5], sizes = [8, 1], strides = [1, 1]} : vector<8x25xf32> to vector<8x1xf32>
    %150 = vector.broadcast %149 : vector<8x1xf32> to vector<8x256xf32>
    %151 = arith.mulf %148, %150 : vector<8x256xf32>
    %152 = arith.addf %142, %151 : vector<8x256xf32>
    %cst_46 = arith.constant 0.000000e+00 : f32
    %153 = vector.broadcast %cst_46 : f32 to vector<8x17xf32>
    %154 = vector.extract_strided_slice %91 {offsets = [0, 0], sizes = [8, 239], strides = [1, 1]} : vector<8x256xf32> to vector<8x239xf32>
    %155 = tpu.concatenate %153, %154 in 1 : vector<8x17xf32>, vector<8x239xf32> -> vector<8x256xf32>
    %156 = vector.extract_strided_slice %1 {offsets = [6, 0], sizes = [1, 256], strides = [1, 1]} : vector<25x256xf32> to vector<1x256xf32>
    %157 = vector.broadcast %156 : vector<1x256xf32> to vector<8x256xf32>
    %158 = arith.mulf %155, %157 : vector<8x256xf32>
    %159 = vector.extract_strided_slice %23 {offsets = [0, 6], sizes = [8, 1], strides = [1, 1]} : vector<8x25xf32> to vector<8x1xf32>
    %160 = vector.broadcast %159 : vector<8x1xf32> to vector<8x256xf32>
    %161 = arith.mulf %158, %160 : vector<8x256xf32>
    %162 = arith.addf %152, %161 : vector<8x256xf32>
    %cst_47 = arith.constant 0.000000e+00 : f32
    %163 = vector.broadcast %cst_47 : f32 to vector<8x16xf32>
    %164 = vector.extract_strided_slice %91 {offsets = [0, 0], sizes = [8, 240], strides = [1, 1]} : vector<8x256xf32> to vector<8x240xf32>
    %165 = tpu.concatenate %163, %164 in 1 : vector<8x16xf32>, vector<8x240xf32> -> vector<8x256xf32>
    %166 = vector.extract_strided_slice %1 {offsets = [7, 0], sizes = [1, 256], strides = [1, 1]} : vector<25x256xf32> to vector<1x256xf32>
    %167 = vector.broadcast %166 : vector<1x256xf32> to vector<8x256xf32>
    %168 = arith.mulf %165, %167 : vector<8x256xf32>
    %169 = vector.extract_strided_slice %23 {offsets = [0, 7], sizes = [8, 1], strides = [1, 1]} : vector<8x25xf32> to vector<8x1xf32>
    %170 = vector.broadcast %169 : vector<8x1xf32> to vector<8x256xf32>
    %171 = arith.mulf %168, %170 : vector<8x256xf32>
    %172 = arith.addf %162, %171 : vector<8x256xf32>
    %cst_48 = arith.constant 0.000000e+00 : f32
    %173 = vector.broadcast %cst_48 : f32 to vector<8x15xf32>
    %174 = vector.extract_strided_slice %91 {offsets = [0, 0], sizes = [8, 241], strides = [1, 1]} : vector<8x256xf32> to vector<8x241xf32>
    %175 = tpu.concatenate %173, %174 in 1 : vector<8x15xf32>, vector<8x241xf32> -> vector<8x256xf32>
    %176 = vector.extract_strided_slice %1 {offsets = [8, 0], sizes = [1, 256], strides = [1, 1]} : vector<25x256xf32> to vector<1x256xf32>
    %177 = vector.broadcast %176 : vector<1x256xf32> to vector<8x256xf32>
    %178 = arith.mulf %175, %177 : vector<8x256xf32>
    %179 = vector.extract_strided_slice %23 {offsets = [0, 8], sizes = [8, 1], strides = [1, 1]} : vector<8x25xf32> to vector<8x1xf32>
    %180 = vector.broadcast %179 : vector<8x1xf32> to vector<8x256xf32>
    %181 = arith.mulf %178, %180 : vector<8x256xf32>
    %182 = arith.addf %172, %181 : vector<8x256xf32>
    %cst_49 = arith.constant 0.000000e+00 : f32
    %183 = vector.broadcast %cst_49 : f32 to vector<8x14xf32>
    %184 = vector.extract_strided_slice %91 {offsets = [0, 0], sizes = [8, 242], strides = [1, 1]} : vector<8x256xf32> to vector<8x242xf32>
    %185 = tpu.concatenate %183, %184 in 1 : vector<8x14xf32>, vector<8x242xf32> -> vector<8x256xf32>
    %186 = vector.extract_strided_slice %1 {offsets = [9, 0], sizes = [1, 256], strides = [1, 1]} : vector<25x256xf32> to vector<1x256xf32>
    %187 = vector.broadcast %186 : vector<1x256xf32> to vector<8x256xf32>
    %188 = arith.mulf %185, %187 : vector<8x256xf32>
    %189 = vector.extract_strided_slice %23 {offsets = [0, 9], sizes = [8, 1], strides = [1, 1]} : vector<8x25xf32> to vector<8x1xf32>
    %190 = vector.broadcast %189 : vector<8x1xf32> to vector<8x256xf32>
    %191 = arith.mulf %188, %190 : vector<8x256xf32>
    %192 = arith.addf %182, %191 : vector<8x256xf32>
    %cst_50 = arith.constant 0.000000e+00 : f32
    %193 = vector.broadcast %cst_50 : f32 to vector<8x2xf32>
    %194 = vector.extract_strided_slice %91 {offsets = [0, 0], sizes = [8, 254], strides = [1, 1]} : vector<8x256xf32> to vector<8x254xf32>
    %195 = tpu.concatenate %193, %194 in 1 : vector<8x2xf32>, vector<8x254xf32> -> vector<8x256xf32>
    %196 = vector.extract_strided_slice %1 {offsets = [10, 0], sizes = [1, 256], strides = [1, 1]} : vector<25x256xf32> to vector<1x256xf32>
    %197 = vector.broadcast %196 : vector<1x256xf32> to vector<8x256xf32>
    %198 = arith.mulf %195, %197 : vector<8x256xf32>
    %199 = vector.extract_strided_slice %23 {offsets = [0, 10], sizes = [8, 1], strides = [1, 1]} : vector<8x25xf32> to vector<8x1xf32>
    %200 = vector.broadcast %199 : vector<8x1xf32> to vector<8x256xf32>
    %201 = arith.mulf %198, %200 : vector<8x256xf32>
    %202 = arith.addf %192, %201 : vector<8x256xf32>
    %cst_51 = arith.constant 0.000000e+00 : f32
    %203 = vector.broadcast %cst_51 : f32 to vector<8x1xf32>
    %204 = vector.extract_strided_slice %91 {offsets = [0, 0], sizes = [8, 255], strides = [1, 1]} : vector<8x256xf32> to vector<8x255xf32>
    %205 = tpu.concatenate %203, %204 in 1 : vector<8x1xf32>, vector<8x255xf32> -> vector<8x256xf32>
    %206 = vector.extract_strided_slice %1 {offsets = [11, 0], sizes = [1, 256], strides = [1, 1]} : vector<25x256xf32> to vector<1x256xf32>
    %207 = vector.broadcast %206 : vector<1x256xf32> to vector<8x256xf32>
    %208 = arith.mulf %205, %207 : vector<8x256xf32>
    %209 = vector.extract_strided_slice %23 {offsets = [0, 11], sizes = [8, 1], strides = [1, 1]} : vector<8x25xf32> to vector<8x1xf32>
    %210 = vector.broadcast %209 : vector<8x1xf32> to vector<8x256xf32>
    %211 = arith.mulf %208, %210 : vector<8x256xf32>
    %212 = arith.addf %202, %211 : vector<8x256xf32>
    %213 = vector.extract_strided_slice %1 {offsets = [12, 0], sizes = [1, 256], strides = [1, 1]} : vector<25x256xf32> to vector<1x256xf32>
    %214 = vector.broadcast %213 : vector<1x256xf32> to vector<8x256xf32>
    %215 = arith.mulf %91, %214 : vector<8x256xf32>
    %216 = vector.extract_strided_slice %23 {offsets = [0, 12], sizes = [8, 1], strides = [1, 1]} : vector<8x25xf32> to vector<8x1xf32>
    %217 = vector.broadcast %216 : vector<8x1xf32> to vector<8x256xf32>
    %218 = arith.mulf %215, %217 : vector<8x256xf32>
    %219 = arith.addf %212, %218 : vector<8x256xf32>
    %cst_52 = arith.constant 0.000000e+00 : f32
    %220 = vector.broadcast %cst_52 : f32 to vector<8x1xf32>
    %221 = vector.extract_strided_slice %91 {offsets = [0, 1], sizes = [8, 255], strides = [1, 1]} : vector<8x256xf32> to vector<8x255xf32>
    %222 = tpu.concatenate %221, %220 in 1 : vector<8x255xf32>, vector<8x1xf32> -> vector<8x256xf32>
    %223 = vector.extract_strided_slice %1 {offsets = [13, 0], sizes = [1, 256], strides = [1, 1]} : vector<25x256xf32> to vector<1x256xf32>
    %224 = vector.broadcast %223 : vector<1x256xf32> to vector<8x256xf32>
    %225 = arith.mulf %222, %224 : vector<8x256xf32>
    %226 = vector.extract_strided_slice %23 {offsets = [0, 13], sizes = [8, 1], strides = [1, 1]} : vector<8x25xf32> to vector<8x1xf32>
    %227 = vector.broadcast %226 : vector<8x1xf32> to vector<8x256xf32>
    %228 = arith.mulf %225, %227 : vector<8x256xf32>
    %229 = arith.addf %219, %228 : vector<8x256xf32>
    %cst_53 = arith.constant 0.000000e+00 : f32
    %230 = vector.broadcast %cst_53 : f32 to vector<8x2xf32>
    %231 = vector.extract_strided_slice %91 {offsets = [0, 2], sizes = [8, 254], strides = [1, 1]} : vector<8x256xf32> to vector<8x254xf32>
    %232 = tpu.concatenate %231, %230 in 1 : vector<8x254xf32>, vector<8x2xf32> -> vector<8x256xf32>
    %233 = vector.extract_strided_slice %1 {offsets = [14, 0], sizes = [1, 256], strides = [1, 1]} : vector<25x256xf32> to vector<1x256xf32>
    %234 = vector.broadcast %233 : vector<1x256xf32> to vector<8x256xf32>
    %235 = arith.mulf %232, %234 : vector<8x256xf32>
    %236 = vector.extract_strided_slice %23 {offsets = [0, 14], sizes = [8, 1], strides = [1, 1]} : vector<8x25xf32> to vector<8x1xf32>
    %237 = vector.broadcast %236 : vector<8x1xf32> to vector<8x256xf32>
    %238 = arith.mulf %235, %237 : vector<8x256xf32>
    %239 = arith.addf %229, %238 : vector<8x256xf32>
    %cst_54 = arith.constant 0.000000e+00 : f32
    %240 = vector.broadcast %cst_54 : f32 to vector<8x14xf32>
    %241 = vector.extract_strided_slice %91 {offsets = [0, 14], sizes = [8, 242], strides = [1, 1]} : vector<8x256xf32> to vector<8x242xf32>
    %242 = tpu.concatenate %241, %240 in 1 : vector<8x242xf32>, vector<8x14xf32> -> vector<8x256xf32>
    %243 = vector.extract_strided_slice %1 {offsets = [15, 0], sizes = [1, 256], strides = [1, 1]} : vector<25x256xf32> to vector<1x256xf32>
    %244 = vector.broadcast %243 : vector<1x256xf32> to vector<8x256xf32>
    %245 = arith.mulf %242, %244 : vector<8x256xf32>
    %246 = vector.extract_strided_slice %23 {offsets = [0, 15], sizes = [8, 1], strides = [1, 1]} : vector<8x25xf32> to vector<8x1xf32>
    %247 = vector.broadcast %246 : vector<8x1xf32> to vector<8x256xf32>
    %248 = arith.mulf %245, %247 : vector<8x256xf32>
    %249 = arith.addf %239, %248 : vector<8x256xf32>
    %cst_55 = arith.constant 0.000000e+00 : f32
    %250 = vector.broadcast %cst_55 : f32 to vector<8x15xf32>
    %251 = vector.extract_strided_slice %91 {offsets = [0, 15], sizes = [8, 241], strides = [1, 1]} : vector<8x256xf32> to vector<8x241xf32>
    %252 = tpu.concatenate %251, %250 in 1 : vector<8x241xf32>, vector<8x15xf32> -> vector<8x256xf32>
    %253 = vector.extract_strided_slice %1 {offsets = [16, 0], sizes = [1, 256], strides = [1, 1]} : vector<25x256xf32> to vector<1x256xf32>
    %254 = vector.broadcast %253 : vector<1x256xf32> to vector<8x256xf32>
    %255 = arith.mulf %252, %254 : vector<8x256xf32>
    %256 = vector.extract_strided_slice %23 {offsets = [0, 16], sizes = [8, 1], strides = [1, 1]} : vector<8x25xf32> to vector<8x1xf32>
    %257 = vector.broadcast %256 : vector<8x1xf32> to vector<8x256xf32>
    %258 = arith.mulf %255, %257 : vector<8x256xf32>
    %259 = arith.addf %249, %258 : vector<8x256xf32>
    %cst_56 = arith.constant 0.000000e+00 : f32
    %260 = vector.broadcast %cst_56 : f32 to vector<8x16xf32>
    %261 = vector.extract_strided_slice %91 {offsets = [0, 16], sizes = [8, 240], strides = [1, 1]} : vector<8x256xf32> to vector<8x240xf32>
    %262 = tpu.concatenate %261, %260 in 1 : vector<8x240xf32>, vector<8x16xf32> -> vector<8x256xf32>
    %263 = vector.extract_strided_slice %1 {offsets = [17, 0], sizes = [1, 256], strides = [1, 1]} : vector<25x256xf32> to vector<1x256xf32>
    %264 = vector.broadcast %263 : vector<1x256xf32> to vector<8x256xf32>
    %265 = arith.mulf %262, %264 : vector<8x256xf32>
    %266 = vector.extract_strided_slice %23 {offsets = [0, 17], sizes = [8, 1], strides = [1, 1]} : vector<8x25xf32> to vector<8x1xf32>
    %267 = vector.broadcast %266 : vector<8x1xf32> to vector<8x256xf32>
    %268 = arith.mulf %265, %267 : vector<8x256xf32>
    %269 = arith.addf %259, %268 : vector<8x256xf32>
    %cst_57 = arith.constant 0.000000e+00 : f32
    %270 = vector.broadcast %cst_57 : f32 to vector<8x17xf32>
    %271 = vector.extract_strided_slice %91 {offsets = [0, 17], sizes = [8, 239], strides = [1, 1]} : vector<8x256xf32> to vector<8x239xf32>
    %272 = tpu.concatenate %271, %270 in 1 : vector<8x239xf32>, vector<8x17xf32> -> vector<8x256xf32>
    %273 = vector.extract_strided_slice %1 {offsets = [18, 0], sizes = [1, 256], strides = [1, 1]} : vector<25x256xf32> to vector<1x256xf32>
    %274 = vector.broadcast %273 : vector<1x256xf32> to vector<8x256xf32>
    %275 = arith.mulf %272, %274 : vector<8x256xf32>
    %276 = vector.extract_strided_slice %23 {offsets = [0, 18], sizes = [8, 1], strides = [1, 1]} : vector<8x25xf32> to vector<8x1xf32>
    %277 = vector.broadcast %276 : vector<8x1xf32> to vector<8x256xf32>
    %278 = arith.mulf %275, %277 : vector<8x256xf32>
    %279 = arith.addf %269, %278 : vector<8x256xf32>
    %cst_58 = arith.constant 0.000000e+00 : f32
    %280 = vector.broadcast %cst_58 : f32 to vector<8x18xf32>
    %281 = vector.extract_strided_slice %91 {offsets = [0, 18], sizes = [8, 238], strides = [1, 1]} : vector<8x256xf32> to vector<8x238xf32>
    %282 = tpu.concatenate %281, %280 in 1 : vector<8x238xf32>, vector<8x18xf32> -> vector<8x256xf32>
    %283 = vector.extract_strided_slice %1 {offsets = [19, 0], sizes = [1, 256], strides = [1, 1]} : vector<25x256xf32> to vector<1x256xf32>
    %284 = vector.broadcast %283 : vector<1x256xf32> to vector<8x256xf32>
    %285 = arith.mulf %282, %284 : vector<8x256xf32>
    %286 = vector.extract_strided_slice %23 {offsets = [0, 19], sizes = [8, 1], strides = [1, 1]} : vector<8x25xf32> to vector<8x1xf32>
    %287 = vector.broadcast %286 : vector<8x1xf32> to vector<8x256xf32>
    %288 = arith.mulf %285, %287 : vector<8x256xf32>
    %289 = arith.addf %279, %288 : vector<8x256xf32>
    %cst_59 = arith.constant 0.000000e+00 : f32
    %290 = vector.broadcast %cst_59 : f32 to vector<8x30xf32>
    %291 = vector.extract_strided_slice %91 {offsets = [0, 30], sizes = [8, 226], strides = [1, 1]} : vector<8x256xf32> to vector<8x226xf32>
    %292 = tpu.concatenate %291, %290 in 1 : vector<8x226xf32>, vector<8x30xf32> -> vector<8x256xf32>
    %293 = vector.extract_strided_slice %1 {offsets = [20, 0], sizes = [1, 256], strides = [1, 1]} : vector<25x256xf32> to vector<1x256xf32>
    %294 = vector.broadcast %293 : vector<1x256xf32> to vector<8x256xf32>
    %295 = arith.mulf %292, %294 : vector<8x256xf32>
    %296 = vector.extract_strided_slice %23 {offsets = [0, 20], sizes = [8, 1], strides = [1, 1]} : vector<8x25xf32> to vector<8x1xf32>
    %297 = vector.broadcast %296 : vector<8x1xf32> to vector<8x256xf32>
    %298 = arith.mulf %295, %297 : vector<8x256xf32>
    %299 = arith.addf %289, %298 : vector<8x256xf32>
    %cst_60 = arith.constant 0.000000e+00 : f32
    %300 = vector.broadcast %cst_60 : f32 to vector<8x31xf32>
    %301 = vector.extract_strided_slice %91 {offsets = [0, 31], sizes = [8, 225], strides = [1, 1]} : vector<8x256xf32> to vector<8x225xf32>
    %302 = tpu.concatenate %301, %300 in 1 : vector<8x225xf32>, vector<8x31xf32> -> vector<8x256xf32>
    %303 = vector.extract_strided_slice %1 {offsets = [21, 0], sizes = [1, 256], strides = [1, 1]} : vector<25x256xf32> to vector<1x256xf32>
    %304 = vector.broadcast %303 : vector<1x256xf32> to vector<8x256xf32>
    %305 = arith.mulf %302, %304 : vector<8x256xf32>
    %306 = vector.extract_strided_slice %23 {offsets = [0, 21], sizes = [8, 1], strides = [1, 1]} : vector<8x25xf32> to vector<8x1xf32>
    %307 = vector.broadcast %306 : vector<8x1xf32> to vector<8x256xf32>
    %308 = arith.mulf %305, %307 : vector<8x256xf32>
    %309 = arith.addf %299, %308 : vector<8x256xf32>
    %cst_61 = arith.constant 0.000000e+00 : f32
    %310 = vector.broadcast %cst_61 : f32 to vector<8x32xf32>
    %311 = vector.extract_strided_slice %91 {offsets = [0, 32], sizes = [8, 224], strides = [1, 1]} : vector<8x256xf32> to vector<8x224xf32>
    %312 = tpu.concatenate %311, %310 in 1 : vector<8x224xf32>, vector<8x32xf32> -> vector<8x256xf32>
    %313 = vector.extract_strided_slice %1 {offsets = [22, 0], sizes = [1, 256], strides = [1, 1]} : vector<25x256xf32> to vector<1x256xf32>
    %314 = vector.broadcast %313 : vector<1x256xf32> to vector<8x256xf32>
    %315 = arith.mulf %312, %314 : vector<8x256xf32>
    %316 = vector.extract_strided_slice %23 {offsets = [0, 22], sizes = [8, 1], strides = [1, 1]} : vector<8x25xf32> to vector<8x1xf32>
    %317 = vector.broadcast %316 : vector<8x1xf32> to vector<8x256xf32>
    %318 = arith.mulf %315, %317 : vector<8x256xf32>
    %319 = arith.addf %309, %318 : vector<8x256xf32>
    %cst_62 = arith.constant 0.000000e+00 : f32
    %320 = vector.broadcast %cst_62 : f32 to vector<8x33xf32>
    %321 = vector.extract_strided_slice %91 {offsets = [0, 33], sizes = [8, 223], strides = [1, 1]} : vector<8x256xf32> to vector<8x223xf32>
    %322 = tpu.concatenate %321, %320 in 1 : vector<8x223xf32>, vector<8x33xf32> -> vector<8x256xf32>
    %323 = vector.extract_strided_slice %1 {offsets = [23, 0], sizes = [1, 256], strides = [1, 1]} : vector<25x256xf32> to vector<1x256xf32>
    %324 = vector.broadcast %323 : vector<1x256xf32> to vector<8x256xf32>
    %325 = arith.mulf %322, %324 : vector<8x256xf32>
    %326 = vector.extract_strided_slice %23 {offsets = [0, 23], sizes = [8, 1], strides = [1, 1]} : vector<8x25xf32> to vector<8x1xf32>
    %327 = vector.broadcast %326 : vector<8x1xf32> to vector<8x256xf32>
    %328 = arith.mulf %325, %327 : vector<8x256xf32>
    %329 = arith.addf %319, %328 : vector<8x256xf32>
    %cst_63 = arith.constant 0.000000e+00 : f32
    %330 = vector.broadcast %cst_63 : f32 to vector<8x34xf32>
    %331 = vector.extract_strided_slice %91 {offsets = [0, 34], sizes = [8, 222], strides = [1, 1]} : vector<8x256xf32> to vector<8x222xf32>
    %332 = tpu.concatenate %331, %330 in 1 : vector<8x222xf32>, vector<8x34xf32> -> vector<8x256xf32>
    %333 = vector.extract_strided_slice %1 {offsets = [24, 0], sizes = [1, 256], strides = [1, 1]} : vector<25x256xf32> to vector<1x256xf32>
    %334 = vector.broadcast %333 : vector<1x256xf32> to vector<8x256xf32>
    %335 = arith.mulf %332, %334 : vector<8x256xf32>
    %336 = vector.extract_strided_slice %23 {offsets = [0, 24], sizes = [8, 1], strides = [1, 1]} : vector<8x25xf32> to vector<8x1xf32>
    %337 = vector.broadcast %336 : vector<8x1xf32> to vector<8x256xf32>
    %338 = arith.mulf %335, %337 : vector<8x256xf32>
    %339 = arith.addf %329, %338 : vector<8x256xf32>
    %340 = vector.broadcast %25 : vector<8x1xf32> to vector<8x256xf32>
    %341 = arith.addf %339, %340 : vector<8x256xf32>
    %342 = arith.negf %341 : vector<8x256xf32>
    %343 = math.exp %342 : vector<8x256xf32>
    %cst_64 = arith.constant 1.000000e+00 : f32
    %344 = vector.broadcast %cst_64 : f32 to vector<8x256xf32>
    %345 = arith.addf %344, %343 : vector<8x256xf32>
    %346 = arith.divf %344, %345 : vector<8x256xf32>
    %347 = arith.mulf %341, %346 : vector<8x256xf32>
    %348 = arith.truncf %347 : vector<8x256xf32> to vector<8x256xbf16>
    %cst_65 = arith.constant dense<0.000000e+00> : vector<8x256xf32>
    %349 = tpu.matmul %27, %348, %cst_65 {dimension_numbers = #tpu.dot_dimension_numbers<[1], [0], [0], [1], [0, 0, 1, 1], [], []>} : vector<8x8xbf16>, vector<8x256xbf16>, vector<8x256xf32> -> vector<8x256xf32>
    %350 = vector.broadcast %29 : vector<8x1xf32> to vector<8x256xf32>
    %351 = arith.addf %349, %350 : vector<8x256xf32>
    %352 = arith.negf %351 : vector<8x256xf32>
    %353 = math.exp %352 : vector<8x256xf32>
    %cst_66 = arith.constant 1.000000e+00 : f32
    %354 = vector.broadcast %cst_66 : f32 to vector<8x256xf32>
    %355 = arith.addf %354, %353 : vector<8x256xf32>
    %356 = arith.divf %354, %355 : vector<8x256xf32>
    %357 = arith.mulf %351, %356 : vector<8x256xf32>
    %358 = arith.addf %357, %91 : vector<8x256xf32>
    %359 = arith.addf %358, %17 : vector<8x256xf32>
    %c1 = arith.constant 1 : index
    %c0_67 = arith.constant 0 : index
    %c0_68 = arith.constant 0 : index
    %360 = vector.load %arg6[%c1, %c0_67, %c0_68] : memref<4x8x72xbf16, #tpu.memory_space<vmem>>, vector<1x8x72xbf16>
    %361 = vector.shape_cast %360 : vector<1x8x72xbf16> to vector<8x72xbf16>
    %c1_69 = arith.constant 1 : index
    %c0_70 = arith.constant 0 : index
    %c0_71 = arith.constant 0 : index
    %362 = vector.load %arg7[%c1_69, %c0_70, %c0_71] : memref<4x8x1xf32, #tpu.memory_space<vmem>>, vector<1x8x1xf32>
    %363 = vector.shape_cast %362 : vector<1x8x1xf32> to vector<8x1xf32>
    %c1_72 = arith.constant 1 : index
    %c0_73 = arith.constant 0 : index
    %c0_74 = arith.constant 0 : index
    %364 = vector.load %arg8[%c1_72, %c0_73, %c0_74] : memref<4x8x25xf32, #tpu.memory_space<vmem>>, vector<1x8x25xf32>
    %365 = vector.shape_cast %364 : vector<1x8x25xf32> to vector<8x25xf32>
    %c1_75 = arith.constant 1 : index
    %c0_76 = arith.constant 0 : index
    %c0_77 = arith.constant 0 : index
    %366 = vector.load %arg9[%c1_75, %c0_76, %c0_77] : memref<4x8x1xf32, #tpu.memory_space<vmem>>, vector<1x8x1xf32>
    %367 = vector.shape_cast %366 : vector<1x8x1xf32> to vector<8x1xf32>
    %c1_78 = arith.constant 1 : index
    %c0_79 = arith.constant 0 : index
    %c0_80 = arith.constant 0 : index
    %368 = vector.load %arg10[%c1_78, %c0_79, %c0_80] : memref<4x8x8xbf16, #tpu.memory_space<vmem>>, vector<1x8x8xbf16>
    %369 = vector.shape_cast %368 : vector<1x8x8xbf16> to vector<8x8xbf16>
    %c1_81 = arith.constant 1 : index
    %c0_82 = arith.constant 0 : index
    %c0_83 = arith.constant 0 : index
    %370 = vector.load %arg11[%c1_81, %c0_82, %c0_83] : memref<4x8x1xf32, #tpu.memory_space<vmem>>, vector<1x8x1xf32>
    %371 = vector.shape_cast %370 : vector<1x8x1xf32> to vector<8x1xf32>
    %cst_84 = arith.constant 0.000000e+00 : f32
    %372 = vector.broadcast %cst_84 : f32 to vector<8x17xf32>
    %373 = vector.extract_strided_slice %359 {offsets = [0, 0], sizes = [8, 239], strides = [1, 1]} : vector<8x256xf32> to vector<8x239xf32>
    %374 = tpu.concatenate %372, %373 in 1 : vector<8x17xf32>, vector<8x239xf32> -> vector<8x256xf32>
    %375 = vector.extract_strided_slice %0 {offsets = [0, 0], sizes = [1, 256], strides = [1, 1]} : vector<9x256xf32> to vector<1x256xf32>
    %376 = vector.broadcast %375 : vector<1x256xf32> to vector<8x256xf32>
    %377 = arith.mulf %374, %376 : vector<8x256xf32>
    %cst_85 = arith.constant 0.000000e+00 : f32
    %378 = vector.broadcast %cst_85 : f32 to vector<8x16xf32>
    %379 = vector.extract_strided_slice %359 {offsets = [0, 0], sizes = [8, 240], strides = [1, 1]} : vector<8x256xf32> to vector<8x240xf32>
    %380 = tpu.concatenate %378, %379 in 1 : vector<8x16xf32>, vector<8x240xf32> -> vector<8x256xf32>
    %381 = vector.extract_strided_slice %0 {offsets = [1, 0], sizes = [1, 256], strides = [1, 1]} : vector<9x256xf32> to vector<1x256xf32>
    %382 = vector.broadcast %381 : vector<1x256xf32> to vector<8x256xf32>
    %383 = arith.mulf %380, %382 : vector<8x256xf32>
    %cst_86 = arith.constant 0.000000e+00 : f32
    %384 = vector.broadcast %cst_86 : f32 to vector<8x15xf32>
    %385 = vector.extract_strided_slice %359 {offsets = [0, 0], sizes = [8, 241], strides = [1, 1]} : vector<8x256xf32> to vector<8x241xf32>
    %386 = tpu.concatenate %384, %385 in 1 : vector<8x15xf32>, vector<8x241xf32> -> vector<8x256xf32>
    %387 = vector.extract_strided_slice %0 {offsets = [2, 0], sizes = [1, 256], strides = [1, 1]} : vector<9x256xf32> to vector<1x256xf32>
    %388 = vector.broadcast %387 : vector<1x256xf32> to vector<8x256xf32>
    %389 = arith.mulf %386, %388 : vector<8x256xf32>
    %cst_87 = arith.constant 0.000000e+00 : f32
    %390 = vector.broadcast %cst_87 : f32 to vector<8x1xf32>
    %391 = vector.extract_strided_slice %359 {offsets = [0, 0], sizes = [8, 255], strides = [1, 1]} : vector<8x256xf32> to vector<8x255xf32>
    %392 = tpu.concatenate %390, %391 in 1 : vector<8x1xf32>, vector<8x255xf32> -> vector<8x256xf32>
    %393 = vector.extract_strided_slice %0 {offsets = [3, 0], sizes = [1, 256], strides = [1, 1]} : vector<9x256xf32> to vector<1x256xf32>
    %394 = vector.broadcast %393 : vector<1x256xf32> to vector<8x256xf32>
    %395 = arith.mulf %392, %394 : vector<8x256xf32>
    %396 = vector.extract_strided_slice %0 {offsets = [4, 0], sizes = [1, 256], strides = [1, 1]} : vector<9x256xf32> to vector<1x256xf32>
    %397 = vector.broadcast %396 : vector<1x256xf32> to vector<8x256xf32>
    %398 = arith.mulf %359, %397 : vector<8x256xf32>
    %cst_88 = arith.constant 0.000000e+00 : f32
    %399 = vector.broadcast %cst_88 : f32 to vector<8x1xf32>
    %400 = vector.extract_strided_slice %359 {offsets = [0, 1], sizes = [8, 255], strides = [1, 1]} : vector<8x256xf32> to vector<8x255xf32>
    %401 = tpu.concatenate %400, %399 in 1 : vector<8x255xf32>, vector<8x1xf32> -> vector<8x256xf32>
    %402 = vector.extract_strided_slice %0 {offsets = [5, 0], sizes = [1, 256], strides = [1, 1]} : vector<9x256xf32> to vector<1x256xf32>
    %403 = vector.broadcast %402 : vector<1x256xf32> to vector<8x256xf32>
    %404 = arith.mulf %401, %403 : vector<8x256xf32>
    %cst_89 = arith.constant 0.000000e+00 : f32
    %405 = vector.broadcast %cst_89 : f32 to vector<8x15xf32>
    %406 = vector.extract_strided_slice %359 {offsets = [0, 15], sizes = [8, 241], strides = [1, 1]} : vector<8x256xf32> to vector<8x241xf32>
    %407 = tpu.concatenate %406, %405 in 1 : vector<8x241xf32>, vector<8x15xf32> -> vector<8x256xf32>
    %408 = vector.extract_strided_slice %0 {offsets = [6, 0], sizes = [1, 256], strides = [1, 1]} : vector<9x256xf32> to vector<1x256xf32>
    %409 = vector.broadcast %408 : vector<1x256xf32> to vector<8x256xf32>
    %410 = arith.mulf %407, %409 : vector<8x256xf32>
    %cst_90 = arith.constant 0.000000e+00 : f32
    %411 = vector.broadcast %cst_90 : f32 to vector<8x16xf32>
    %412 = vector.extract_strided_slice %359 {offsets = [0, 16], sizes = [8, 240], strides = [1, 1]} : vector<8x256xf32> to vector<8x240xf32>
    %413 = tpu.concatenate %412, %411 in 1 : vector<8x240xf32>, vector<8x16xf32> -> vector<8x256xf32>
    %414 = vector.extract_strided_slice %0 {offsets = [7, 0], sizes = [1, 256], strides = [1, 1]} : vector<9x256xf32> to vector<1x256xf32>
    %415 = vector.broadcast %414 : vector<1x256xf32> to vector<8x256xf32>
    %416 = arith.mulf %413, %415 : vector<8x256xf32>
    %cst_91 = arith.constant 0.000000e+00 : f32
    %417 = vector.broadcast %cst_91 : f32 to vector<8x17xf32>
    %418 = vector.extract_strided_slice %359 {offsets = [0, 17], sizes = [8, 239], strides = [1, 1]} : vector<8x256xf32> to vector<8x239xf32>
    %419 = tpu.concatenate %418, %417 in 1 : vector<8x239xf32>, vector<8x17xf32> -> vector<8x256xf32>
    %420 = vector.extract_strided_slice %0 {offsets = [8, 0], sizes = [1, 256], strides = [1, 1]} : vector<9x256xf32> to vector<1x256xf32>
    %421 = vector.broadcast %420 : vector<1x256xf32> to vector<8x256xf32>
    %422 = arith.mulf %419, %421 : vector<8x256xf32>
    %423 = tpu.concatenate %377, %383, %389, %395, %398, %404, %410, %416, %422 in 0 : vector<8x256xf32>, vector<8x256xf32>, vector<8x256xf32>, vector<8x256xf32>, vector<8x256xf32>, vector<8x256xf32>, vector<8x256xf32>, vector<8x256xf32>, vector<8x256xf32> -> vector<72x256xf32>
    %424 = arith.truncf %423 : vector<72x256xf32> to vector<72x256xbf16>
    %cst_92 = arith.constant dense<0.000000e+00> : vector<8x256xf32>
    %425 = tpu.matmul %361, %424, %cst_92 {dimension_numbers = #tpu.dot_dimension_numbers<[1], [0], [0], [1], [0, 0, 1, 1], [], []>} : vector<8x72xbf16>, vector<72x256xbf16>, vector<8x256xf32> -> vector<8x256xf32>
    %426 = vector.broadcast %363 : vector<8x1xf32> to vector<8x256xf32>
    %427 = arith.addf %425, %426 : vector<8x256xf32>
    %428 = arith.negf %427 : vector<8x256xf32>
    %429 = math.exp %428 : vector<8x256xf32>
    %cst_93 = arith.constant 1.000000e+00 : f32
    %430 = vector.broadcast %cst_93 : f32 to vector<8x256xf32>
    %431 = arith.addf %430, %429 : vector<8x256xf32>
    %432 = arith.divf %430, %431 : vector<8x256xf32>
    %433 = arith.mulf %427, %432 : vector<8x256xf32>
    %cst_94 = arith.constant 0.000000e+00 : f32
    %434 = vector.broadcast %cst_94 : f32 to vector<8x256xf32>
    %cst_95 = arith.constant 0.000000e+00 : f32
    %435 = vector.broadcast %cst_95 : f32 to vector<8x34xf32>
    %436 = vector.extract_strided_slice %433 {offsets = [0, 0], sizes = [8, 222], strides = [1, 1]} : vector<8x256xf32> to vector<8x222xf32>
    %437 = tpu.concatenate %435, %436 in 1 : vector<8x34xf32>, vector<8x222xf32> -> vector<8x256xf32>
    %438 = vector.extract_strided_slice %1 {offsets = [0, 0], sizes = [1, 256], strides = [1, 1]} : vector<25x256xf32> to vector<1x256xf32>
    %439 = vector.broadcast %438 : vector<1x256xf32> to vector<8x256xf32>
    %440 = arith.mulf %437, %439 : vector<8x256xf32>
    %441 = vector.extract_strided_slice %365 {offsets = [0, 0], sizes = [8, 1], strides = [1, 1]} : vector<8x25xf32> to vector<8x1xf32>
    %442 = vector.broadcast %441 : vector<8x1xf32> to vector<8x256xf32>
    %443 = arith.mulf %440, %442 : vector<8x256xf32>
    %444 = arith.addf %434, %443 : vector<8x256xf32>
    %cst_96 = arith.constant 0.000000e+00 : f32
    %445 = vector.broadcast %cst_96 : f32 to vector<8x33xf32>
    %446 = vector.extract_strided_slice %433 {offsets = [0, 0], sizes = [8, 223], strides = [1, 1]} : vector<8x256xf32> to vector<8x223xf32>
    %447 = tpu.concatenate %445, %446 in 1 : vector<8x33xf32>, vector<8x223xf32> -> vector<8x256xf32>
    %448 = vector.extract_strided_slice %1 {offsets = [1, 0], sizes = [1, 256], strides = [1, 1]} : vector<25x256xf32> to vector<1x256xf32>
    %449 = vector.broadcast %448 : vector<1x256xf32> to vector<8x256xf32>
    %450 = arith.mulf %447, %449 : vector<8x256xf32>
    %451 = vector.extract_strided_slice %365 {offsets = [0, 1], sizes = [8, 1], strides = [1, 1]} : vector<8x25xf32> to vector<8x1xf32>
    %452 = vector.broadcast %451 : vector<8x1xf32> to vector<8x256xf32>
    %453 = arith.mulf %450, %452 : vector<8x256xf32>
    %454 = arith.addf %444, %453 : vector<8x256xf32>
    %cst_97 = arith.constant 0.000000e+00 : f32
    %455 = vector.broadcast %cst_97 : f32 to vector<8x32xf32>
    %456 = vector.extract_strided_slice %433 {offsets = [0, 0], sizes = [8, 224], strides = [1, 1]} : vector<8x256xf32> to vector<8x224xf32>
    %457 = tpu.concatenate %455, %456 in 1 : vector<8x32xf32>, vector<8x224xf32> -> vector<8x256xf32>
    %458 = vector.extract_strided_slice %1 {offsets = [2, 0], sizes = [1, 256], strides = [1, 1]} : vector<25x256xf32> to vector<1x256xf32>
    %459 = vector.broadcast %458 : vector<1x256xf32> to vector<8x256xf32>
    %460 = arith.mulf %457, %459 : vector<8x256xf32>
    %461 = vector.extract_strided_slice %365 {offsets = [0, 2], sizes = [8, 1], strides = [1, 1]} : vector<8x25xf32> to vector<8x1xf32>
    %462 = vector.broadcast %461 : vector<8x1xf32> to vector<8x256xf32>
    %463 = arith.mulf %460, %462 : vector<8x256xf32>
    %464 = arith.addf %454, %463 : vector<8x256xf32>
    %cst_98 = arith.constant 0.000000e+00 : f32
    %465 = vector.broadcast %cst_98 : f32 to vector<8x31xf32>
    %466 = vector.extract_strided_slice %433 {offsets = [0, 0], sizes = [8, 225], strides = [1, 1]} : vector<8x256xf32> to vector<8x225xf32>
    %467 = tpu.concatenate %465, %466 in 1 : vector<8x31xf32>, vector<8x225xf32> -> vector<8x256xf32>
    %468 = vector.extract_strided_slice %1 {offsets = [3, 0], sizes = [1, 256], strides = [1, 1]} : vector<25x256xf32> to vector<1x256xf32>
    %469 = vector.broadcast %468 : vector<1x256xf32> to vector<8x256xf32>
    %470 = arith.mulf %467, %469 : vector<8x256xf32>
    %471 = vector.extract_strided_slice %365 {offsets = [0, 3], sizes = [8, 1], strides = [1, 1]} : vector<8x25xf32> to vector<8x1xf32>
    %472 = vector.broadcast %471 : vector<8x1xf32> to vector<8x256xf32>
    %473 = arith.mulf %470, %472 : vector<8x256xf32>
    %474 = arith.addf %464, %473 : vector<8x256xf32>
    %cst_99 = arith.constant 0.000000e+00 : f32
    %475 = vector.broadcast %cst_99 : f32 to vector<8x30xf32>
    %476 = vector.extract_strided_slice %433 {offsets = [0, 0], sizes = [8, 226], strides = [1, 1]} : vector<8x256xf32> to vector<8x226xf32>
    %477 = tpu.concatenate %475, %476 in 1 : vector<8x30xf32>, vector<8x226xf32> -> vector<8x256xf32>
    %478 = vector.extract_strided_slice %1 {offsets = [4, 0], sizes = [1, 256], strides = [1, 1]} : vector<25x256xf32> to vector<1x256xf32>
    %479 = vector.broadcast %478 : vector<1x256xf32> to vector<8x256xf32>
    %480 = arith.mulf %477, %479 : vector<8x256xf32>
    %481 = vector.extract_strided_slice %365 {offsets = [0, 4], sizes = [8, 1], strides = [1, 1]} : vector<8x25xf32> to vector<8x1xf32>
    %482 = vector.broadcast %481 : vector<8x1xf32> to vector<8x256xf32>
    %483 = arith.mulf %480, %482 : vector<8x256xf32>
    %484 = arith.addf %474, %483 : vector<8x256xf32>
    %cst_100 = arith.constant 0.000000e+00 : f32
    %485 = vector.broadcast %cst_100 : f32 to vector<8x18xf32>
    %486 = vector.extract_strided_slice %433 {offsets = [0, 0], sizes = [8, 238], strides = [1, 1]} : vector<8x256xf32> to vector<8x238xf32>
    %487 = tpu.concatenate %485, %486 in 1 : vector<8x18xf32>, vector<8x238xf32> -> vector<8x256xf32>
    %488 = vector.extract_strided_slice %1 {offsets = [5, 0], sizes = [1, 256], strides = [1, 1]} : vector<25x256xf32> to vector<1x256xf32>
    %489 = vector.broadcast %488 : vector<1x256xf32> to vector<8x256xf32>
    %490 = arith.mulf %487, %489 : vector<8x256xf32>
    %491 = vector.extract_strided_slice %365 {offsets = [0, 5], sizes = [8, 1], strides = [1, 1]} : vector<8x25xf32> to vector<8x1xf32>
    %492 = vector.broadcast %491 : vector<8x1xf32> to vector<8x256xf32>
    %493 = arith.mulf %490, %492 : vector<8x256xf32>
    %494 = arith.addf %484, %493 : vector<8x256xf32>
    %cst_101 = arith.constant 0.000000e+00 : f32
    %495 = vector.broadcast %cst_101 : f32 to vector<8x17xf32>
    %496 = vector.extract_strided_slice %433 {offsets = [0, 0], sizes = [8, 239], strides = [1, 1]} : vector<8x256xf32> to vector<8x239xf32>
    %497 = tpu.concatenate %495, %496 in 1 : vector<8x17xf32>, vector<8x239xf32> -> vector<8x256xf32>
    %498 = vector.extract_strided_slice %1 {offsets = [6, 0], sizes = [1, 256], strides = [1, 1]} : vector<25x256xf32> to vector<1x256xf32>
    %499 = vector.broadcast %498 : vector<1x256xf32> to vector<8x256xf32>
    %500 = arith.mulf %497, %499 : vector<8x256xf32>
    %501 = vector.extract_strided_slice %365 {offsets = [0, 6], sizes = [8, 1], strides = [1, 1]} : vector<8x25xf32> to vector<8x1xf32>
    %502 = vector.broadcast %501 : vector<8x1xf32> to vector<8x256xf32>
    %503 = arith.mulf %500, %502 : vector<8x256xf32>
    %504 = arith.addf %494, %503 : vector<8x256xf32>
    %cst_102 = arith.constant 0.000000e+00 : f32
    %505 = vector.broadcast %cst_102 : f32 to vector<8x16xf32>
    %506 = vector.extract_strided_slice %433 {offsets = [0, 0], sizes = [8, 240], strides = [1, 1]} : vector<8x256xf32> to vector<8x240xf32>
    %507 = tpu.concatenate %505, %506 in 1 : vector<8x16xf32>, vector<8x240xf32> -> vector<8x256xf32>
    %508 = vector.extract_strided_slice %1 {offsets = [7, 0], sizes = [1, 256], strides = [1, 1]} : vector<25x256xf32> to vector<1x256xf32>
    %509 = vector.broadcast %508 : vector<1x256xf32> to vector<8x256xf32>
    %510 = arith.mulf %507, %509 : vector<8x256xf32>
    %511 = vector.extract_strided_slice %365 {offsets = [0, 7], sizes = [8, 1], strides = [1, 1]} : vector<8x25xf32> to vector<8x1xf32>
    %512 = vector.broadcast %511 : vector<8x1xf32> to vector<8x256xf32>
    %513 = arith.mulf %510, %512 : vector<8x256xf32>
    %514 = arith.addf %504, %513 : vector<8x256xf32>
    %cst_103 = arith.constant 0.000000e+00 : f32
    %515 = vector.broadcast %cst_103 : f32 to vector<8x15xf32>
    %516 = vector.extract_strided_slice %433 {offsets = [0, 0], sizes = [8, 241], strides = [1, 1]} : vector<8x256xf32> to vector<8x241xf32>
    %517 = tpu.concatenate %515, %516 in 1 : vector<8x15xf32>, vector<8x241xf32> -> vector<8x256xf32>
    %518 = vector.extract_strided_slice %1 {offsets = [8, 0], sizes = [1, 256], strides = [1, 1]} : vector<25x256xf32> to vector<1x256xf32>
    %519 = vector.broadcast %518 : vector<1x256xf32> to vector<8x256xf32>
    %520 = arith.mulf %517, %519 : vector<8x256xf32>
    %521 = vector.extract_strided_slice %365 {offsets = [0, 8], sizes = [8, 1], strides = [1, 1]} : vector<8x25xf32> to vector<8x1xf32>
    %522 = vector.broadcast %521 : vector<8x1xf32> to vector<8x256xf32>
    %523 = arith.mulf %520, %522 : vector<8x256xf32>
    %524 = arith.addf %514, %523 : vector<8x256xf32>
    %cst_104 = arith.constant 0.000000e+00 : f32
    %525 = vector.broadcast %cst_104 : f32 to vector<8x14xf32>
    %526 = vector.extract_strided_slice %433 {offsets = [0, 0], sizes = [8, 242], strides = [1, 1]} : vector<8x256xf32> to vector<8x242xf32>
    %527 = tpu.concatenate %525, %526 in 1 : vector<8x14xf32>, vector<8x242xf32> -> vector<8x256xf32>
    %528 = vector.extract_strided_slice %1 {offsets = [9, 0], sizes = [1, 256], strides = [1, 1]} : vector<25x256xf32> to vector<1x256xf32>
    %529 = vector.broadcast %528 : vector<1x256xf32> to vector<8x256xf32>
    %530 = arith.mulf %527, %529 : vector<8x256xf32>
    %531 = vector.extract_strided_slice %365 {offsets = [0, 9], sizes = [8, 1], strides = [1, 1]} : vector<8x25xf32> to vector<8x1xf32>
    %532 = vector.broadcast %531 : vector<8x1xf32> to vector<8x256xf32>
    %533 = arith.mulf %530, %532 : vector<8x256xf32>
    %534 = arith.addf %524, %533 : vector<8x256xf32>
    %cst_105 = arith.constant 0.000000e+00 : f32
    %535 = vector.broadcast %cst_105 : f32 to vector<8x2xf32>
    %536 = vector.extract_strided_slice %433 {offsets = [0, 0], sizes = [8, 254], strides = [1, 1]} : vector<8x256xf32> to vector<8x254xf32>
    %537 = tpu.concatenate %535, %536 in 1 : vector<8x2xf32>, vector<8x254xf32> -> vector<8x256xf32>
    %538 = vector.extract_strided_slice %1 {offsets = [10, 0], sizes = [1, 256], strides = [1, 1]} : vector<25x256xf32> to vector<1x256xf32>
    %539 = vector.broadcast %538 : vector<1x256xf32> to vector<8x256xf32>
    %540 = arith.mulf %537, %539 : vector<8x256xf32>
    %541 = vector.extract_strided_slice %365 {offsets = [0, 10], sizes = [8, 1], strides = [1, 1]} : vector<8x25xf32> to vector<8x1xf32>
    %542 = vector.broadcast %541 : vector<8x1xf32> to vector<8x256xf32>
    %543 = arith.mulf %540, %542 : vector<8x256xf32>
    %544 = arith.addf %534, %543 : vector<8x256xf32>
    %cst_106 = arith.constant 0.000000e+00 : f32
    %545 = vector.broadcast %cst_106 : f32 to vector<8x1xf32>
    %546 = vector.extract_strided_slice %433 {offsets = [0, 0], sizes = [8, 255], strides = [1, 1]} : vector<8x256xf32> to vector<8x255xf32>
    %547 = tpu.concatenate %545, %546 in 1 : vector<8x1xf32>, vector<8x255xf32> -> vector<8x256xf32>
    %548 = vector.extract_strided_slice %1 {offsets = [11, 0], sizes = [1, 256], strides = [1, 1]} : vector<25x256xf32> to vector<1x256xf32>
    %549 = vector.broadcast %548 : vector<1x256xf32> to vector<8x256xf32>
    %550 = arith.mulf %547, %549 : vector<8x256xf32>
    %551 = vector.extract_strided_slice %365 {offsets = [0, 11], sizes = [8, 1], strides = [1, 1]} : vector<8x25xf32> to vector<8x1xf32>
    %552 = vector.broadcast %551 : vector<8x1xf32> to vector<8x256xf32>
    %553 = arith.mulf %550, %552 : vector<8x256xf32>
    %554 = arith.addf %544, %553 : vector<8x256xf32>
    %555 = vector.extract_strided_slice %1 {offsets = [12, 0], sizes = [1, 256], strides = [1, 1]} : vector<25x256xf32> to vector<1x256xf32>
    %556 = vector.broadcast %555 : vector<1x256xf32> to vector<8x256xf32>
    %557 = arith.mulf %433, %556 : vector<8x256xf32>
    %558 = vector.extract_strided_slice %365 {offsets = [0, 12], sizes = [8, 1], strides = [1, 1]} : vector<8x25xf32> to vector<8x1xf32>
    %559 = vector.broadcast %558 : vector<8x1xf32> to vector<8x256xf32>
    %560 = arith.mulf %557, %559 : vector<8x256xf32>
    %561 = arith.addf %554, %560 : vector<8x256xf32>
    %cst_107 = arith.constant 0.000000e+00 : f32
    %562 = vector.broadcast %cst_107 : f32 to vector<8x1xf32>
    %563 = vector.extract_strided_slice %433 {offsets = [0, 1], sizes = [8, 255], strides = [1, 1]} : vector<8x256xf32> to vector<8x255xf32>
    %564 = tpu.concatenate %563, %562 in 1 : vector<8x255xf32>, vector<8x1xf32> -> vector<8x256xf32>
    %565 = vector.extract_strided_slice %1 {offsets = [13, 0], sizes = [1, 256], strides = [1, 1]} : vector<25x256xf32> to vector<1x256xf32>
    %566 = vector.broadcast %565 : vector<1x256xf32> to vector<8x256xf32>
    %567 = arith.mulf %564, %566 : vector<8x256xf32>
    %568 = vector.extract_strided_slice %365 {offsets = [0, 13], sizes = [8, 1], strides = [1, 1]} : vector<8x25xf32> to vector<8x1xf32>
    %569 = vector.broadcast %568 : vector<8x1xf32> to vector<8x256xf32>
    %570 = arith.mulf %567, %569 : vector<8x256xf32>
    %571 = arith.addf %561, %570 : vector<8x256xf32>
    %cst_108 = arith.constant 0.000000e+00 : f32
    %572 = vector.broadcast %cst_108 : f32 to vector<8x2xf32>
    %573 = vector.extract_strided_slice %433 {offsets = [0, 2], sizes = [8, 254], strides = [1, 1]} : vector<8x256xf32> to vector<8x254xf32>
    %574 = tpu.concatenate %573, %572 in 1 : vector<8x254xf32>, vector<8x2xf32> -> vector<8x256xf32>
    %575 = vector.extract_strided_slice %1 {offsets = [14, 0], sizes = [1, 256], strides = [1, 1]} : vector<25x256xf32> to vector<1x256xf32>
    %576 = vector.broadcast %575 : vector<1x256xf32> to vector<8x256xf32>
    %577 = arith.mulf %574, %576 : vector<8x256xf32>
    %578 = vector.extract_strided_slice %365 {offsets = [0, 14], sizes = [8, 1], strides = [1, 1]} : vector<8x25xf32> to vector<8x1xf32>
    %579 = vector.broadcast %578 : vector<8x1xf32> to vector<8x256xf32>
    %580 = arith.mulf %577, %579 : vector<8x256xf32>
    %581 = arith.addf %571, %580 : vector<8x256xf32>
    %cst_109 = arith.constant 0.000000e+00 : f32
    %582 = vector.broadcast %cst_109 : f32 to vector<8x14xf32>
    %583 = vector.extract_strided_slice %433 {offsets = [0, 14], sizes = [8, 242], strides = [1, 1]} : vector<8x256xf32> to vector<8x242xf32>
    %584 = tpu.concatenate %583, %582 in 1 : vector<8x242xf32>, vector<8x14xf32> -> vector<8x256xf32>
    %585 = vector.extract_strided_slice %1 {offsets = [15, 0], sizes = [1, 256], strides = [1, 1]} : vector<25x256xf32> to vector<1x256xf32>
    %586 = vector.broadcast %585 : vector<1x256xf32> to vector<8x256xf32>
    %587 = arith.mulf %584, %586 : vector<8x256xf32>
    %588 = vector.extract_strided_slice %365 {offsets = [0, 15], sizes = [8, 1], strides = [1, 1]} : vector<8x25xf32> to vector<8x1xf32>
    %589 = vector.broadcast %588 : vector<8x1xf32> to vector<8x256xf32>
    %590 = arith.mulf %587, %589 : vector<8x256xf32>
    %591 = arith.addf %581, %590 : vector<8x256xf32>
    %cst_110 = arith.constant 0.000000e+00 : f32
    %592 = vector.broadcast %cst_110 : f32 to vector<8x15xf32>
    %593 = vector.extract_strided_slice %433 {offsets = [0, 15], sizes = [8, 241], strides = [1, 1]} : vector<8x256xf32> to vector<8x241xf32>
    %594 = tpu.concatenate %593, %592 in 1 : vector<8x241xf32>, vector<8x15xf32> -> vector<8x256xf32>
    %595 = vector.extract_strided_slice %1 {offsets = [16, 0], sizes = [1, 256], strides = [1, 1]} : vector<25x256xf32> to vector<1x256xf32>
    %596 = vector.broadcast %595 : vector<1x256xf32> to vector<8x256xf32>
    %597 = arith.mulf %594, %596 : vector<8x256xf32>
    %598 = vector.extract_strided_slice %365 {offsets = [0, 16], sizes = [8, 1], strides = [1, 1]} : vector<8x25xf32> to vector<8x1xf32>
    %599 = vector.broadcast %598 : vector<8x1xf32> to vector<8x256xf32>
    %600 = arith.mulf %597, %599 : vector<8x256xf32>
    %601 = arith.addf %591, %600 : vector<8x256xf32>
    %cst_111 = arith.constant 0.000000e+00 : f32
    %602 = vector.broadcast %cst_111 : f32 to vector<8x16xf32>
    %603 = vector.extract_strided_slice %433 {offsets = [0, 16], sizes = [8, 240], strides = [1, 1]} : vector<8x256xf32> to vector<8x240xf32>
    %604 = tpu.concatenate %603, %602 in 1 : vector<8x240xf32>, vector<8x16xf32> -> vector<8x256xf32>
    %605 = vector.extract_strided_slice %1 {offsets = [17, 0], sizes = [1, 256], strides = [1, 1]} : vector<25x256xf32> to vector<1x256xf32>
    %606 = vector.broadcast %605 : vector<1x256xf32> to vector<8x256xf32>
    %607 = arith.mulf %604, %606 : vector<8x256xf32>
    %608 = vector.extract_strided_slice %365 {offsets = [0, 17], sizes = [8, 1], strides = [1, 1]} : vector<8x25xf32> to vector<8x1xf32>
    %609 = vector.broadcast %608 : vector<8x1xf32> to vector<8x256xf32>
    %610 = arith.mulf %607, %609 : vector<8x256xf32>
    %611 = arith.addf %601, %610 : vector<8x256xf32>
    %cst_112 = arith.constant 0.000000e+00 : f32
    %612 = vector.broadcast %cst_112 : f32 to vector<8x17xf32>
    %613 = vector.extract_strided_slice %433 {offsets = [0, 17], sizes = [8, 239], strides = [1, 1]} : vector<8x256xf32> to vector<8x239xf32>
    %614 = tpu.concatenate %613, %612 in 1 : vector<8x239xf32>, vector<8x17xf32> -> vector<8x256xf32>
    %615 = vector.extract_strided_slice %1 {offsets = [18, 0], sizes = [1, 256], strides = [1, 1]} : vector<25x256xf32> to vector<1x256xf32>
    %616 = vector.broadcast %615 : vector<1x256xf32> to vector<8x256xf32>
    %617 = arith.mulf %614, %616 : vector<8x256xf32>
    %618 = vector.extract_strided_slice %365 {offsets = [0, 18], sizes = [8, 1], strides = [1, 1]} : vector<8x25xf32> to vector<8x1xf32>
    %619 = vector.broadcast %618 : vector<8x1xf32> to vector<8x256xf32>
    %620 = arith.mulf %617, %619 : vector<8x256xf32>
    %621 = arith.addf %611, %620 : vector<8x256xf32>
    %cst_113 = arith.constant 0.000000e+00 : f32
    %622 = vector.broadcast %cst_113 : f32 to vector<8x18xf32>
    %623 = vector.extract_strided_slice %433 {offsets = [0, 18], sizes = [8, 238], strides = [1, 1]} : vector<8x256xf32> to vector<8x238xf32>
    %624 = tpu.concatenate %623, %622 in 1 : vector<8x238xf32>, vector<8x18xf32> -> vector<8x256xf32>
    %625 = vector.extract_strided_slice %1 {offsets = [19, 0], sizes = [1, 256], strides = [1, 1]} : vector<25x256xf32> to vector<1x256xf32>
    %626 = vector.broadcast %625 : vector<1x256xf32> to vector<8x256xf32>
    %627 = arith.mulf %624, %626 : vector<8x256xf32>
    %628 = vector.extract_strided_slice %365 {offsets = [0, 19], sizes = [8, 1], strides = [1, 1]} : vector<8x25xf32> to vector<8x1xf32>
    %629 = vector.broadcast %628 : vector<8x1xf32> to vector<8x256xf32>
    %630 = arith.mulf %627, %629 : vector<8x256xf32>
    %631 = arith.addf %621, %630 : vector<8x256xf32>
    %cst_114 = arith.constant 0.000000e+00 : f32
    %632 = vector.broadcast %cst_114 : f32 to vector<8x30xf32>
    %633 = vector.extract_strided_slice %433 {offsets = [0, 30], sizes = [8, 226], strides = [1, 1]} : vector<8x256xf32> to vector<8x226xf32>
    %634 = tpu.concatenate %633, %632 in 1 : vector<8x226xf32>, vector<8x30xf32> -> vector<8x256xf32>
    %635 = vector.extract_strided_slice %1 {offsets = [20, 0], sizes = [1, 256], strides = [1, 1]} : vector<25x256xf32> to vector<1x256xf32>
    %636 = vector.broadcast %635 : vector<1x256xf32> to vector<8x256xf32>
    %637 = arith.mulf %634, %636 : vector<8x256xf32>
    %638 = vector.extract_strided_slice %365 {offsets = [0, 20], sizes = [8, 1], strides = [1, 1]} : vector<8x25xf32> to vector<8x1xf32>
    %639 = vector.broadcast %638 : vector<8x1xf32> to vector<8x256xf32>
    %640 = arith.mulf %637, %639 : vector<8x256xf32>
    %641 = arith.addf %631, %640 : vector<8x256xf32>
    %cst_115 = arith.constant 0.000000e+00 : f32
    %642 = vector.broadcast %cst_115 : f32 to vector<8x31xf32>
    %643 = vector.extract_strided_slice %433 {offsets = [0, 31], sizes = [8, 225], strides = [1, 1]} : vector<8x256xf32> to vector<8x225xf32>
    %644 = tpu.concatenate %643, %642 in 1 : vector<8x225xf32>, vector<8x31xf32> -> vector<8x256xf32>
    %645 = vector.extract_strided_slice %1 {offsets = [21, 0], sizes = [1, 256], strides = [1, 1]} : vector<25x256xf32> to vector<1x256xf32>
    %646 = vector.broadcast %645 : vector<1x256xf32> to vector<8x256xf32>
    %647 = arith.mulf %644, %646 : vector<8x256xf32>
    %648 = vector.extract_strided_slice %365 {offsets = [0, 21], sizes = [8, 1], strides = [1, 1]} : vector<8x25xf32> to vector<8x1xf32>
    %649 = vector.broadcast %648 : vector<8x1xf32> to vector<8x256xf32>
    %650 = arith.mulf %647, %649 : vector<8x256xf32>
    %651 = arith.addf %641, %650 : vector<8x256xf32>
    %cst_116 = arith.constant 0.000000e+00 : f32
    %652 = vector.broadcast %cst_116 : f32 to vector<8x32xf32>
    %653 = vector.extract_strided_slice %433 {offsets = [0, 32], sizes = [8, 224], strides = [1, 1]} : vector<8x256xf32> to vector<8x224xf32>
    %654 = tpu.concatenate %653, %652 in 1 : vector<8x224xf32>, vector<8x32xf32> -> vector<8x256xf32>
    %655 = vector.extract_strided_slice %1 {offsets = [22, 0], sizes = [1, 256], strides = [1, 1]} : vector<25x256xf32> to vector<1x256xf32>
    %656 = vector.broadcast %655 : vector<1x256xf32> to vector<8x256xf32>
    %657 = arith.mulf %654, %656 : vector<8x256xf32>
    %658 = vector.extract_strided_slice %365 {offsets = [0, 22], sizes = [8, 1], strides = [1, 1]} : vector<8x25xf32> to vector<8x1xf32>
    %659 = vector.broadcast %658 : vector<8x1xf32> to vector<8x256xf32>
    %660 = arith.mulf %657, %659 : vector<8x256xf32>
    %661 = arith.addf %651, %660 : vector<8x256xf32>
    %cst_117 = arith.constant 0.000000e+00 : f32
    %662 = vector.broadcast %cst_117 : f32 to vector<8x33xf32>
    %663 = vector.extract_strided_slice %433 {offsets = [0, 33], sizes = [8, 223], strides = [1, 1]} : vector<8x256xf32> to vector<8x223xf32>
    %664 = tpu.concatenate %663, %662 in 1 : vector<8x223xf32>, vector<8x33xf32> -> vector<8x256xf32>
    %665 = vector.extract_strided_slice %1 {offsets = [23, 0], sizes = [1, 256], strides = [1, 1]} : vector<25x256xf32> to vector<1x256xf32>
    %666 = vector.broadcast %665 : vector<1x256xf32> to vector<8x256xf32>
    %667 = arith.mulf %664, %666 : vector<8x256xf32>
    %668 = vector.extract_strided_slice %365 {offsets = [0, 23], sizes = [8, 1], strides = [1, 1]} : vector<8x25xf32> to vector<8x1xf32>
    %669 = vector.broadcast %668 : vector<8x1xf32> to vector<8x256xf32>
    %670 = arith.mulf %667, %669 : vector<8x256xf32>
    %671 = arith.addf %661, %670 : vector<8x256xf32>
    %cst_118 = arith.constant 0.000000e+00 : f32
    %672 = vector.broadcast %cst_118 : f32 to vector<8x34xf32>
    %673 = vector.extract_strided_slice %433 {offsets = [0, 34], sizes = [8, 222], strides = [1, 1]} : vector<8x256xf32> to vector<8x222xf32>
    %674 = tpu.concatenate %673, %672 in 1 : vector<8x222xf32>, vector<8x34xf32> -> vector<8x256xf32>
    %675 = vector.extract_strided_slice %1 {offsets = [24, 0], sizes = [1, 256], strides = [1, 1]} : vector<25x256xf32> to vector<1x256xf32>
    %676 = vector.broadcast %675 : vector<1x256xf32> to vector<8x256xf32>
    %677 = arith.mulf %674, %676 : vector<8x256xf32>
    %678 = vector.extract_strided_slice %365 {offsets = [0, 24], sizes = [8, 1], strides = [1, 1]} : vector<8x25xf32> to vector<8x1xf32>
    %679 = vector.broadcast %678 : vector<8x1xf32> to vector<8x256xf32>
    %680 = arith.mulf %677, %679 : vector<8x256xf32>
    %681 = arith.addf %671, %680 : vector<8x256xf32>
    %682 = vector.broadcast %367 : vector<8x1xf32> to vector<8x256xf32>
    %683 = arith.addf %681, %682 : vector<8x256xf32>
    %684 = arith.negf %683 : vector<8x256xf32>
    %685 = math.exp %684 : vector<8x256xf32>
    %cst_119 = arith.constant 1.000000e+00 : f32
    %686 = vector.broadcast %cst_119 : f32 to vector<8x256xf32>
    %687 = arith.addf %686, %685 : vector<8x256xf32>
    %688 = arith.divf %686, %687 : vector<8x256xf32>
    %689 = arith.mulf %683, %688 : vector<8x256xf32>
    %690 = arith.truncf %689 : vector<8x256xf32> to vector<8x256xbf16>
    %cst_120 = arith.constant dense<0.000000e+00> : vector<8x256xf32>
    %691 = tpu.matmul %369, %690, %cst_120 {dimension_numbers = #tpu.dot_dimension_numbers<[1], [0], [0], [1], [0, 0, 1, 1], [], []>} : vector<8x8xbf16>, vector<8x256xbf16>, vector<8x256xf32> -> vector<8x256xf32>
    %692 = vector.broadcast %371 : vector<8x1xf32> to vector<8x256xf32>
    %693 = arith.addf %691, %692 : vector<8x256xf32>
    %694 = arith.negf %693 : vector<8x256xf32>
    %695 = math.exp %694 : vector<8x256xf32>
    %cst_121 = arith.constant 1.000000e+00 : f32
    %696 = vector.broadcast %cst_121 : f32 to vector<8x256xf32>
    %697 = arith.addf %696, %695 : vector<8x256xf32>
    %698 = arith.divf %696, %697 : vector<8x256xf32>
    %699 = arith.mulf %693, %698 : vector<8x256xf32>
    %700 = arith.addf %699, %433 : vector<8x256xf32>
    %701 = arith.addf %700, %359 : vector<8x256xf32>
    %c2 = arith.constant 2 : index
    %c0_122 = arith.constant 0 : index
    %c0_123 = arith.constant 0 : index
    %702 = vector.load %arg6[%c2, %c0_122, %c0_123] : memref<4x8x72xbf16, #tpu.memory_space<vmem>>, vector<1x8x72xbf16>
    %703 = vector.shape_cast %702 : vector<1x8x72xbf16> to vector<8x72xbf16>
    %c2_124 = arith.constant 2 : index
    %c0_125 = arith.constant 0 : index
    %c0_126 = arith.constant 0 : index
    %704 = vector.load %arg7[%c2_124, %c0_125, %c0_126] : memref<4x8x1xf32, #tpu.memory_space<vmem>>, vector<1x8x1xf32>
    %705 = vector.shape_cast %704 : vector<1x8x1xf32> to vector<8x1xf32>
    %c2_127 = arith.constant 2 : index
    %c0_128 = arith.constant 0 : index
    %c0_129 = arith.constant 0 : index
    %706 = vector.load %arg8[%c2_127, %c0_128, %c0_129] : memref<4x8x25xf32, #tpu.memory_space<vmem>>, vector<1x8x25xf32>
    %707 = vector.shape_cast %706 : vector<1x8x25xf32> to vector<8x25xf32>
    %c2_130 = arith.constant 2 : index
    %c0_131 = arith.constant 0 : index
    %c0_132 = arith.constant 0 : index
    %708 = vector.load %arg9[%c2_130, %c0_131, %c0_132] : memref<4x8x1xf32, #tpu.memory_space<vmem>>, vector<1x8x1xf32>
    %709 = vector.shape_cast %708 : vector<1x8x1xf32> to vector<8x1xf32>
    %c2_133 = arith.constant 2 : index
    %c0_134 = arith.constant 0 : index
    %c0_135 = arith.constant 0 : index
    %710 = vector.load %arg10[%c2_133, %c0_134, %c0_135] : memref<4x8x8xbf16, #tpu.memory_space<vmem>>, vector<1x8x8xbf16>
    %711 = vector.shape_cast %710 : vector<1x8x8xbf16> to vector<8x8xbf16>
    %c2_136 = arith.constant 2 : index
    %c0_137 = arith.constant 0 : index
    %c0_138 = arith.constant 0 : index
    %712 = vector.load %arg11[%c2_136, %c0_137, %c0_138] : memref<4x8x1xf32, #tpu.memory_space<vmem>>, vector<1x8x1xf32>
    %713 = vector.shape_cast %712 : vector<1x8x1xf32> to vector<8x1xf32>
    %cst_139 = arith.constant 0.000000e+00 : f32
    %714 = vector.broadcast %cst_139 : f32 to vector<8x17xf32>
    %715 = vector.extract_strided_slice %701 {offsets = [0, 0], sizes = [8, 239], strides = [1, 1]} : vector<8x256xf32> to vector<8x239xf32>
    %716 = tpu.concatenate %714, %715 in 1 : vector<8x17xf32>, vector<8x239xf32> -> vector<8x256xf32>
    %717 = vector.extract_strided_slice %0 {offsets = [0, 0], sizes = [1, 256], strides = [1, 1]} : vector<9x256xf32> to vector<1x256xf32>
    %718 = vector.broadcast %717 : vector<1x256xf32> to vector<8x256xf32>
    %719 = arith.mulf %716, %718 : vector<8x256xf32>
    %cst_140 = arith.constant 0.000000e+00 : f32
    %720 = vector.broadcast %cst_140 : f32 to vector<8x16xf32>
    %721 = vector.extract_strided_slice %701 {offsets = [0, 0], sizes = [8, 240], strides = [1, 1]} : vector<8x256xf32> to vector<8x240xf32>
    %722 = tpu.concatenate %720, %721 in 1 : vector<8x16xf32>, vector<8x240xf32> -> vector<8x256xf32>
    %723 = vector.extract_strided_slice %0 {offsets = [1, 0], sizes = [1, 256], strides = [1, 1]} : vector<9x256xf32> to vector<1x256xf32>
    %724 = vector.broadcast %723 : vector<1x256xf32> to vector<8x256xf32>
    %725 = arith.mulf %722, %724 : vector<8x256xf32>
    %cst_141 = arith.constant 0.000000e+00 : f32
    %726 = vector.broadcast %cst_141 : f32 to vector<8x15xf32>
    %727 = vector.extract_strided_slice %701 {offsets = [0, 0], sizes = [8, 241], strides = [1, 1]} : vector<8x256xf32> to vector<8x241xf32>
    %728 = tpu.concatenate %726, %727 in 1 : vector<8x15xf32>, vector<8x241xf32> -> vector<8x256xf32>
    %729 = vector.extract_strided_slice %0 {offsets = [2, 0], sizes = [1, 256], strides = [1, 1]} : vector<9x256xf32> to vector<1x256xf32>
    %730 = vector.broadcast %729 : vector<1x256xf32> to vector<8x256xf32>
    %731 = arith.mulf %728, %730 : vector<8x256xf32>
    %cst_142 = arith.constant 0.000000e+00 : f32
    %732 = vector.broadcast %cst_142 : f32 to vector<8x1xf32>
    %733 = vector.extract_strided_slice %701 {offsets = [0, 0], sizes = [8, 255], strides = [1, 1]} : vector<8x256xf32> to vector<8x255xf32>
    %734 = tpu.concatenate %732, %733 in 1 : vector<8x1xf32>, vector<8x255xf32> -> vector<8x256xf32>
    %735 = vector.extract_strided_slice %0 {offsets = [3, 0], sizes = [1, 256], strides = [1, 1]} : vector<9x256xf32> to vector<1x256xf32>
    %736 = vector.broadcast %735 : vector<1x256xf32> to vector<8x256xf32>
    %737 = arith.mulf %734, %736 : vector<8x256xf32>
    %738 = vector.extract_strided_slice %0 {offsets = [4, 0], sizes = [1, 256], strides = [1, 1]} : vector<9x256xf32> to vector<1x256xf32>
    %739 = vector.broadcast %738 : vector<1x256xf32> to vector<8x256xf32>
    %740 = arith.mulf %701, %739 : vector<8x256xf32>
    %cst_143 = arith.constant 0.000000e+00 : f32
    %741 = vector.broadcast %cst_143 : f32 to vector<8x1xf32>
    %742 = vector.extract_strided_slice %701 {offsets = [0, 1], sizes = [8, 255], strides = [1, 1]} : vector<8x256xf32> to vector<8x255xf32>
    %743 = tpu.concatenate %742, %741 in 1 : vector<8x255xf32>, vector<8x1xf32> -> vector<8x256xf32>
    %744 = vector.extract_strided_slice %0 {offsets = [5, 0], sizes = [1, 256], strides = [1, 1]} : vector<9x256xf32> to vector<1x256xf32>
    %745 = vector.broadcast %744 : vector<1x256xf32> to vector<8x256xf32>
    %746 = arith.mulf %743, %745 : vector<8x256xf32>
    %cst_144 = arith.constant 0.000000e+00 : f32
    %747 = vector.broadcast %cst_144 : f32 to vector<8x15xf32>
    %748 = vector.extract_strided_slice %701 {offsets = [0, 15], sizes = [8, 241], strides = [1, 1]} : vector<8x256xf32> to vector<8x241xf32>
    %749 = tpu.concatenate %748, %747 in 1 : vector<8x241xf32>, vector<8x15xf32> -> vector<8x256xf32>
    %750 = vector.extract_strided_slice %0 {offsets = [6, 0], sizes = [1, 256], strides = [1, 1]} : vector<9x256xf32> to vector<1x256xf32>
    %751 = vector.broadcast %750 : vector<1x256xf32> to vector<8x256xf32>
    %752 = arith.mulf %749, %751 : vector<8x256xf32>
    %cst_145 = arith.constant 0.000000e+00 : f32
    %753 = vector.broadcast %cst_145 : f32 to vector<8x16xf32>
    %754 = vector.extract_strided_slice %701 {offsets = [0, 16], sizes = [8, 240], strides = [1, 1]} : vector<8x256xf32> to vector<8x240xf32>
    %755 = tpu.concatenate %754, %753 in 1 : vector<8x240xf32>, vector<8x16xf32> -> vector<8x256xf32>
    %756 = vector.extract_strided_slice %0 {offsets = [7, 0], sizes = [1, 256], strides = [1, 1]} : vector<9x256xf32> to vector<1x256xf32>
    %757 = vector.broadcast %756 : vector<1x256xf32> to vector<8x256xf32>
    %758 = arith.mulf %755, %757 : vector<8x256xf32>
    %cst_146 = arith.constant 0.000000e+00 : f32
    %759 = vector.broadcast %cst_146 : f32 to vector<8x17xf32>
    %760 = vector.extract_strided_slice %701 {offsets = [0, 17], sizes = [8, 239], strides = [1, 1]} : vector<8x256xf32> to vector<8x239xf32>
    %761 = tpu.concatenate %760, %759 in 1 : vector<8x239xf32>, vector<8x17xf32> -> vector<8x256xf32>
    %762 = vector.extract_strided_slice %0 {offsets = [8, 0], sizes = [1, 256], strides = [1, 1]} : vector<9x256xf32> to vector<1x256xf32>
    %763 = vector.broadcast %762 : vector<1x256xf32> to vector<8x256xf32>
    %764 = arith.mulf %761, %763 : vector<8x256xf32>
    %765 = tpu.concatenate %719, %725, %731, %737, %740, %746, %752, %758, %764 in 0 : vector<8x256xf32>, vector<8x256xf32>, vector<8x256xf32>, vector<8x256xf32>, vector<8x256xf32>, vector<8x256xf32>, vector<8x256xf32>, vector<8x256xf32>, vector<8x256xf32> -> vector<72x256xf32>
    %766 = arith.truncf %765 : vector<72x256xf32> to vector<72x256xbf16>
    %cst_147 = arith.constant dense<0.000000e+00> : vector<8x256xf32>
    %767 = tpu.matmul %703, %766, %cst_147 {dimension_numbers = #tpu.dot_dimension_numbers<[1], [0], [0], [1], [0, 0, 1, 1], [], []>} : vector<8x72xbf16>, vector<72x256xbf16>, vector<8x256xf32> -> vector<8x256xf32>
    %768 = vector.broadcast %705 : vector<8x1xf32> to vector<8x256xf32>
    %769 = arith.addf %767, %768 : vector<8x256xf32>
    %770 = arith.negf %769 : vector<8x256xf32>
    %771 = math.exp %770 : vector<8x256xf32>
    %cst_148 = arith.constant 1.000000e+00 : f32
    %772 = vector.broadcast %cst_148 : f32 to vector<8x256xf32>
    %773 = arith.addf %772, %771 : vector<8x256xf32>
    %774 = arith.divf %772, %773 : vector<8x256xf32>
    %775 = arith.mulf %769, %774 : vector<8x256xf32>
    %cst_149 = arith.constant 0.000000e+00 : f32
    %776 = vector.broadcast %cst_149 : f32 to vector<8x256xf32>
    %cst_150 = arith.constant 0.000000e+00 : f32
    %777 = vector.broadcast %cst_150 : f32 to vector<8x34xf32>
    %778 = vector.extract_strided_slice %775 {offsets = [0, 0], sizes = [8, 222], strides = [1, 1]} : vector<8x256xf32> to vector<8x222xf32>
    %779 = tpu.concatenate %777, %778 in 1 : vector<8x34xf32>, vector<8x222xf32> -> vector<8x256xf32>
    %780 = vector.extract_strided_slice %1 {offsets = [0, 0], sizes = [1, 256], strides = [1, 1]} : vector<25x256xf32> to vector<1x256xf32>
    %781 = vector.broadcast %780 : vector<1x256xf32> to vector<8x256xf32>
    %782 = arith.mulf %779, %781 : vector<8x256xf32>
    %783 = vector.extract_strided_slice %707 {offsets = [0, 0], sizes = [8, 1], strides = [1, 1]} : vector<8x25xf32> to vector<8x1xf32>
    %784 = vector.broadcast %783 : vector<8x1xf32> to vector<8x256xf32>
    %785 = arith.mulf %782, %784 : vector<8x256xf32>
    %786 = arith.addf %776, %785 : vector<8x256xf32>
    %cst_151 = arith.constant 0.000000e+00 : f32
    %787 = vector.broadcast %cst_151 : f32 to vector<8x33xf32>
    %788 = vector.extract_strided_slice %775 {offsets = [0, 0], sizes = [8, 223], strides = [1, 1]} : vector<8x256xf32> to vector<8x223xf32>
    %789 = tpu.concatenate %787, %788 in 1 : vector<8x33xf32>, vector<8x223xf32> -> vector<8x256xf32>
    %790 = vector.extract_strided_slice %1 {offsets = [1, 0], sizes = [1, 256], strides = [1, 1]} : vector<25x256xf32> to vector<1x256xf32>
    %791 = vector.broadcast %790 : vector<1x256xf32> to vector<8x256xf32>
    %792 = arith.mulf %789, %791 : vector<8x256xf32>
    %793 = vector.extract_strided_slice %707 {offsets = [0, 1], sizes = [8, 1], strides = [1, 1]} : vector<8x25xf32> to vector<8x1xf32>
    %794 = vector.broadcast %793 : vector<8x1xf32> to vector<8x256xf32>
    %795 = arith.mulf %792, %794 : vector<8x256xf32>
    %796 = arith.addf %786, %795 : vector<8x256xf32>
    %cst_152 = arith.constant 0.000000e+00 : f32
    %797 = vector.broadcast %cst_152 : f32 to vector<8x32xf32>
    %798 = vector.extract_strided_slice %775 {offsets = [0, 0], sizes = [8, 224], strides = [1, 1]} : vector<8x256xf32> to vector<8x224xf32>
    %799 = tpu.concatenate %797, %798 in 1 : vector<8x32xf32>, vector<8x224xf32> -> vector<8x256xf32>
    %800 = vector.extract_strided_slice %1 {offsets = [2, 0], sizes = [1, 256], strides = [1, 1]} : vector<25x256xf32> to vector<1x256xf32>
    %801 = vector.broadcast %800 : vector<1x256xf32> to vector<8x256xf32>
    %802 = arith.mulf %799, %801 : vector<8x256xf32>
    %803 = vector.extract_strided_slice %707 {offsets = [0, 2], sizes = [8, 1], strides = [1, 1]} : vector<8x25xf32> to vector<8x1xf32>
    %804 = vector.broadcast %803 : vector<8x1xf32> to vector<8x256xf32>
    %805 = arith.mulf %802, %804 : vector<8x256xf32>
    %806 = arith.addf %796, %805 : vector<8x256xf32>
    %cst_153 = arith.constant 0.000000e+00 : f32
    %807 = vector.broadcast %cst_153 : f32 to vector<8x31xf32>
    %808 = vector.extract_strided_slice %775 {offsets = [0, 0], sizes = [8, 225], strides = [1, 1]} : vector<8x256xf32> to vector<8x225xf32>
    %809 = tpu.concatenate %807, %808 in 1 : vector<8x31xf32>, vector<8x225xf32> -> vector<8x256xf32>
    %810 = vector.extract_strided_slice %1 {offsets = [3, 0], sizes = [1, 256], strides = [1, 1]} : vector<25x256xf32> to vector<1x256xf32>
    %811 = vector.broadcast %810 : vector<1x256xf32> to vector<8x256xf32>
    %812 = arith.mulf %809, %811 : vector<8x256xf32>
    %813 = vector.extract_strided_slice %707 {offsets = [0, 3], sizes = [8, 1], strides = [1, 1]} : vector<8x25xf32> to vector<8x1xf32>
    %814 = vector.broadcast %813 : vector<8x1xf32> to vector<8x256xf32>
    %815 = arith.mulf %812, %814 : vector<8x256xf32>
    %816 = arith.addf %806, %815 : vector<8x256xf32>
    %cst_154 = arith.constant 0.000000e+00 : f32
    %817 = vector.broadcast %cst_154 : f32 to vector<8x30xf32>
    %818 = vector.extract_strided_slice %775 {offsets = [0, 0], sizes = [8, 226], strides = [1, 1]} : vector<8x256xf32> to vector<8x226xf32>
    %819 = tpu.concatenate %817, %818 in 1 : vector<8x30xf32>, vector<8x226xf32> -> vector<8x256xf32>
    %820 = vector.extract_strided_slice %1 {offsets = [4, 0], sizes = [1, 256], strides = [1, 1]} : vector<25x256xf32> to vector<1x256xf32>
    %821 = vector.broadcast %820 : vector<1x256xf32> to vector<8x256xf32>
    %822 = arith.mulf %819, %821 : vector<8x256xf32>
    %823 = vector.extract_strided_slice %707 {offsets = [0, 4], sizes = [8, 1], strides = [1, 1]} : vector<8x25xf32> to vector<8x1xf32>
    %824 = vector.broadcast %823 : vector<8x1xf32> to vector<8x256xf32>
    %825 = arith.mulf %822, %824 : vector<8x256xf32>
    %826 = arith.addf %816, %825 : vector<8x256xf32>
    %cst_155 = arith.constant 0.000000e+00 : f32
    %827 = vector.broadcast %cst_155 : f32 to vector<8x18xf32>
    %828 = vector.extract_strided_slice %775 {offsets = [0, 0], sizes = [8, 238], strides = [1, 1]} : vector<8x256xf32> to vector<8x238xf32>
    %829 = tpu.concatenate %827, %828 in 1 : vector<8x18xf32>, vector<8x238xf32> -> vector<8x256xf32>
    %830 = vector.extract_strided_slice %1 {offsets = [5, 0], sizes = [1, 256], strides = [1, 1]} : vector<25x256xf32> to vector<1x256xf32>
    %831 = vector.broadcast %830 : vector<1x256xf32> to vector<8x256xf32>
    %832 = arith.mulf %829, %831 : vector<8x256xf32>
    %833 = vector.extract_strided_slice %707 {offsets = [0, 5], sizes = [8, 1], strides = [1, 1]} : vector<8x25xf32> to vector<8x1xf32>
    %834 = vector.broadcast %833 : vector<8x1xf32> to vector<8x256xf32>
    %835 = arith.mulf %832, %834 : vector<8x256xf32>
    %836 = arith.addf %826, %835 : vector<8x256xf32>
    %cst_156 = arith.constant 0.000000e+00 : f32
    %837 = vector.broadcast %cst_156 : f32 to vector<8x17xf32>
    %838 = vector.extract_strided_slice %775 {offsets = [0, 0], sizes = [8, 239], strides = [1, 1]} : vector<8x256xf32> to vector<8x239xf32>
    %839 = tpu.concatenate %837, %838 in 1 : vector<8x17xf32>, vector<8x239xf32> -> vector<8x256xf32>
    %840 = vector.extract_strided_slice %1 {offsets = [6, 0], sizes = [1, 256], strides = [1, 1]} : vector<25x256xf32> to vector<1x256xf32>
    %841 = vector.broadcast %840 : vector<1x256xf32> to vector<8x256xf32>
    %842 = arith.mulf %839, %841 : vector<8x256xf32>
    %843 = vector.extract_strided_slice %707 {offsets = [0, 6], sizes = [8, 1], strides = [1, 1]} : vector<8x25xf32> to vector<8x1xf32>
    %844 = vector.broadcast %843 : vector<8x1xf32> to vector<8x256xf32>
    %845 = arith.mulf %842, %844 : vector<8x256xf32>
    %846 = arith.addf %836, %845 : vector<8x256xf32>
    %cst_157 = arith.constant 0.000000e+00 : f32
    %847 = vector.broadcast %cst_157 : f32 to vector<8x16xf32>
    %848 = vector.extract_strided_slice %775 {offsets = [0, 0], sizes = [8, 240], strides = [1, 1]} : vector<8x256xf32> to vector<8x240xf32>
    %849 = tpu.concatenate %847, %848 in 1 : vector<8x16xf32>, vector<8x240xf32> -> vector<8x256xf32>
    %850 = vector.extract_strided_slice %1 {offsets = [7, 0], sizes = [1, 256], strides = [1, 1]} : vector<25x256xf32> to vector<1x256xf32>
    %851 = vector.broadcast %850 : vector<1x256xf32> to vector<8x256xf32>
    %852 = arith.mulf %849, %851 : vector<8x256xf32>
    %853 = vector.extract_strided_slice %707 {offsets = [0, 7], sizes = [8, 1], strides = [1, 1]} : vector<8x25xf32> to vector<8x1xf32>
    %854 = vector.broadcast %853 : vector<8x1xf32> to vector<8x256xf32>
    %855 = arith.mulf %852, %854 : vector<8x256xf32>
    %856 = arith.addf %846, %855 : vector<8x256xf32>
    %cst_158 = arith.constant 0.000000e+00 : f32
    %857 = vector.broadcast %cst_158 : f32 to vector<8x15xf32>
    %858 = vector.extract_strided_slice %775 {offsets = [0, 0], sizes = [8, 241], strides = [1, 1]} : vector<8x256xf32> to vector<8x241xf32>
    %859 = tpu.concatenate %857, %858 in 1 : vector<8x15xf32>, vector<8x241xf32> -> vector<8x256xf32>
    %860 = vector.extract_strided_slice %1 {offsets = [8, 0], sizes = [1, 256], strides = [1, 1]} : vector<25x256xf32> to vector<1x256xf32>
    %861 = vector.broadcast %860 : vector<1x256xf32> to vector<8x256xf32>
    %862 = arith.mulf %859, %861 : vector<8x256xf32>
    %863 = vector.extract_strided_slice %707 {offsets = [0, 8], sizes = [8, 1], strides = [1, 1]} : vector<8x25xf32> to vector<8x1xf32>
    %864 = vector.broadcast %863 : vector<8x1xf32> to vector<8x256xf32>
    %865 = arith.mulf %862, %864 : vector<8x256xf32>
    %866 = arith.addf %856, %865 : vector<8x256xf32>
    %cst_159 = arith.constant 0.000000e+00 : f32
    %867 = vector.broadcast %cst_159 : f32 to vector<8x14xf32>
    %868 = vector.extract_strided_slice %775 {offsets = [0, 0], sizes = [8, 242], strides = [1, 1]} : vector<8x256xf32> to vector<8x242xf32>
    %869 = tpu.concatenate %867, %868 in 1 : vector<8x14xf32>, vector<8x242xf32> -> vector<8x256xf32>
    %870 = vector.extract_strided_slice %1 {offsets = [9, 0], sizes = [1, 256], strides = [1, 1]} : vector<25x256xf32> to vector<1x256xf32>
    %871 = vector.broadcast %870 : vector<1x256xf32> to vector<8x256xf32>
    %872 = arith.mulf %869, %871 : vector<8x256xf32>
    %873 = vector.extract_strided_slice %707 {offsets = [0, 9], sizes = [8, 1], strides = [1, 1]} : vector<8x25xf32> to vector<8x1xf32>
    %874 = vector.broadcast %873 : vector<8x1xf32> to vector<8x256xf32>
    %875 = arith.mulf %872, %874 : vector<8x256xf32>
    %876 = arith.addf %866, %875 : vector<8x256xf32>
    %cst_160 = arith.constant 0.000000e+00 : f32
    %877 = vector.broadcast %cst_160 : f32 to vector<8x2xf32>
    %878 = vector.extract_strided_slice %775 {offsets = [0, 0], sizes = [8, 254], strides = [1, 1]} : vector<8x256xf32> to vector<8x254xf32>
    %879 = tpu.concatenate %877, %878 in 1 : vector<8x2xf32>, vector<8x254xf32> -> vector<8x256xf32>
    %880 = vector.extract_strided_slice %1 {offsets = [10, 0], sizes = [1, 256], strides = [1, 1]} : vector<25x256xf32> to vector<1x256xf32>
    %881 = vector.broadcast %880 : vector<1x256xf32> to vector<8x256xf32>
    %882 = arith.mulf %879, %881 : vector<8x256xf32>
    %883 = vector.extract_strided_slice %707 {offsets = [0, 10], sizes = [8, 1], strides = [1, 1]} : vector<8x25xf32> to vector<8x1xf32>
    %884 = vector.broadcast %883 : vector<8x1xf32> to vector<8x256xf32>
    %885 = arith.mulf %882, %884 : vector<8x256xf32>
    %886 = arith.addf %876, %885 : vector<8x256xf32>
    %cst_161 = arith.constant 0.000000e+00 : f32
    %887 = vector.broadcast %cst_161 : f32 to vector<8x1xf32>
    %888 = vector.extract_strided_slice %775 {offsets = [0, 0], sizes = [8, 255], strides = [1, 1]} : vector<8x256xf32> to vector<8x255xf32>
    %889 = tpu.concatenate %887, %888 in 1 : vector<8x1xf32>, vector<8x255xf32> -> vector<8x256xf32>
    %890 = vector.extract_strided_slice %1 {offsets = [11, 0], sizes = [1, 256], strides = [1, 1]} : vector<25x256xf32> to vector<1x256xf32>
    %891 = vector.broadcast %890 : vector<1x256xf32> to vector<8x256xf32>
    %892 = arith.mulf %889, %891 : vector<8x256xf32>
    %893 = vector.extract_strided_slice %707 {offsets = [0, 11], sizes = [8, 1], strides = [1, 1]} : vector<8x25xf32> to vector<8x1xf32>
    %894 = vector.broadcast %893 : vector<8x1xf32> to vector<8x256xf32>
    %895 = arith.mulf %892, %894 : vector<8x256xf32>
    %896 = arith.addf %886, %895 : vector<8x256xf32>
    %897 = vector.extract_strided_slice %1 {offsets = [12, 0], sizes = [1, 256], strides = [1, 1]} : vector<25x256xf32> to vector<1x256xf32>
    %898 = vector.broadcast %897 : vector<1x256xf32> to vector<8x256xf32>
    %899 = arith.mulf %775, %898 : vector<8x256xf32>
    %900 = vector.extract_strided_slice %707 {offsets = [0, 12], sizes = [8, 1], strides = [1, 1]} : vector<8x25xf32> to vector<8x1xf32>
    %901 = vector.broadcast %900 : vector<8x1xf32> to vector<8x256xf32>
    %902 = arith.mulf %899, %901 : vector<8x256xf32>
    %903 = arith.addf %896, %902 : vector<8x256xf32>
    %cst_162 = arith.constant 0.000000e+00 : f32
    %904 = vector.broadcast %cst_162 : f32 to vector<8x1xf32>
    %905 = vector.extract_strided_slice %775 {offsets = [0, 1], sizes = [8, 255], strides = [1, 1]} : vector<8x256xf32> to vector<8x255xf32>
    %906 = tpu.concatenate %905, %904 in 1 : vector<8x255xf32>, vector<8x1xf32> -> vector<8x256xf32>
    %907 = vector.extract_strided_slice %1 {offsets = [13, 0], sizes = [1, 256], strides = [1, 1]} : vector<25x256xf32> to vector<1x256xf32>
    %908 = vector.broadcast %907 : vector<1x256xf32> to vector<8x256xf32>
    %909 = arith.mulf %906, %908 : vector<8x256xf32>
    %910 = vector.extract_strided_slice %707 {offsets = [0, 13], sizes = [8, 1], strides = [1, 1]} : vector<8x25xf32> to vector<8x1xf32>
    %911 = vector.broadcast %910 : vector<8x1xf32> to vector<8x256xf32>
    %912 = arith.mulf %909, %911 : vector<8x256xf32>
    %913 = arith.addf %903, %912 : vector<8x256xf32>
    %cst_163 = arith.constant 0.000000e+00 : f32
    %914 = vector.broadcast %cst_163 : f32 to vector<8x2xf32>
    %915 = vector.extract_strided_slice %775 {offsets = [0, 2], sizes = [8, 254], strides = [1, 1]} : vector<8x256xf32> to vector<8x254xf32>
    %916 = tpu.concatenate %915, %914 in 1 : vector<8x254xf32>, vector<8x2xf32> -> vector<8x256xf32>
    %917 = vector.extract_strided_slice %1 {offsets = [14, 0], sizes = [1, 256], strides = [1, 1]} : vector<25x256xf32> to vector<1x256xf32>
    %918 = vector.broadcast %917 : vector<1x256xf32> to vector<8x256xf32>
    %919 = arith.mulf %916, %918 : vector<8x256xf32>
    %920 = vector.extract_strided_slice %707 {offsets = [0, 14], sizes = [8, 1], strides = [1, 1]} : vector<8x25xf32> to vector<8x1xf32>
    %921 = vector.broadcast %920 : vector<8x1xf32> to vector<8x256xf32>
    %922 = arith.mulf %919, %921 : vector<8x256xf32>
    %923 = arith.addf %913, %922 : vector<8x256xf32>
    %cst_164 = arith.constant 0.000000e+00 : f32
    %924 = vector.broadcast %cst_164 : f32 to vector<8x14xf32>
    %925 = vector.extract_strided_slice %775 {offsets = [0, 14], sizes = [8, 242], strides = [1, 1]} : vector<8x256xf32> to vector<8x242xf32>
    %926 = tpu.concatenate %925, %924 in 1 : vector<8x242xf32>, vector<8x14xf32> -> vector<8x256xf32>
    %927 = vector.extract_strided_slice %1 {offsets = [15, 0], sizes = [1, 256], strides = [1, 1]} : vector<25x256xf32> to vector<1x256xf32>
    %928 = vector.broadcast %927 : vector<1x256xf32> to vector<8x256xf32>
    %929 = arith.mulf %926, %928 : vector<8x256xf32>
    %930 = vector.extract_strided_slice %707 {offsets = [0, 15], sizes = [8, 1], strides = [1, 1]} : vector<8x25xf32> to vector<8x1xf32>
    %931 = vector.broadcast %930 : vector<8x1xf32> to vector<8x256xf32>
    %932 = arith.mulf %929, %931 : vector<8x256xf32>
    %933 = arith.addf %923, %932 : vector<8x256xf32>
    %cst_165 = arith.constant 0.000000e+00 : f32
    %934 = vector.broadcast %cst_165 : f32 to vector<8x15xf32>
    %935 = vector.extract_strided_slice %775 {offsets = [0, 15], sizes = [8, 241], strides = [1, 1]} : vector<8x256xf32> to vector<8x241xf32>
    %936 = tpu.concatenate %935, %934 in 1 : vector<8x241xf32>, vector<8x15xf32> -> vector<8x256xf32>
    %937 = vector.extract_strided_slice %1 {offsets = [16, 0], sizes = [1, 256], strides = [1, 1]} : vector<25x256xf32> to vector<1x256xf32>
    %938 = vector.broadcast %937 : vector<1x256xf32> to vector<8x256xf32>
    %939 = arith.mulf %936, %938 : vector<8x256xf32>
    %940 = vector.extract_strided_slice %707 {offsets = [0, 16], sizes = [8, 1], strides = [1, 1]} : vector<8x25xf32> to vector<8x1xf32>
    %941 = vector.broadcast %940 : vector<8x1xf32> to vector<8x256xf32>
    %942 = arith.mulf %939, %941 : vector<8x256xf32>
    %943 = arith.addf %933, %942 : vector<8x256xf32>
    %cst_166 = arith.constant 0.000000e+00 : f32
    %944 = vector.broadcast %cst_166 : f32 to vector<8x16xf32>
    %945 = vector.extract_strided_slice %775 {offsets = [0, 16], sizes = [8, 240], strides = [1, 1]} : vector<8x256xf32> to vector<8x240xf32>
    %946 = tpu.concatenate %945, %944 in 1 : vector<8x240xf32>, vector<8x16xf32> -> vector<8x256xf32>
    %947 = vector.extract_strided_slice %1 {offsets = [17, 0], sizes = [1, 256], strides = [1, 1]} : vector<25x256xf32> to vector<1x256xf32>
    %948 = vector.broadcast %947 : vector<1x256xf32> to vector<8x256xf32>
    %949 = arith.mulf %946, %948 : vector<8x256xf32>
    %950 = vector.extract_strided_slice %707 {offsets = [0, 17], sizes = [8, 1], strides = [1, 1]} : vector<8x25xf32> to vector<8x1xf32>
    %951 = vector.broadcast %950 : vector<8x1xf32> to vector<8x256xf32>
    %952 = arith.mulf %949, %951 : vector<8x256xf32>
    %953 = arith.addf %943, %952 : vector<8x256xf32>
    %cst_167 = arith.constant 0.000000e+00 : f32
    %954 = vector.broadcast %cst_167 : f32 to vector<8x17xf32>
    %955 = vector.extract_strided_slice %775 {offsets = [0, 17], sizes = [8, 239], strides = [1, 1]} : vector<8x256xf32> to vector<8x239xf32>
    %956 = tpu.concatenate %955, %954 in 1 : vector<8x239xf32>, vector<8x17xf32> -> vector<8x256xf32>
    %957 = vector.extract_strided_slice %1 {offsets = [18, 0], sizes = [1, 256], strides = [1, 1]} : vector<25x256xf32> to vector<1x256xf32>
    %958 = vector.broadcast %957 : vector<1x256xf32> to vector<8x256xf32>
    %959 = arith.mulf %956, %958 : vector<8x256xf32>
    %960 = vector.extract_strided_slice %707 {offsets = [0, 18], sizes = [8, 1], strides = [1, 1]} : vector<8x25xf32> to vector<8x1xf32>
    %961 = vector.broadcast %960 : vector<8x1xf32> to vector<8x256xf32>
    %962 = arith.mulf %959, %961 : vector<8x256xf32>
    %963 = arith.addf %953, %962 : vector<8x256xf32>
    %cst_168 = arith.constant 0.000000e+00 : f32
    %964 = vector.broadcast %cst_168 : f32 to vector<8x18xf32>
    %965 = vector.extract_strided_slice %775 {offsets = [0, 18], sizes = [8, 238], strides = [1, 1]} : vector<8x256xf32> to vector<8x238xf32>
    %966 = tpu.concatenate %965, %964 in 1 : vector<8x238xf32>, vector<8x18xf32> -> vector<8x256xf32>
    %967 = vector.extract_strided_slice %1 {offsets = [19, 0], sizes = [1, 256], strides = [1, 1]} : vector<25x256xf32> to vector<1x256xf32>
    %968 = vector.broadcast %967 : vector<1x256xf32> to vector<8x256xf32>
    %969 = arith.mulf %966, %968 : vector<8x256xf32>
    %970 = vector.extract_strided_slice %707 {offsets = [0, 19], sizes = [8, 1], strides = [1, 1]} : vector<8x25xf32> to vector<8x1xf32>
    %971 = vector.broadcast %970 : vector<8x1xf32> to vector<8x256xf32>
    %972 = arith.mulf %969, %971 : vector<8x256xf32>
    %973 = arith.addf %963, %972 : vector<8x256xf32>
    %cst_169 = arith.constant 0.000000e+00 : f32
    %974 = vector.broadcast %cst_169 : f32 to vector<8x30xf32>
    %975 = vector.extract_strided_slice %775 {offsets = [0, 30], sizes = [8, 226], strides = [1, 1]} : vector<8x256xf32> to vector<8x226xf32>
    %976 = tpu.concatenate %975, %974 in 1 : vector<8x226xf32>, vector<8x30xf32> -> vector<8x256xf32>
    %977 = vector.extract_strided_slice %1 {offsets = [20, 0], sizes = [1, 256], strides = [1, 1]} : vector<25x256xf32> to vector<1x256xf32>
    %978 = vector.broadcast %977 : vector<1x256xf32> to vector<8x256xf32>
    %979 = arith.mulf %976, %978 : vector<8x256xf32>
    %980 = vector.extract_strided_slice %707 {offsets = [0, 20], sizes = [8, 1], strides = [1, 1]} : vector<8x25xf32> to vector<8x1xf32>
    %981 = vector.broadcast %980 : vector<8x1xf32> to vector<8x256xf32>
    %982 = arith.mulf %979, %981 : vector<8x256xf32>
    %983 = arith.addf %973, %982 : vector<8x256xf32>
    %cst_170 = arith.constant 0.000000e+00 : f32
    %984 = vector.broadcast %cst_170 : f32 to vector<8x31xf32>
    %985 = vector.extract_strided_slice %775 {offsets = [0, 31], sizes = [8, 225], strides = [1, 1]} : vector<8x256xf32> to vector<8x225xf32>
    %986 = tpu.concatenate %985, %984 in 1 : vector<8x225xf32>, vector<8x31xf32> -> vector<8x256xf32>
    %987 = vector.extract_strided_slice %1 {offsets = [21, 0], sizes = [1, 256], strides = [1, 1]} : vector<25x256xf32> to vector<1x256xf32>
    %988 = vector.broadcast %987 : vector<1x256xf32> to vector<8x256xf32>
    %989 = arith.mulf %986, %988 : vector<8x256xf32>
    %990 = vector.extract_strided_slice %707 {offsets = [0, 21], sizes = [8, 1], strides = [1, 1]} : vector<8x25xf32> to vector<8x1xf32>
    %991 = vector.broadcast %990 : vector<8x1xf32> to vector<8x256xf32>
    %992 = arith.mulf %989, %991 : vector<8x256xf32>
    %993 = arith.addf %983, %992 : vector<8x256xf32>
    %cst_171 = arith.constant 0.000000e+00 : f32
    %994 = vector.broadcast %cst_171 : f32 to vector<8x32xf32>
    %995 = vector.extract_strided_slice %775 {offsets = [0, 32], sizes = [8, 224], strides = [1, 1]} : vector<8x256xf32> to vector<8x224xf32>
    %996 = tpu.concatenate %995, %994 in 1 : vector<8x224xf32>, vector<8x32xf32> -> vector<8x256xf32>
    %997 = vector.extract_strided_slice %1 {offsets = [22, 0], sizes = [1, 256], strides = [1, 1]} : vector<25x256xf32> to vector<1x256xf32>
    %998 = vector.broadcast %997 : vector<1x256xf32> to vector<8x256xf32>
    %999 = arith.mulf %996, %998 : vector<8x256xf32>
    %1000 = vector.extract_strided_slice %707 {offsets = [0, 22], sizes = [8, 1], strides = [1, 1]} : vector<8x25xf32> to vector<8x1xf32>
    %1001 = vector.broadcast %1000 : vector<8x1xf32> to vector<8x256xf32>
    %1002 = arith.mulf %999, %1001 : vector<8x256xf32>
    %1003 = arith.addf %993, %1002 : vector<8x256xf32>
    %cst_172 = arith.constant 0.000000e+00 : f32
    %1004 = vector.broadcast %cst_172 : f32 to vector<8x33xf32>
    %1005 = vector.extract_strided_slice %775 {offsets = [0, 33], sizes = [8, 223], strides = [1, 1]} : vector<8x256xf32> to vector<8x223xf32>
    %1006 = tpu.concatenate %1005, %1004 in 1 : vector<8x223xf32>, vector<8x33xf32> -> vector<8x256xf32>
    %1007 = vector.extract_strided_slice %1 {offsets = [23, 0], sizes = [1, 256], strides = [1, 1]} : vector<25x256xf32> to vector<1x256xf32>
    %1008 = vector.broadcast %1007 : vector<1x256xf32> to vector<8x256xf32>
    %1009 = arith.mulf %1006, %1008 : vector<8x256xf32>
    %1010 = vector.extract_strided_slice %707 {offsets = [0, 23], sizes = [8, 1], strides = [1, 1]} : vector<8x25xf32> to vector<8x1xf32>
    %1011 = vector.broadcast %1010 : vector<8x1xf32> to vector<8x256xf32>
    %1012 = arith.mulf %1009, %1011 : vector<8x256xf32>
    %1013 = arith.addf %1003, %1012 : vector<8x256xf32>
    %cst_173 = arith.constant 0.000000e+00 : f32
    %1014 = vector.broadcast %cst_173 : f32 to vector<8x34xf32>
    %1015 = vector.extract_strided_slice %775 {offsets = [0, 34], sizes = [8, 222], strides = [1, 1]} : vector<8x256xf32> to vector<8x222xf32>
    %1016 = tpu.concatenate %1015, %1014 in 1 : vector<8x222xf32>, vector<8x34xf32> -> vector<8x256xf32>
    %1017 = vector.extract_strided_slice %1 {offsets = [24, 0], sizes = [1, 256], strides = [1, 1]} : vector<25x256xf32> to vector<1x256xf32>
    %1018 = vector.broadcast %1017 : vector<1x256xf32> to vector<8x256xf32>
    %1019 = arith.mulf %1016, %1018 : vector<8x256xf32>
    %1020 = vector.extract_strided_slice %707 {offsets = [0, 24], sizes = [8, 1], strides = [1, 1]} : vector<8x25xf32> to vector<8x1xf32>
    %1021 = vector.broadcast %1020 : vector<8x1xf32> to vector<8x256xf32>
    %1022 = arith.mulf %1019, %1021 : vector<8x256xf32>
    %1023 = arith.addf %1013, %1022 : vector<8x256xf32>
    %1024 = vector.broadcast %709 : vector<8x1xf32> to vector<8x256xf32>
    %1025 = arith.addf %1023, %1024 : vector<8x256xf32>
    %1026 = arith.negf %1025 : vector<8x256xf32>
    %1027 = math.exp %1026 : vector<8x256xf32>
    %cst_174 = arith.constant 1.000000e+00 : f32
    %1028 = vector.broadcast %cst_174 : f32 to vector<8x256xf32>
    %1029 = arith.addf %1028, %1027 : vector<8x256xf32>
    %1030 = arith.divf %1028, %1029 : vector<8x256xf32>
    %1031 = arith.mulf %1025, %1030 : vector<8x256xf32>
    %1032 = arith.truncf %1031 : vector<8x256xf32> to vector<8x256xbf16>
    %cst_175 = arith.constant dense<0.000000e+00> : vector<8x256xf32>
    %1033 = tpu.matmul %711, %1032, %cst_175 {dimension_numbers = #tpu.dot_dimension_numbers<[1], [0], [0], [1], [0, 0, 1, 1], [], []>} : vector<8x8xbf16>, vector<8x256xbf16>, vector<8x256xf32> -> vector<8x256xf32>
    %1034 = vector.broadcast %713 : vector<8x1xf32> to vector<8x256xf32>
    %1035 = arith.addf %1033, %1034 : vector<8x256xf32>
    %1036 = arith.negf %1035 : vector<8x256xf32>
    %1037 = math.exp %1036 : vector<8x256xf32>
    %cst_176 = arith.constant 1.000000e+00 : f32
    %1038 = vector.broadcast %cst_176 : f32 to vector<8x256xf32>
    %1039 = arith.addf %1038, %1037 : vector<8x256xf32>
    %1040 = arith.divf %1038, %1039 : vector<8x256xf32>
    %1041 = arith.mulf %1035, %1040 : vector<8x256xf32>
    %1042 = arith.addf %1041, %775 : vector<8x256xf32>
    %1043 = arith.addf %1042, %701 : vector<8x256xf32>
    %c3 = arith.constant 3 : index
    %c0_177 = arith.constant 0 : index
    %c0_178 = arith.constant 0 : index
    %1044 = vector.load %arg6[%c3, %c0_177, %c0_178] : memref<4x8x72xbf16, #tpu.memory_space<vmem>>, vector<1x8x72xbf16>
    %1045 = vector.shape_cast %1044 : vector<1x8x72xbf16> to vector<8x72xbf16>
    %c3_179 = arith.constant 3 : index
    %c0_180 = arith.constant 0 : index
    %c0_181 = arith.constant 0 : index
    %1046 = vector.load %arg7[%c3_179, %c0_180, %c0_181] : memref<4x8x1xf32, #tpu.memory_space<vmem>>, vector<1x8x1xf32>
    %1047 = vector.shape_cast %1046 : vector<1x8x1xf32> to vector<8x1xf32>
    %c3_182 = arith.constant 3 : index
    %c0_183 = arith.constant 0 : index
    %c0_184 = arith.constant 0 : index
    %1048 = vector.load %arg8[%c3_182, %c0_183, %c0_184] : memref<4x8x25xf32, #tpu.memory_space<vmem>>, vector<1x8x25xf32>
    %1049 = vector.shape_cast %1048 : vector<1x8x25xf32> to vector<8x25xf32>
    %c3_185 = arith.constant 3 : index
    %c0_186 = arith.constant 0 : index
    %c0_187 = arith.constant 0 : index
    %1050 = vector.load %arg9[%c3_185, %c0_186, %c0_187] : memref<4x8x1xf32, #tpu.memory_space<vmem>>, vector<1x8x1xf32>
    %1051 = vector.shape_cast %1050 : vector<1x8x1xf32> to vector<8x1xf32>
    %c3_188 = arith.constant 3 : index
    %c0_189 = arith.constant 0 : index
    %c0_190 = arith.constant 0 : index
    %1052 = vector.load %arg10[%c3_188, %c0_189, %c0_190] : memref<4x8x8xbf16, #tpu.memory_space<vmem>>, vector<1x8x8xbf16>
    %1053 = vector.shape_cast %1052 : vector<1x8x8xbf16> to vector<8x8xbf16>
    %c3_191 = arith.constant 3 : index
    %c0_192 = arith.constant 0 : index
    %c0_193 = arith.constant 0 : index
    %1054 = vector.load %arg11[%c3_191, %c0_192, %c0_193] : memref<4x8x1xf32, #tpu.memory_space<vmem>>, vector<1x8x1xf32>
    %1055 = vector.shape_cast %1054 : vector<1x8x1xf32> to vector<8x1xf32>
    %cst_194 = arith.constant 0.000000e+00 : f32
    %1056 = vector.broadcast %cst_194 : f32 to vector<8x17xf32>
    %1057 = vector.extract_strided_slice %1043 {offsets = [0, 0], sizes = [8, 239], strides = [1, 1]} : vector<8x256xf32> to vector<8x239xf32>
    %1058 = tpu.concatenate %1056, %1057 in 1 : vector<8x17xf32>, vector<8x239xf32> -> vector<8x256xf32>
    %1059 = vector.extract_strided_slice %0 {offsets = [0, 0], sizes = [1, 256], strides = [1, 1]} : vector<9x256xf32> to vector<1x256xf32>
    %1060 = vector.broadcast %1059 : vector<1x256xf32> to vector<8x256xf32>
    %1061 = arith.mulf %1058, %1060 : vector<8x256xf32>
    %cst_195 = arith.constant 0.000000e+00 : f32
    %1062 = vector.broadcast %cst_195 : f32 to vector<8x16xf32>
    %1063 = vector.extract_strided_slice %1043 {offsets = [0, 0], sizes = [8, 240], strides = [1, 1]} : vector<8x256xf32> to vector<8x240xf32>
    %1064 = tpu.concatenate %1062, %1063 in 1 : vector<8x16xf32>, vector<8x240xf32> -> vector<8x256xf32>
    %1065 = vector.extract_strided_slice %0 {offsets = [1, 0], sizes = [1, 256], strides = [1, 1]} : vector<9x256xf32> to vector<1x256xf32>
    %1066 = vector.broadcast %1065 : vector<1x256xf32> to vector<8x256xf32>
    %1067 = arith.mulf %1064, %1066 : vector<8x256xf32>
    %cst_196 = arith.constant 0.000000e+00 : f32
    %1068 = vector.broadcast %cst_196 : f32 to vector<8x15xf32>
    %1069 = vector.extract_strided_slice %1043 {offsets = [0, 0], sizes = [8, 241], strides = [1, 1]} : vector<8x256xf32> to vector<8x241xf32>
    %1070 = tpu.concatenate %1068, %1069 in 1 : vector<8x15xf32>, vector<8x241xf32> -> vector<8x256xf32>
    %1071 = vector.extract_strided_slice %0 {offsets = [2, 0], sizes = [1, 256], strides = [1, 1]} : vector<9x256xf32> to vector<1x256xf32>
    %1072 = vector.broadcast %1071 : vector<1x256xf32> to vector<8x256xf32>
    %1073 = arith.mulf %1070, %1072 : vector<8x256xf32>
    %cst_197 = arith.constant 0.000000e+00 : f32
    %1074 = vector.broadcast %cst_197 : f32 to vector<8x1xf32>
    %1075 = vector.extract_strided_slice %1043 {offsets = [0, 0], sizes = [8, 255], strides = [1, 1]} : vector<8x256xf32> to vector<8x255xf32>
    %1076 = tpu.concatenate %1074, %1075 in 1 : vector<8x1xf32>, vector<8x255xf32> -> vector<8x256xf32>
    %1077 = vector.extract_strided_slice %0 {offsets = [3, 0], sizes = [1, 256], strides = [1, 1]} : vector<9x256xf32> to vector<1x256xf32>
    %1078 = vector.broadcast %1077 : vector<1x256xf32> to vector<8x256xf32>
    %1079 = arith.mulf %1076, %1078 : vector<8x256xf32>
    %1080 = vector.extract_strided_slice %0 {offsets = [4, 0], sizes = [1, 256], strides = [1, 1]} : vector<9x256xf32> to vector<1x256xf32>
    %1081 = vector.broadcast %1080 : vector<1x256xf32> to vector<8x256xf32>
    %1082 = arith.mulf %1043, %1081 : vector<8x256xf32>
    %cst_198 = arith.constant 0.000000e+00 : f32
    %1083 = vector.broadcast %cst_198 : f32 to vector<8x1xf32>
    %1084 = vector.extract_strided_slice %1043 {offsets = [0, 1], sizes = [8, 255], strides = [1, 1]} : vector<8x256xf32> to vector<8x255xf32>
    %1085 = tpu.concatenate %1084, %1083 in 1 : vector<8x255xf32>, vector<8x1xf32> -> vector<8x256xf32>
    %1086 = vector.extract_strided_slice %0 {offsets = [5, 0], sizes = [1, 256], strides = [1, 1]} : vector<9x256xf32> to vector<1x256xf32>
    %1087 = vector.broadcast %1086 : vector<1x256xf32> to vector<8x256xf32>
    %1088 = arith.mulf %1085, %1087 : vector<8x256xf32>
    %cst_199 = arith.constant 0.000000e+00 : f32
    %1089 = vector.broadcast %cst_199 : f32 to vector<8x15xf32>
    %1090 = vector.extract_strided_slice %1043 {offsets = [0, 15], sizes = [8, 241], strides = [1, 1]} : vector<8x256xf32> to vector<8x241xf32>
    %1091 = tpu.concatenate %1090, %1089 in 1 : vector<8x241xf32>, vector<8x15xf32> -> vector<8x256xf32>
    %1092 = vector.extract_strided_slice %0 {offsets = [6, 0], sizes = [1, 256], strides = [1, 1]} : vector<9x256xf32> to vector<1x256xf32>
    %1093 = vector.broadcast %1092 : vector<1x256xf32> to vector<8x256xf32>
    %1094 = arith.mulf %1091, %1093 : vector<8x256xf32>
    %cst_200 = arith.constant 0.000000e+00 : f32
    %1095 = vector.broadcast %cst_200 : f32 to vector<8x16xf32>
    %1096 = vector.extract_strided_slice %1043 {offsets = [0, 16], sizes = [8, 240], strides = [1, 1]} : vector<8x256xf32> to vector<8x240xf32>
    %1097 = tpu.concatenate %1096, %1095 in 1 : vector<8x240xf32>, vector<8x16xf32> -> vector<8x256xf32>
    %1098 = vector.extract_strided_slice %0 {offsets = [7, 0], sizes = [1, 256], strides = [1, 1]} : vector<9x256xf32> to vector<1x256xf32>
    %1099 = vector.broadcast %1098 : vector<1x256xf32> to vector<8x256xf32>
    %1100 = arith.mulf %1097, %1099 : vector<8x256xf32>
    %cst_201 = arith.constant 0.000000e+00 : f32
    %1101 = vector.broadcast %cst_201 : f32 to vector<8x17xf32>
    %1102 = vector.extract_strided_slice %1043 {offsets = [0, 17], sizes = [8, 239], strides = [1, 1]} : vector<8x256xf32> to vector<8x239xf32>
    %1103 = tpu.concatenate %1102, %1101 in 1 : vector<8x239xf32>, vector<8x17xf32> -> vector<8x256xf32>
    %1104 = vector.extract_strided_slice %0 {offsets = [8, 0], sizes = [1, 256], strides = [1, 1]} : vector<9x256xf32> to vector<1x256xf32>
    %1105 = vector.broadcast %1104 : vector<1x256xf32> to vector<8x256xf32>
    %1106 = arith.mulf %1103, %1105 : vector<8x256xf32>
    %1107 = tpu.concatenate %1061, %1067, %1073, %1079, %1082, %1088, %1094, %1100, %1106 in 0 : vector<8x256xf32>, vector<8x256xf32>, vector<8x256xf32>, vector<8x256xf32>, vector<8x256xf32>, vector<8x256xf32>, vector<8x256xf32>, vector<8x256xf32>, vector<8x256xf32> -> vector<72x256xf32>
    %1108 = arith.truncf %1107 : vector<72x256xf32> to vector<72x256xbf16>
    %cst_202 = arith.constant dense<0.000000e+00> : vector<8x256xf32>
    %1109 = tpu.matmul %1045, %1108, %cst_202 {dimension_numbers = #tpu.dot_dimension_numbers<[1], [0], [0], [1], [0, 0, 1, 1], [], []>} : vector<8x72xbf16>, vector<72x256xbf16>, vector<8x256xf32> -> vector<8x256xf32>
    %1110 = vector.broadcast %1047 : vector<8x1xf32> to vector<8x256xf32>
    %1111 = arith.addf %1109, %1110 : vector<8x256xf32>
    %1112 = arith.negf %1111 : vector<8x256xf32>
    %1113 = math.exp %1112 : vector<8x256xf32>
    %cst_203 = arith.constant 1.000000e+00 : f32
    %1114 = vector.broadcast %cst_203 : f32 to vector<8x256xf32>
    %1115 = arith.addf %1114, %1113 : vector<8x256xf32>
    %1116 = arith.divf %1114, %1115 : vector<8x256xf32>
    %1117 = arith.mulf %1111, %1116 : vector<8x256xf32>
    %cst_204 = arith.constant 0.000000e+00 : f32
    %1118 = vector.broadcast %cst_204 : f32 to vector<8x256xf32>
    %cst_205 = arith.constant 0.000000e+00 : f32
    %1119 = vector.broadcast %cst_205 : f32 to vector<8x34xf32>
    %1120 = vector.extract_strided_slice %1117 {offsets = [0, 0], sizes = [8, 222], strides = [1, 1]} : vector<8x256xf32> to vector<8x222xf32>
    %1121 = tpu.concatenate %1119, %1120 in 1 : vector<8x34xf32>, vector<8x222xf32> -> vector<8x256xf32>
    %1122 = vector.extract_strided_slice %1 {offsets = [0, 0], sizes = [1, 256], strides = [1, 1]} : vector<25x256xf32> to vector<1x256xf32>
    %1123 = vector.broadcast %1122 : vector<1x256xf32> to vector<8x256xf32>
    %1124 = arith.mulf %1121, %1123 : vector<8x256xf32>
    %1125 = vector.extract_strided_slice %1049 {offsets = [0, 0], sizes = [8, 1], strides = [1, 1]} : vector<8x25xf32> to vector<8x1xf32>
    %1126 = vector.broadcast %1125 : vector<8x1xf32> to vector<8x256xf32>
    %1127 = arith.mulf %1124, %1126 : vector<8x256xf32>
    %1128 = arith.addf %1118, %1127 : vector<8x256xf32>
    %cst_206 = arith.constant 0.000000e+00 : f32
    %1129 = vector.broadcast %cst_206 : f32 to vector<8x33xf32>
    %1130 = vector.extract_strided_slice %1117 {offsets = [0, 0], sizes = [8, 223], strides = [1, 1]} : vector<8x256xf32> to vector<8x223xf32>
    %1131 = tpu.concatenate %1129, %1130 in 1 : vector<8x33xf32>, vector<8x223xf32> -> vector<8x256xf32>
    %1132 = vector.extract_strided_slice %1 {offsets = [1, 0], sizes = [1, 256], strides = [1, 1]} : vector<25x256xf32> to vector<1x256xf32>
    %1133 = vector.broadcast %1132 : vector<1x256xf32> to vector<8x256xf32>
    %1134 = arith.mulf %1131, %1133 : vector<8x256xf32>
    %1135 = vector.extract_strided_slice %1049 {offsets = [0, 1], sizes = [8, 1], strides = [1, 1]} : vector<8x25xf32> to vector<8x1xf32>
    %1136 = vector.broadcast %1135 : vector<8x1xf32> to vector<8x256xf32>
    %1137 = arith.mulf %1134, %1136 : vector<8x256xf32>
    %1138 = arith.addf %1128, %1137 : vector<8x256xf32>
    %cst_207 = arith.constant 0.000000e+00 : f32
    %1139 = vector.broadcast %cst_207 : f32 to vector<8x32xf32>
    %1140 = vector.extract_strided_slice %1117 {offsets = [0, 0], sizes = [8, 224], strides = [1, 1]} : vector<8x256xf32> to vector<8x224xf32>
    %1141 = tpu.concatenate %1139, %1140 in 1 : vector<8x32xf32>, vector<8x224xf32> -> vector<8x256xf32>
    %1142 = vector.extract_strided_slice %1 {offsets = [2, 0], sizes = [1, 256], strides = [1, 1]} : vector<25x256xf32> to vector<1x256xf32>
    %1143 = vector.broadcast %1142 : vector<1x256xf32> to vector<8x256xf32>
    %1144 = arith.mulf %1141, %1143 : vector<8x256xf32>
    %1145 = vector.extract_strided_slice %1049 {offsets = [0, 2], sizes = [8, 1], strides = [1, 1]} : vector<8x25xf32> to vector<8x1xf32>
    %1146 = vector.broadcast %1145 : vector<8x1xf32> to vector<8x256xf32>
    %1147 = arith.mulf %1144, %1146 : vector<8x256xf32>
    %1148 = arith.addf %1138, %1147 : vector<8x256xf32>
    %cst_208 = arith.constant 0.000000e+00 : f32
    %1149 = vector.broadcast %cst_208 : f32 to vector<8x31xf32>
    %1150 = vector.extract_strided_slice %1117 {offsets = [0, 0], sizes = [8, 225], strides = [1, 1]} : vector<8x256xf32> to vector<8x225xf32>
    %1151 = tpu.concatenate %1149, %1150 in 1 : vector<8x31xf32>, vector<8x225xf32> -> vector<8x256xf32>
    %1152 = vector.extract_strided_slice %1 {offsets = [3, 0], sizes = [1, 256], strides = [1, 1]} : vector<25x256xf32> to vector<1x256xf32>
    %1153 = vector.broadcast %1152 : vector<1x256xf32> to vector<8x256xf32>
    %1154 = arith.mulf %1151, %1153 : vector<8x256xf32>
    %1155 = vector.extract_strided_slice %1049 {offsets = [0, 3], sizes = [8, 1], strides = [1, 1]} : vector<8x25xf32> to vector<8x1xf32>
    %1156 = vector.broadcast %1155 : vector<8x1xf32> to vector<8x256xf32>
    %1157 = arith.mulf %1154, %1156 : vector<8x256xf32>
    %1158 = arith.addf %1148, %1157 : vector<8x256xf32>
    %cst_209 = arith.constant 0.000000e+00 : f32
    %1159 = vector.broadcast %cst_209 : f32 to vector<8x30xf32>
    %1160 = vector.extract_strided_slice %1117 {offsets = [0, 0], sizes = [8, 226], strides = [1, 1]} : vector<8x256xf32> to vector<8x226xf32>
    %1161 = tpu.concatenate %1159, %1160 in 1 : vector<8x30xf32>, vector<8x226xf32> -> vector<8x256xf32>
    %1162 = vector.extract_strided_slice %1 {offsets = [4, 0], sizes = [1, 256], strides = [1, 1]} : vector<25x256xf32> to vector<1x256xf32>
    %1163 = vector.broadcast %1162 : vector<1x256xf32> to vector<8x256xf32>
    %1164 = arith.mulf %1161, %1163 : vector<8x256xf32>
    %1165 = vector.extract_strided_slice %1049 {offsets = [0, 4], sizes = [8, 1], strides = [1, 1]} : vector<8x25xf32> to vector<8x1xf32>
    %1166 = vector.broadcast %1165 : vector<8x1xf32> to vector<8x256xf32>
    %1167 = arith.mulf %1164, %1166 : vector<8x256xf32>
    %1168 = arith.addf %1158, %1167 : vector<8x256xf32>
    %cst_210 = arith.constant 0.000000e+00 : f32
    %1169 = vector.broadcast %cst_210 : f32 to vector<8x18xf32>
    %1170 = vector.extract_strided_slice %1117 {offsets = [0, 0], sizes = [8, 238], strides = [1, 1]} : vector<8x256xf32> to vector<8x238xf32>
    %1171 = tpu.concatenate %1169, %1170 in 1 : vector<8x18xf32>, vector<8x238xf32> -> vector<8x256xf32>
    %1172 = vector.extract_strided_slice %1 {offsets = [5, 0], sizes = [1, 256], strides = [1, 1]} : vector<25x256xf32> to vector<1x256xf32>
    %1173 = vector.broadcast %1172 : vector<1x256xf32> to vector<8x256xf32>
    %1174 = arith.mulf %1171, %1173 : vector<8x256xf32>
    %1175 = vector.extract_strided_slice %1049 {offsets = [0, 5], sizes = [8, 1], strides = [1, 1]} : vector<8x25xf32> to vector<8x1xf32>
    %1176 = vector.broadcast %1175 : vector<8x1xf32> to vector<8x256xf32>
    %1177 = arith.mulf %1174, %1176 : vector<8x256xf32>
    %1178 = arith.addf %1168, %1177 : vector<8x256xf32>
    %cst_211 = arith.constant 0.000000e+00 : f32
    %1179 = vector.broadcast %cst_211 : f32 to vector<8x17xf32>
    %1180 = vector.extract_strided_slice %1117 {offsets = [0, 0], sizes = [8, 239], strides = [1, 1]} : vector<8x256xf32> to vector<8x239xf32>
    %1181 = tpu.concatenate %1179, %1180 in 1 : vector<8x17xf32>, vector<8x239xf32> -> vector<8x256xf32>
    %1182 = vector.extract_strided_slice %1 {offsets = [6, 0], sizes = [1, 256], strides = [1, 1]} : vector<25x256xf32> to vector<1x256xf32>
    %1183 = vector.broadcast %1182 : vector<1x256xf32> to vector<8x256xf32>
    %1184 = arith.mulf %1181, %1183 : vector<8x256xf32>
    %1185 = vector.extract_strided_slice %1049 {offsets = [0, 6], sizes = [8, 1], strides = [1, 1]} : vector<8x25xf32> to vector<8x1xf32>
    %1186 = vector.broadcast %1185 : vector<8x1xf32> to vector<8x256xf32>
    %1187 = arith.mulf %1184, %1186 : vector<8x256xf32>
    %1188 = arith.addf %1178, %1187 : vector<8x256xf32>
    %cst_212 = arith.constant 0.000000e+00 : f32
    %1189 = vector.broadcast %cst_212 : f32 to vector<8x16xf32>
    %1190 = vector.extract_strided_slice %1117 {offsets = [0, 0], sizes = [8, 240], strides = [1, 1]} : vector<8x256xf32> to vector<8x240xf32>
    %1191 = tpu.concatenate %1189, %1190 in 1 : vector<8x16xf32>, vector<8x240xf32> -> vector<8x256xf32>
    %1192 = vector.extract_strided_slice %1 {offsets = [7, 0], sizes = [1, 256], strides = [1, 1]} : vector<25x256xf32> to vector<1x256xf32>
    %1193 = vector.broadcast %1192 : vector<1x256xf32> to vector<8x256xf32>
    %1194 = arith.mulf %1191, %1193 : vector<8x256xf32>
    %1195 = vector.extract_strided_slice %1049 {offsets = [0, 7], sizes = [8, 1], strides = [1, 1]} : vector<8x25xf32> to vector<8x1xf32>
    %1196 = vector.broadcast %1195 : vector<8x1xf32> to vector<8x256xf32>
    %1197 = arith.mulf %1194, %1196 : vector<8x256xf32>
    %1198 = arith.addf %1188, %1197 : vector<8x256xf32>
    %cst_213 = arith.constant 0.000000e+00 : f32
    %1199 = vector.broadcast %cst_213 : f32 to vector<8x15xf32>
    %1200 = vector.extract_strided_slice %1117 {offsets = [0, 0], sizes = [8, 241], strides = [1, 1]} : vector<8x256xf32> to vector<8x241xf32>
    %1201 = tpu.concatenate %1199, %1200 in 1 : vector<8x15xf32>, vector<8x241xf32> -> vector<8x256xf32>
    %1202 = vector.extract_strided_slice %1 {offsets = [8, 0], sizes = [1, 256], strides = [1, 1]} : vector<25x256xf32> to vector<1x256xf32>
    %1203 = vector.broadcast %1202 : vector<1x256xf32> to vector<8x256xf32>
    %1204 = arith.mulf %1201, %1203 : vector<8x256xf32>
    %1205 = vector.extract_strided_slice %1049 {offsets = [0, 8], sizes = [8, 1], strides = [1, 1]} : vector<8x25xf32> to vector<8x1xf32>
    %1206 = vector.broadcast %1205 : vector<8x1xf32> to vector<8x256xf32>
    %1207 = arith.mulf %1204, %1206 : vector<8x256xf32>
    %1208 = arith.addf %1198, %1207 : vector<8x256xf32>
    %cst_214 = arith.constant 0.000000e+00 : f32
    %1209 = vector.broadcast %cst_214 : f32 to vector<8x14xf32>
    %1210 = vector.extract_strided_slice %1117 {offsets = [0, 0], sizes = [8, 242], strides = [1, 1]} : vector<8x256xf32> to vector<8x242xf32>
    %1211 = tpu.concatenate %1209, %1210 in 1 : vector<8x14xf32>, vector<8x242xf32> -> vector<8x256xf32>
    %1212 = vector.extract_strided_slice %1 {offsets = [9, 0], sizes = [1, 256], strides = [1, 1]} : vector<25x256xf32> to vector<1x256xf32>
    %1213 = vector.broadcast %1212 : vector<1x256xf32> to vector<8x256xf32>
    %1214 = arith.mulf %1211, %1213 : vector<8x256xf32>
    %1215 = vector.extract_strided_slice %1049 {offsets = [0, 9], sizes = [8, 1], strides = [1, 1]} : vector<8x25xf32> to vector<8x1xf32>
    %1216 = vector.broadcast %1215 : vector<8x1xf32> to vector<8x256xf32>
    %1217 = arith.mulf %1214, %1216 : vector<8x256xf32>
    %1218 = arith.addf %1208, %1217 : vector<8x256xf32>
    %cst_215 = arith.constant 0.000000e+00 : f32
    %1219 = vector.broadcast %cst_215 : f32 to vector<8x2xf32>
    %1220 = vector.extract_strided_slice %1117 {offsets = [0, 0], sizes = [8, 254], strides = [1, 1]} : vector<8x256xf32> to vector<8x254xf32>
    %1221 = tpu.concatenate %1219, %1220 in 1 : vector<8x2xf32>, vector<8x254xf32> -> vector<8x256xf32>
    %1222 = vector.extract_strided_slice %1 {offsets = [10, 0], sizes = [1, 256], strides = [1, 1]} : vector<25x256xf32> to vector<1x256xf32>
    %1223 = vector.broadcast %1222 : vector<1x256xf32> to vector<8x256xf32>
    %1224 = arith.mulf %1221, %1223 : vector<8x256xf32>
    %1225 = vector.extract_strided_slice %1049 {offsets = [0, 10], sizes = [8, 1], strides = [1, 1]} : vector<8x25xf32> to vector<8x1xf32>
    %1226 = vector.broadcast %1225 : vector<8x1xf32> to vector<8x256xf32>
    %1227 = arith.mulf %1224, %1226 : vector<8x256xf32>
    %1228 = arith.addf %1218, %1227 : vector<8x256xf32>
    %cst_216 = arith.constant 0.000000e+00 : f32
    %1229 = vector.broadcast %cst_216 : f32 to vector<8x1xf32>
    %1230 = vector.extract_strided_slice %1117 {offsets = [0, 0], sizes = [8, 255], strides = [1, 1]} : vector<8x256xf32> to vector<8x255xf32>
    %1231 = tpu.concatenate %1229, %1230 in 1 : vector<8x1xf32>, vector<8x255xf32> -> vector<8x256xf32>
    %1232 = vector.extract_strided_slice %1 {offsets = [11, 0], sizes = [1, 256], strides = [1, 1]} : vector<25x256xf32> to vector<1x256xf32>
    %1233 = vector.broadcast %1232 : vector<1x256xf32> to vector<8x256xf32>
    %1234 = arith.mulf %1231, %1233 : vector<8x256xf32>
    %1235 = vector.extract_strided_slice %1049 {offsets = [0, 11], sizes = [8, 1], strides = [1, 1]} : vector<8x25xf32> to vector<8x1xf32>
    %1236 = vector.broadcast %1235 : vector<8x1xf32> to vector<8x256xf32>
    %1237 = arith.mulf %1234, %1236 : vector<8x256xf32>
    %1238 = arith.addf %1228, %1237 : vector<8x256xf32>
    %1239 = vector.extract_strided_slice %1 {offsets = [12, 0], sizes = [1, 256], strides = [1, 1]} : vector<25x256xf32> to vector<1x256xf32>
    %1240 = vector.broadcast %1239 : vector<1x256xf32> to vector<8x256xf32>
    %1241 = arith.mulf %1117, %1240 : vector<8x256xf32>
    %1242 = vector.extract_strided_slice %1049 {offsets = [0, 12], sizes = [8, 1], strides = [1, 1]} : vector<8x25xf32> to vector<8x1xf32>
    %1243 = vector.broadcast %1242 : vector<8x1xf32> to vector<8x256xf32>
    %1244 = arith.mulf %1241, %1243 : vector<8x256xf32>
    %1245 = arith.addf %1238, %1244 : vector<8x256xf32>
    %cst_217 = arith.constant 0.000000e+00 : f32
    %1246 = vector.broadcast %cst_217 : f32 to vector<8x1xf32>
    %1247 = vector.extract_strided_slice %1117 {offsets = [0, 1], sizes = [8, 255], strides = [1, 1]} : vector<8x256xf32> to vector<8x255xf32>
    %1248 = tpu.concatenate %1247, %1246 in 1 : vector<8x255xf32>, vector<8x1xf32> -> vector<8x256xf32>
    %1249 = vector.extract_strided_slice %1 {offsets = [13, 0], sizes = [1, 256], strides = [1, 1]} : vector<25x256xf32> to vector<1x256xf32>
    %1250 = vector.broadcast %1249 : vector<1x256xf32> to vector<8x256xf32>
    %1251 = arith.mulf %1248, %1250 : vector<8x256xf32>
    %1252 = vector.extract_strided_slice %1049 {offsets = [0, 13], sizes = [8, 1], strides = [1, 1]} : vector<8x25xf32> to vector<8x1xf32>
    %1253 = vector.broadcast %1252 : vector<8x1xf32> to vector<8x256xf32>
    %1254 = arith.mulf %1251, %1253 : vector<8x256xf32>
    %1255 = arith.addf %1245, %1254 : vector<8x256xf32>
    %cst_218 = arith.constant 0.000000e+00 : f32
    %1256 = vector.broadcast %cst_218 : f32 to vector<8x2xf32>
    %1257 = vector.extract_strided_slice %1117 {offsets = [0, 2], sizes = [8, 254], strides = [1, 1]} : vector<8x256xf32> to vector<8x254xf32>
    %1258 = tpu.concatenate %1257, %1256 in 1 : vector<8x254xf32>, vector<8x2xf32> -> vector<8x256xf32>
    %1259 = vector.extract_strided_slice %1 {offsets = [14, 0], sizes = [1, 256], strides = [1, 1]} : vector<25x256xf32> to vector<1x256xf32>
    %1260 = vector.broadcast %1259 : vector<1x256xf32> to vector<8x256xf32>
    %1261 = arith.mulf %1258, %1260 : vector<8x256xf32>
    %1262 = vector.extract_strided_slice %1049 {offsets = [0, 14], sizes = [8, 1], strides = [1, 1]} : vector<8x25xf32> to vector<8x1xf32>
    %1263 = vector.broadcast %1262 : vector<8x1xf32> to vector<8x256xf32>
    %1264 = arith.mulf %1261, %1263 : vector<8x256xf32>
    %1265 = arith.addf %1255, %1264 : vector<8x256xf32>
    %cst_219 = arith.constant 0.000000e+00 : f32
    %1266 = vector.broadcast %cst_219 : f32 to vector<8x14xf32>
    %1267 = vector.extract_strided_slice %1117 {offsets = [0, 14], sizes = [8, 242], strides = [1, 1]} : vector<8x256xf32> to vector<8x242xf32>
    %1268 = tpu.concatenate %1267, %1266 in 1 : vector<8x242xf32>, vector<8x14xf32> -> vector<8x256xf32>
    %1269 = vector.extract_strided_slice %1 {offsets = [15, 0], sizes = [1, 256], strides = [1, 1]} : vector<25x256xf32> to vector<1x256xf32>
    %1270 = vector.broadcast %1269 : vector<1x256xf32> to vector<8x256xf32>
    %1271 = arith.mulf %1268, %1270 : vector<8x256xf32>
    %1272 = vector.extract_strided_slice %1049 {offsets = [0, 15], sizes = [8, 1], strides = [1, 1]} : vector<8x25xf32> to vector<8x1xf32>
    %1273 = vector.broadcast %1272 : vector<8x1xf32> to vector<8x256xf32>
    %1274 = arith.mulf %1271, %1273 : vector<8x256xf32>
    %1275 = arith.addf %1265, %1274 : vector<8x256xf32>
    %cst_220 = arith.constant 0.000000e+00 : f32
    %1276 = vector.broadcast %cst_220 : f32 to vector<8x15xf32>
    %1277 = vector.extract_strided_slice %1117 {offsets = [0, 15], sizes = [8, 241], strides = [1, 1]} : vector<8x256xf32> to vector<8x241xf32>
    %1278 = tpu.concatenate %1277, %1276 in 1 : vector<8x241xf32>, vector<8x15xf32> -> vector<8x256xf32>
    %1279 = vector.extract_strided_slice %1 {offsets = [16, 0], sizes = [1, 256], strides = [1, 1]} : vector<25x256xf32> to vector<1x256xf32>
    %1280 = vector.broadcast %1279 : vector<1x256xf32> to vector<8x256xf32>
    %1281 = arith.mulf %1278, %1280 : vector<8x256xf32>
    %1282 = vector.extract_strided_slice %1049 {offsets = [0, 16], sizes = [8, 1], strides = [1, 1]} : vector<8x25xf32> to vector<8x1xf32>
    %1283 = vector.broadcast %1282 : vector<8x1xf32> to vector<8x256xf32>
    %1284 = arith.mulf %1281, %1283 : vector<8x256xf32>
    %1285 = arith.addf %1275, %1284 : vector<8x256xf32>
    %cst_221 = arith.constant 0.000000e+00 : f32
    %1286 = vector.broadcast %cst_221 : f32 to vector<8x16xf32>
    %1287 = vector.extract_strided_slice %1117 {offsets = [0, 16], sizes = [8, 240], strides = [1, 1]} : vector<8x256xf32> to vector<8x240xf32>
    %1288 = tpu.concatenate %1287, %1286 in 1 : vector<8x240xf32>, vector<8x16xf32> -> vector<8x256xf32>
    %1289 = vector.extract_strided_slice %1 {offsets = [17, 0], sizes = [1, 256], strides = [1, 1]} : vector<25x256xf32> to vector<1x256xf32>
    %1290 = vector.broadcast %1289 : vector<1x256xf32> to vector<8x256xf32>
    %1291 = arith.mulf %1288, %1290 : vector<8x256xf32>
    %1292 = vector.extract_strided_slice %1049 {offsets = [0, 17], sizes = [8, 1], strides = [1, 1]} : vector<8x25xf32> to vector<8x1xf32>
    %1293 = vector.broadcast %1292 : vector<8x1xf32> to vector<8x256xf32>
    %1294 = arith.mulf %1291, %1293 : vector<8x256xf32>
    %1295 = arith.addf %1285, %1294 : vector<8x256xf32>
    %cst_222 = arith.constant 0.000000e+00 : f32
    %1296 = vector.broadcast %cst_222 : f32 to vector<8x17xf32>
    %1297 = vector.extract_strided_slice %1117 {offsets = [0, 17], sizes = [8, 239], strides = [1, 1]} : vector<8x256xf32> to vector<8x239xf32>
    %1298 = tpu.concatenate %1297, %1296 in 1 : vector<8x239xf32>, vector<8x17xf32> -> vector<8x256xf32>
    %1299 = vector.extract_strided_slice %1 {offsets = [18, 0], sizes = [1, 256], strides = [1, 1]} : vector<25x256xf32> to vector<1x256xf32>
    %1300 = vector.broadcast %1299 : vector<1x256xf32> to vector<8x256xf32>
    %1301 = arith.mulf %1298, %1300 : vector<8x256xf32>
    %1302 = vector.extract_strided_slice %1049 {offsets = [0, 18], sizes = [8, 1], strides = [1, 1]} : vector<8x25xf32> to vector<8x1xf32>
    %1303 = vector.broadcast %1302 : vector<8x1xf32> to vector<8x256xf32>
    %1304 = arith.mulf %1301, %1303 : vector<8x256xf32>
    %1305 = arith.addf %1295, %1304 : vector<8x256xf32>
    %cst_223 = arith.constant 0.000000e+00 : f32
    %1306 = vector.broadcast %cst_223 : f32 to vector<8x18xf32>
    %1307 = vector.extract_strided_slice %1117 {offsets = [0, 18], sizes = [8, 238], strides = [1, 1]} : vector<8x256xf32> to vector<8x238xf32>
    %1308 = tpu.concatenate %1307, %1306 in 1 : vector<8x238xf32>, vector<8x18xf32> -> vector<8x256xf32>
    %1309 = vector.extract_strided_slice %1 {offsets = [19, 0], sizes = [1, 256], strides = [1, 1]} : vector<25x256xf32> to vector<1x256xf32>
    %1310 = vector.broadcast %1309 : vector<1x256xf32> to vector<8x256xf32>
    %1311 = arith.mulf %1308, %1310 : vector<8x256xf32>
    %1312 = vector.extract_strided_slice %1049 {offsets = [0, 19], sizes = [8, 1], strides = [1, 1]} : vector<8x25xf32> to vector<8x1xf32>
    %1313 = vector.broadcast %1312 : vector<8x1xf32> to vector<8x256xf32>
    %1314 = arith.mulf %1311, %1313 : vector<8x256xf32>
    %1315 = arith.addf %1305, %1314 : vector<8x256xf32>
    %cst_224 = arith.constant 0.000000e+00 : f32
    %1316 = vector.broadcast %cst_224 : f32 to vector<8x30xf32>
    %1317 = vector.extract_strided_slice %1117 {offsets = [0, 30], sizes = [8, 226], strides = [1, 1]} : vector<8x256xf32> to vector<8x226xf32>
    %1318 = tpu.concatenate %1317, %1316 in 1 : vector<8x226xf32>, vector<8x30xf32> -> vector<8x256xf32>
    %1319 = vector.extract_strided_slice %1 {offsets = [20, 0], sizes = [1, 256], strides = [1, 1]} : vector<25x256xf32> to vector<1x256xf32>
    %1320 = vector.broadcast %1319 : vector<1x256xf32> to vector<8x256xf32>
    %1321 = arith.mulf %1318, %1320 : vector<8x256xf32>
    %1322 = vector.extract_strided_slice %1049 {offsets = [0, 20], sizes = [8, 1], strides = [1, 1]} : vector<8x25xf32> to vector<8x1xf32>
    %1323 = vector.broadcast %1322 : vector<8x1xf32> to vector<8x256xf32>
    %1324 = arith.mulf %1321, %1323 : vector<8x256xf32>
    %1325 = arith.addf %1315, %1324 : vector<8x256xf32>
    %cst_225 = arith.constant 0.000000e+00 : f32
    %1326 = vector.broadcast %cst_225 : f32 to vector<8x31xf32>
    %1327 = vector.extract_strided_slice %1117 {offsets = [0, 31], sizes = [8, 225], strides = [1, 1]} : vector<8x256xf32> to vector<8x225xf32>
    %1328 = tpu.concatenate %1327, %1326 in 1 : vector<8x225xf32>, vector<8x31xf32> -> vector<8x256xf32>
    %1329 = vector.extract_strided_slice %1 {offsets = [21, 0], sizes = [1, 256], strides = [1, 1]} : vector<25x256xf32> to vector<1x256xf32>
    %1330 = vector.broadcast %1329 : vector<1x256xf32> to vector<8x256xf32>
    %1331 = arith.mulf %1328, %1330 : vector<8x256xf32>
    %1332 = vector.extract_strided_slice %1049 {offsets = [0, 21], sizes = [8, 1], strides = [1, 1]} : vector<8x25xf32> to vector<8x1xf32>
    %1333 = vector.broadcast %1332 : vector<8x1xf32> to vector<8x256xf32>
    %1334 = arith.mulf %1331, %1333 : vector<8x256xf32>
    %1335 = arith.addf %1325, %1334 : vector<8x256xf32>
    %cst_226 = arith.constant 0.000000e+00 : f32
    %1336 = vector.broadcast %cst_226 : f32 to vector<8x32xf32>
    %1337 = vector.extract_strided_slice %1117 {offsets = [0, 32], sizes = [8, 224], strides = [1, 1]} : vector<8x256xf32> to vector<8x224xf32>
    %1338 = tpu.concatenate %1337, %1336 in 1 : vector<8x224xf32>, vector<8x32xf32> -> vector<8x256xf32>
    %1339 = vector.extract_strided_slice %1 {offsets = [22, 0], sizes = [1, 256], strides = [1, 1]} : vector<25x256xf32> to vector<1x256xf32>
    %1340 = vector.broadcast %1339 : vector<1x256xf32> to vector<8x256xf32>
    %1341 = arith.mulf %1338, %1340 : vector<8x256xf32>
    %1342 = vector.extract_strided_slice %1049 {offsets = [0, 22], sizes = [8, 1], strides = [1, 1]} : vector<8x25xf32> to vector<8x1xf32>
    %1343 = vector.broadcast %1342 : vector<8x1xf32> to vector<8x256xf32>
    %1344 = arith.mulf %1341, %1343 : vector<8x256xf32>
    %1345 = arith.addf %1335, %1344 : vector<8x256xf32>
    %cst_227 = arith.constant 0.000000e+00 : f32
    %1346 = vector.broadcast %cst_227 : f32 to vector<8x33xf32>
    %1347 = vector.extract_strided_slice %1117 {offsets = [0, 33], sizes = [8, 223], strides = [1, 1]} : vector<8x256xf32> to vector<8x223xf32>
    %1348 = tpu.concatenate %1347, %1346 in 1 : vector<8x223xf32>, vector<8x33xf32> -> vector<8x256xf32>
    %1349 = vector.extract_strided_slice %1 {offsets = [23, 0], sizes = [1, 256], strides = [1, 1]} : vector<25x256xf32> to vector<1x256xf32>
    %1350 = vector.broadcast %1349 : vector<1x256xf32> to vector<8x256xf32>
    %1351 = arith.mulf %1348, %1350 : vector<8x256xf32>
    %1352 = vector.extract_strided_slice %1049 {offsets = [0, 23], sizes = [8, 1], strides = [1, 1]} : vector<8x25xf32> to vector<8x1xf32>
    %1353 = vector.broadcast %1352 : vector<8x1xf32> to vector<8x256xf32>
    %1354 = arith.mulf %1351, %1353 : vector<8x256xf32>
    %1355 = arith.addf %1345, %1354 : vector<8x256xf32>
    %cst_228 = arith.constant 0.000000e+00 : f32
    %1356 = vector.broadcast %cst_228 : f32 to vector<8x34xf32>
    %1357 = vector.extract_strided_slice %1117 {offsets = [0, 34], sizes = [8, 222], strides = [1, 1]} : vector<8x256xf32> to vector<8x222xf32>
    %1358 = tpu.concatenate %1357, %1356 in 1 : vector<8x222xf32>, vector<8x34xf32> -> vector<8x256xf32>
    %1359 = vector.extract_strided_slice %1 {offsets = [24, 0], sizes = [1, 256], strides = [1, 1]} : vector<25x256xf32> to vector<1x256xf32>
    %1360 = vector.broadcast %1359 : vector<1x256xf32> to vector<8x256xf32>
    %1361 = arith.mulf %1358, %1360 : vector<8x256xf32>
    %1362 = vector.extract_strided_slice %1049 {offsets = [0, 24], sizes = [8, 1], strides = [1, 1]} : vector<8x25xf32> to vector<8x1xf32>
    %1363 = vector.broadcast %1362 : vector<8x1xf32> to vector<8x256xf32>
    %1364 = arith.mulf %1361, %1363 : vector<8x256xf32>
    %1365 = arith.addf %1355, %1364 : vector<8x256xf32>
    %1366 = vector.broadcast %1051 : vector<8x1xf32> to vector<8x256xf32>
    %1367 = arith.addf %1365, %1366 : vector<8x256xf32>
    %1368 = arith.negf %1367 : vector<8x256xf32>
    %1369 = math.exp %1368 : vector<8x256xf32>
    %cst_229 = arith.constant 1.000000e+00 : f32
    %1370 = vector.broadcast %cst_229 : f32 to vector<8x256xf32>
    %1371 = arith.addf %1370, %1369 : vector<8x256xf32>
    %1372 = arith.divf %1370, %1371 : vector<8x256xf32>
    %1373 = arith.mulf %1367, %1372 : vector<8x256xf32>
    %1374 = arith.truncf %1373 : vector<8x256xf32> to vector<8x256xbf16>
    %cst_230 = arith.constant dense<0.000000e+00> : vector<8x256xf32>
    %1375 = tpu.matmul %1053, %1374, %cst_230 {dimension_numbers = #tpu.dot_dimension_numbers<[1], [0], [0], [1], [0, 0, 1, 1], [], []>} : vector<8x8xbf16>, vector<8x256xbf16>, vector<8x256xf32> -> vector<8x256xf32>
    %1376 = vector.broadcast %1055 : vector<8x1xf32> to vector<8x256xf32>
    %1377 = arith.addf %1375, %1376 : vector<8x256xf32>
    %1378 = arith.negf %1377 : vector<8x256xf32>
    %1379 = math.exp %1378 : vector<8x256xf32>
    %cst_231 = arith.constant 1.000000e+00 : f32
    %1380 = vector.broadcast %cst_231 : f32 to vector<8x256xf32>
    %1381 = arith.addf %1380, %1379 : vector<8x256xf32>
    %1382 = arith.divf %1380, %1381 : vector<8x256xf32>
    %1383 = arith.mulf %1377, %1382 : vector<8x256xf32>
    %1384 = arith.addf %1383, %1117 : vector<8x256xf32>
    %1385 = arith.addf %1384, %1043 : vector<8x256xf32>
    %1386 = tpu.concatenate %16, %17, %359, %701, %1043, %1385 in 0 : vector<8x256xf32>, vector<8x256xf32>, vector<8x256xf32>, vector<8x256xf32>, vector<8x256xf32>, vector<8x256xf32> -> vector<48x256xf32>
    %1387 = arith.truncf %1386 : vector<48x256xf32> to vector<48x256xbf16>
    %c0_232 = arith.constant 0 : index
    %c0_233 = arith.constant 0 : index
    %c0_234 = arith.constant 0 : index
    %1388 = vector.load %arg12[%c0_232, %c0_233, %c0_234] : memref<1x48x256xbf16, #tpu.memory_space<vmem>>, vector<1x48x256xbf16>
    %1389 = vector.shape_cast %1388 : vector<1x48x256xbf16> to vector<48x256xbf16>
    %1390 = vector.shape_cast %1387 : vector<48x256xbf16> to vector<1x48x256xbf16>
    tpu.vector_store %arg12[%c0_232, %c0_233, %c0_234], %1390 {strides = array<i32>} : memref<1x48x256xbf16, #tpu.memory_space<vmem>>, vector<1x48x256xbf16>,
    %cst_235 = arith.constant dense<0.000000e+00> : vector<48xf32>
    %1391 = vector.multi_reduction <add>, %1386, %cst_235 [1] : vector<48x256xf32> to vector<48xf32>
    %1392 = vector.shape_cast %1391 : vector<48xf32> to vector<48x1xf32>
    %cst_236 = arith.constant 2.560000e+02 : f32
    %1393 = vector.broadcast %cst_236 : f32 to vector<48x1xf32>
    %1394 = arith.divf %1392, %1393 : vector<48x1xf32>
    %c0_237 = arith.constant 0 : index
    %c0_238 = arith.constant 0 : index
    %c0_239 = arith.constant 0 : index
    %1395 = vector.load %arg13[%c0_237, %c0_238, %c0_239] : memref<1x48x1xf32, #tpu.memory_space<vmem>>, vector<1x48x1xf32>
    %1396 = vector.shape_cast %1395 : vector<1x48x1xf32> to vector<48x1xf32>
    %1397 = vector.shape_cast %1394 : vector<48x1xf32> to vector<1x48x1xf32>
    tpu.vector_store %arg13[%c0_237, %c0_238, %c0_239], %1397 {strides = array<i32>} : memref<1x48x1xf32, #tpu.memory_space<vmem>>, vector<1x48x1xf32>,
    return
  }
  func.func @transform_0(%arg0: i32) -> (i32, i32, i32) {
    %c0_i32 = arith.constant 0 : i32
    %c0_i32_0 = arith.constant 0 : i32
    %c0_i32_1 = arith.constant 0 : i32
    return %arg0, %c0_i32, %c0_i32_0 : i32, i32, i32
  }
  func.func @transform_1(%arg0: i32) -> (i32, i32) {
    %c0_i32 = arith.constant 0 : i32
    %c0_i32_0 = arith.constant 0 : i32
    %c0_i32_1 = arith.constant 0 : i32
    return %c0_i32, %c0_i32_0 : i32, i32
  }
  func.func @transform_2(%arg0: i32) -> (i32, i32) {
    %c0_i32 = arith.constant 0 : i32
    %c0_i32_0 = arith.constant 0 : i32
    %c0_i32_1 = arith.constant 0 : i32
    return %c0_i32, %c0_i32_0 : i32, i32
  }
  func.func @transform_3(%arg0: i32) -> (i32, i32) {
    %c0_i32 = arith.constant 0 : i32
    %c0_i32_0 = arith.constant 0 : i32
    %c0_i32_1 = arith.constant 0 : i32
    return %c0_i32, %c0_i32_0 : i32, i32
  }
  func.func @transform_4(%arg0: i32) -> (i32, i32) {
    %c0_i32 = arith.constant 0 : i32
    %c0_i32_0 = arith.constant 0 : i32
    %c0_i32_1 = arith.constant 0 : i32
    return %c0_i32, %c0_i32_0 : i32, i32
  }
  func.func @transform_5(%arg0: i32) -> (i32, i32, i32) {
    %c0_i32 = arith.constant 0 : i32
    %c0_i32_0 = arith.constant 0 : i32
    %c0_i32_1 = arith.constant 0 : i32
    %c0_i32_2 = arith.constant 0 : i32
    return %c0_i32, %c0_i32_0, %c0_i32_1 : i32, i32, i32
  }
  func.func @transform_6(%arg0: i32) -> (i32, i32, i32) {
    %c0_i32 = arith.constant 0 : i32
    %c0_i32_0 = arith.constant 0 : i32
    %c0_i32_1 = arith.constant 0 : i32
    %c0_i32_2 = arith.constant 0 : i32
    return %c0_i32, %c0_i32_0, %c0_i32_1 : i32, i32, i32
  }
  func.func @transform_7(%arg0: i32) -> (i32, i32, i32) {
    %c0_i32 = arith.constant 0 : i32
    %c0_i32_0 = arith.constant 0 : i32
    %c0_i32_1 = arith.constant 0 : i32
    %c0_i32_2 = arith.constant 0 : i32
    return %c0_i32, %c0_i32_0, %c0_i32_1 : i32, i32, i32
  }
  func.func @transform_8(%arg0: i32) -> (i32, i32, i32) {
    %c0_i32 = arith.constant 0 : i32
    %c0_i32_0 = arith.constant 0 : i32
    %c0_i32_1 = arith.constant 0 : i32
    %c0_i32_2 = arith.constant 0 : i32
    return %c0_i32, %c0_i32_0, %c0_i32_1 : i32, i32, i32
  }
  func.func @transform_9(%arg0: i32) -> (i32, i32, i32) {
    %c0_i32 = arith.constant 0 : i32
    %c0_i32_0 = arith.constant 0 : i32
    %c0_i32_1 = arith.constant 0 : i32
    %c0_i32_2 = arith.constant 0 : i32
    return %c0_i32, %c0_i32_0, %c0_i32_1 : i32, i32, i32
  }
  func.func @transform_10(%arg0: i32) -> (i32, i32, i32) {
    %c0_i32 = arith.constant 0 : i32
    %c0_i32_0 = arith.constant 0 : i32
    %c0_i32_1 = arith.constant 0 : i32
    %c0_i32_2 = arith.constant 0 : i32
    return %c0_i32, %c0_i32_0, %c0_i32_1 : i32, i32, i32
  }
  func.func @transform_11(%arg0: i32) -> (i32, i32, i32) {
    %c0_i32 = arith.constant 0 : i32
    %c0_i32_0 = arith.constant 0 : i32
    %c0_i32_1 = arith.constant 0 : i32
    return %arg0, %c0_i32, %c0_i32_0 : i32, i32, i32
  }
  func.func @transform_12(%arg0: i32) -> (i32, i32, i32) {
    %c0_i32 = arith.constant 0 : i32
    %c0_i32_0 = arith.constant 0 : i32
    %c0_i32_1 = arith.constant 0 : i32
    return %arg0, %c0_i32, %c0_i32_0 : i32, i32, i32
  }
}

module attributes {stable_mosaic.version = 11 : i64} {
  func.func @_attn_conv11_kernel(%arg0: i32, %arg1: i32, %arg2: memref<1x48x256xbf16, #tpu.memory_space<vmem>>, %arg3: memref<1x16x48xbf16, #tpu.memory_space<vmem>>, %arg4: memref<16x1xf32, #tpu.memory_space<vmem>>, %arg5: memref<1x16x256xf32, #tpu.memory_space<vmem>>) attributes {dimension_semantics = [#tpu.dimension_semantics<parallel>, #tpu.dimension_semantics<parallel>], iteration_bounds = array<i64: 2, 1>, scalar_prefetch = 0 : i64, scratch_operands = 0 : i64, tpu.core_type = #tpu.core_type<tc>, window_params = [{transform_indices = @transform_0, window_bounds = array<i64: 1, 48, 256>}, {transform_indices = @transform_1, window_bounds = array<i64: 1, 16, 48>}, {pipeline_mode = #tpu.pipeline_mode<synchronous>, transform_indices = @transform_2, window_bounds = array<i64: 16, 1>}, {transform_indices = @transform_3, window_bounds = array<i64: 1, 16, 256>}]} {
    %c0 = arith.constant 0 : index
    %c0_0 = arith.constant 0 : index
    %c0_1 = arith.constant 0 : index
    %0 = vector.load %arg3[%c0, %c0_0, %c0_1] : memref<1x16x48xbf16, #tpu.memory_space<vmem>>, vector<1x16x48xbf16>
    %1 = vector.shape_cast %0 : vector<1x16x48xbf16> to vector<16x48xbf16>
    %c0_2 = arith.constant 0 : index
    %c0_3 = arith.constant 0 : index
    %c0_4 = arith.constant 0 : index
    %2 = vector.load %arg2[%c0_2, %c0_3, %c0_4] : memref<1x48x256xbf16, #tpu.memory_space<vmem>>, vector<1x48x256xbf16>
    %3 = vector.shape_cast %2 : vector<1x48x256xbf16> to vector<48x256xbf16>
    %cst = arith.constant dense<0.000000e+00> : vector<16x256xf32>
    %4 = tpu.matmul %1, %3, %cst {dimension_numbers = #tpu.dot_dimension_numbers<[1], [0], [0], [1], [0, 0, 1, 1], [], []>} : vector<16x48xbf16>, vector<48x256xbf16>, vector<16x256xf32> -> vector<16x256xf32>
    %c0_5 = arith.constant 0 : index
    %c0_6 = arith.constant 0 : index
    %5 = vector.load %arg4[%c0_5, %c0_6] : memref<16x1xf32, #tpu.memory_space<vmem>>, vector<16x1xf32>
    %6 = vector.broadcast %5 : vector<16x1xf32> to vector<16x256xf32>
    %7 = arith.addf %4, %6 : vector<16x256xf32>
    %8 = arith.negf %7 : vector<16x256xf32>
    %9 = math.exp %8 : vector<16x256xf32>
    %cst_7 = arith.constant 1.000000e+00 : f32
    %10 = vector.broadcast %cst_7 : f32 to vector<16x256xf32>
    %11 = arith.addf %10, %9 : vector<16x256xf32>
    %12 = arith.divf %10, %11 : vector<16x256xf32>
    %13 = arith.mulf %7, %12 : vector<16x256xf32>
    %c0_8 = arith.constant 0 : index
    %c0_9 = arith.constant 0 : index
    %c0_10 = arith.constant 0 : index
    %14 = vector.load %arg5[%c0_8, %c0_9, %c0_10] : memref<1x16x256xf32, #tpu.memory_space<vmem>>, vector<1x16x256xf32>
    %15 = vector.shape_cast %14 : vector<1x16x256xf32> to vector<16x256xf32>
    %16 = vector.shape_cast %13 : vector<16x256xf32> to vector<1x16x256xf32>
    tpu.vector_store %arg5[%c0_8, %c0_9, %c0_10], %16 {strides = array<i32>} : memref<1x16x256xf32, #tpu.memory_space<vmem>>, vector<1x16x256xf32>,
    return
  }
  func.func @transform_0(%arg0: i32, %arg1: i32) -> (i32, i32, i32) {
    %c0_i32 = arith.constant 0 : i32
    %c0_i32_0 = arith.constant 0 : i32
    return %arg0, %c0_i32, %arg1 : i32, i32, i32
  }
  func.func @transform_1(%arg0: i32, %arg1: i32) -> (i32, i32, i32) {
    %c0_i32 = arith.constant 0 : i32
    %c0_i32_0 = arith.constant 0 : i32
    %c0_i32_1 = arith.constant 0 : i32
    return %arg0, %c0_i32, %c0_i32_0 : i32, i32, i32
  }
  func.func @transform_2(%arg0: i32, %arg1: i32) -> (i32, i32) {
    %c0_i32 = arith.constant 0 : i32
    %c0_i32_0 = arith.constant 0 : i32
    %c0_i32_1 = arith.constant 0 : i32
    return %c0_i32, %c0_i32_0 : i32, i32
  }
  func.func @transform_3(%arg0: i32, %arg1: i32) -> (i32, i32, i32) {
    %c0_i32 = arith.constant 0 : i32
    %c0_i32_0 = arith.constant 0 : i32
    return %arg0, %c0_i32, %arg1 : i32, i32, i32
  }
}

</mosaic_0001>

<bundles_post_ra>
// kernel: elan_depth_m_forward.3
= control target key start
LH: loop header
LB: loop body
LE: loop exit
PB: predicated region body
PF: predicated region fallthrough
CT: control target
= control target key end

     0   :  { %s588_s12 = smov 0   ;;  %s590_s13 = smov 0   ;;  %s635_s0 = inlined_call_operand.vmem [shape: bf16[2,48,256], index: 0, kind: input, shape index: {}]   ;;  %s636_s1 = inlined_call_operand.vmem [shape: bf16[2,16,48], index: 1, kind: input, shape index: {}]   ;;  %s637_s2 = inlined_call_operand.vmem [shape: f32[16,1], index: 2, kind: input, shape index: {}]   ;;  %s638_s3 = inlined_call_operand.vmem [shape: f32[2,16,256], index: 3, kind: output, shape index: {}]  }
   0x1   :  { %s592_s14 = smov 0  }
   0x2 LB: > { %s25_s15 = sadd.s32 1, %s561_s13  ;;  %p468_p0 = scmp.ge.s32.totalorder %s565_s14, 1  ;;  %s565_s14 = sphi %s592_s14, %s13_s14   ;;  %s561_s13 = sphi %s590_s13, %s640_s13   ;;  %s557_s12 = sphi %s588_s12, %s639_s12  }
   0x3   : > { %p27_p1 = scmp.ge.s32.totalorder %s25_s15, 2  ;;  %p168_p2 = scmp.lt.s32.totalorder %s565_s14, 3 }
   0x5   : > { %s642_s15 = smov (%p27_p1, %s25_s15), 0  ;;  %p169_p3 = pnand %p468_p0, %p168_p2 }
   0x6   : > { %p206_p4 = scmp.lt.s32.totalorder (!%p169_p3), %s557_s12, 1  ;;  %v239_v0 = vld [vmem:[%s637_s2] sm:$0xff] (!%p169_p3)  ;;  %v567_v1 = vmov (!%p169_p3), 0   ;;  %v240_v2 = vld [vmem:[%s637_s2 + $0x8] sm:$0xff] (!%p169_p3)  ;;  %vm286_vm0 = vcmask (!%p169_p3), 392192  }
   0x7   : > { %172 = sbr.rel (%p169_p3) target bundleno = 277 (0x115), region = 32  ;;  %322 = vmatprep.mubr.bf16.mxu0 (!%p169_p3), %v567_v1  ;;  %516 = vset.pattern.permute.xlu0 (!%p169_p3), %v567_v1 }
   0x8   : > { %243 = vperm.xlu0 (!%p169_p3), %516, %v239_v0  }
   0xc   : > { %248 = vperm.xlu0 (!%p169_p3), %516, %v240_v2  }
   0xe   : > { %s644_s12 = smov (!%p206_p4, %s557_s12), 1 }
   0xf   : > { %s490_s20 = smul.u32 48, %s644_s12  ;;  %s488_s21 = sshll.u32 %s644_s12, 3 }
  0x10   : > { %s219_s24 = scalar_lea.vmem %s636_s1, %s488_s21  ;;  %s489_s28 = sshll.u32 %s644_s12, 5 }
  0x11   : > { %s213_s27 = scalar_lea.vmem %s635_s0, %s490_s20  ;;  %v526_v9 = vld [vmem:[%s219_s24] sm:$0xff]   ;;  %s228_s4 = scalar_lea.vmem %s638_s3, %s489_s28 }
  0x12   : > { %v517_v3 = vld [vmem:[%s213_s27 + $0x4] ss:$8 sps:$4 sm:$0xff]   ;;  %v519_v4 = vld [vmem:[%s213_s27] ss:$8 sps:$4 sm:$0xff]   ;;  %v520_v5 = vld [vmem:[%s213_s27 + $0x14] ss:$8 sps:$4 sm:$0xff]  }
  0x13   : > { %290 = vmatprep.subr.bf16.mxu0 %v517_v3  ;;  %v522_v6 = vld [vmem:[%s213_s27 + $0x10] ss:$8 sps:$4 sm:$0xff]   ;;  %v523_v7 = vld [vmem:[%s213_s27 + $0x24] ss:$8 sps:$4 sm:$0xff]   ;;  %v525_v8 = vld [vmem:[%s213_s27 + $0x20] ss:$8 sps:$4 sm:$0xff]  }
  0x14   : > { %291 = vmatpush1.bf16.msra.mxu0 %v519_v4 }
  0x15   : > { %292 = vmatprep.subr.bf16.mxu0 %v520_v5 }
  0x18   : > { %293 = vmatpush1.bf16.msra.mxu0 %v522_v6 }
  0x19   : > { %294 = vmatprep.subr.bf16.mxu0 %v523_v7 }
  0x1c   : > { %295 = vmatpush1.bf16.msra.mxu0 %v525_v8 }
  0x1f   : > { %481 = vmatmul.mubr.msk.bf16.vlgmr.msra.gmra.mrb[0].mxu0 %vm286_vm0, %v526_v9 }
  0x87   : > { %v244_v10 = vpop.permute.xlu0 %243 }
  0x8b   : > { %v249_v14 = vpop.permute.xlu0 %248 }
  0xf2   : > { %v324_v11 = vpop.f32.mrb[0].mxu0 }
  0xf3   : > { %v325_v12 = vadd.f32 %v324_v11, %v244_v10  ;;  %v326_v13 = vpop.f32.mrb[1].mxu0 }
  0xf4   : > { %v327_v15 = vadd.f32 %v326_v13, %v244_v10  ;;  %v328_v16 = vpop.f32.mrb[2].mxu0 }
  0xf5   : > { %v482_v17 = vmul.f32 -1.442695, %v325_v12  ;;  %v329_v18 = vadd.f32 %v328_v16, %v249_v14  ;;  %v330_v19 = vpop.f32.mrb[3].mxu0 }
  0xf6   : > { %v483_v20 = vmul.f32 -1.442695, %v327_v15  ;;  %v331_v21 = vadd.f32 %v330_v19, %v249_v14 }
  0xf7   : > { %527 = vpow2.f32 %v482_v17  ;;  %v484_v22 = vmul.f32 -1.442695, %v329_v18 }
  0xf8   : > { %529 = vpow2.f32 %v483_v20  ;;  %v485_v23 = vmul.f32 -1.442695, %v331_v21 }
  0xf9   : > { %531 = vpow2.f32 %v484_v22 }
  0xfa   : > { %533 = vpow2.f32 %v485_v23 }
 0x101   : > { %v528_v24 = vpop.eup %527 }
 0x102   : > { %v530_v25 = vpop.eup %529  ;;  %v345_v26 = vadd.f32 1.0, %v528_v24 }
 0x103   : > { %v532_v27 = vpop.eup %531  ;;  %v346_v28 = vadd.f32 1.0, %v530_v25 }
 0x104   : > { %v534_v29 = vpop.eup %533  ;;  %535 = vrcp.f32 %v345_v26  ;;  %v347_v30 = vadd.f32 1.0, %v532_v27 }
 0x105   : > { %537 = vrcp.f32 %v346_v28  ;;  %v348_v31 = vadd.f32 1.0, %v534_v29 }
 0x106   : > { %539 = vrcp.f32 %v347_v30 }
 0x107   : > { %541 = vrcp.f32 %v348_v31 }
 0x10e   : > { %v536_v32 = vpop.eup %535 }
 0x10f   : > { %v538_v33 = vpop.eup %537  ;;  %v357_v34 = vmul.f32 %v536_v32, %v325_v12 }
 0x110   : > { %v540_v35 = vpop.eup %539  ;;  %v358_v36 = vmul.f32 %v538_v33, %v327_v15 }
 0x111   : > { %v542_v37 = vpop.eup %541  ;;  %361 = vst [vmem:[%s228_s4] sm:$0xff] %v357_v34  ;;  %v359_v38 = vmul.f32 %v540_v35, %v329_v18 }
 0x112   : > { %362 = vst [vmem:[%s228_s4 + $0x8] sm:$0xff] %v358_v36  ;;  %v360_v39 = vmul.f32 %v542_v37, %v331_v21 }
 0x113   : > { %363 = vst [vmem:[%s228_s4 + $0x10] sm:$0xff] %v359_v38 }
 0x114   : > { %364 = vst [vmem:[%s228_s4 + $0x18] sm:$0xff] %v360_v39 }
 0x115 PF: > { %s13_s14 = sadd.s32 1, %s565_s14   ;;  %s639_s12 = smov %s561_s13 }
 0x116   : > { %p10_p5 = scmp.ge.s32.totalorder %s13_s14, 4   ;;  %s640_s13 = smov %s642_s15 }
 0x118   :  { %12 = sbr.rel (!%p10_p5) target bundleno = 2 (0x2), region = 65 }

// kernel: elan_depth_m_forward.2
= control target key start
LH: loop header
LB: loop body
LE: loop exit
PB: predicated region body
PF: predicated region fallthrough
CT: control target
= control target key end

     0   :  { %s4360_s21 = smov 0   ;;  %s6875_s0 = inlined_call_operand.vmem [shape: f32[2,16,256], index: 0, kind: input, shape index: {}]   ;;  %s6876_s1 = inlined_call_operand.vmem [shape: bf16[16,16], index: 1, kind: input, shape index: {}]   ;;  %s6877_s2 = inlined_call_operand.vmem [shape: f32[16,1], index: 2, kind: input, shape index: {}]   ;;  %s6878_s3 = inlined_call_operand.vmem [shape: f32[9,256], index: 3, kind: input, shape index: {}]   ;;  %s6879_s4 = inlined_call_operand.vmem [shape: f32[25,256], index: 4, kind: input, shape index: {}]   ;;  %s6880_s5 = inlined_call_operand.vmem [shape: bf16[4,8,72], index: 5, kind: input, shape index: {}]   ;;  %s6881_s6 = inlined_call_operand.vmem [shape: f32[4,8,1], index: 6, kind: input, shape index: {}]   ;;  %s6882_s7 = inlined_call_operand.vmem [shape: f32[4,8,25], index: 7, kind: input, shape index: {}]   ;;  %s6883_s8 = inlined_call_operand.vmem [shape: f32[4,8,1], index: 8, kind: input, shape index: {}]   ;;  %s6884_s9 = inlined_call_operand.vmem [shape: bf16[4,8,8], index: 9, kind: input, shape index: {}]   ;;  %s6885_s10 = inlined_call_operand.vmem [shape: f32[4,8,1], index: 10, kind: input, shape index: {}]   ;;  %s6886_s11 = inlined_call_operand.vmem [shape: bf16[2,48,256], index: 11, kind: output, shape index: {0}]   ;;  %s6887_s12 = inlined_call_operand.vmem [shape: f32[2,48,1], index: 12, kind: output, shape index: {1}]  }
   0x1   :  { %7192 = sst [smem:[#allocation82_spill]] %s6875_s0 }
   0x2   :  { %7193 = sst [smem:[#allocation83_spill]] %s6876_s1 }
   0x3   :  { %7194 = sst [smem:[#allocation84_spill]] %s6877_s2 }
   0x4   :  { %7195 = sst [smem:[#allocation85_spill]] %s6878_s3 }
   0x5   :  { %7196 = sst [smem:[#allocation86_spill]] %s6879_s4 }
   0x6   :  { %7197 = sst [smem:[#allocation87_spill]] %s6880_s5 }
   0x7   :  { %7198 = sst [smem:[#allocation88_spill]] %s6881_s6 }
   0x8   :  { %7199 = sst [smem:[#allocation89_spill]] %s6882_s7 }
   0x9   :  { %7200 = sst [smem:[#allocation90_spill]] %s6884_s9 }
   0xa   :  { %7201 = sst [smem:[#allocation91_spill]] %s6885_s10 }
   0xb   :  { %7202 = sst [smem:[#allocation92_spill]] %s6886_s11 }
   0xc   :  { %7203 = sst [smem:[#allocation93_spill]] %s6887_s12 }
   0xd LB: > { %7204 = sst [smem:[#allocation2_spill]] %s4244_s21  ;;  %s3857_s22 = sadd.s32 4294967295, %s4244_s21   ;;  %s4244_s21 = sphi %s4360_s21, %s23_s21  }
   0xe   : > { %p3861_p0 = scmp.ge.s32.totalorder %s4244_s21, 1  ;;  %p365_p1 = scmp.lt.s32.totalorder %s4244_s21, 3 }
  0x10   : > { %p366_p2 = pnand %p3861_p0, %p365_p1 }
  0x12   : > { %369 = sbr.rel (%p366_p2) target bundleno = 4316 (0x10dc), region = 64 }
  0x19   : > { %p412_p3 = scmp.lt.s32.totalorder %s3857_s22, 1  ;;  %v6973_v0 = vmov 0   ;;  %s7205_s2 = sld [smem:[#allocation84_spill]]  ;;  %vm465_vm0 = vcmask 130048   ;;  %v6971_v29 = vmov 2   ;;  %v6967_v30 = vmov 3  }
  0x1a   : > { %501 = vmatprep.mubr.bf16.mxu0 %v6973_v0  ;;  %4007 = vset.pattern.permute.xlu0 %v6973_v0  ;;  %s7207_s0 = sld [smem:[#allocation82_spill]]  ;;  %s7208_s1 = sld [smem:[#allocation83_spill]]  ;;  %v6963_v31 = vmov 4   ;;  %v6957_v32 = vmov 5   ;;  %v6955_v33 = vmov 6   ;;  %v6953_v34 = vmov 7  }
  0x1b   : > { %s7794_s22 = smov (!%p412_p3, %s3857_s22), 1  ;;  %767 = vmatprep.mubr.bf16.mxu1 %v6973_v0  ;;  %4008 = vset.pattern.permute.xlu1 %v6973_v0  ;;  %s7213_s11 = sld [smem:[#allocation92_spill]]  ;;  %v6951_v35 = vmov 8   ;;  %v6947_v36 = vmov 9   ;;  %v6945_v37 = vmov 10   ;;  %v6941_v38 = vmov 11  }
  0x1c   : > { %7206 = sst [smem:[#allocation3_spill]] %s7794_s22  ;;  %s3942_s25 = sshll.u32 %s7794_s22, 5  ;;  %v6939_v39 = vmov 12   ;;  %v6935_v40 = vmov 13   ;;  %v6933_v41 = vmov 16   ;;  %v6931_v42 = vmov 17  }
  0x1d   : > { %s6892_s13 = smul.u32 48, %s7794_s22  ;;  %s6899_s17 = smov 16   ;;  %v557_v43 = vlaneseq  ;;  %vm552_vm1 = vcmask 138240   ;;  %vm608_vm2 = vcmask 7168   ;;  %vm589_vm3 = vcmask 121856  }
  0x1e   : > { %s6895_s18 = smov 17   ;;  %s7091_s19 = smov 15   ;;  %vm637_vm4 = vcmask 1039360   ;;  %vm656_vm5 = vcmask 924672   ;;  %vm675_vm6 = vcmask 916480   ;;  %vm694_vm7 = vcmask 908288  }
  0x1f   : > { %v449_v1 = vld [vmem:[%s7205_s2 + $0x8] sm:$0xff]  ;;  %s6905_s20 = smov 127   ;;  %s7089_s23 = smov 1   ;;  %v558_v46 = vshrl.u32 %v557_v43, 7  ;;  %vm7143_vm8 = vcmask 1043456   ;;  %vm7131_vm9 = vcmask 588800  }
  0x20   : > { %457 = vperm.xlu0 %4007, %v449_v1   ;;  %s416_s28 = scalar_lea.vmem %s7207_s0, %s3942_s25  ;;  %v4113_v8 = vld [vmem:[%s7208_s1] sm:$0xff]   ;;  %s7007_s24 = smov 113   ;;  %vm824_vm10 = vcmask 269312   ;;  %vm796_vm11 = vcmask 277504   ;;  %vm7041_vm12 = vcmask 261120   ;;  %vm7048_vm13 = vcmask 252928  }
  0x21   : > { %v441_v2 = vld [vmem:[%s416_s28 + $0x8] sm:$0xff]  ;;  %v443_v3 = vld [vmem:[%s416_s28 + $0x18] sm:$0xff]  ;;  %v440_v4 = vld [vmem:[%s416_s28] sm:$0xff]  ;;  %s4400_s16 = scalar_lea.vmem %s7213_s11, %s6892_s13  ;;  %s7005_s25 = smov 112   ;;  %v4474_v49 = vsub.s32 0, %v558_v46  ;;  %v4476_v50 = vsub.s32 1, %v558_v46 }
  0x22   : > { %v445_v5 = vpack.c.bf16 %v443_v3, %v441_v2  ;;  %v442_v6 = vld [vmem:[%s416_s28 + $0x10] sm:$0xff]  ;;  %7214 = sst [smem:[#allocation8_spill]] %s4400_s16  ;;  %s6961_s26 = smov 111   ;;  %v4483_v52 = vsub.s32 3, %v558_v46  ;;  %v4485_v55 = vsub.s32 2, %v558_v46  ;;  %v4507_v1 = vsub.s32 4, %v558_v46 }
  0x23   : > { %v444_v7 = vpack.c.bf16 %v442_v6, %v440_v4  ;;  %s7215_s7 = sld [smem:[#allocation89_spill]]  ;;  %s7216_s6 = sld [smem:[#allocation88_spill]]  ;;  %vm7151_vm14 = vcmask 244736   ;;  %vm7080_vm15 = vcmask 146432  }
  0x24   : > { %469 = vmatprep.subr.bf16.mxu0 %v445_v5  ;;  %s7217_s3 = sld [smem:[#allocation85_spill]]  ;;  %7218 = vst [vmem:[#allocation9_spill] sm:$0xff] %v4483_v52  ;;  %7223 = vst [vmem:[#allocation14_spill] sm:$0xff] %v4507_v1  ;;  %s7236_s5 = sld [smem:[#allocation87_spill]] }
  0x25   : > { %470 = vmatpush1.bf16.msra.mxu0 %v444_v7  ;;  %s6949_s29 = smov 33   ;;  %s6913_s30 = smov 34  }
  0x26   : > { %s6943_s14 = smov 32   ;;  %s6915_s15 = smov 31  }
  0x27   : > { %s6901_s27 = smov 30   ;;  %s6893_s28 = smov 126  }
  0x28   : > { %3867 = vmatmul.mubr.msk.bf16.vlgmr.msra.gmra.mrb[0].mxu0 %vm465_vm0, %v4113_v8  ;;  %s6897_s13 = smov 18   ;;  %s7265_s10 = sld [smem:[#allocation91_spill]] }
  0x29   : > { %1521 = vmatprep.mubr.bf16.mxu0 %v6973_v0  ;;  %v4440_v27 = vld [vmem:[%s7215_s7] sm:$0xff]  ;;  %s7269_s4 = sld [smem:[#allocation86_spill]]  ;;  %s7335_s9 = sld [smem:[#allocation90_spill]] }
  0x2a   : > { %v541_v28 = vld [vmem:[%s7216_s6] sm:$0xff]  ;;  %v429_v56 = vld [vmem:[%s7217_s3 + $0x8] sm:$0xff]  ;;  %s7383_s11 = smov 33   ;;  %s7384_s21 = smov 34  }
  0x2b   : > { %v4481_v51 = vld [vmem:[%s7217_s3] sm:$0xff]  ;;  %v4501_v61 = vrot.slane %v429_v56, %v4474_v49  ;;  %v4504_v62 = vrot.slane %v429_v56, %v4476_v50  ;;  %v4514_v4 = vrot.slane %v429_v56, %v4485_v55  ;;  %s7385_s0 = smov 32   ;;  %s7387_s1 = smov 31  }
  0x2c   : > { %v4492_v57 = vrot.slane %v4481_v51, %v4474_v49  ;;  %v4496_v58 = vrot.slane %v4481_v51, %v4476_v50  ;;  %v4511_v2 = vrot.slane %v4481_v51, %v4483_v52  ;;  %s7393_s12 = smov 2   ;;  %s7398_s2 = smov 96  }
  0x2d   : > { %7221 = vst [vmem:[#allocation12_spill] sm:$0xff] %v4501_v61  ;;  %7222 = vst [vmem:[#allocation13_spill] sm:$0xff] %v4504_v62  ;;  %s7399_s22 = smov 95  }
  0x2e   : > { %7219 = vst [vmem:[#allocation10_spill] sm:$0xff] %v4492_v57  ;;  %7220 = vst [vmem:[#allocation11_spill] sm:$0xff] %v4496_v58 }
  0x2f   : > { %7224 = vst [vmem:[#allocation15_spill] sm:$0xff] %v4511_v2  ;;  %7225 = vst [vmem:[#allocation16_spill] sm:$0xff] %v4514_v4 }
  0x9f   : > { %v458_v10 = vpop.permute.xlu0 %457 }
  0xfb   : > { %v4386_v9 = vpop.f32.mrb[0].mxu0 }
  0xfc   : > { %7209 = vst [vmem:[#allocation4_spill] sm:$0xff] %v4386_v9  ;;  %v4388_v11 = vpop.f32.mrb[1].mxu0 }
  0xfd   : > { %7210 = vst [vmem:[#allocation5_spill] sm:$0xff] %v4388_v11  ;;  %v507_v12 = vpop.f32.mrb[2].mxu0 }
  0xfe   : > { %v508_v13 = vadd.f32 %v507_v12, %v458_v10  ;;  %v509_v14 = vpop.f32.mrb[3].mxu0 }
  0xff   : > { %v510_v15 = vadd.f32 %v509_v14, %v458_v10  ;;  %v4519_v10 = vsub.s32 5, %v558_v46 }
 0x100   : > { %v3870_v16 = vmul.f32 -1.442695, %v508_v13 }
 0x101   : > { %v3871_v17 = vmul.f32 -1.442695, %v510_v15 }
 0x102   : > { %4114 = vpow2.f32 %v3870_v16  ;;  %v4529_v16 = vrot.slane %v4481_v51, %v4485_v55 }
 0x103   : > { %4116 = vpow2.f32 %v3871_v17 }
 0x104   : > { %7227 = vst [vmem:[#allocation18_spill] sm:$0xff] %v4529_v16 }
 0x10c   : > { %v4115_v18 = vpop.eup %4114 }
 0x10d   : > { %v4117_v19 = vpop.eup %4116  ;;  %v526_v20 = vadd.f32 1.0, %v4115_v18  ;;  %v4533_v18 = vrot.slane %v429_v56, %v4507_v1 }
 0x10e   : > { %v527_v21 = vadd.f32 1.0, %v4117_v19  ;;  %v4537_v19 = vrot.slane %v4481_v51, %v4507_v1 }
 0x10f   : > { %4118 = vrcp.f32 %v526_v20  ;;  %7228 = vst [vmem:[#allocation19_spill] sm:$0xff] %v4533_v18 }
 0x110   : > { %4120 = vrcp.f32 %v527_v21  ;;  %7229 = vst [vmem:[#allocation20_spill] sm:$0xff] %v4537_v19 }
 0x119   : > { %v4119_v22 = vpop.eup %4118 }
 0x11a   : > { %v4121_v23 = vpop.eup %4120  ;;  %v4391_v24 = vmul.f32 %v4119_v22, %v508_v13  ;;  %v4523_v13 = vrot.slane %v429_v56, %v4483_v52 }
 0x11b   : > { %v4393_v25 = vmul.f32 %v4121_v23, %v510_v15 }
 0x11c   : > { %7211 = vst [vmem:[#allocation6_spill] sm:$0xff] %v4391_v24  ;;  %567 = vrot.lane.b32.xlu1 %v4391_v24, %s6899_s17  ;;  %548 = vrot.lane.b32.xlu0 %v4391_v24, %s6895_s18  ;;  %7226 = vst [vmem:[#allocation17_spill] sm:$0xff] %v4523_v13 }
 0x11d   : > { %7212 = vst [vmem:[#allocation7_spill] sm:$0xff] %v4393_v25  ;;  %v3944_v26 = vpack.c.bf16 %v4393_v25, %v4391_v24 }
 0x11f   : > { %3733 = vst [vmem:[%s4400_s16 + $0x8] sm:$0xff] %v3944_v26  ;;  %v4540_v26 = vsub.s32 6, %v558_v46 }
 0x120   : > { %585 = vrot.lane.b32.xlu1 %v4391_v24, %s7091_s19  ;;  %633 = vrot.lane.b32.xlu0 %v4391_v24, %s6905_s20 }
 0x124   : > { %604 = vrot.lane.b32.xlu1 %v4391_v24, %s7089_s23  ;;  %569 = vrot.lane.b32.xlu0 %v4393_v25, %s6899_s17 }
 0x128   : > { %550 = vrot.lane.b32.xlu1 %v4393_v25, %s6895_s18  ;;  %587 = vrot.lane.b32.xlu0 %v4393_v25, %s7091_s19 }
 0x12c   : > { %652 = vrot.lane.b32.xlu1 %v4391_v24, %s7007_s24  ;;  %606 = vrot.lane.b32.xlu0 %v4393_v25, %s7089_s23 }
 0x130   : > { %635 = vrot.lane.b32.xlu1 %v4393_v25, %s6905_s20  ;;  %671 = vrot.lane.b32.xlu0 %v4391_v24, %s7005_s25 }
 0x134   : > { %654 = vrot.lane.b32.xlu1 %v4393_v25, %s7007_s24  ;;  %673 = vrot.lane.b32.xlu0 %v4393_v25, %s7005_s25 }
 0x138   : > { %690 = vrot.lane.b32.xlu1 %v4391_v24, %s6961_s26  ;;  %692 = vrot.lane.b32.xlu0 %v4393_v25, %s6961_s26 }
 0x13c   : > { %813 = vperm.xlu0 %4007, %v4440_v27   ;;  %721 = vperm.xlu1 %4008, %v541_v28  }
 0x140   : > { %4010 = vset.pattern.permute.xlu0 %v6971_v29 }
 0x141   : > { %867 = vperm.xlu0 %4010, %v4440_v27  }
 0x145   : > { %4011 = vset.pattern.permute.xlu0 %v6967_v30 }
 0x146   : > { %894 = vperm.xlu0 %4011, %v4440_v27  }
 0x14a   : > { %4012 = vset.pattern.permute.xlu0 %v6963_v31 }
 0x14b   : > { %921 = vperm.xlu0 %4012, %v4440_v27  }
 0x14f   : > { %4013 = vset.pattern.permute.xlu0 %v6957_v32 }
 0x150   : > { %948 = vperm.xlu0 %4013, %v4440_v27  }
 0x154   : > { %4014 = vset.pattern.permute.xlu0 %v6955_v33 }
 0x155   : > { %974 = vperm.xlu0 %4014, %v4440_v27  }
 0x159   : > { %4015 = vset.pattern.permute.xlu0 %v6953_v34 }
 0x15a   : > { %1000 = vperm.xlu0 %4015, %v4440_v27  }
 0x15e   : > { %4016 = vset.pattern.permute.xlu0 %v6951_v35 }
 0x15f   : > { %1026 = vperm.xlu0 %4016, %v4440_v27  }
 0x163   : > { %4017 = vset.pattern.permute.xlu0 %v6947_v36 }
 0x164   : > { %1053 = vperm.xlu0 %4017, %v4440_v27  }
 0x168   : > { %4018 = vset.pattern.permute.xlu0 %v6945_v37 }
 0x169   : > { %1080 = vperm.xlu0 %4018, %v4440_v27  }
 0x16d   : > { %4019 = vset.pattern.permute.xlu0 %v6941_v38 }
 0x16e   : > { %1106 = vperm.xlu0 %4019, %v4440_v27  }
 0x172   : > { %4020 = vset.pattern.permute.xlu0 %v6939_v39 }
 0x173   : > { %1124 = vperm.xlu0 %4020, %v4440_v27  }
 0x177   : > { %4021 = vset.pattern.permute.xlu0 %v6935_v40 }
 0x178   : > { %1150 = vperm.xlu0 %4021, %v4440_v27  }
 0x17c   : > { %4024 = vset.pattern.permute.xlu0 %v6933_v41 }
 0x17d   : > { %1230 = vperm.xlu0 %4024, %v4440_v27  }
 0x181   : > { %4025 = vset.pattern.permute.xlu0 %v6931_v42 }
 0x182   : > { %1256 = vperm.xlu0 %4025, %v4440_v27  }
 0x18e   : > { %v568_v44 = vpop.permute.xlu1 %567  ;;  %v549_v45 = vpop.permute.xlu0 %548 }
 0x18f   : > { %v574_v59 = vsel %vm465_vm0, 0.0, %v568_v44  ;;  %v556_v60 = vsel %vm552_vm1, 0.0, %v549_v45 }
 0x190   : > { %v565_v7 = vmul.f32 %v4492_v57, %v556_v60  ;;  %v583_v8 = vmul.f32 %v4496_v58, %v574_v59  ;;  %v4553_v60 = vsub.s32 7, %v558_v46  ;;  %v4565_v46 = vrot.slane %v429_v56, %v4540_v26 }
 0x192   : > { %v586_v47 = vpop.permute.xlu1 %585  ;;  %v634_v48 = vpop.permute.xlu0 %633  ;;  %7233 = vst [vmem:[#allocation24_spill] sm:$0xff] %v4565_v46 }
 0x193   : > { %v593_v20 = vsel %vm589_vm3, 0.0, %v586_v47 }
 0x196   : > { %v605_v53 = vpop.permute.xlu1 %604  ;;  %v570_v54 = vpop.permute.xlu0 %569 }
 0x197   : > { %v571_v63 = vsel %vm465_vm0, %v568_v44, %v570_v54  ;;  %v612_v12 = vsel %vm608_vm2, 0.0, %v605_v53  ;;  %v709_v44 = vpack.c.bf16 %v583_v8, %v565_v7  ;;  %v4562_v8 = vrot.slane %v4481_v51, %v4540_v26 }
 0x198   : > { %v584_v15 = vmul.f32 %v4504_v62, %v571_v63  ;;  %v621_v28 = vmul.f32 %v4511_v2, %v612_v12  ;;  %v602_v63 = vmul.f32 %v4529_v16, %v593_v20  ;;  %v4820_v62 = vld [vmem:[%s7269_s4 + $0x10] sm:$0xff] }
 0x199   : > { %7232 = vst [vmem:[#allocation23_spill] sm:$0xff] %v4562_v8  ;;  %7270 = vst [vmem:[#allocation49_spill] sm:$0xff] %v4820_v62 }
 0x19a   : > { %v551_v3 = vpop.permute.xlu1 %550  ;;  %v588_v5 = vpop.permute.xlu0 %587 }
 0x19b   : > { %v553_v6 = vsel %vm552_vm1, %v549_v45, %v551_v3  ;;  %v590_v17 = vsel %vm589_vm3, %v586_v47, %v588_v5  ;;  %v4546_v45 = vrot.slane %v4481_v51, %v4519_v10  ;;  %v4551_v47 = vrot.slane %v429_v56, %v4519_v10 }
 0x19c   : > { %v566_v14 = vmul.f32 %v4501_v61, %v553_v6  ;;  %v603_v54 = vmul.f32 %v4514_v4, %v590_v17  ;;  %v631_v3 = vmul.f32 %v4537_v19, %v4391_v24  ;;  %v4827_v61 = vrot.slane %v4820_v62, %v4507_v1 }
 0x19d   : > { %7230 = vst [vmem:[#allocation21_spill] sm:$0xff] %v4546_v45  ;;  %7231 = vst [vmem:[#allocation22_spill] sm:$0xff] %v4551_v47 }
 0x19e   : > { %v653_v21 = vpop.permute.xlu1 %652  ;;  %v607_v22 = vpop.permute.xlu0 %606  ;;  %v710_v23 = vpack.c.bf16 %v584_v15, %v566_v14  ;;  %v711_v15 = vpack.c.bf16 %v621_v28, %v602_v63  ;;  %7271 = vst [vmem:[#allocation50_spill] sm:$0xff] %v4827_v61 }
 0x19f   : > { %v609_v43 = vsel %vm608_vm2, %v605_v53, %v607_v22  ;;  %v632_v53 = vmul.f32 %v4533_v18, %v4393_v25  ;;  %v4573_v22 = vrot.slane %v4481_v51, %v4553_v60 }
 0x1a0   : > { %v622_v59 = vmul.f32 %v4523_v13, %v609_v43  ;;  %735 = vmatprep.subr.bf16.mxu1 %v710_v23  ;;  %v4576_v23 = vrot.slane %v429_v56, %v4553_v60 }
 0x1a1   : > { %736 = vmatpush1.bf16.msra.mxu1 %v709_v44  ;;  %7234 = vst [vmem:[#allocation25_spill] sm:$0xff] %v4573_v22 }
 0x1a2   : > { %v636_v5 = vpop.permute.xlu1 %635  ;;  %v672_v6 = vpop.permute.xlu0 %671  ;;  %v712_v7 = vpack.c.bf16 %v622_v59, %v603_v54  ;;  %7235 = vst [vmem:[#allocation26_spill] sm:$0xff] %v4576_v23 }
 0x1a3   : > { %v638_v12 = vsel %vm637_vm4, %v634_v48, %v636_v5  ;;  %v641_v14 = vsel %vm637_vm4, %v636_v5, 0.0 }
 0x1a4   : > { %v650_v17 = vmul.f32 %v4546_v45, %v638_v12  ;;  %v651_v20 = vmul.f32 %v4551_v47, %v641_v14  ;;  %737 = vmatprep.subr.bf16.mxu1 %v712_v7  ;;  %v545_v47 = vld [vmem:[%s7265_s10] sm:$0xff] }
 0x1a5   : > { %738 = vmatpush1.bf16.msra.mxu1 %v711_v15 }
 0x1a6   : > { %v655_v43 = vpop.permute.xlu1 %654  ;;  %v674_v44 = vpop.permute.xlu0 %673  ;;  %v714_v48 = vpack.c.bf16 %v651_v20, %v632_v53  ;;  %v713_v54 = vpack.c.bf16 %v650_v17, %v631_v3  ;;  %v3872_v53 = vld [vmem:[%s7217_s3 + $0x10] ss:$0 sm:$0xff] }
 0x1a7   : > { %v657_v28 = vsel %vm656_vm5, %v653_v21, %v655_v43  ;;  %v660_v59 = vsel %vm656_vm5, %v655_v43, 0.0  ;;  %v676_v63 = vsel %vm675_vm6, %v672_v6, %v674_v44  ;;  %v679_v5 = vsel %vm675_vm6, %v674_v44, 0.0  ;;  %v3873_v21 = vld [vmem:[%s7217_s3 + $0x18] ss:$0 sm:$0xff] }
 0x1a8   : > { %v669_v51 = vmul.f32 %v4562_v8, %v657_v28  ;;  %v670_v7 = vmul.f32 %v4565_v46, %v660_v59  ;;  %v688_v56 = vmul.f32 %v4573_v22, %v676_v63  ;;  %v689_v12 = vmul.f32 %v4576_v23, %v679_v5  ;;  %739 = vmatprep.subr.bf16.mxu1 %v714_v48  ;;  %v540_v59 = vld [vmem:[%s7236_s5] sm:$0xf] }
 0x1a9   : > { %740 = vmatpush1.bf16.msra.mxu1 %v713_v54  ;;  %v6969_v63 = vmov 1   ;;  %v6929_v5 = vmov 18  }
 0x1aa   : > { %v691_v3 = vpop.permute.xlu1 %690  ;;  %v693_v6 = vpop.permute.xlu0 %692  ;;  %v716_v14 = vpack.c.bf16 %v689_v12, %v670_v7  ;;  %v715_v15 = vpack.c.bf16 %v688_v56, %v669_v51  ;;  %4009 = vset.pattern.permute.xlu1 %v6969_v63  ;;  %4026 = vset.pattern.permute.xlu0 %v6929_v5  ;;  %v6965_v51 = vmov 14   ;;  %v6890_v7 = vmov 19  }
 0x1ab   : > { %v695_v17 = vsel %vm694_vm7, %v691_v3, %v693_v6  ;;  %v698_v20 = vsel %vm694_vm7, %v693_v6, 0.0  ;;  %840 = vperm.xlu1 %4009, %v4440_v27   ;;  %1282 = vperm.xlu0 %4026, %v4440_v27   ;;  %v6959_v56 = vmov 15   ;;  %v6888_v12 = vmov 20  }
 0x1ac   : > { %v708_v43 = vmul.f32 %v3873_v21, %v698_v20  ;;  %741 = vmatprep.subr.bf16.mxu1 %v716_v14  ;;  %v707_v44 = vmul.f32 %v3872_v53, %v695_v17  ;;  %v6927_v21 = vmov 21  }
 0x1ad   : > { %742 = vmatpush1.bf16.msra.mxu1 %v715_v15 }
 0x1ae   : > { %v718_v48 = vpack.c.bf16 %v708_v43, %v708_v43  ;;  %v717_v54 = vpack.c.bf16 %v707_v44, %v707_v44 }
 0x1af   : > { %4022 = vset.pattern.permute.xlu1 %v6965_v51  ;;  %4027 = vset.pattern.permute.xlu0 %v6890_v7 }
 0x1b0   : > { %3874 = vmatprep.subr.msk.bf16.mxu1 %vm7143_vm8, %v718_v48  ;;  %v730_v28 = vsel %vm7143_vm8, %v717_v54, 0  ;;  %1177 = vperm.xlu1 %4022, %v4440_v27  }
 0x1b1   : > { %744 = vmatpush1.bf16.msra.mxu1 %v730_v28  ;;  %1309 = vperm.xlu0 %4027, %v4440_v27  }
 0x1b4   : > { %3875 = vmatmul.mubr.msk.bf16.vlgmr.msra.gmra.mrb[0].mxu1 %vm7131_vm9, %v540_v59  ;;  %4023 = vset.pattern.permute.xlu1 %v6959_v56 }
 0x1b5   : > { %2237 = vmatprep.mubr.bf16.mxu1 %v6973_v0  ;;  %4028 = vset.pattern.permute.xlu0 %v6888_v12 }
 0x1b6   : > { %1204 = vperm.xlu1 %4023, %v4440_v27   ;;  %1336 = vperm.xlu0 %4028, %v4440_v27  }
 0x1ba   : > { %4034 = vset.pattern.permute.xlu1 %v6973_v0  ;;  %4029 = vset.pattern.permute.xlu0 %v6927_v21 }
 0x1bb   : > { %v722_v53 = vpop.permute.xlu1 %721 }
 0x287   : > { %v769_v3 = vpop.f32.mrb[0].mxu1 }
 0x288   : > { %v770_v6 = vadd.f32 %v769_v3, %v722_v53  ;;  %v771_v14 = vpop.f32.mrb[1].mxu1 }
 0x289   : > { %v773_v15 = vpop.f32.mrb[2].mxu1  ;;  %v772_v43 = vadd.f32 %v771_v14, %v722_v53  ;;  %v6925_v53 = vmov 22   ;;  %v6921_v14 = vmov 24  }
 0x28a   : > { %v3876_v17 = vmul.f32 -1.442695, %v770_v6  ;;  %v774_v20 = vpop.f32.mrb[3].mxu1  ;;  %v4688_v15 = vpop.permute.xlu1 %840 }
 0x28b   : > { %v3877_v44 = vmul.f32 -1.442695, %v772_v43 }
 0x28c   : > { %4122 = vpow2.f32 %v3876_v17 }
 0x28d   : > { %4124 = vpow2.f32 %v3877_v44 }
 0x28e   : > { %v4692_v17 = vpop.permute.xlu1 %1177 }
 0x28f   : > { %7242 = vst [vmem:[#allocation29_spill] sm:$0xff] %v4692_v17  ;;  %v4867_v17 = vrot.slane %v4820_v62, %v4476_v50 }
 0x292   : > { %v4698_v20 = vpop.permute.xlu1 %1204 }
 0x293   : > { %7244 = vst [vmem:[#allocation30_spill] sm:$0xff] %v4698_v20 }
 0x296   : > { %v4123_v48 = vpop.eup %4122 }
 0x297   : > { %v782_v54 = vadd.f32 1.0, %v4123_v48  ;;  %v4125_v28 = vpop.eup %4124  ;;  %v4708_v48 = vpop.permute.xlu0 %813 }
 0x298   : > { %v783_v7 = vadd.f32 1.0, %v4125_v28 }
 0x299   : > { %4126 = vrcp.f32 %v782_v54 }
 0x29a   : > { %4128 = vrcp.f32 %v783_v7  ;;  %v6923_v7 = vmov 23  }
 0x29b   : > { %v4714_v28 = vpop.permute.xlu0 %867 }
 0x2a3   : > { %v4127_v59 = vpop.eup %4126 }
 0x2a4   : > { %v4615_v12 = vmul.f32 %v4127_v59, %v770_v6  ;;  %v4129_v3 = vpop.eup %4128 }
 0x2a5   : > { %v4633_v6 = vmul.f32 %v4129_v3, %v772_v43  ;;  %v4722_v3 = vpop.permute.xlu0 %894 }
 0x2a6   : > { %7237 = vst [vmem:[#allocation27_spill] sm:$0xff] %v4615_v12  ;;  %820 = vrot.lane.b32.xlu0 %v4615_v12, %s6949_s29  ;;  %792 = vrot.lane.b32.xlu1 %v4615_v12, %s6913_s30 }
 0x2a7   : > { %7238 = vst [vmem:[#allocation28_spill] sm:$0xff] %v4633_v6 }
 0x2aa   : > { %1363 = vperm.xlu0 %4029, %v4440_v27   ;;  %847 = vrot.lane.b32.xlu1 %v4615_v12, %s6943_s14 }
 0x2ae   : > { %4030 = vset.pattern.permute.xlu0 %v6925_v53  ;;  %874 = vrot.lane.b32.xlu1 %v4615_v12, %s6915_s15 }
 0x2af   : > { %1390 = vperm.xlu0 %4030, %v4440_v27  }
 0x2b2   : > { %901 = vrot.lane.b32.xlu1 %v4615_v12, %s6901_s27  ;;  %s6909_s27 = smov 98  }
 0x2b3   : > { %1157 = vrot.lane.b32.xlu0 %v4615_v12, %s6893_s28  ;;  %s6903_s28 = smov 94  }
 0x2b4   : > { %4031 = vset.pattern.permute.xlu0 %v6923_v7  ;;  %v4730_v7 = vpop.permute.xlu0 %921 }
 0x2b6   : > { %928 = vrot.lane.b32.xlu1 %v4615_v12, %s6897_s13  ;;  %s6919_s13 = smov 2  }
 0x2b7   : > { %1133 = vrot.lane.b32.xlu0 %v4633_v6, %s6905_s20 }
 0x2b8   : > { %v4738_v21 = vpop.permute.xlu0 %948 }
 0x2ba   : > { %955 = vrot.lane.b32.xlu1 %v4615_v12, %s6895_s18  ;;  %s6917_s18 = smov 14  }
 0x2bb   : > { %1417 = vperm.xlu0 %4031, %v4440_v27  }
 0x2bc   : > { %v4746_v41 = vpop.permute.xlu0 %974 }
 0x2be   : > { %981 = vrot.lane.b32.xlu1 %v4615_v12, %s6899_s17  ;;  %s6907_s17 = smov 110  }
 0x2bf   : > { %4032 = vset.pattern.permute.xlu0 %v6921_v14 }
 0x2c0   : > { %1444 = vperm.xlu0 %4032, %v4440_v27   ;;  %v543_v27 = vld [vmem:[%s6883_s8] sm:$0xff]  ;;  %v4754_v39 = vpop.permute.xlu0 %1000 }
 0x2c2   : > { %1007 = vrot.lane.b32.xlu1 %v4615_v12, %s7091_s19 }
 0x2c4   : > { %1424 = vrot.lane.b32.xlu0 %v4615_v12, %s6903_s28  ;;  %s6937_s28 = smov 114   ;;  %v4762_v36 = vpop.permute.xlu0 %1026 }
 0x2c5   : > { %4033 = vset.pattern.permute.xlu0 %v6973_v0 }
 0x2c6   : > { %1033 = vrot.lane.b32.xlu1 %v4615_v12, %s6917_s18 }
 0x2c8   : > { %1453 = vperm.xlu0 %4033, %v543_v27   ;;  %v4770_v34 = vpop.permute.xlu0 %1053 }
 0x2c9   : > { %7251 = vst [vmem:[#allocation33_spill] sm:$0xff] %v4770_v34 }
 0x2ca   : > { %1060 = vrot.lane.b32.xlu1 %v4615_v12, %s6919_s13 }
 0x2cc   : > { %v4778_v56 = vpop.permute.xlu0 %1080 }
 0x2cd   : > { %7254 = vst [vmem:[#allocation36_spill] sm:$0xff] %v4778_v56 }
 0x2ce   : > { %1087 = vrot.lane.b32.xlu1 %v4615_v12, %s7089_s23 }
 0x2d0   : > { %v4784_v51 = vpop.permute.xlu0 %1106 }
 0x2d1   : > { %7257 = vst [vmem:[#allocation38_spill] sm:$0xff] %v4784_v51 }
 0x2d2   : > { %1131 = vrot.lane.b32.xlu1 %v4615_v12, %s6905_s20  ;;  %s6911_s20 = smov 97  }
 0x2d4   : > { %v4790_v29 = vpop.permute.xlu0 %1124 }
 0x2d5   : > { %7260 = vst [vmem:[#allocation41_spill] sm:$0xff] %v4790_v29 }
 0x2d6   : > { %1184 = vrot.lane.b32.xlu1 %v4615_v12, %s6937_s28 }
 0x2d8   : > { %v4794_v11 = vpop.permute.xlu0 %1150 }
 0x2d9   : > { %7262 = vst [vmem:[#allocation43_spill] sm:$0xff] %v4794_v11 }
 0x2da   : > { %1211 = vrot.lane.b32.xlu1 %v4615_v12, %s7007_s24 }
 0x2dc   : > { %v4796_v46 = vpop.permute.xlu0 %1230 }
 0x2dd   : > { %7263 = vst [vmem:[#allocation44_spill] sm:$0xff] %v4796_v46 }
 0x2de   : > { %1237 = vrot.lane.b32.xlu1 %v4615_v12, %s7005_s25 }
 0x2e0   : > { %v4798_v22 = vpop.permute.xlu0 %1256 }
 0x2e1   : > { %7264 = vst [vmem:[#allocation45_spill] sm:$0xff] %v4798_v22 }
 0x2e2   : > { %1263 = vrot.lane.b32.xlu1 %v4615_v12, %s6961_s26 }
 0x2e4   : > { %v4803_v45 = vpop.permute.xlu0 %1282 }
 0x2e5   : > { %7266 = vst [vmem:[#allocation46_spill] sm:$0xff] %v4803_v45 }
 0x2e6   : > { %1289 = vrot.lane.b32.xlu1 %v4615_v12, %s6907_s17  ;;  %s7239_s17 = smov 30  }
 0x2e8   : > { %v4809_v13 = vpop.permute.xlu0 %1309 }
 0x2e9   : > { %7267 = vst [vmem:[#allocation47_spill] sm:$0xff] %v4809_v13 }
 0x2ea   : > { %1316 = vrot.lane.b32.xlu1 %v4615_v12, %s6909_s27  ;;  %s7240_s27 = smov 18  }
 0x2ec   : > { %v4813_v2 = vpop.permute.xlu0 %1336 }
 0x2ed   : > { %7268 = vst [vmem:[#allocation48_spill] sm:$0xff] %v4813_v2 }
 0x2ee   : > { %1343 = vrot.lane.b32.xlu1 %v4615_v12, %s6911_s20  ;;  %s7241_s20 = smov 17  }
 0x2f2   : > { %794 = vrot.lane.b32.xlu1 %v4633_v6, %s6913_s30  ;;  %s7243_s30 = smov 16  }
 0x2f6   : > { %822 = vrot.lane.b32.xlu1 %v4633_v6, %s6949_s29  ;;  %s7249_s29 = smov 97  }
 0x2fa   : > { %849 = vrot.lane.b32.xlu1 %v4633_v6, %s6943_s14  ;;  %s7247_s14 = smov 98  }
 0x2fe   : > { %876 = vrot.lane.b32.xlu1 %v4633_v6, %s6915_s15  ;;  %s6987_s15 = smov 96  }
 0x302   : > { %903 = vrot.lane.b32.xlu1 %v4633_v6, %s7239_s17 }
 0x306   : > { %930 = vrot.lane.b32.xlu1 %v4633_v6, %s7240_s27 }
 0x30a   : > { %957 = vrot.lane.b32.xlu1 %v4633_v6, %s7241_s20 }
 0x30e   : > { %983 = vrot.lane.b32.xlu1 %v4633_v6, %s7243_s30 }
 0x312   : > { %1009 = vrot.lane.b32.xlu1 %v4633_v6, %s7091_s19 }
 0x316   : > { %1035 = vrot.lane.b32.xlu1 %v4633_v6, %s6917_s18  ;;  %s6985_s18 = smov 95  }
 0x318   : > { %v4702_v43 = vpop.permute.xlu1 %792  ;;  %v821_v24 = vpop.permute.xlu0 %820 }
 0x319   : > { %v828_v20 = vsel %vm824_vm10, 0.0, %v821_v24 }
 0x31a   : > { %1062 = vrot.lane.b32.xlu1 %v4633_v6, %s6919_s13  ;;  %s7245_s13 = smov 126  }
 0x31c   : > { %v4706_v44 = vpop.permute.xlu1 %847 }
 0x31d   : > { %v855_v51 = vsel %vm7041_vm12, 0.0, %v4706_v44 }
 0x31e   : > { %1089 = vrot.lane.b32.xlu1 %v4633_v6, %s7089_s23 }
 0x320   : > { %v4712_v54 = vpop.permute.xlu1 %874 }
 0x321   : > { %v882_v34 = vsel %vm7048_vm13, 0.0, %v4712_v54 }
 0x322   : > { %1370 = vrot.lane.b32.xlu1 %v4615_v12, %s6987_s15 }
 0x324   : > { %v4718_v59 = vpop.permute.xlu1 %901 }
 0x326   : > { %1397 = vrot.lane.b32.xlu1 %v4615_v12, %s6985_s18 }
 0x328   : > { %v4724_v27 = vpop.permute.xlu1 %928 }
 0x32a   : > { %1159 = vrot.lane.b32.xlu1 %v4633_v6, %s7245_s13 }
 0x32c   : > { %v4728_v14 = vpop.permute.xlu1 %955 }
 0x32e   : > { %1186 = vrot.lane.b32.xlu1 %v4633_v6, %s6937_s28  ;;  %s7246_s28 = smov 110  }
 0x330   : > { %v4734_v53 = vpop.permute.xlu1 %981 }
 0x332   : > { %1213 = vrot.lane.b32.xlu1 %v4633_v6, %s7007_s24  ;;  %s7343_s24 = smov 112  }
 0x334   : > { %v4740_v5 = vpop.permute.xlu1 %1007 }
 0x336   : > { %1239 = vrot.lane.b32.xlu1 %v4633_v6, %s7005_s25  ;;  %s7344_s25 = smov 111  }
 0x338   : > { %v4744_v42 = vpop.permute.xlu1 %1033 }
 0x33a   : > { %1265 = vrot.lane.b32.xlu1 %v4633_v6, %s6961_s26  ;;  %s7255_s26 = smov 94  }
 0x33c   : > { %v4750_v40 = vpop.permute.xlu1 %1060 }
 0x33e   : > { %1291 = vrot.lane.b32.xlu1 %v4633_v6, %s7246_s28 }
 0x340   : > { %v4756_v38 = vpop.permute.xlu1 %1087 }
 0x342   : > { %1318 = vrot.lane.b32.xlu1 %v4633_v6, %s7247_s14 }
 0x344   : > { %v4760_v37 = vpop.permute.xlu1 %1131 }
 0x345   : > { %7248 = vst [vmem:[#allocation31_spill] sm:$0xff] %v4760_v37 }
 0x346   : > { %1345 = vrot.lane.b32.xlu1 %v4633_v6, %s7249_s29 }
 0x348   : > { %v4766_v35 = vpop.permute.xlu1 %1184 }
 0x349   : > { %7250 = vst [vmem:[#allocation32_spill] sm:$0xff] %v4766_v35  ;;  %v4880_v35 = vrot.slane %v4820_v62, %v4483_v52 }
 0x34a   : > { %1372 = vrot.lane.b32.xlu1 %v4633_v6, %s6987_s15  ;;  %s7342_s15 = smov 113  }
 0x34b   : > { %7278 = vst [vmem:[#allocation57_spill] sm:$0xff] %v4880_v35 }
 0x34c   : > { %v4772_v33 = vpop.permute.xlu1 %1211 }
 0x34d   : > { %7252 = vst [vmem:[#allocation34_spill] sm:$0xff] %v4772_v33 }
 0x34e   : > { %1399 = vrot.lane.b32.xlu1 %v4633_v6, %s6985_s18  ;;  %s7341_s18 = smov 127  }
 0x350   : > { %v4776_v32 = vpop.permute.xlu1 %1237 }
 0x351   : > { %7253 = vst [vmem:[#allocation35_spill] sm:$0xff] %v4776_v32  ;;  %v800_v32 = vsel %vm796_vm11, 0.0, %v4702_v43 }
 0x352   : > { %1426 = vrot.lane.b32.xlu1 %v4633_v6, %s7255_s26 }
 0x354   : > { %v4782_v31 = vpop.permute.xlu1 %1263 }
 0x355   : > { %7256 = vst [vmem:[#allocation37_spill] sm:$0xff] %v4782_v31  ;;  %v4860_v31 = vrot.slane %v4820_v62, %v4474_v49 }
 0x356   : > { %1476 = vperm.xlu1 %4034, %v545_v47   ;;  %v432_v47 = vld [vmem:[%s7269_s4] sm:$0xff] }
 0x357   : > { %v4830_v58 = vrot.slane %v432_v47, %v4476_v50  ;;  %v4835_v2 = vrot.slane %v432_v47, %v4474_v49  ;;  %v4838_v13 = vrot.slane %v432_v47, %v4485_v55  ;;  %v4844_v45 = vrot.slane %v432_v47, %v4507_v1 }
 0x358   : > { %v4786_v30 = vpop.permute.xlu1 %1289  ;;  %v4850_v22 = vrot.slane %v432_v47, %v4519_v10  ;;  %v4856_v46 = vrot.slane %v432_v47, %v4553_v60 }
 0x359   : > { %7258 = vst [vmem:[#allocation39_spill] sm:$0xff] %v4786_v30  ;;  %7272 = vst [vmem:[#allocation51_spill] sm:$0xff] %v4830_v58  ;;  %v4853_v30 = vrot.slane %v432_v47, %v4540_v26  ;;  %v809_v12 = vmul.f32 %v4835_v2, %v800_v32 }
 0x35a   : > { %7273 = vst [vmem:[#allocation52_spill] sm:$0xff] %v4835_v2  ;;  %7274 = vst [vmem:[#allocation53_spill] sm:$0xff] %v4838_v13 }
 0x35b   : > { %7276 = vst [vmem:[#allocation55_spill] sm:$0xff] %v4844_v45 }
 0x35c   : > { %v4788_v63 = vpop.permute.xlu1 %1316 }
 0x35d   : > { %7259 = vst [vmem:[#allocation40_spill] sm:$0xff] %v4788_v63  ;;  %v433_v63 = vld [vmem:[%s7269_s4 + $0x8] sm:$0xff] }
 0x35e   : > { %v4870_v33 = vrot.slane %v433_v63, %v4476_v50  ;;  %v4883_v37 = vrot.slane %v433_v63, %v4474_v49  ;;  %v4889_v6 = vrot.slane %v433_v63, %v4485_v55  ;;  %v4892_v56 = vrot.slane %v433_v63, %v4483_v52 }
 0x35f   : > { %v4895_v61 = vrot.slane %v433_v63, %v4507_v1  ;;  %v4915_v32 = vrot.slane %v433_v63, %v4540_v26 }
 0x360   : > { %v4792_v0 = vpop.permute.xlu1 %1343  ;;  %7277 = vst [vmem:[#allocation56_spill] sm:$0xff] %v4870_v33  ;;  %7279 = vst [vmem:[#allocation58_spill] sm:$0xff] %v4883_v37 }
 0x361   : > { %7261 = vst [vmem:[#allocation42_spill] sm:$0xff] %v4792_v0  ;;  %v4841_v0 = vrot.slane %v432_v47, %v4483_v52  ;;  %v4876_v47 = vrot.slane %v4820_v62, %v4485_v55  ;;  %7280 = vst [vmem:[#allocation59_spill] sm:$0xff] %v4889_v6  ;;  %v837_v62 = vmul.f32 %v4830_v58, %v828_v20 }
 0x362   : > { %7281 = vst [vmem:[#allocation60_spill] sm:$0xff] %v4892_v56  ;;  %v4912_v20 = vrot.slane %v433_v63, %v4519_v10 }
 0x363   : > { %7275 = vst [vmem:[#allocation54_spill] sm:$0xff] %v4841_v0 }
 0x364   : > { %v795_v9 = vpop.permute.xlu1 %794 }
 0x365   : > { %v797_v35 = vsel %vm796_vm11, %v4702_v43, %v795_v9 }
 0x366   : > { %v810_v2 = vmul.f32 %v4883_v37, %v797_v35  ;;  %v936_v35 = vsel %vm7080_vm15, 0.0, %v4724_v27 }
 0x368   : > { %v823_v8 = vpop.permute.xlu1 %822 }
 0x369   : > { %v825_v29 = vsel %vm824_vm10, %v821_v24, %v823_v8  ;;  %v4906_v8 = vld [vmem:[%s7269_s4 + $0x18] sm:$0xff] }
 0x36a   : > { %v838_v1 = vmul.f32 %v4870_v33, %v825_v29  ;;  %v4927_v29 = vrot.slane %v4906_v8, %v4474_v49  ;;  %v909_v33 = vsel %vm7151_vm14, 0.0, %v4718_v59  ;;  %v4949_v37 = vrot.slane %v4906_v8, %v4485_v55 }
 0x36c   : > { %v850_v23 = vpop.permute.xlu1 %849 }
 0x36d   : > { %v852_v24 = vsel %vm7041_vm12, %v4706_v44, %v850_v23  ;;  %v864_v23 = vmul.f32 %v4838_v13, %v855_v51  ;;  %vm7065_vm12 = vcmask 113664   ;;  %v4923_v44 = vrot.slane %v433_v63, %v4553_v60 }
 0x36e   : > { %v865_v58 = vmul.f32 %v4889_v6, %v852_v24  ;;  %v4935_v51 = vrot.slane %v4906_v8, %v4476_v50  ;;  %v816_v63 = vmul.f32 %v4708_v48, %v809_v12  ;;  %v844_v24 = vmul.f32 %v4688_v15, %v838_v1 }
 0x36f   : > { %v870_v12 = vmul.f32 %v4714_v28, %v864_v23  ;;  %v4960_v1 = vrot.slane %v4906_v8, %v4483_v52 }
 0x370   : > { %v877_v18 = vpop.permute.xlu1 %876 }
 0x371   : > { %v879_v43 = vsel %vm7048_vm13, %v4712_v54, %v877_v18  ;;  %v843_v18 = vmul.f32 %v4688_v15, %v837_v62  ;;  %v891_v54 = vmul.f32 %v4841_v0, %v882_v34  ;;  %vm7064_vm13 = vcmask 15360   ;;  %v4953_v0 = vpop.permute.xlu0 %1363  ;;  %7283 = vst [vmem:[#allocation62_spill] sm:$0xff] %v4960_v1 }
 0x372   : > { %v892_v6 = vmul.f32 %v4892_v56, %v879_v43  ;;  %v918_v34 = vmul.f32 %v4844_v45, %v909_v33  ;;  %7282 = vst [vmem:[#allocation61_spill] sm:$0xff] %v4953_v0  ;;  %v962_v15 = vsel %vm552_vm1, 0.0, %v4728_v14  ;;  %v871_v43 = vmul.f32 %v4714_v28, %v865_v58 }
 0x373   : > { %v845_v33 = vadd.f32 %v843_v18, %v816_v63  ;;  %v897_v45 = vmul.f32 %v4722_v3, %v891_v54  ;;  %v945_v56 = vmul.f32 %v4850_v22, %v936_v35  ;;  %v971_v28 = vmul.f32 %v4853_v30, %v962_v15 }
 0x374   : > { %v4805_v19 = vpop.permute.xlu1 %903  ;;  %v898_v52 = vmul.f32 %v4722_v3, %v892_v6 }
 0x375   : > { %v906_v13 = vsel %vm7151_vm14, %v4718_v59, %v4805_v19  ;;  %v817_v59 = vmul.f32 %v4708_v48, %v810_v2  ;;  %v924_v48 = vmul.f32 %v4730_v7, %v918_v34  ;;  %v951_v54 = vmul.f32 %v4738_v21, %v945_v56  ;;  %v4988_v35 = vpop.permute.xlu0 %1390 }
 0x376   : > { %v919_v23 = vmul.f32 %v4895_v61, %v906_v13  ;;  %v872_v13 = vadd.f32 %v870_v12, %v845_v33  ;;  %v977_v56 = vmul.f32 %v4746_v41, %v971_v28 }
 0x377   : > { %v846_v0 = vadd.f32 %v844_v24, %v817_v59 }
 0x378   : > { %v4807_v16 = vpop.permute.xlu1 %930  ;;  %v925_v63 = vmul.f32 %v4730_v7, %v919_v23  ;;  %v899_v3 = vadd.f32 %v897_v45, %v872_v13 }
 0x379   : > { %v933_v19 = vsel %vm7080_vm15, %v4724_v27, %v4807_v16  ;;  %v988_v27 = vsel %vm465_vm0, 0.0, %v4734_v53  ;;  %v1158_v13 = vpop.permute.xlu0 %1157  ;;  %vm1347_vm15 = vcmask 793600  }
 0x37a   : > { %v946_v2 = vmul.f32 %v4912_v20, %v933_v19  ;;  %v997_v24 = vmul.f32 %v4856_v46, %v988_v27  ;;  %v926_v45 = vadd.f32 %v924_v48, %v899_v3 }
 0x37c   : > { %v4811_v4 = vpop.permute.xlu1 %957  ;;  %v953_v59 = vadd.f32 %v951_v54, %v926_v45  ;;  %v7287_v54 = vld [vmem:[#allocation57_spill] sm:$0xff]  ;;  %v7290_v45 = vld [vmem:[#allocation36_spill] sm:$0xff] }
 0x37d   : > { %v959_v16 = vsel %vm552_vm1, %v4728_v14, %v4811_v4  ;;  %v1014_v4 = vsel %vm589_vm3, 0.0, %v4740_v5  ;;  %v873_v14 = vadd.f32 %v871_v43, %v846_v0  ;;  %v952_v0 = vmul.f32 %v4738_v21, %v946_v2 }
 0x37e   : > { %v972_v6 = vmul.f32 %v4915_v32, %v959_v16  ;;  %v1023_v19 = vmul.f32 %v4860_v31, %v1014_v4  ;;  %v1003_v43 = vmul.f32 %v4754_v39, %v997_v24  ;;  %v979_v2 = vadd.f32 %v977_v56, %v953_v59  ;;  %v7292_v59 = vld [vmem:[#allocation38_spill] sm:$0xff] }
 0x380   : > { %v4815_v57 = vpop.permute.xlu1 %983  ;;  %v1029_v48 = vmul.f32 %v4762_v36, %v1023_v19 }
 0x381   : > { %v985_v18 = vsel %vm465_vm0, %v4734_v53, %v4815_v57  ;;  %v1041_v57 = vsel %vm7065_vm12, 0.0, %v4744_v42  ;;  %v900_v53 = vadd.f32 %v898_v52, %v873_v14  ;;  %v978_v52 = vmul.f32 %v4746_v41, %v972_v6  ;;  %v7284_v14 = vld [vmem:[#allocation14_spill] sm:$0xff]  ;;  %v7286_v6 = vld [vmem:[#allocation33_spill] sm:$0xff] }
 0x382   : > { %v998_v7 = vmul.f32 %v4923_v44, %v985_v18  ;;  %v1050_v23 = vmul.f32 %v4867_v17, %v1041_v57 }
 0x384   : > { %v4832_v25 = vpop.permute.xlu1 %1009  ;;  %v1004_v16 = vmul.f32 %v4754_v39, %v998_v7  ;;  %v5026_v39 = vrot.slane %v4906_v8, %v7284_v14  ;;  %v1056_v3 = vmul.f32 %v7286_v6, %v1050_v23  ;;  %v7293_v23 = vld [vmem:[#allocation49_spill] sm:$0xff] }
 0x385   : > { %v1011_v12 = vsel %vm589_vm3, %v4740_v5, %v4832_v25  ;;  %v1068_v25 = vsel %vm7064_vm13, 0.0, %v4750_v40  ;;  %v927_v5 = vadd.f32 %v925_v63, %v900_v53  ;;  %v1005_v63 = vadd.f32 %v1003_v43, %v979_v2 }
 0x386   : > { %v1024_v21 = vmul.f32 %v4927_v29, %v1011_v12  ;;  %v1077_v28 = vmul.f32 %v4876_v47, %v1068_v25  ;;  %7285 = vst [vmem:[#allocation14_spill] sm:$0xff] %v5026_v39  ;;  %v7291_v25 = vld [vmem:[#allocation28_spill] sm:$0xff] }
 0x387   : > { %v1031_v7 = vadd.f32 %v1029_v48, %v1005_v63  ;;  %v5047_v48 = vrot.slane %v4906_v8, %v4519_v10  ;;  %v5054_v63 = vrot.slane %v7293_v23, %v4540_v26 }
 0x388   : > { %v4872_v11 = vpop.permute.xlu1 %1035  ;;  %v1083_v56 = vmul.f32 %v7290_v45, %v1077_v28 }
 0x389   : > { %v1038_v15 = vsel %vm7065_vm12, %v4744_v42, %v4872_v11  ;;  %v1094_v11 = vsel %vm608_vm2, 0.0, %v4756_v38  ;;  %v954_v42 = vadd.f32 %v952_v0, %v927_v5  ;;  %v7289_v0 = vld [vmem:[#allocation50_spill] sm:$0xff]  ;;  %v1122_v5 = vmul.f32 %v5026_v39, %v7291_v25  ;;  %7296 = vst [vmem:[#allocation57_spill] sm:$0xff] %v5047_v48 }
 0x38a   : > { %v1051_v27 = vmul.f32 %v4935_v51, %v1038_v15  ;;  %v1103_v24 = vmul.f32 %v7287_v54, %v1094_v11  ;;  %vm7066_vm12 = vcmask 932864  }
 0x38b   : > { %v980_v4 = vadd.f32 %v978_v52, %v954_v42  ;;  %v1134_v52 = vpop.permute.xlu0 %1133 }
 0x38c   : > { %v4917_v9 = vpop.permute.xlu1 %1062  ;;  %v1057_v57 = vmul.f32 %v7286_v6, %v1051_v27  ;;  %v1109_v43 = vmul.f32 %v7292_v59, %v1103_v24  ;;  %v7295_v27 = vld [vmem:[#allocation41_spill] sm:$0xff]  ;;  %v5058_v6 = vrot.slane %v4906_v8, %v4540_v26  ;;  %v5068_v24 = vld [vmem:[%s7269_s4 + $0x28] sm:$0xff] }
 0x38d   : > { %v1065_v33 = vsel %vm7064_vm13, %v4750_v40, %v4917_v9  ;;  %v1030_v40 = vmul.f32 %v4762_v36, %v1024_v21  ;;  %v1006_v12 = vadd.f32 %v1004_v16, %v980_v4  ;;  %v1058_v21 = vadd.f32 %v1056_v3, %v1031_v7  ;;  %v5063_v3 = vld [vmem:[%s7269_s4 + $0x20] sm:$0xff] }
 0x38e   : > { %v1078_v9 = vmul.f32 %v4949_v37, %v1065_v33  ;;  %v5041_v33 = vrot.slane %v7293_v23, %v4519_v10  ;;  %vm7071_vm13 = vcmask 1031168   ;;  %7299 = vst [vmem:[#allocation36_spill] sm:$0xff] %v5058_v6 }
 0x38f   : > { %v1032_v19 = vadd.f32 %v1030_v40, %v1006_v12  ;;  %v1085_v28 = vadd.f32 %v1083_v56, %v1058_v21  ;;  %v1138_v40 = vsel %vm637_vm4, %v1134_v52, 0.0  ;;  %v5076_v56 = vrot.slane %v7293_v23, %v4553_v60 }
 0x390   : > { %v1090_v62 = vpop.permute.xlu1 %1089  ;;  %v1084_v15 = vmul.f32 %v7290_v45, %v1078_v9  ;;  %7294 = vst [vmem:[#allocation33_spill] sm:$0xff] %v5041_v33 }
 0x391   : > { %v1091_v18 = vsel %vm608_vm2, %v4756_v38, %v1090_v62  ;;  %v7288_v62 = vld [vmem:[#allocation27_spill] sm:$0xff]  ;;  %v1059_v11 = vadd.f32 %v1057_v57, %v1032_v19  ;;  %v1111_v12 = vadd.f32 %v1109_v43, %v1085_v28  ;;  %7300 = vst [vmem:[#allocation28_spill] sm:$0xff] %v5076_v56 }
 0x392   : > { %v1104_v53 = vmul.f32 %v4960_v1, %v1091_v18  ;;  %v1121_v36 = vmul.f32 %v7289_v0, %v7288_v62  ;;  %v7297_v18 = vld [vmem:[#allocation31_spill] sm:$0xff]  ;;  %7298 = vst [vmem:[#allocation27_spill] sm:$0xff] %v5054_v63 }
 0x393   : > { %v1135_v4 = vsel %vm637_vm4, %v7297_v18, %v1134_v52  ;;  %v1086_v9 = vadd.f32 %v1084_v15, %v1059_v11  ;;  %v1148_v15 = vmul.f32 %v5047_v48, %v1138_v40  ;;  %v5081_v52 = vrot.slane %v4906_v8, %v4553_v60 }
 0x394   : > { %v4976_v58 = vpop.permute.xlu1 %1370  ;;  %v1110_v42 = vmul.f32 %v7292_v59, %v1104_v53  ;;  %v1127_v2 = vmul.f32 %v7295_v27, %v1121_v36  ;;  %v1128_v36 = vmul.f32 %v7295_v27, %v1122_v5  ;;  %v1147_v7 = vmul.f32 %v5041_v33, %v1135_v4  ;;  %v7304_v59 = vld [vmem:[#allocation32_spill] sm:$0xff]  ;;  %v7308_v27 = vld [vmem:[#allocation43_spill] sm:$0xff]  ;;  %v7309_v4 = vld [vmem:[#allocation34_spill] sm:$0xff] }
 0x395   : > { %7301 = vst [vmem:[#allocation38_spill] sm:$0xff] %v5081_v52  ;;  %v5098_v8 = vrot.slane %v5063_v3, %v4476_v50 }
 0x396   : > { %v1112_v45 = vadd.f32 %v1110_v42, %v1086_v9  ;;  %v1129_v11 = vadd.f32 %v1127_v2, %v1111_v12  ;;  %v5102_v42 = vrot.slane %v5068_v24, %v4476_v50  ;;  %v1153_v28 = vmul.f32 %v7308_v27, %v1147_v7 }
 0x397   : > { %7305 = vst [vmem:[#allocation31_spill] sm:$0xff] %v5098_v8  ;;  %v5116_v50 = vrot.slane %v5068_v24, %v4485_v55 }
 0x398   : > { %v4998_v34 = vpop.permute.xlu1 %1397  ;;  %7306 = vst [vmem:[#allocation32_spill] sm:$0xff] %v5102_v42  ;;  %v1130_v18 = vadd.f32 %v1128_v36, %v1112_v45  ;;  %v7312_v45 = vld [vmem:[#allocation9_spill] sm:$0xff] }
 0x399   : > { %7310 = vst [vmem:[#allocation43_spill] sm:$0xff] %v5116_v50 }
 0x39c   : > { %v1160_v41 = vpop.permute.xlu1 %1159 }
 0x39d   : > { %v1162_v57 = vsel %vm7071_vm13, %v1158_v13, %v1160_v41  ;;  %v1165_v53 = vsel %vm7071_vm13, %v1160_v41, 0.0  ;;  %v5085_v41 = vrot.slane %v5063_v3, %v4474_v49  ;;  %v5089_v13 = vrot.slane %v5068_v24, %v4474_v49 }
 0x39e   : > { %v1174_v5 = vmul.f32 %v5054_v63, %v1162_v57  ;;  %v1175_v21 = vmul.f32 %v5058_v6, %v1165_v53  ;;  %v5106_v49 = vrot.slane %v5063_v3, %v4485_v55  ;;  %v1154_v57 = vmul.f32 %v7308_v27, %v1148_v15  ;;  %v7311_v53 = vld [vmem:[#allocation29_spill] sm:$0xff]  ;;  %v7417_v63 = vld [vmem:[#allocation51_spill] sm:$0xff] }
 0x39f   : > { %7302 = vst [vmem:[#allocation49_spill] sm:$0xff] %v5085_v41  ;;  %7303 = vst [vmem:[#allocation41_spill] sm:$0xff] %v5089_v13  ;;  %v5132_v15 = vrot.slane %v5068_v24, %v7312_v45  ;;  %vm7082_vm13 = vcmask 801792  }
 0x3a0   : > { %v1187_v38 = vpop.permute.xlu1 %1186  ;;  %7307 = vst [vmem:[#allocation63_spill] sm:$0xff] %v5106_v49  ;;  %v1180_v7 = vmul.f32 %v7311_v53, %v1174_v5  ;;  %v1181_v36 = vmul.f32 %v7311_v53, %v1175_v21  ;;  %v7316_v21 = vld [vmem:[#allocation30_spill] sm:$0xff] }
 0x3a1   : > { %v1189_v43 = vsel %vm7066_vm12, %v7304_v59, %v1187_v38  ;;  %v1192_v23 = vsel %vm7066_vm12, %v1187_v38, 0.0  ;;  %vm7081_vm12 = vcmask 900096   ;;  %v5123_v59 = vrot.slane %v5063_v3, %v7312_v45  ;;  %7315 = vst [vmem:[#allocation29_spill] sm:$0xff] %v5132_v15 }
 0x3a2   : > { %v1201_v9 = vmul.f32 %v5076_v56, %v1189_v43  ;;  %v1202_v12 = vmul.f32 %v5081_v52, %v1192_v23  ;;  %v7314_v23 = vld [vmem:[#allocation35_spill] sm:$0xff]  ;;  %v1155_v52 = vadd.f32 %v1153_v28, %v1129_v11  ;;  %v1156_v56 = vadd.f32 %v1154_v57, %v1130_v18 }
 0x3a3   : > { %7313 = vst [vmem:[#allocation34_spill] sm:$0xff] %v5123_v59  ;;  %v5143_v11 = vrot.slane %v5063_v3, %v7284_v14  ;;  %v5147_v28 = vrot.slane %v5068_v24, %v7284_v14  ;;  %v5158_v14 = vrot.slane %v5063_v3, %v4519_v10 }
 0x3a4   : > { %v1214_v16 = vpop.permute.xlu1 %1213  ;;  %v1207_v27 = vmul.f32 %v7316_v21, %v1201_v9  ;;  %v1208_v53 = vmul.f32 %v7316_v21, %v1202_v12  ;;  %v1182_v18 = vadd.f32 %v1180_v7, %v1155_v52  ;;  %v1183_v9 = vadd.f32 %v1181_v36, %v1156_v56  ;;  %v7320_v12 = vld [vmem:[#allocation44_spill] sm:$0xff]  ;;  %v7321_v21 = vld [vmem:[#allocation39_spill] sm:$0xff]  ;;  %v7323_v56 = vld [vmem:[#allocation45_spill] sm:$0xff] }
 0x3a5   : > { %v1215_v40 = vsel %vm656_vm5, %v7309_v4, %v1214_v16  ;;  %v1218_v38 = vsel %vm656_vm5, %v1214_v16, 0.0  ;;  %7318 = vst [vmem:[#allocation9_spill] sm:$0xff] %v5143_v11  ;;  %7319 = vst [vmem:[#allocation35_spill] sm:$0xff] %v5147_v28  ;;  %v7324_v36 = vld [vmem:[#allocation40_spill] sm:$0xff] }
 0x3a6   : > { %v1227_v16 = vmul.f32 %v5085_v41, %v1215_v40  ;;  %v1228_v43 = vmul.f32 %v5089_v13, %v1218_v38  ;;  %v7317_v40 = vld [vmem:[#allocation37_spill] sm:$0xff]  ;;  %v1210_v41 = vadd.f32 %v1208_v53, %v1183_v9  ;;  %7322 = vst [vmem:[#allocation30_spill] sm:$0xff] %v5158_v14  ;;  %v1418_v53 = vpop.permute.xlu0 %1417 }
 0x3a8   : > { %v1240_v19 = vpop.permute.xlu1 %1239  ;;  %v1233_v57 = vmul.f32 %v7320_v12, %v1227_v16  ;;  %v1234_v45 = vmul.f32 %v7320_v12, %v1228_v43 }
 0x3a9   : > { %v1241_v4 = vsel %vm675_vm6, %v7314_v23, %v1240_v19  ;;  %v1244_v55 = vsel %vm675_vm6, %v1240_v19, 0.0 }
 0x3aa   : > { %v1253_v23 = vmul.f32 %v5098_v8, %v1241_v4  ;;  %v1254_v19 = vmul.f32 %v5102_v42, %v1244_v55  ;;  %v1209_v8 = vadd.f32 %v1207_v27, %v1182_v18  ;;  %v5169_v27 = vrot.slane %v5068_v24, %v4519_v10 }
 0x3ab   : > { %v1236_v18 = vadd.f32 %v1234_v45, %v1210_v41  ;;  %v5184_v41 = vrot.slane %v5068_v24, %v4540_v26 }
 0x3ac   : > { %v1266_v2 = vpop.permute.xlu1 %1265  ;;  %v1259_v52 = vmul.f32 %v7323_v56, %v1253_v23  ;;  %v1260_v7 = vmul.f32 %v7323_v56, %v1254_v19  ;;  %7325 = vst [vmem:[#allocation37_spill] sm:$0xff] %v5169_v27  ;;  %v7326_v23 = vld [vmem:[#allocation46_spill] sm:$0xff] }
 0x3ad   : > { %v1267_v38 = vsel %vm694_vm7, %v7317_v40, %v1266_v2  ;;  %v1270_v13 = vsel %vm694_vm7, %v1266_v2, 0.0  ;;  %7329 = vst [vmem:[#allocation39_spill] sm:$0xff] %v5184_v41 }
 0x3ae   : > { %v1279_v2 = vmul.f32 %v5106_v49, %v1267_v38  ;;  %v1280_v4 = vmul.f32 %v5116_v50, %v1270_v13  ;;  %v1235_v38 = vadd.f32 %v1233_v57, %v1209_v8  ;;  %v5180_v8 = vrot.slane %v5063_v3, %v4540_v26  ;;  %v7330_v57 = vld [vmem:[#allocation47_spill] sm:$0xff] }
 0x3b0   : > { %v1292_v5 = vpop.permute.xlu1 %1291  ;;  %v1285_v9 = vmul.f32 %v7326_v23, %v1279_v2  ;;  %v1286_v19 = vmul.f32 %v7326_v23, %v1280_v4  ;;  %v1261_v10 = vadd.f32 %v1259_v52, %v1235_v38  ;;  %7328 = vst [vmem:[#allocation44_spill] sm:$0xff] %v5180_v8  ;;  %v7331_v38 = vld [vmem:[#allocation48_spill] sm:$0xff] }
 0x3b1   : > { %v1294_v55 = vsel %vm7081_vm12, %v7321_v21, %v1292_v5  ;;  %v1297_v40 = vsel %vm7081_vm12, %v1292_v5, 0.0  ;;  %vm7083_vm12 = vcmask 785408  }
 0x3b2   : > { %v1306_v43 = vmul.f32 %v5123_v59, %v1294_v55  ;;  %v1307_v5 = vmul.f32 %v5132_v15, %v1297_v40  ;;  %v7327_v55 = vld [vmem:[#allocation42_spill] sm:$0xff]  ;;  %v1287_v4 = vadd.f32 %v1285_v9, %v1261_v10 }
 0x3b4   : > { %v1319_v42 = vpop.permute.xlu1 %1318  ;;  %v1312_v45 = vmul.f32 %v7330_v57, %v1306_v43  ;;  %v1313_v2 = vmul.f32 %v7330_v57, %v1307_v5  ;;  %v1445_v43 = vpop.permute.xlu0 %1444 }
 0x3b5   : > { %v1321_v13 = vsel %vm7082_vm13, %v7324_v36, %v1319_v42  ;;  %v1324_v16 = vsel %vm7082_vm13, %v1319_v42, 0.0  ;;  %v1262_v36 = vadd.f32 %v1260_v7, %v1236_v18  ;;  %vm1401_vm13 = vcmask 777216  }
 0x3b6   : > { %v1333_v21 = vmul.f32 %v5143_v11, %v1321_v13  ;;  %v1334_v42 = vmul.f32 %v5147_v28, %v1324_v16 }
 0x3b7   : > { %v1288_v13 = vadd.f32 %v1286_v19, %v1262_v36  ;;  %v5199_v19 = vrot.slane %v5063_v3, %v4553_v60 }
 0x3b8   : > { %v1346_v12 = vpop.permute.xlu1 %1345  ;;  %v1339_v18 = vmul.f32 %v7331_v38, %v1333_v21  ;;  %v1340_v23 = vmul.f32 %v7331_v38, %v1334_v42  ;;  %v1314_v21 = vadd.f32 %v1312_v45, %v1287_v4  ;;  %v3879_v4 = vld [vmem:[%s7269_s4 + $0x38] ss:$0 sm:$0xff] }
 0x3b9   : > { %v1348_v40 = vsel %vm1347_vm15, %v7327_v55, %v1346_v12  ;;  %v1351_v56 = vsel %vm1347_vm15, %v1346_v12, 0.0  ;;  %7332 = vst [vmem:[#allocation45_spill] sm:$0xff] %v5199_v19  ;;  %v5203_v55 = vrot.slane %v5068_v24, %v4553_v60  ;;  %v1315_v42 = vadd.f32 %v1313_v2, %v1288_v13  ;;  %v3878_v2 = vld [vmem:[%s7269_s4 + $0x30] ss:$0 sm:$0xff]  ;;  %v1425_v13 = vpop.permute.xlu0 %1424 }
 0x3ba   : > { %v1360_v16 = vmul.f32 %v5158_v14, %v1348_v40  ;;  %v1361_v52 = vmul.f32 %v5169_v27, %v1351_v56  ;;  %v7334_v40 = vld [vmem:[#allocation61_spill] sm:$0xff]  ;;  %v1341_v36 = vadd.f32 %v1339_v18, %v1314_v21 }
 0x3bb   : > { %7333 = vst [vmem:[#allocation40_spill] sm:$0xff] %v5203_v55  ;;  %v1342_v57 = vadd.f32 %v1340_v23, %v1315_v42 }
 0x3bc   : > { %v1373_v7 = vpop.permute.xlu1 %1372  ;;  %v1366_v56 = vmul.f32 %v7334_v40, %v1360_v16 }
 0x3bd   : > { %v1375_v26 = vsel %vm7083_vm12, %v4976_v58, %v1373_v7  ;;  %v1378_v12 = vsel %vm7083_vm12, %v1373_v7, 0.0  ;;  %v1367_v58 = vmul.f32 %v7334_v40, %v1361_v52  ;;  %vm7088_vm12 = vcmask 769024  }
 0x3be   : > { %v1387_v5 = vmul.f32 %v5180_v8, %v1375_v26  ;;  %v1388_v9 = vmul.f32 %v5184_v41, %v1378_v12 }
 0x3bf   : > { %v1369_v16 = vadd.f32 %v1367_v58, %v1342_v57 }
 0x3c0   : > { %v1400_v10 = vpop.permute.xlu1 %1399  ;;  %v1393_v38 = vmul.f32 %v4988_v35, %v1387_v5  ;;  %v1394_v60 = vmul.f32 %v4988_v35, %v1388_v9 }
 0x3c1   : > { %v1402_v7 = vsel %vm1401_vm13, %v4998_v34, %v1400_v10  ;;  %v1405_v3 = vsel %vm1401_vm13, %v1400_v10, 0.0  ;;  %v1368_v34 = vadd.f32 %v1366_v56, %v1341_v36 }
 0x3c2   : > { %v1414_v24 = vmul.f32 %v5199_v19, %v1402_v7  ;;  %v1415_v45 = vmul.f32 %v5203_v55, %v1405_v3  ;;  %v1396_v5 = vadd.f32 %v1394_v60, %v1369_v16  ;;  %v1454_v3 = vpop.permute.xlu0 %1453 }
 0x3c3   : > { %v1395_v12 = vadd.f32 %v1393_v38, %v1368_v34 }
 0x3c4   : > { %v1420_v52 = vmul.f32 %v1418_v53, %v1414_v24  ;;  %v1421_v18 = vmul.f32 %v1418_v53, %v1415_v45  ;;  %v1427_v23 = vpop.permute.xlu1 %1426 }
 0x3c5   : > { %v1429_v35 = vsel %vm7088_vm12, %v1425_v13, %v1427_v23  ;;  %v1432_v26 = vsel %vm7088_vm12, %v1427_v23, 0.0  ;;  %vm7140_vm12 = vcmask 64512  }
 0x3c6   : > { %v1441_v9 = vmul.f32 %v3878_v2, %v1429_v35  ;;  %v1442_v21 = vmul.f32 %v3879_v4, %v1432_v26  ;;  %v1422_v10 = vadd.f32 %v1420_v52, %v1395_v12  ;;  %v1423_v7 = vadd.f32 %v1421_v18, %v1396_v5 }
 0x3c8   : > { %v1447_v42 = vmul.f32 %v1445_v43, %v1441_v9  ;;  %v1448_v40 = vmul.f32 %v1445_v43, %v1442_v21 }
 0x3ca   : > { %v1449_v55 = vadd.f32 %v1447_v42, %v1422_v10  ;;  %v1450_v19 = vadd.f32 %v1448_v40, %v1423_v7 }
 0x3cc   : > { %v1456_v56 = vadd.f32 %v1454_v3, %v1449_v55  ;;  %v1457_v58 = vadd.f32 %v1454_v3, %v1450_v19  ;;  %v544_v19 = vld [vmem:[%s7335_s9] sm:$0xf]  ;;  %v7336_v55 = vmov 0  }
 0x3ce   : > { %v3880_v36 = vmul.f32 -1.442695, %v1456_v56  ;;  %v3881_v53 = vmul.f32 -1.442695, %v1457_v58 }
 0x3d0   : > { %4130 = vpow2.f32 %v3880_v36 }
 0x3d1   : > { %4132 = vpow2.f32 %v3881_v53 }
 0x3d5   : > { %v1477_v52 = vpop.permute.xlu1 %1476 }
 0x3da   : > { %v4131_v57 = vpop.eup %4130 }
 0x3db   : > { %v4133_v24 = vpop.eup %4132  ;;  %v1464_v45 = vadd.f32 1.0, %v4131_v57 }
 0x3dc   : > { %v1465_v38 = vadd.f32 1.0, %v4133_v24  ;;  %v7337_v24 = vld [vmem:[#allocation6_spill] sm:$0xff] }
 0x3dd   : > { %4134 = vrcp.f32 %v1464_v45 }
 0x3de   : > { %4136 = vrcp.f32 %v1465_v38  ;;  %v7339_v38 = vld [vmem:[#allocation7_spill] sm:$0xff] }
 0x3e7   : > { %v4135_v60 = vpop.eup %4134 }
 0x3e8   : > { %v4137_v2 = vpop.eup %4136  ;;  %v1470_v43 = vmul.f32 %v4135_v60, %v1456_v56 }
 0x3e9   : > { %v1471_v4 = vmul.f32 %v4137_v2, %v1457_v58 }
 0x3ea   : > { %v1472_v13 = vpack.c.bf16 %v1470_v43, %v1470_v43  ;;  %v7345_v43 = vmov 2  }
 0x3eb   : > { %v1473_v34 = vpack.c.bf16 %v1471_v4, %v1471_v4  ;;  %v7346_v4 = vmov 1  }
 0x3ec   : > { %v1484_v16 = vsel %vm7143_vm8, %v1472_v13, 0  ;;  %v7347_v13 = vmov 3  }
 0x3ed   : > { %3882 = vmatprep.subr.msk.bf16.mxu0 %vm7143_vm8, %v1473_v34  ;;  %v7348_v34 = vmov 14  }
 0x3ee   : > { %1490 = vmatpush1.bf16.msra.mxu0 %v1484_v16  ;;  %v7349_v16 = vmov 4  }
 0x3f1   : > { %3883 = vmatmul.mubr.msk.bf16.vlgmr.msra.gmra.mrb[4].mxu0 %vm7140_vm12, %v544_v19  ;;  %v7350_v19 = vmov 15  }
 0x3f2   : > { %1700 = vmatprep.mubr.bf16.mxu0 %v7336_v55 }
 0x4c4   : > { %v1523_v18 = vpop.f32.mrb[4].mxu0 }
 0x4c5   : > { %v1524_v23 = vadd.f32 %v1523_v18, %v1477_v52  ;;  %v1525_v35 = vpop.f32.mrb[5].mxu0  ;;  %v7352_v18 = vmov 6  }
 0x4c6   : > { %v1526_v26 = vadd.f32 %v1525_v35, %v1477_v52  ;;  %v1527_v12 = vpop.f32.mrb[6].mxu0  ;;  %v7351_v52 = vmov 5   ;;  %v7354_v35 = vmov 8  }
 0x4c7   : > { %v3884_v5 = vmul.f32 -1.442695, %v1524_v23  ;;  %v1528_v9 = vpop.f32.mrb[7].mxu0  ;;  %v7356_v12 = vmov 10  }
 0x4c8   : > { %v3885_v21 = vmul.f32 -1.442695, %v1526_v26  ;;  %v7358_v9 = vmov 12  }
 0x4c9   : > { %4138 = vpow2.f32 %v3884_v5  ;;  %v7357_v5 = vmov 11  }
 0x4ca   : > { %4140 = vpow2.f32 %v3885_v21  ;;  %v7359_v21 = vmov 13  }
 0x4d3   : > { %v4139_v42 = vpop.eup %4138 }
 0x4d4   : > { %v4141_v40 = vpop.eup %4140  ;;  %v1536_v10 = vadd.f32 1.0, %v4139_v42  ;;  %v7360_v42 = vmov 16  }
 0x4d5   : > { %v1537_v7 = vadd.f32 1.0, %v4141_v40  ;;  %v7361_v40 = vmov 17  }
 0x4d6   : > { %4142 = vrcp.f32 %v1536_v10  ;;  %v7362_v10 = vmov 18  }
 0x4d7   : > { %4144 = vrcp.f32 %v1537_v7  ;;  %v7363_v7 = vmov 19  }
 0x4e0   : > { %v4143_v3 = vpop.eup %4142 }
 0x4e1   : > { %v4145_v56 = vpop.eup %4144  ;;  %v1542_v58 = vmul.f32 %v4143_v3, %v1524_v23  ;;  %v7353_v23 = vmov 7  }
 0x4e2   : > { %v1543_v36 = vmul.f32 %v4145_v56, %v1526_v26  ;;  %v7355_v26 = vmov 9  }
 0x4e3   : > { %v1544_v53 = vadd.f32 %v1542_v58, %v7288_v62  ;;  %v5275_v62 = vld [vmem:[%s7215_s7 + $0x8] sm:$0xff]  ;;  %v7364_v58 = vmov 20  }
 0x4e4   : > { %v1545_v57 = vadd.f32 %v1543_v36, %v7291_v25  ;;  %v3887_v25 = vld [vmem:[%s7216_s6 + $0x8] sm:$0xff] }
 0x4e5   : > { %v5232_v45 = vadd.f32 %v1544_v53, %v7337_v24 }
 0x4e6   : > { %v5235_v60 = vadd.f32 %v1545_v57, %v7339_v38 }
 0x4e7   : > { %7338 = vst [vmem:[#allocation46_spill] sm:$0xff] %v5232_v45  ;;  %1604 = vrot.lane.b32.xlu0 %v5232_v45, %s7341_s18  ;;  %1562 = vrot.lane.b32.xlu1 %v5232_v45, %s7241_s20 }
 0x4e8   : > { %7340 = vst [vmem:[#allocation42_spill] sm:$0xff] %v5235_v60  ;;  %v3945_v2 = vpack.c.bf16 %v5235_v60, %v5232_v45 }
 0x4ea   : > { %3734 = vst [vmem:[%s4400_s16 + $0x10] sm:$0xff] %v3945_v2 }
 0x4eb   : > { %1564 = vrot.lane.b32.xlu0 %v5235_v60, %s7241_s20  ;;  %1572 = vrot.lane.b32.xlu1 %v5232_v45, %s7243_s30 }
 0x4ef   : > { %1574 = vrot.lane.b32.xlu0 %v5235_v60, %s7243_s30  ;;  %1582 = vrot.lane.b32.xlu1 %v5232_v45, %s7091_s19 }
 0x4f3   : > { %1584 = vrot.lane.b32.xlu0 %v5235_v60, %s7091_s19  ;;  %1592 = vrot.lane.b32.xlu1 %v5232_v45, %s7089_s23  ;;  %s7391_s19 = smov 15  }
 0x4f7   : > { %1594 = vrot.lane.b32.xlu0 %v5235_v60, %s7089_s23  ;;  %1614 = vrot.lane.b32.xlu1 %v5232_v45, %s7342_s15  ;;  %s7392_s23 = smov 14  }
 0x4fb   : > { %1624 = vrot.lane.b32.xlu0 %v5232_v45, %s7343_s24  ;;  %1606 = vrot.lane.b32.xlu1 %v5235_v60, %s7341_s18 }
 0x4ff   : > { %1626 = vrot.lane.b32.xlu0 %v5235_v60, %s7343_s24  ;;  %1616 = vrot.lane.b32.xlu1 %v5235_v60, %s7342_s15 }
 0x503   : > { %1636 = vrot.lane.b32.xlu0 %v5235_v60, %s7344_s25  ;;  %1634 = vrot.lane.b32.xlu1 %v5232_v45, %s7344_s25 }
 0x507   : > { %1737 = vperm.xlu0 %4033, %v5275_v62   ;;  %1656 = vperm.xlu1 %4034, %v3887_v25   ;;  %v7365_v25 = vmov 21  }
 0x50b   : > { %4036 = vset.pattern.permute.xlu0 %v7345_v43  ;;  %4035 = vset.pattern.permute.xlu1 %v7346_v4 }
 0x50c   : > { %1773 = vperm.xlu0 %4036, %v5275_v62   ;;  %1755 = vperm.xlu1 %4035, %v5275_v62  }
 0x510   : > { %4037 = vset.pattern.permute.xlu0 %v7347_v13  ;;  %4048 = vset.pattern.permute.xlu1 %v7348_v34 }
 0x511   : > { %1791 = vperm.xlu0 %4037, %v5275_v62   ;;  %1981 = vperm.xlu1 %4048, %v5275_v62  }
 0x515   : > { %4038 = vset.pattern.permute.xlu0 %v7349_v16  ;;  %4049 = vset.pattern.permute.xlu1 %v7350_v19 }
 0x516   : > { %1809 = vperm.xlu0 %4038, %v5275_v62   ;;  %1999 = vperm.xlu1 %4049, %v5275_v62  }
 0x51a   : > { %4039 = vset.pattern.permute.xlu0 %v7351_v52  ;;  %4060 = vset.pattern.permute.xlu1 %v7336_v55 }
 0x51b   : > { %1827 = vperm.xlu0 %4039, %v5275_v62  }
 0x51f   : > { %4040 = vset.pattern.permute.xlu0 %v7352_v18 }
 0x520   : > { %1845 = vperm.xlu0 %4040, %v5275_v62  }
 0x524   : > { %4041 = vset.pattern.permute.xlu0 %v7353_v23 }
 0x525   : > { %1863 = vperm.xlu0 %4041, %v5275_v62  }
 0x529   : > { %4042 = vset.pattern.permute.xlu0 %v7354_v35 }
 0x52a   : > { %1881 = vperm.xlu0 %4042, %v5275_v62  }
 0x52e   : > { %4043 = vset.pattern.permute.xlu0 %v7355_v26 }
 0x52f   : > { %1899 = vperm.xlu0 %4043, %v5275_v62  }
 0x533   : > { %4044 = vset.pattern.permute.xlu0 %v7356_v12  ;;  %v7369_v12 = vld [vmem:[#allocation10_spill] sm:$0xff] }
 0x534   : > { %1917 = vperm.xlu0 %4044, %v5275_v62  }
 0x538   : > { %4045 = vset.pattern.permute.xlu0 %v7357_v5 }
 0x539   : > { %1935 = vperm.xlu0 %4045, %v5275_v62  }
 0x53d   : > { %4046 = vset.pattern.permute.xlu0 %v7358_v9  ;;  %v7368_v9 = vld [vmem:[#allocation13_spill] sm:$0xff] }
 0x53e   : > { %1945 = vperm.xlu0 %4046, %v5275_v62  }
 0x542   : > { %4047 = vset.pattern.permute.xlu0 %v7359_v21  ;;  %v7367_v21 = vld [vmem:[#allocation12_spill] sm:$0xff] }
 0x543   : > { %1963 = vperm.xlu0 %4047, %v5275_v62  }
 0x547   : > { %4050 = vset.pattern.permute.xlu0 %v7360_v42 }
 0x548   : > { %2017 = vperm.xlu0 %4050, %v5275_v62  }
 0x54c   : > { %4051 = vset.pattern.permute.xlu0 %v7361_v40 }
 0x54d   : > { %2035 = vperm.xlu0 %4051, %v5275_v62  }
 0x551   : > { %4052 = vset.pattern.permute.xlu0 %v7362_v10  ;;  %v7366_v10 = vld [vmem:[#allocation11_spill] sm:$0xff] }
 0x552   : > { %2053 = vperm.xlu0 %4052, %v5275_v62  }
 0x556   : > { %4053 = vset.pattern.permute.xlu0 %v7363_v7 }
 0x557   : > { %2071 = vperm.xlu0 %4053, %v5275_v62  }
 0x559   : > { %v1605_v3 = vpop.permute.xlu0 %1604  ;;  %v1563_v56 = vpop.permute.xlu1 %1562 }
 0x55a   : > { %v1569_v38 = vsel %vm552_vm1, 0.0, %v1563_v56 }
 0x55b   : > { %4054 = vset.pattern.permute.xlu0 %v7364_v58  ;;  %v1570_v26 = vmul.f32 %v1569_v38, %v7369_v12  ;;  %v7372_v12 = vld [vmem:[#allocation17_spill] sm:$0xff] }
 0x55c   : > { %2089 = vperm.xlu0 %4054, %v5275_v62  }
 0x55d   : > { %v1565_v36 = vpop.permute.xlu0 %1564  ;;  %v1573_v53 = vpop.permute.xlu1 %1572 }
 0x55e   : > { %v1579_v57 = vsel %vm465_vm0, 0.0, %v1573_v53  ;;  %v1566_v2 = vsel %vm552_vm1, %v1563_v56, %v1565_v36 }
 0x55f   : > { %v1580_v40 = vmul.f32 %v1579_v57, %v7366_v10  ;;  %v1571_v58 = vmul.f32 %v1566_v2, %v7367_v21 }
 0x560   : > { %4055 = vset.pattern.permute.xlu0 %v7365_v25 }
 0x561   : > { %v1575_v24 = vpop.permute.xlu0 %1574  ;;  %v1583_v7 = vpop.permute.xlu1 %1582  ;;  %v1644_v36 = vpack.c.bf16 %v1580_v40, %v1570_v26 }
 0x562   : > { %v1576_v42 = vsel %vm465_vm0, %v1573_v53, %v1575_v24  ;;  %v1589_v57 = vsel %vm589_vm3, 0.0, %v1583_v7  ;;  %v7370_v53 = vld [vmem:[#allocation15_spill] sm:$0xff] }
 0x563   : > { %v1581_v5 = vmul.f32 %v1576_v42, %v7368_v9  ;;  %v7371_v9 = vld [vmem:[#allocation16_spill] sm:$0xff] }
 0x565   : > { %v1585_v35 = vpop.permute.xlu0 %1584  ;;  %v1593_v23 = vpop.permute.xlu1 %1592  ;;  %v1645_v18 = vpack.c.bf16 %v1581_v5, %v1571_v58  ;;  %v7373_v5 = vld [vmem:[#allocation18_spill] sm:$0xff] }
 0x566   : > { %v1599_v25 = vsel %vm608_vm2, 0.0, %v1593_v23  ;;  %v1586_v56 = vsel %vm589_vm3, %v1583_v7, %v1585_v35  ;;  %v1590_v26 = vmul.f32 %v1589_v57, %v7373_v5 }
 0x567   : > { %1668 = vmatprep.subr.bf16.mxu0 %v1645_v18  ;;  %v1600_v2 = vmul.f32 %v1599_v25, %v7370_v53  ;;  %v1591_v38 = vmul.f32 %v1586_v56, %v7371_v9  ;;  %v7375_v25 = vld [vmem:[#allocation21_spill] sm:$0xff]  ;;  %v7377_v56 = vld [vmem:[#allocation19_spill] sm:$0xff] }
 0x568   : > { %1669 = vmatpush1.bf16.msra.mxu0 %v1644_v36  ;;  %v7374_v36 = vld [vmem:[#allocation20_spill] sm:$0xff] }
 0x569   : > { %v1595_v10 = vpop.permute.xlu0 %1594  ;;  %v1615_v24 = vpop.permute.xlu1 %1614  ;;  %v1646_v52 = vpack.c.bf16 %v1600_v2, %v1590_v26  ;;  %v1602_v19 = vmul.f32 %v5232_v45, %v7374_v36 }
 0x56a   : > { %v1596_v42 = vsel %vm608_vm2, %v1593_v23, %v1595_v10  ;;  %v7376_v23 = vld [vmem:[#allocation22_spill] sm:$0xff] }
 0x56b   : > { %v1601_v21 = vmul.f32 %v1596_v42, %v7372_v12  ;;  %v1603_v42 = vmul.f32 %v5235_v60, %v7377_v56  ;;  %v7381_v56 = vld [vmem:[#allocation24_spill] sm:$0xff] }
 0x56d   : > { %v1625_v40 = vpop.permute.xlu0 %1624  ;;  %v1607_v58 = vpop.permute.xlu1 %1606  ;;  %v1647_v18 = vpack.c.bf16 %v1601_v21, %v1591_v38 }
 0x56e   : > { %v1608_v35 = vsel %vm637_vm4, %v1605_v3, %v1607_v58  ;;  %v1611_v7 = vsel %vm637_vm4, %v1607_v58, 0.0 }
 0x56f   : > { %v1612_v53 = vmul.f32 %v1608_v35, %v7375_v25  ;;  %v1613_v10 = vmul.f32 %v1611_v7, %v7376_v23  ;;  %1670 = vmatprep.subr.bf16.mxu0 %v1647_v18  ;;  %v7378_v35 = vld [vmem:[#allocation25_spill] sm:$0xff]  ;;  %v7379_v7 = vld [vmem:[#allocation26_spill] sm:$0xff]  ;;  %v7380_v23 = vld [vmem:[#allocation23_spill] sm:$0xff] }
 0x570   : > { %1671 = vmatpush1.bf16.msra.mxu0 %v1646_v52 }
 0x571   : > { %v1648_v57 = vpack.c.bf16 %v1612_v53, %v1602_v19  ;;  %v1627_v5 = vpop.permute.xlu0 %1626  ;;  %v1617_v21 = vpop.permute.xlu1 %1616  ;;  %v1649_v2 = vpack.c.bf16 %v1613_v10, %v1603_v42  ;;  %v4226_v42 = vld [vmem:[%s7217_s3 + $0x18] ss:$0 sm:$0xff] }
 0x572   : > { %v1628_v3 = vsel %vm675_vm6, %v1625_v40, %v1627_v5  ;;  %v1631_v38 = vsel %vm675_vm6, %v1627_v5, 0.0  ;;  %v1618_v26 = vsel %vm656_vm5, %v1615_v24, %v1617_v21  ;;  %v1621_v58 = vsel %vm656_vm5, %v1617_v21, 0.0 }
 0x573   : > { %v1632_v25 = vmul.f32 %v1628_v3, %v7378_v35  ;;  %v1633_v18 = vmul.f32 %v1631_v38, %v7379_v7  ;;  %v1622_v36 = vmul.f32 %v1618_v26, %v7380_v23  ;;  %v1623_v52 = vmul.f32 %v1621_v58, %v7381_v56  ;;  %1672 = vmatprep.subr.bf16.mxu0 %v1649_v2  ;;  %v4227_v3 = vld [vmem:[%s7217_s3 + $0x10] ss:$0 sm:$0xff]  ;;  %v3886_v2 = vld [vmem:[%s7236_s5 + $0x4] sm:$0xf]  ;;  %s7394_s5 = smov 1   ;;  %s7395_s3 = smov 114  }
 0x574   : > { %1673 = vmatpush1.bf16.msra.mxu0 %v1648_v57 }
 0x575   : > { %v1650_v19 = vpack.c.bf16 %v1632_v25, %v1622_v36  ;;  %v1637_v53 = vpop.permute.xlu0 %1636  ;;  %v1635_v10 = vpop.permute.xlu1 %1634  ;;  %v1651_v40 = vpack.c.bf16 %v1633_v18, %v1623_v52 }
 0x576   : > { %v1641_v5 = vsel %vm694_vm7, %v1637_v53, 0.0  ;;  %v1638_v24 = vsel %vm694_vm7, %v1635_v10, %v1637_v53 }
 0x577   : > { %v1643_v21 = vmul.f32 %v4226_v42, %v1641_v5  ;;  %v1642_v38 = vmul.f32 %v4227_v3, %v1638_v24  ;;  %1674 = vmatprep.subr.bf16.mxu0 %v1651_v40 }
 0x578   : > { %1675 = vmatpush1.bf16.msra.mxu0 %v1650_v19 }
 0x579   : > { %v1653_v36 = vpack.c.bf16 %v1643_v21, %v1643_v21  ;;  %v1652_v25 = vpack.c.bf16 %v1642_v38, %v1642_v38 }
 0x57b   : > { %3892 = vmatprep.subr.msk.bf16.mxu0 %vm7143_vm8, %v1653_v36  ;;  %v1663_v57 = vsel %vm7143_vm8, %v1652_v25, 0  ;;  %v7386_v25 = vmov 22   ;;  %vm7420_vm8 = vcmask 252928  }
 0x57c   : > { %1677 = vmatpush1.bf16.msra.mxu0 %v1663_v57 }
 0x57f   : > { %3893 = vmatmul.mubr.msk.bf16.vlgmr.msra.gmra.mrb[8].mxu0 %vm7131_vm9, %v3886_v2  ;;  %v7388_v2 = vmov 23   ;;  %vm7416_vm9 = vcmask 261120  }
 0x580   : > { %2953 = vmatprep.mubr.bf16.mxu0 %v7336_v55  ;;  %vm7419_vm12 = vmmov %vm7416_vm9 }
 0x586   : > { %v1657_v26 = vpop.permute.xlu1 %1656 }
 0x652   : > { %v1702_v58 = vpop.f32.mrb[8].mxu0 }
 0x653   : > { %v1703_v18 = vadd.f32 %v1702_v58, %v1657_v26  ;;  %v1704_v52 = vpop.f32.mrb[9].mxu0  ;;  %v7390_v58 = vmov 24  }
 0x654   : > { %v1706_v19 = vpop.f32.mrb[10].mxu0  ;;  %v1705_v40 = vadd.f32 %v1704_v52, %v1657_v26 }
 0x655   : > { %v3894_v53 = vmul.f32 -1.442695, %v1703_v18  ;;  %v1707_v10 = vpop.f32.mrb[11].mxu0 }
 0x656   : > { %v3895_v5 = vmul.f32 -1.442695, %v1705_v40 }
 0x657   : > { %4146 = vpow2.f32 %v3894_v53 }
 0x658   : > { %4148 = vpow2.f32 %v3895_v5 }
 0x661   : > { %v4147_v24 = vpop.eup %4146 }
 0x662   : > { %v1715_v42 = vadd.f32 1.0, %v4147_v24  ;;  %v4149_v21 = vpop.eup %4148 }
 0x663   : > { %v1716_v36 = vadd.f32 1.0, %v4149_v21 }
 0x664   : > { %4150 = vrcp.f32 %v1715_v42 }
 0x665   : > { %4152 = vrcp.f32 %v1716_v36 }
 0x66e   : > { %v4151_v3 = vpop.eup %4150 }
 0x66f   : > { %v5370_v38 = vmul.f32 %v4151_v3, %v1703_v18  ;;  %v4153_v57 = vpop.eup %4152  ;;  %v3889_v18 = vld [vmem:[%s6883_s8 + $0x8] sm:$0xff] }
 0x670   : > { %v5388_v26 = vmul.f32 %v4153_v57, %v1705_v40  ;;  %v5463_v40 = vpop.permute.xlu0 %1737 }
 0x671   : > { %7382 = vst [vmem:[#allocation47_spill] sm:$0xff] %v5370_v38  ;;  %1744 = vrot.lane.b32.xlu0 %v5370_v38, %s7383_s11  ;;  %1725 = vrot.lane.b32.xlu1 %v5370_v38, %s7384_s21 }
 0x672   : > { %7389 = vst [vmem:[#allocation48_spill] sm:$0xff] %v5388_v26 }
 0x674   : > { %v5469_v24 = vpop.permute.xlu0 %1773 }
 0x675   : > { %2107 = vperm.xlu0 %4055, %v5275_v62   ;;  %1762 = vrot.lane.b32.xlu1 %v5370_v38, %s7385_s0 }
 0x678   : > { %v5477_v21 = vpop.permute.xlu0 %1791 }
 0x679   : > { %4056 = vset.pattern.permute.xlu0 %v7386_v25  ;;  %1780 = vrot.lane.b32.xlu1 %v5370_v38, %s7387_s1 }
 0x67a   : > { %2125 = vperm.xlu0 %4056, %v5275_v62  }
 0x67c   : > { %v5485_v57 = vpop.permute.xlu0 %1809 }
 0x67d   : > { %1798 = vrot.lane.b32.xlu1 %v5370_v38, %s7239_s17 }
 0x67e   : > { %1970 = vrot.lane.b32.xlu0 %v5370_v38, %s7245_s13 }
 0x67f   : > { %4057 = vset.pattern.permute.xlu0 %v7388_v2 }
 0x681   : > { %1816 = vrot.lane.b32.xlu1 %v5370_v38, %s7240_s27 }
 0x682   : > { %1954 = vrot.lane.b32.xlu0 %v5388_v26, %s7341_s18 }
 0x685   : > { %1834 = vrot.lane.b32.xlu1 %v5370_v38, %s7241_s20 }
 0x686   : > { %2143 = vperm.xlu0 %4057, %v5275_v62  }
 0x689   : > { %1852 = vrot.lane.b32.xlu1 %v5370_v38, %s7243_s30 }
 0x68a   : > { %4058 = vset.pattern.permute.xlu0 %v7390_v58  ;;  %v5493_v58 = vpop.permute.xlu0 %1827 }
 0x68b   : > { %2161 = vperm.xlu0 %4058, %v5275_v62   ;;  %v5443_v62 = vpop.permute.xlu1 %1755 }
 0x68d   : > { %1870 = vrot.lane.b32.xlu1 %v5370_v38, %s7391_s19 }
 0x68e   : > { %v5501_v56 = vpop.permute.xlu0 %1845 }
 0x68f   : > { %2150 = vrot.lane.b32.xlu0 %v5370_v38, %s7255_s26  ;;  %v5447_v52 = vpop.permute.xlu1 %1981 }
 0x690   : > { %4059 = vset.pattern.permute.xlu0 %v7336_v55  ;;  %7396 = vst [vmem:[#allocation61_spill] sm:$0xff] %v5447_v52 }
 0x691   : > { %1888 = vrot.lane.b32.xlu1 %v5370_v38, %s7392_s23 }
 0x692   : > { %v5509_v7 = vpop.permute.xlu0 %1863 }
 0x693   : > { %2170 = vperm.xlu0 %4059, %v3889_v18   ;;  %v5453_v19 = vpop.permute.xlu1 %1999 }
 0x694   : > { %7397 = vst [vmem:[#allocation64_spill] sm:$0xff] %v5453_v19 }
 0x695   : > { %1906 = vrot.lane.b32.xlu1 %v5370_v38, %s7393_s12 }
 0x696   : > { %v5517_v9 = vpop.permute.xlu0 %1881 }
 0x699   : > { %1924 = vrot.lane.b32.xlu1 %v5370_v38, %s7394_s5 }
 0x69a   : > { %v5525_v34 = vpop.permute.xlu0 %1899 }
 0x69d   : > { %1952 = vrot.lane.b32.xlu1 %v5370_v38, %s7341_s18 }
 0x69e   : > { %v5533_v43 = vpop.permute.xlu0 %1917 }
 0x6a1   : > { %1988 = vrot.lane.b32.xlu1 %v5370_v38, %s7395_s3 }
 0x6a2   : > { %v5539_v45 = vpop.permute.xlu0 %1935 }
 0x6a3   : > { %7405 = vst [vmem:[#allocation70_spill] sm:$0xff] %v5539_v45 }
 0x6a5   : > { %2006 = vrot.lane.b32.xlu1 %v5370_v38, %s7342_s15 }
 0x6a6   : > { %v5545_v8 = vpop.permute.xlu0 %1945 }
 0x6a7   : > { %7408 = vst [vmem:[#allocation73_spill] sm:$0xff] %v5545_v8 }
 0x6a9   : > { %2024 = vrot.lane.b32.xlu1 %v5370_v38, %s7343_s24 }
 0x6aa   : > { %v5549_v14 = vpop.permute.xlu0 %1963 }
 0x6ab   : > { %7410 = vst [vmem:[#allocation75_spill] sm:$0xff] %v5549_v14 }
 0x6ad   : > { %2042 = vrot.lane.b32.xlu1 %v5370_v38, %s7344_s25 }
 0x6ae   : > { %v5551_v11 = vpop.permute.xlu0 %2017 }
 0x6af   : > { %7411 = vst [vmem:[#allocation76_spill] sm:$0xff] %v5551_v11 }
 0x6b1   : > { %2060 = vrot.lane.b32.xlu1 %v5370_v38, %s7246_s28 }
 0x6b2   : > { %v5553_v50 = vpop.permute.xlu0 %2035 }
 0x6b3   : > { %7412 = vst [vmem:[#allocation77_spill] sm:$0xff] %v5553_v50 }
 0x6b5   : > { %2078 = vrot.lane.b32.xlu1 %v5370_v38, %s7247_s14 }
 0x6b9   : > { %2096 = vrot.lane.b32.xlu1 %v5370_v38, %s7249_s29 }
 0x6bd   : > { %1727 = vrot.lane.b32.xlu1 %v5388_v26, %s7384_s21 }
 0x6c1   : > { %1746 = vrot.lane.b32.xlu1 %v5388_v26, %s7383_s11 }
 0x6c5   : > { %1764 = vrot.lane.b32.xlu1 %v5388_v26, %s7385_s0 }
 0x6c9   : > { %1782 = vrot.lane.b32.xlu1 %v5388_v26, %s7387_s1 }
 0x6cd   : > { %1800 = vrot.lane.b32.xlu1 %v5388_v26, %s7239_s17 }
 0x6d1   : > { %1818 = vrot.lane.b32.xlu1 %v5388_v26, %s7240_s27 }
 0x6d5   : > { %1836 = vrot.lane.b32.xlu1 %v5388_v26, %s7241_s20 }
 0x6d9   : > { %1854 = vrot.lane.b32.xlu1 %v5388_v26, %s7243_s30 }
 0x6dd   : > { %1872 = vrot.lane.b32.xlu1 %v5388_v26, %s7391_s19 }
 0x6e1   : > { %1890 = vrot.lane.b32.xlu1 %v5388_v26, %s7392_s23 }
 0x6e3   : > { %v5457_v53 = vpop.permute.xlu1 %1725 }
 0x6e5   : > { %1908 = vrot.lane.b32.xlu1 %v5388_v26, %s7393_s12 }
 0x6e7   : > { %v5461_v10 = vpop.permute.xlu1 %1762 }
 0x6e9   : > { %1926 = vrot.lane.b32.xlu1 %v5388_v26, %s7394_s5 }
 0x6eb   : > { %v5467_v5 = vpop.permute.xlu1 %1780 }
 0x6ed   : > { %2114 = vrot.lane.b32.xlu1 %v5370_v38, %s7398_s2 }
 0x6ef   : > { %v5473_v42 = vpop.permute.xlu1 %1798 }
 0x6f1   : > { %2132 = vrot.lane.b32.xlu1 %v5370_v38, %s7399_s22 }
 0x6f3   : > { %v5479_v3 = vpop.permute.xlu1 %1816 }
 0x6f5   : > { %1972 = vrot.lane.b32.xlu1 %v5388_v26, %s7245_s13 }
 0x6f7   : > { %v5483_v36 = vpop.permute.xlu1 %1834 }
 0x6f9   : > { %1990 = vrot.lane.b32.xlu1 %v5388_v26, %s7395_s3 }
 0x6fb   : > { %v5489_v18 = vpop.permute.xlu1 %1852 }
 0x6fd   : > { %2008 = vrot.lane.b32.xlu1 %v5388_v26, %s7342_s15 }
 0x6ff   : > { %v5495_v2 = vpop.permute.xlu1 %1870 }
 0x701   : > { %2026 = vrot.lane.b32.xlu1 %v5388_v26, %s7343_s24 }
 0x703   : > { %v5499_v25 = vpop.permute.xlu1 %1888 }
 0x705   : > { %2044 = vrot.lane.b32.xlu1 %v5388_v26, %s7344_s25 }
 0x707   : > { %v5505_v23 = vpop.permute.xlu1 %1906 }
 0x709   : > { %2062 = vrot.lane.b32.xlu1 %v5388_v26, %s7246_s28 }
 0x70b   : > { %v5511_v35 = vpop.permute.xlu1 %1924 }
 0x70d   : > { %2080 = vrot.lane.b32.xlu1 %v5388_v26, %s7247_s14 }
 0x70f   : > { %v5515_v12 = vpop.permute.xlu1 %1952 }
 0x710   : > { %7400 = vst [vmem:[#allocation65_spill] sm:$0xff] %v5515_v12  ;;  %v1787_v12 = vsel %vm7420_vm8, 0.0, %v5467_v5 }
 0x711   : > { %2098 = vrot.lane.b32.xlu1 %v5388_v26, %s7249_s29  ;;  %s7647_s29 = sld [smem:[#allocation90_spill]] }
 0x713   : > { %v5521_v16 = vpop.permute.xlu1 %1988 }
 0x714   : > { %7401 = vst [vmem:[#allocation66_spill] sm:$0xff] %v5521_v16  ;;  %v1732_v16 = vsel %vm796_vm11, 0.0, %v5457_v53 }
 0x715   : > { %2116 = vrot.lane.b32.xlu1 %v5388_v26, %s7398_s2  ;;  %s7549_s2 = smov 96  }
 0x717   : > { %v5527_v13 = vpop.permute.xlu1 %2006 }
 0x718   : > { %7402 = vst [vmem:[#allocation67_spill] sm:$0xff] %v5527_v13 }
 0x719   : > { %2134 = vrot.lane.b32.xlu1 %v5388_v26, %s7399_s22  ;;  %s7550_s22 = smov 95  }
 0x71b   : > { %v5531_v4 = vpop.permute.xlu1 %2024 }
 0x71c   : > { %7403 = vst [vmem:[#allocation68_spill] sm:$0xff] %v5531_v4 }
 0x71d   : > { %2152 = vrot.lane.b32.xlu1 %v5388_v26, %s7255_s26  ;;  %v7421_v26 = vld [vmem:[#allocation56_spill] sm:$0xff] }
 0x71f   : > { %v5537_v60 = vpop.permute.xlu1 %2042 }
 0x720   : > { %7404 = vst [vmem:[#allocation69_spill] sm:$0xff] %v5537_v60 }
 0x723   : > { %v5541_v55 = vpop.permute.xlu1 %2060 }
 0x724   : > { %7406 = vst [vmem:[#allocation71_spill] sm:$0xff] %v5541_v55  ;;  %v3891_v55 = vld [vmem:[%s7265_s10 + $0x8] sm:$0xff]  ;;  %s7536_s10 = sld [smem:[#allocation85_spill]] }
 0x725   : > { %2193 = vperm.xlu1 %4060, %v3891_v55  }
 0x727   : > { %v5543_v41 = vpop.permute.xlu1 %2078 }
 0x728   : > { %7407 = vst [vmem:[#allocation72_spill] sm:$0xff] %v5543_v41  ;;  %v5558_v41 = vpop.permute.xlu0 %2053 }
 0x729   : > { %7413 = vst [vmem:[#allocation78_spill] sm:$0xff] %v5558_v41  ;;  %v1769_v41 = vsel %vm7416_vm9, 0.0, %v5461_v10  ;;  %vm7423_vm9 = vmmov %vm7420_vm8  ;;  %vm7427_vm8 = vcmask 146432  }
 0x72b   : > { %v5547_v27 = vpop.permute.xlu1 %2096 }
 0x72c   : > { %7409 = vst [vmem:[#allocation74_spill] sm:$0xff] %v5547_v27  ;;  %v5560_v27 = vpop.permute.xlu0 %2071 }
 0x72d   : > { %7414 = vst [vmem:[#allocation79_spill] sm:$0xff] %v5560_v27  ;;  %v7418_v27 = vld [vmem:[#allocation52_spill] sm:$0xff] }
 0x72e   : > { %v1733_v8 = vmul.f32 %v1732_v16, %v7418_v27  ;;  %v7424_v16 = vld [vmem:[#allocation58_spill] sm:$0xff] }
 0x72f   : > { %v1728_v28 = vpop.permute.xlu1 %1727 }
 0x730   : > { %v5562_v52 = vpop.permute.xlu0 %2089 }
 0x731   : > { %7415 = vst [vmem:[#allocation80_spill] sm:$0xff] %v5562_v52  ;;  %v1729_v52 = vsel %vm796_vm11, %v5457_v53, %v1728_v28  ;;  %v7425_v28 = vld [vmem:[#allocation59_spill] sm:$0xff] }
 0x732   : > { %v1734_v27 = vmul.f32 %v1729_v52, %v7424_v16 }
 0x733   : > { %v1747_v15 = vpop.permute.xlu1 %1746 }
 0x734   : > { %v1745_v14 = vpop.permute.xlu0 %1744 }
 0x735   : > { %v1751_v50 = vsel %vm824_vm10, 0.0, %v1745_v14  ;;  %v1748_v55 = vsel %vm824_vm10, %v1745_v14, %v1747_v15  ;;  %v7422_v15 = vld [vmem:[#allocation53_spill] sm:$0xff] }
 0x736   : > { %v1752_v48 = vmul.f32 %v1751_v50, %v7417_v63  ;;  %v1753_v39 = vmul.f32 %v1748_v55, %v7421_v26  ;;  %v1770_v14 = vmul.f32 %v1769_v41, %v7422_v15  ;;  %v1805_v50 = vsel %vm7151_vm14, 0.0, %v5473_v42  ;;  %v7426_v63 = vld [vmem:[#allocation54_spill] sm:$0xff] }
 0x737   : > { %v1765_v59 = vpop.permute.xlu1 %1764  ;;  %v1788_v45 = vmul.f32 %v1787_v12, %v7426_v63  ;;  %v1823_v41 = vsel %vm7427_vm8, 0.0, %v5479_v3  ;;  %v1741_v12 = vmul.f32 %v5463_v40, %v1734_v27 }
 0x738   : > { %v1766_v33 = vsel %vm7419_vm12, %v5461_v10, %v1765_v59  ;;  %v1758_v59 = vmul.f32 %v5443_v62, %v1752_v48  ;;  %v1740_v10 = vmul.f32 %v5463_v40, %v1733_v8  ;;  %v1776_v52 = vmul.f32 %v5469_v24, %v1770_v14  ;;  %v5597_v48 = vpop.permute.xlu0 %2107  ;;  %vm7430_vm12 = vmmov %vm7427_vm8 }
 0x739   : > { %v1771_v53 = vmul.f32 %v1766_v33, %v7425_v28  ;;  %v7429_v33 = vld [vmem:[#allocation55_spill] sm:$0xff]  ;;  %v1824_v14 = vmul.f32 %v1823_v41, %v4850_v22 }
 0x73a   : > { %v1806_v28 = vmul.f32 %v1805_v50, %v7429_v33 }
 0x73b   : > { %v1783_v49 = vpop.permute.xlu1 %1782 }
 0x73c   : > { %v1784_v0 = vsel %vm7423_vm9, %v5467_v5, %v1783_v49  ;;  %v1759_v49 = vmul.f32 %v5443_v62, %v1753_v39  ;;  %v7428_v5 = vld [vmem:[#allocation60_spill] sm:$0xff]  ;;  %v1794_v62 = vmul.f32 %v5477_v21, %v1788_v45  ;;  %v5625_v41 = vpop.permute.xlu0 %2125  ;;  %vm7431_vm9 = vcmask 113664  }
 0x73d   : > { %v1789_v15 = vmul.f32 %v1784_v0, %v7428_v5  ;;  %v1760_v0 = vadd.f32 %v1758_v59, %v1740_v10  ;;  %vm7432_vm8 = vmmov %vm7431_vm9 }
 0x73f   : > { %v1801_v60 = vpop.permute.xlu1 %1800  ;;  %v1795_v33 = vmul.f32 %v5477_v21, %v1789_v15 }
 0x740   : > { %v1802_v55 = vsel %vm7151_vm14, %v5473_v42, %v1801_v60  ;;  %v1841_v60 = vsel %vm552_vm1, 0.0, %v5483_v36  ;;  %v1777_v42 = vmul.f32 %v5469_v24, %v1771_v53  ;;  %v1778_v24 = vadd.f32 %v1776_v52, %v1760_v0 }
 0x741   : > { %v1807_v39 = vmul.f32 %v1802_v55, %v4895_v61  ;;  %v1812_v53 = vmul.f32 %v5485_v57, %v1806_v28  ;;  %v1842_v45 = vmul.f32 %v1841_v60, %v4853_v30  ;;  %v1830_v55 = vmul.f32 %v5493_v58, %v1824_v14 }
 0x742   : > { %v1796_v15 = vadd.f32 %v1794_v62, %v1778_v24  ;;  %v1971_v24 = vpop.permute.xlu0 %1970 }
 0x743   : > { %v1819_v19 = vpop.permute.xlu1 %1818  ;;  %v1813_v10 = vmul.f32 %v5485_v57, %v1807_v39 }
 0x744   : > { %v1820_v8 = vsel %vm7430_vm12, %v5479_v3, %v1819_v19  ;;  %v1859_v19 = vsel %vm465_vm0, 0.0, %v5489_v18  ;;  %v1761_v3 = vadd.f32 %v1759_v49, %v1741_v12  ;;  %v1814_v60 = vadd.f32 %v1812_v53, %v1796_v15 }
 0x745   : > { %v1825_v27 = vmul.f32 %v1820_v8, %v4912_v20  ;;  %v1860_v28 = vmul.f32 %v1859_v19, %v4856_v46  ;;  %v1848_v12 = vmul.f32 %v5501_v56, %v1842_v45  ;;  %vm7433_vm12 = vcmask 15360  }
 0x746   : > { %v1832_v0 = vadd.f32 %v1830_v55, %v1814_v60  ;;  %v1931_v19 = vsel %vm608_vm2, 0.0, %v5511_v35 }
 0x747   : > { %v1837_v4 = vpop.permute.xlu1 %1836  ;;  %v1831_v52 = vmul.f32 %v5493_v58, %v1825_v27  ;;  %v1866_v62 = vmul.f32 %v5509_v7, %v1860_v28 }
 0x748   : > { %v1838_v50 = vsel %vm552_vm1, %v5483_v36, %v1837_v4  ;;  %v1877_v4 = vsel %vm589_vm3, 0.0, %v5495_v2  ;;  %v1779_v36 = vadd.f32 %v1777_v42, %v1761_v3 }
 0x749   : > { %v1843_v21 = vmul.f32 %v1838_v50, %v4915_v32  ;;  %v1878_v42 = vmul.f32 %v1877_v4, %v4860_v31 }
 0x74b   : > { %v1855_v11 = vpop.permute.xlu1 %1854  ;;  %v1884_v53 = vmul.f32 %v5517_v9, %v1878_v42 }
 0x74c   : > { %v1856_v59 = vsel %vm465_vm0, %v5489_v18, %v1855_v11  ;;  %v1895_v11 = vsel %vm7431_vm9, 0.0, %v5499_v25  ;;  %v1797_v18 = vadd.f32 %v1795_v33, %v1779_v36  ;;  %v1849_v33 = vmul.f32 %v5501_v56, %v1843_v21  ;;  %vm7434_vm9 = vmmov %vm7433_vm12 }
 0x74d   : > { %v1861_v57 = vmul.f32 %v1856_v59, %v4923_v44  ;;  %v1896_v14 = vmul.f32 %v1895_v11, %v4867_v17  ;;  %v1850_v56 = vadd.f32 %v1848_v12, %v1832_v0 }
 0x74f   : > { %v1873_v13 = vpop.permute.xlu1 %1872  ;;  %v1868_v36 = vadd.f32 %v1866_v62, %v1850_v56  ;;  %v7440_v62 = vld [vmem:[#allocation65_spill] sm:$0xff] }
 0x750   : > { %v1874_v49 = vsel %vm589_vm3, %v5495_v2, %v1873_v13  ;;  %v1913_v13 = vsel %vm7433_vm12, 0.0, %v5505_v23  ;;  %v1815_v2 = vadd.f32 %v1813_v10, %v1797_v18  ;;  %v1932_v10 = vmul.f32 %v1931_v19, %v7287_v54 }
 0x751   : > { %v1879_v58 = vmul.f32 %v1874_v49, %v4927_v29  ;;  %v1914_v45 = vmul.f32 %v1913_v13, %v4876_v47  ;;  %v1886_v49 = vadd.f32 %v1884_v53, %v1868_v36  ;;  %v7437_v13 = vld [vmem:[#allocation47_spill] sm:$0xff] }
 0x753   : > { %v1891_v6 = vpop.permute.xlu1 %1890  ;;  %v1920_v11 = vmul.f32 %v5533_v43, %v1914_v45 }
 0x754   : > { %v1892_v39 = vsel %vm7432_vm8, %v5499_v25, %v1891_v6  ;;  %v1833_v6 = vadd.f32 %v1831_v52, %v1815_v2  ;;  %v1867_v25 = vmul.f32 %v5509_v7, %v1861_v57  ;;  %v1902_v7 = vmul.f32 %v5525_v34, %v1896_v14  ;;  %v7435_v52 = vld [vmem:[#allocation70_spill] sm:$0xff] }
 0x755   : > { %v1897_v3 = vmul.f32 %v1892_v39, %v4935_v51  ;;  %v1938_v57 = vmul.f32 %v7435_v52, %v1932_v10  ;;  %v7436_v39 = vld [vmem:[#allocation50_spill] sm:$0xff]  ;;  %vm7441_vm8 = vcmask 1031168  }
 0x756   : > { %v1851_v4 = vadd.f32 %v1849_v33, %v1833_v6  ;;  %v1904_v18 = vadd.f32 %v1902_v7, %v1886_v49  ;;  %v7438_v2 = vld [vmem:[#allocation14_spill] sm:$0xff]  ;;  %v7439_v33 = vld [vmem:[#allocation48_spill] sm:$0xff]  ;;  %vm7442_vm12 = vmmov %vm7441_vm8 }
 0x757   : > { %v1909_v38 = vpop.permute.xlu1 %1908  ;;  %v1903_v15 = vmul.f32 %v5525_v34, %v1897_v3  ;;  %v1942_v34 = vmul.f32 %v7437_v13, %v7436_v39  ;;  %v7443_v3 = vld [vmem:[#allocation33_spill] sm:$0xff]  ;;  %v7446_v7 = vld [vmem:[#allocation27_spill] sm:$0xff]  ;;  %v7574_v39 = vld [vmem:[#allocation56_spill] sm:$0xff] }
 0x758   : > { %v1910_v50 = vsel %vm7434_vm9, %v5505_v23, %v1909_v38  ;;  %v1885_v23 = vmul.f32 %v5517_v9, %v1879_v58  ;;  %v1869_v21 = vadd.f32 %v1867_v25, %v1851_v4  ;;  %v1955_v9 = vpop.permute.xlu0 %1954  ;;  %v1943_v58 = vmul.f32 %v7439_v33, %v7438_v2 }
 0x759   : > { %v1915_v38 = vmul.f32 %v1910_v50, %v4949_v37  ;;  %v1922_v0 = vadd.f32 %v1920_v11, %v1904_v18  ;;  %v1956_v14 = vsel %vm637_vm4, %v7440_v62, %v1955_v9  ;;  %vm7449_vm9 = vcmask 932864   ;;  %v7451_v11 = vld [vmem:[#allocation75_spill] sm:$0xff]  ;;  %v7455_v62 = vld [vmem:[#allocation61_spill] sm:$0xff] }
 0x75a   : > { %v1960_v56 = vmul.f32 %v1956_v14, %v7443_v3  ;;  %v7570_v3 = vld [vmem:[#allocation51_spill] sm:$0xff] }
 0x75b   : > { %v1927_v26 = vpop.permute.xlu1 %1926  ;;  %v1940_v19 = vadd.f32 %v1938_v57, %v1922_v0 }
 0x75c   : > { %v1928_v59 = vsel %vm608_vm2, %v5511_v35, %v1927_v26  ;;  %v1887_v35 = vadd.f32 %v1885_v23, %v1869_v21  ;;  %v1921_v26 = vmul.f32 %v5533_v43, %v1915_v38  ;;  %v1959_v43 = vsel %vm637_vm4, %v1955_v9, 0.0  ;;  %v7445_v38 = vld [vmem:[#allocation57_spill] sm:$0xff]  ;;  %v7447_v21 = vld [vmem:[#allocation36_spill] sm:$0xff]  ;;  %v7452_v9 = vld [vmem:[#allocation67_spill] sm:$0xff] }
 0x75d   : > { %v1933_v55 = vmul.f32 %v1928_v59, %v4960_v1  ;;  %v7444_v59 = vld [vmem:[#allocation73_spill] sm:$0xff]  ;;  %v1961_v36 = vmul.f32 %v1959_v43, %v7445_v38 }
 0x75e   : > { %v1905_v60 = vadd.f32 %v1903_v15, %v1887_v35  ;;  %v1948_v4 = vmul.f32 %v7444_v59, %v1942_v34  ;;  %v1949_v23 = vmul.f32 %v7444_v59, %v1943_v58  ;;  %v1966_v35 = vmul.f32 %v7451_v11, %v1960_v56  ;;  %v7454_v34 = vld [vmem:[#allocation38_spill] sm:$0xff]  ;;  %v7456_v43 = vld [vmem:[#allocation49_spill] sm:$0xff] }
 0x75f   : > { %v5614_v40 = vpop.permute.xlu1 %2114  ;;  %v1939_v12 = vmul.f32 %v7435_v52, %v1933_v55  ;;  %v7448_v55 = vld [vmem:[#allocation66_spill] sm:$0xff]  ;;  %v1967_v0 = vmul.f32 %v7451_v11, %v1961_v36 }
 0x760   : > { %v1923_v50 = vadd.f32 %v1921_v26, %v1905_v60  ;;  %v7453_v60 = vld [vmem:[#allocation28_spill] sm:$0xff] }
 0x762   : > { %v1941_v53 = vadd.f32 %v1939_v12, %v1923_v50 }
 0x763   : > { %v5634_v8 = vpop.permute.xlu1 %2132 }
 0x764   : > { %v1951_v26 = vadd.f32 %v1949_v23, %v1941_v53  ;;  %v7459_v23 = vld [vmem:[#allocation64_spill] sm:$0xff] }
 0x766   : > { %v1969_v59 = vadd.f32 %v1967_v0, %v1951_v26 }
 0x767   : > { %v1973_v27 = vpop.permute.xlu1 %1972 }
 0x768   : > { %v1974_v6 = vsel %vm7441_vm8, %v1971_v24, %v1973_v27  ;;  %v1977_v25 = vsel %vm7442_vm12, %v1973_v27, 0.0  ;;  %vm7450_vm8 = vmmov %vm7449_vm9  ;;  %v1950_v27 = vadd.f32 %v1948_v4, %v1940_v19  ;;  %v7457_v19 = vld [vmem:[#allocation41_spill] sm:$0xff]  ;;  %vm7467_vm12 = vcmask 900096  }
 0x769   : > { %v1978_v10 = vmul.f32 %v1974_v6, %v7446_v7  ;;  %v1979_v15 = vmul.f32 %v1977_v25, %v7447_v21  ;;  %v7458_v25 = vld [vmem:[#allocation68_spill] sm:$0xff] }
 0x76a   : > { %v1968_v53 = vadd.f32 %v1966_v35, %v1950_v27  ;;  %v7464_v35 = vld [vmem:[#allocation63_spill] sm:$0xff] }
 0x76b   : > { %v1991_v28 = vpop.permute.xlu1 %1990  ;;  %v1984_v14 = vmul.f32 %v7455_v62, %v1978_v10 }
 0x76c   : > { %v1992_v49 = vsel %vm7449_vm9, %v7448_v55, %v1991_v28  ;;  %v1995_v24 = vsel %vm7450_vm8, %v1991_v28, 0.0  ;;  %v1985_v28 = vmul.f32 %v7455_v62, %v1979_v15  ;;  %vm7468_vm9 = vmmov %vm7467_vm12  ;;  %vm7471_vm8 = vcmask 801792  }
 0x76d   : > { %v1996_v12 = vmul.f32 %v1992_v49, %v7453_v60  ;;  %v1997_v58 = vmul.f32 %v1995_v24, %v7454_v34  ;;  %v7460_v49 = vld [vmem:[#allocation69_spill] sm:$0xff]  ;;  %v7461_v24 = vld [vmem:[#allocation31_spill] sm:$0xff]  ;;  %vm7472_vm14 = vmmov %vm7471_vm8 }
 0x76e   : > { %v1987_v62 = vadd.f32 %v1985_v28, %v1969_v59  ;;  %v7470_v28 = vld [vmem:[#allocation72_spill] sm:$0xff] }
 0x76f   : > { %v2009_v42 = vpop.permute.xlu1 %2008  ;;  %v2002_v55 = vmul.f32 %v7459_v23, %v1996_v12  ;;  %v2003_v36 = vmul.f32 %v7459_v23, %v1997_v58  ;;  %v7465_v12 = vld [vmem:[#allocation43_spill] sm:$0xff] }
 0x770   : > { %v2010_v18 = vsel %vm656_vm5, %v7452_v9, %v2009_v42  ;;  %v2013_v52 = vsel %vm656_vm5, %v2009_v42, 0.0  ;;  %v7462_v9 = vld [vmem:[#allocation32_spill] sm:$0xff]  ;;  %v7466_v58 = vld [vmem:[#allocation71_spill] sm:$0xff] }
 0x771   : > { %v2014_v50 = vmul.f32 %v2010_v18, %v7456_v43  ;;  %v2015_v6 = vmul.f32 %v2013_v52, %v7457_v19  ;;  %v1986_v52 = vadd.f32 %v1984_v14, %v1968_v53  ;;  %v7473_v53 = vld [vmem:[#allocation34_spill] sm:$0xff] }
 0x773   : > { %v2027_v45 = vpop.permute.xlu1 %2026  ;;  %v2004_v19 = vadd.f32 %v2002_v55, %v1986_v52 }
 0x774   : > { %v2028_v56 = vsel %vm675_vm6, %v7458_v25, %v2027_v45  ;;  %v2031_v42 = vsel %vm675_vm6, %v2027_v45, 0.0  ;;  %v7463_v25 = vld [vmem:[#allocation76_spill] sm:$0xff] }
 0x775   : > { %v2032_v11 = vmul.f32 %v2028_v56, %v7461_v24  ;;  %v2033_v18 = vmul.f32 %v2031_v42, %v7462_v9  ;;  %v2020_v45 = vmul.f32 %v7463_v25, %v2014_v50  ;;  %v2021_v27 = vmul.f32 %v7463_v25, %v2015_v6  ;;  %v7469_v24 = vld [vmem:[#allocation77_spill] sm:$0xff]  ;;  %v2144_v25 = vpop.permute.xlu0 %2143 }
 0x776   : > { %v2005_v56 = vadd.f32 %v2003_v36, %v1987_v62  ;;  %v7478_v62 = vld [vmem:[#allocation74_spill] sm:$0xff] }
 0x777   : > { %v2045_v57 = vpop.permute.xlu1 %2044  ;;  %v2038_v42 = vmul.f32 %v7469_v24, %v2032_v11  ;;  %v2039_v14 = vmul.f32 %v7469_v24, %v2033_v18  ;;  %v7476_v11 = vld [vmem:[#allocation9_spill] sm:$0xff]  ;;  %v7477_v24 = vld [vmem:[#allocation35_spill] sm:$0xff] }
 0x778   : > { %v2046_v10 = vsel %vm694_vm7, %v7460_v49, %v2045_v57  ;;  %v2049_v15 = vsel %vm694_vm7, %v2045_v57, 0.0 }
 0x779   : > { %v2050_v26 = vmul.f32 %v2046_v10, %v7464_v35  ;;  %v2051_v0 = vmul.f32 %v2049_v15, %v7465_v12  ;;  %v7474_v10 = vld [vmem:[#allocation29_spill] sm:$0xff]  ;;  %v2023_v12 = vadd.f32 %v2021_v27, %v2005_v56 }
 0x77a   : > { %v7481_v56 = vld [vmem:[#allocation37_spill] sm:$0xff] }
 0x77b   : > { %v2063_v4 = vpop.permute.xlu1 %2062 }
 0x77c   : > { %v2064_v23 = vsel %vm7467_vm12, %v7466_v58, %v2063_v4  ;;  %v2067_v49 = vsel %vm7468_vm9, %v2063_v4, 0.0  ;;  %v2022_v58 = vadd.f32 %v2020_v45, %v2004_v19  ;;  %v7475_v4 = vld [vmem:[#allocation78_spill] sm:$0xff]  ;;  %vm7489_vm9 = vcmask 769024  }
 0x77d   : > { %v2068_v59 = vmul.f32 %v2064_v23, %v7473_v53  ;;  %v2069_v15 = vmul.f32 %v2067_v49, %v7474_v10  ;;  %v2056_v35 = vmul.f32 %v7475_v4, %v2050_v26  ;;  %v2057_v55 = vmul.f32 %v7475_v4, %v2051_v0  ;;  %v7479_v49 = vld [vmem:[#allocation79_spill] sm:$0xff]  ;;  %v7480_v26 = vld [vmem:[#allocation30_spill] sm:$0xff] }
 0x77e   : > { %v2040_v23 = vadd.f32 %v2038_v42, %v2022_v58  ;;  %v2041_v53 = vadd.f32 %v2039_v14, %v2023_v12  ;;  %v2162_v42 = vpop.permute.xlu0 %2161  ;;  %v7485_v14 = vld [vmem:[#allocation44_spill] sm:$0xff] }
 0x77f   : > { %v2081_v57 = vpop.permute.xlu1 %2080  ;;  %v2074_v10 = vmul.f32 %v7479_v49, %v2068_v59  ;;  %v2075_v19 = vmul.f32 %v7479_v49, %v2069_v15  ;;  %v7486_v15 = vld [vmem:[#allocation39_spill] sm:$0xff]  ;;  %v7487_v49 = vld [vmem:[#allocation45_spill] sm:$0xff] }
 0x780   : > { %v2082_v50 = vsel %vm7471_vm8, %v7470_v28, %v2081_v57  ;;  %v2085_v6 = vsel %vm7472_vm14, %v2081_v57, 0.0  ;;  %v2058_v45 = vadd.f32 %v2056_v35, %v2040_v23  ;;  %v2059_v27 = vadd.f32 %v2057_v55, %v2041_v53  ;;  %vm7490_vm8 = vmmov %vm7489_vm9 }
 0x781   : > { %v2086_v52 = vmul.f32 %v2082_v50, %v7476_v11  ;;  %v2087_v18 = vmul.f32 %v2085_v6, %v7477_v24  ;;  %v7482_v11 = vld [vmem:[#allocation80_spill] sm:$0xff]  ;;  %vm7483_vm14 = vcmask 785408  }
 0x782   : > { %vm7484_vm12 = vmmov %vm7483_vm14  ;;  %v2076_v53 = vadd.f32 %v2074_v10, %v2058_v45  ;;  %v2077_v58 = vadd.f32 %v2075_v19, %v2059_v27  ;;  %v7488_v10 = vld [vmem:[#allocation40_spill] sm:$0xff]  ;;  %v2151_v45 = vpop.permute.xlu0 %2150 }
 0x783   : > { %v2099_v36 = vpop.permute.xlu1 %2098  ;;  %v2092_v6 = vmul.f32 %v7482_v11, %v2086_v52  ;;  %v2093_v24 = vmul.f32 %v7482_v11, %v2087_v18 }
 0x784   : > { %v2100_v28 = vsel %vm1347_vm15, %v7478_v62, %v2099_v36  ;;  %v2103_v57 = vsel %vm1347_vm15, %v2099_v36, 0.0 }
 0x785   : > { %v2104_v0 = vmul.f32 %v2100_v28, %v7480_v26  ;;  %v2105_v4 = vmul.f32 %v2103_v57, %v7481_v56  ;;  %v2094_v52 = vadd.f32 %v2092_v6, %v2076_v53  ;;  %v2095_v57 = vadd.f32 %v2093_v24, %v2077_v58 }
 0x787   : > { %v2117_v50 = vpop.permute.xlu1 %2116  ;;  %v2110_v55 = vmul.f32 %v5597_v48, %v2104_v0  ;;  %v2111_v62 = vmul.f32 %v5597_v48, %v2105_v4 }
 0x788   : > { %v2118_v36 = vsel %vm7483_vm14, %v5614_v40, %v2117_v50  ;;  %v2121_v12 = vsel %vm7484_vm12, %v2117_v50, 0.0  ;;  %vm7491_vm14 = vcmask 1043456  }
 0x789   : > { %v2122_v59 = vmul.f32 %v2118_v36, %v7485_v14  ;;  %v2123_v35 = vmul.f32 %v2121_v12, %v7486_v15  ;;  %v2112_v27 = vadd.f32 %v2110_v55, %v2094_v52  ;;  %v2113_v0 = vadd.f32 %v2111_v62, %v2095_v57  ;;  %vm7492_vm12 = vmmov %vm7491_vm14 }
 0x78b   : > { %v2135_v28 = vpop.permute.xlu1 %2134  ;;  %v2128_v18 = vmul.f32 %v5625_v41, %v2122_v59  ;;  %v2129_v23 = vmul.f32 %v5625_v41, %v2123_v35  ;;  %v4228_v41 = vld [vmem:[%s7269_s4 + $0x30] ss:$0 sm:$0xff]  ;;  %v4229_v35 = vld [vmem:[%s7269_s4 + $0x38] ss:$0 sm:$0xff] }
 0x78c   : > { %v2136_v11 = vsel %vm1401_vm13, %v5634_v8, %v2135_v28  ;;  %v2139_v40 = vsel %vm1401_vm13, %v2135_v28, 0.0  ;;  %v2171_v28 = vpop.permute.xlu0 %2170 }
 0x78d   : > { %v2140_v50 = vmul.f32 %v2136_v11, %v7487_v49  ;;  %v2141_v19 = vmul.f32 %v2139_v40, %v7488_v10  ;;  %v2130_v36 = vadd.f32 %v2128_v18, %v2112_v27  ;;  %v2131_v12 = vadd.f32 %v2129_v23, %v2113_v0 }
 0x78f   : > { %v2146_v48 = vmul.f32 %v2144_v25, %v2140_v50  ;;  %v2147_v4 = vmul.f32 %v2144_v25, %v2141_v19  ;;  %v2153_v6 = vpop.permute.xlu1 %2152 }
 0x790   : > { %v2154_v24 = vsel %vm7489_vm9, %v2151_v45, %v2153_v6  ;;  %v2157_v8 = vsel %vm7490_vm8, %v2153_v6, 0.0  ;;  %vm7493_vm9 = vcmask 64512   ;;  %vm7537_vm8 = vmmov %vm7492_vm12 }
 0x791   : > { %v2158_v59 = vmul.f32 %v4228_v41, %v2154_v24  ;;  %v2159_v53 = vmul.f32 %v4229_v35, %v2157_v8  ;;  %v2148_v25 = vadd.f32 %v2146_v48, %v2130_v36  ;;  %v2149_v62 = vadd.f32 %v2147_v4, %v2131_v12  ;;  %v3890_v36 = vld [vmem:[%s7335_s9 + $0x4] sm:$0xf]  ;;  %s7539_s9 = sld [smem:[#allocation87_spill]] }
 0x792   : > { %v7494_v12 = vmov 0  }
 0x793   : > { %v2164_v58 = vmul.f32 %v2162_v42, %v2158_v59  ;;  %v2165_v55 = vmul.f32 %v2162_v42, %v2159_v53 }
 0x795   : > { %v2166_v52 = vadd.f32 %v2164_v58, %v2148_v25  ;;  %v2167_v57 = vadd.f32 %v2165_v55, %v2149_v62 }
 0x797   : > { %v2173_v11 = vadd.f32 %v2171_v28, %v2166_v52  ;;  %v2174_v40 = vadd.f32 %v2171_v28, %v2167_v57 }
 0x799   : > { %v3896_v18 = vmul.f32 -1.442695, %v2173_v11  ;;  %v3897_v23 = vmul.f32 -1.442695, %v2174_v40 }
 0x79b   : > { %4154 = vpow2.f32 %v3896_v18 }
 0x79c   : > { %4156 = vpow2.f32 %v3897_v23 }
 0x7a4   : > { %v2194_v41 = vpop.permute.xlu1 %2193 }
 0x7a5   : > { %v4155_v50 = vpop.eup %4154 }
 0x7a6   : > { %v4157_v19 = vpop.eup %4156  ;;  %v2181_v45 = vadd.f32 1.0, %v4155_v50 }
 0x7a7   : > { %v2182_v27 = vadd.f32 1.0, %v4157_v19 }
 0x7a8   : > { %4158 = vrcp.f32 %v2181_v45 }
 0x7a9   : > { %4160 = vrcp.f32 %v2182_v27 }
 0x7b2   : > { %v4159_v0 = vpop.eup %4158 }
 0x7b3   : > { %v4161_v6 = vpop.eup %4160  ;;  %v2187_v42 = vmul.f32 %v4159_v0, %v2173_v11  ;;  %v7495_v0 = vld [vmem:[#allocation46_spill] sm:$0xff] }
 0x7b4   : > { %v2188_v48 = vmul.f32 %v4161_v6, %v2174_v40 }
 0x7b5   : > { %v2189_v4 = vpack.c.bf16 %v2187_v42, %v2187_v42  ;;  %v7497_v42 = vld [vmem:[#allocation42_spill] sm:$0xff] }
 0x7b6   : > { %v2190_v24 = vpack.c.bf16 %v2188_v48, %v2188_v48 }
 0x7b7   : > { %v2200_v8 = vsel %vm7491_vm14, %v2189_v4, 0  ;;  %vm7538_vm14 = vmmov %vm7537_vm8 }
 0x7b8   : > { %3898 = vmatprep.subr.msk.bf16.mxu1 %vm7492_vm12, %v2190_v24  ;;  %v7499_v24 = vmov 2   ;;  %vm7540_vm12 = vcmask 588800  }
 0x7b9   : > { %2206 = vmatpush1.bf16.msra.mxu1 %v2200_v8  ;;  %v7500_v8 = vmov 1  }
 0x7bc   : > { %3899 = vmatmul.mubr.msk.bf16.vlgmr.msra.gmra.mrb[4].mxu1 %vm7493_vm9, %v3890_v36  ;;  %v7501_v36 = vmov 3   ;;  %vm7569_vm9 = vcmask 261120  }
 0x7bd   : > { %2416 = vmatprep.mubr.bf16.mxu1 %v7494_v12 }
 0x88f   : > { %v2239_v59 = vpop.f32.mrb[4].mxu1 }
 0x890   : > { %v2240_v35 = vadd.f32 %v2239_v59, %v2194_v41  ;;  %v2241_v53 = vpop.f32.mrb[5].mxu1  ;;  %v7503_v59 = vmov 4  }
 0x891   : > { %v2242_v58 = vadd.f32 %v2241_v53, %v2194_v41  ;;  %v2243_v55 = vpop.f32.mrb[6].mxu1  ;;  %v7502_v41 = vmov 14   ;;  %v7505_v53 = vmov 5  }
 0x892   : > { %v3900_v25 = vmul.f32 -1.442695, %v2240_v35  ;;  %v2244_v62 = vpop.f32.mrb[7].mxu1  ;;  %v7507_v55 = vmov 7  }
 0x893   : > { %v3901_v28 = vmul.f32 -1.442695, %v2242_v58  ;;  %v7509_v62 = vmov 9  }
 0x894   : > { %4162 = vpow2.f32 %v3900_v25  ;;  %v7508_v25 = vmov 8  }
 0x895   : > { %4164 = vpow2.f32 %v3901_v28  ;;  %v7510_v28 = vmov 10  }
 0x89e   : > { %v4163_v52 = vpop.eup %4162 }
 0x89f   : > { %v4165_v57 = vpop.eup %4164  ;;  %v2252_v11 = vadd.f32 1.0, %v4163_v52  ;;  %v7511_v52 = vmov 11  }
 0x8a0   : > { %v2253_v40 = vadd.f32 1.0, %v4165_v57  ;;  %v7512_v57 = vmov 12  }
 0x8a1   : > { %4166 = vrcp.f32 %v2252_v11  ;;  %v7513_v11 = vmov 13  }
 0x8a2   : > { %4168 = vrcp.f32 %v2253_v40  ;;  %v7514_v40 = vmov 16  }
 0x8ab   : > { %v4167_v18 = vpop.eup %4166 }
 0x8ac   : > { %v4169_v23 = vpop.eup %4168  ;;  %v2258_v50 = vmul.f32 %v4167_v18, %v2240_v35  ;;  %v7504_v35 = vmov 15   ;;  %v7515_v18 = vmov 17  }
 0x8ad   : > { %v2259_v19 = vmul.f32 %v4169_v23, %v2242_v58  ;;  %v7506_v58 = vmov 6   ;;  %v7516_v23 = vmov 18  }
 0x8ae   : > { %v2260_v45 = vadd.f32 %v2258_v50, %v7437_v13  ;;  %v5807_v13 = vld [vmem:[%s7215_s7 + $0x10] sm:$0xff]  ;;  %v7517_v50 = vmov 19   ;;  %s7565_s7 = sld [smem:[#allocation91_spill]] }
 0x8af   : > { %v2261_v27 = vadd.f32 %v2259_v19, %v7439_v33  ;;  %v3903_v33 = vld [vmem:[%s7216_s6 + $0x10] sm:$0xff]  ;;  %s7650_s6 = sld [smem:[#allocation8_spill]] }
 0x8b0   : > { %v5764_v6 = vadd.f32 %v2260_v45, %v7495_v0 }
 0x8b1   : > { %v5767_v48 = vadd.f32 %v2261_v27, %v7497_v42  ;;  %v7518_v27 = vmov 20  }
 0x8b2   : > { %7496 = vst [vmem:[#allocation58_spill] sm:$0xff] %v5764_v6  ;;  %2320 = vrot.lane.b32.xlu0 %v5764_v6, %s7341_s18  ;;  %2278 = vrot.lane.b32.xlu1 %v5764_v6, %s7241_s20 }
 0x8b3   : > { %7498 = vst [vmem:[#allocation54_spill] sm:$0xff] %v5767_v48  ;;  %v3946_v4 = vpack.c.bf16 %v5767_v48, %v5764_v6 }
 0x8b5   : > { %3735 = vst [vmem:[%s4400_s16 + $0x18] sm:$0xff] %v3946_v4  ;;  %s7546_s16 = smov 97  }
 0x8b6   : > { %2280 = vrot.lane.b32.xlu0 %v5767_v48, %s7241_s20  ;;  %2288 = vrot.lane.b32.xlu1 %v5764_v6, %s7243_s30 }
 0x8ba   : > { %2290 = vrot.lane.b32.xlu0 %v5767_v48, %s7243_s30  ;;  %2298 = vrot.lane.b32.xlu1 %v5764_v6, %s7391_s19 }
 0x8be   : > { %2300 = vrot.lane.b32.xlu0 %v5767_v48, %s7391_s19  ;;  %2308 = vrot.lane.b32.xlu1 %v5764_v6, %s7394_s5 }
 0x8c2   : > { %2310 = vrot.lane.b32.xlu0 %v5767_v48, %s7394_s5  ;;  %2330 = vrot.lane.b32.xlu1 %v5764_v6, %s7342_s15 }
 0x8c6   : > { %2340 = vrot.lane.b32.xlu0 %v5764_v6, %s7343_s24  ;;  %2322 = vrot.lane.b32.xlu1 %v5767_v48, %s7341_s18 }
 0x8ca   : > { %2342 = vrot.lane.b32.xlu0 %v5767_v48, %s7343_s24  ;;  %2332 = vrot.lane.b32.xlu1 %v5767_v48, %s7342_s15 }
 0x8ce   : > { %2352 = vrot.lane.b32.xlu0 %v5767_v48, %s7344_s25  ;;  %2350 = vrot.lane.b32.xlu1 %v5764_v6, %s7344_s25 }
 0x8d2   : > { %2453 = vperm.xlu0 %4059, %v5807_v13   ;;  %2372 = vperm.xlu1 %4060, %v3903_v33  }
 0x8d6   : > { %4062 = vset.pattern.permute.xlu0 %v7499_v24  ;;  %4061 = vset.pattern.permute.xlu1 %v7500_v8 }
 0x8d7   : > { %2489 = vperm.xlu0 %4062, %v5807_v13   ;;  %2471 = vperm.xlu1 %4061, %v5807_v13  }
 0x8db   : > { %4063 = vset.pattern.permute.xlu0 %v7501_v36  ;;  %4074 = vset.pattern.permute.xlu1 %v7502_v41 }
 0x8dc   : > { %2507 = vperm.xlu0 %4063, %v5807_v13   ;;  %2697 = vperm.xlu1 %4074, %v5807_v13  }
 0x8e0   : > { %4064 = vset.pattern.permute.xlu0 %v7503_v59  ;;  %4075 = vset.pattern.permute.xlu1 %v7504_v35 }
 0x8e1   : > { %2525 = vperm.xlu0 %4064, %v5807_v13   ;;  %2715 = vperm.xlu1 %4075, %v5807_v13  }
 0x8e5   : > { %4065 = vset.pattern.permute.xlu0 %v7505_v53  ;;  %4086 = vset.pattern.permute.xlu1 %v7494_v12 }
 0x8e6   : > { %2543 = vperm.xlu0 %4065, %v5807_v13  }
 0x8ea   : > { %4066 = vset.pattern.permute.xlu0 %v7506_v58 }
 0x8eb   : > { %2561 = vperm.xlu0 %4066, %v5807_v13  }
 0x8ef   : > { %4067 = vset.pattern.permute.xlu0 %v7507_v55  ;;  %v7523_v55 = vld [vmem:[#allocation10_spill] sm:$0xff] }
 0x8f0   : > { %2579 = vperm.xlu0 %4067, %v5807_v13  }
 0x8f4   : > { %4068 = vset.pattern.permute.xlu0 %v7508_v25 }
 0x8f5   : > { %2597 = vperm.xlu0 %4068, %v5807_v13  }
 0x8f9   : > { %4069 = vset.pattern.permute.xlu0 %v7509_v62  ;;  %v7522_v62 = vld [vmem:[#allocation13_spill] sm:$0xff] }
 0x8fa   : > { %2615 = vperm.xlu0 %4069, %v5807_v13  }
 0x8fe   : > { %4070 = vset.pattern.permute.xlu0 %v7510_v28  ;;  %v7521_v28 = vld [vmem:[#allocation12_spill] sm:$0xff] }
 0x8ff   : > { %2633 = vperm.xlu0 %4070, %v5807_v13  }
 0x903   : > { %4071 = vset.pattern.permute.xlu0 %v7511_v52 }
 0x904   : > { %2651 = vperm.xlu0 %4071, %v5807_v13  }
 0x908   : > { %4072 = vset.pattern.permute.xlu0 %v7512_v57 }
 0x909   : > { %2661 = vperm.xlu0 %4072, %v5807_v13  }
 0x90d   : > { %4073 = vset.pattern.permute.xlu0 %v7513_v11  ;;  %v7520_v11 = vld [vmem:[#allocation11_spill] sm:$0xff] }
 0x90e   : > { %2679 = vperm.xlu0 %4073, %v5807_v13  }
 0x912   : > { %4076 = vset.pattern.permute.xlu0 %v7514_v40 }
 0x913   : > { %2733 = vperm.xlu0 %4076, %v5807_v13  }
 0x917   : > { %4077 = vset.pattern.permute.xlu0 %v7515_v18  ;;  %v7519_v18 = vmov 21  }
 0x918   : > { %2751 = vperm.xlu0 %4077, %v5807_v13  }
 0x91c   : > { %4078 = vset.pattern.permute.xlu0 %v7516_v23 }
 0x91d   : > { %2769 = vperm.xlu0 %4078, %v5807_v13  }
 0x921   : > { %4079 = vset.pattern.permute.xlu0 %v7517_v50 }
 0x922   : > { %2787 = vperm.xlu0 %4079, %v5807_v13  }
 0x924   : > { %v2321_v19 = vpop.permute.xlu0 %2320  ;;  %v2279_v45 = vpop.permute.xlu1 %2278 }
 0x925   : > { %v2285_v23 = vsel %vm552_vm1, 0.0, %v2279_v45 }
 0x926   : > { %4080 = vset.pattern.permute.xlu0 %v7518_v27  ;;  %v2286_v58 = vmul.f32 %v2285_v23, %v7523_v55  ;;  %v7526_v55 = vld [vmem:[#allocation17_spill] sm:$0xff] }
 0x927   : > { %2805 = vperm.xlu0 %4080, %v5807_v13  }
 0x928   : > { %v2281_v4 = vpop.permute.xlu0 %2280  ;;  %v2289_v33 = vpop.permute.xlu1 %2288 }
 0x929   : > { %v2295_v42 = vsel %vm465_vm0, 0.0, %v2289_v33  ;;  %v2282_v0 = vsel %vm552_vm1, %v2279_v45, %v2281_v4 }
 0x92a   : > { %v2296_v57 = vmul.f32 %v2295_v42, %v7520_v11  ;;  %v2287_v27 = vmul.f32 %v2282_v0, %v7521_v28 }
 0x92b   : > { %4081 = vset.pattern.permute.xlu0 %v7519_v18 }
 0x92c   : > { %v2291_v40 = vpop.permute.xlu0 %2290  ;;  %v2299_v50 = vpop.permute.xlu1 %2298  ;;  %v2360_v4 = vpack.c.bf16 %v2296_v57, %v2286_v58 }
 0x92d   : > { %v2292_v52 = vsel %vm465_vm0, %v2289_v33, %v2291_v40  ;;  %v2305_v42 = vsel %vm589_vm3, 0.0, %v2299_v50  ;;  %v7524_v33 = vld [vmem:[#allocation15_spill] sm:$0xff] }
 0x92e   : > { %v2297_v25 = vmul.f32 %v2292_v52, %v7522_v62  ;;  %v7525_v62 = vld [vmem:[#allocation16_spill] sm:$0xff] }
 0x930   : > { %v2301_v53 = vpop.permute.xlu0 %2300  ;;  %v2309_v35 = vpop.permute.xlu1 %2308  ;;  %v2361_v59 = vpack.c.bf16 %v2297_v25, %v2287_v27  ;;  %v7527_v25 = vld [vmem:[#allocation18_spill] sm:$0xff] }
 0x931   : > { %v2315_v18 = vsel %vm608_vm2, 0.0, %v2309_v35  ;;  %v2302_v45 = vsel %vm589_vm3, %v2299_v50, %v2301_v53  ;;  %v2306_v58 = vmul.f32 %v2305_v42, %v7527_v25 }
 0x932   : > { %2384 = vmatprep.subr.bf16.mxu1 %v2361_v59  ;;  %v2316_v0 = vmul.f32 %v2315_v18, %v7524_v33  ;;  %v2307_v23 = vmul.f32 %v2302_v45, %v7525_v62  ;;  %v7529_v18 = vld [vmem:[#allocation21_spill] sm:$0xff]  ;;  %v7531_v45 = vld [vmem:[#allocation19_spill] sm:$0xff] }
 0x933   : > { %2385 = vmatpush1.bf16.msra.mxu1 %v2360_v4  ;;  %v7528_v4 = vld [vmem:[#allocation20_spill] sm:$0xff] }
 0x934   : > { %v2311_v11 = vpop.permute.xlu0 %2310  ;;  %v2331_v40 = vpop.permute.xlu1 %2330  ;;  %v2362_v41 = vpack.c.bf16 %v2316_v0, %v2306_v58  ;;  %v2318_v36 = vmul.f32 %v5764_v6, %v7528_v4 }
 0x935   : > { %v2312_v52 = vsel %vm608_vm2, %v2309_v35, %v2311_v11  ;;  %v7530_v35 = vld [vmem:[#allocation22_spill] sm:$0xff] }
 0x936   : > { %v2317_v28 = vmul.f32 %v2312_v52, %v7526_v55  ;;  %v2319_v52 = vmul.f32 %v5767_v48, %v7531_v45  ;;  %v7535_v45 = vld [vmem:[#allocation24_spill] sm:$0xff] }
 0x938   : > { %v2341_v57 = vpop.permute.xlu0 %2340  ;;  %v2323_v27 = vpop.permute.xlu1 %2322  ;;  %v2363_v59 = vpack.c.bf16 %v2317_v28, %v2307_v23 }
 0x939   : > { %v2324_v53 = vsel %vm637_vm4, %v2321_v19, %v2323_v27  ;;  %v2327_v50 = vsel %vm637_vm4, %v2323_v27, 0.0 }
 0x93a   : > { %v2328_v33 = vmul.f32 %v2324_v53, %v7529_v18  ;;  %v2329_v11 = vmul.f32 %v2327_v50, %v7530_v35  ;;  %2386 = vmatprep.subr.bf16.mxu1 %v2363_v59  ;;  %v7532_v53 = vld [vmem:[#allocation25_spill] sm:$0xff]  ;;  %v7533_v50 = vld [vmem:[#allocation26_spill] sm:$0xff]  ;;  %v7534_v35 = vld [vmem:[#allocation23_spill] sm:$0xff] }
 0x93b   : > { %2387 = vmatpush1.bf16.msra.mxu1 %v2362_v41 }
 0x93c   : > { %v2364_v42 = vpack.c.bf16 %v2328_v33, %v2318_v36  ;;  %v2343_v25 = vpop.permute.xlu0 %2342  ;;  %v2333_v28 = vpop.permute.xlu1 %2332  ;;  %v2365_v0 = vpack.c.bf16 %v2329_v11, %v2319_v52  ;;  %v4230_v52 = vld [vmem:[%s7536_s10 + $0x18] ss:$0 sm:$0xff] }
 0x93d   : > { %v2344_v19 = vsel %vm675_vm6, %v2341_v57, %v2343_v25  ;;  %v2347_v23 = vsel %vm675_vm6, %v2343_v25, 0.0  ;;  %v2334_v58 = vsel %vm656_vm5, %v2331_v40, %v2333_v28  ;;  %v2337_v27 = vsel %vm656_vm5, %v2333_v28, 0.0 }
 0x93e   : > { %v2348_v18 = vmul.f32 %v2344_v19, %v7532_v53  ;;  %v2349_v59 = vmul.f32 %v2347_v23, %v7533_v50  ;;  %v2338_v4 = vmul.f32 %v2334_v58, %v7534_v35  ;;  %v2339_v41 = vmul.f32 %v2337_v27, %v7535_v45  ;;  %2388 = vmatprep.subr.bf16.mxu1 %v2365_v0  ;;  %v4231_v19 = vld [vmem:[%s7536_s10 + $0x10] ss:$0 sm:$0xff]  ;;  %v3902_v0 = vld [vmem:[%s7539_s9 + $0x8] sm:$0xf] }
 0x93f   : > { %2389 = vmatpush1.bf16.msra.mxu1 %v2364_v42 }
 0x940   : > { %v2366_v36 = vpack.c.bf16 %v2348_v18, %v2338_v4  ;;  %v2353_v33 = vpop.permute.xlu0 %2352  ;;  %v2351_v11 = vpop.permute.xlu1 %2350  ;;  %v2367_v57 = vpack.c.bf16 %v2349_v59, %v2339_v41 }
 0x941   : > { %v2357_v25 = vsel %vm694_vm7, %v2353_v33, 0.0  ;;  %v2354_v40 = vsel %vm694_vm7, %v2351_v11, %v2353_v33 }
 0x942   : > { %v2359_v28 = vmul.f32 %v4230_v52, %v2357_v25  ;;  %v2358_v23 = vmul.f32 %v4231_v19, %v2354_v40  ;;  %2390 = vmatprep.subr.bf16.mxu1 %v2367_v57 }
 0x943   : > { %2391 = vmatpush1.bf16.msra.mxu1 %v2366_v36 }
 0x944   : > { %v2369_v4 = vpack.c.bf16 %v2359_v28, %v2359_v28  ;;  %v2368_v18 = vpack.c.bf16 %v2358_v23, %v2358_v23 }
 0x946   : > { %3908 = vmatprep.subr.msk.bf16.mxu1 %vm7537_vm8, %v2369_v4  ;;  %v2379_v42 = vsel %vm7538_vm14, %v2368_v18, 0  ;;  %v7542_v18 = vmov 22   ;;  %vm7572_vm8 = vmmov %vm7569_vm9  ;;  %vm7573_vm14 = vcmask 252928  }
 0x947   : > { %2393 = vmatpush1.bf16.msra.mxu1 %v2379_v42 }
 0x94a   : > { %3909 = vmatmul.mubr.msk.bf16.vlgmr.msra.gmra.mrb[8].mxu1 %vm7540_vm12, %v3902_v0  ;;  %v7543_v0 = vmov 23   ;;  %vm7576_vm12 = vmmov %vm7573_vm14 }
 0x94b   : > { %3669 = vmatprep.mubr.bf16.mxu1 %v7494_v12 }
 0x951   : > { %v2373_v58 = vpop.permute.xlu1 %2372 }
 0xa1d   : > { %v2418_v27 = vpop.f32.mrb[8].mxu1 }
 0xa1e   : > { %v2419_v59 = vadd.f32 %v2418_v27, %v2373_v58  ;;  %v2420_v41 = vpop.f32.mrb[9].mxu1  ;;  %v7545_v27 = vmov 24  }
 0xa1f   : > { %v2422_v36 = vpop.f32.mrb[10].mxu1  ;;  %v2421_v57 = vadd.f32 %v2420_v41, %v2373_v58 }
 0xa20   : > { %v3910_v33 = vmul.f32 -1.442695, %v2419_v59  ;;  %v2423_v11 = vpop.f32.mrb[11].mxu1 }
 0xa21   : > { %v3911_v25 = vmul.f32 -1.442695, %v2421_v57 }
 0xa22   : > { %4170 = vpow2.f32 %v3910_v33 }
 0xa23   : > { %4172 = vpow2.f32 %v3911_v25 }
 0xa2c   : > { %v4171_v40 = vpop.eup %4170 }
 0xa2d   : > { %v2431_v52 = vadd.f32 1.0, %v4171_v40  ;;  %v4173_v28 = vpop.eup %4172 }
 0xa2e   : > { %v2432_v4 = vadd.f32 1.0, %v4173_v28 }
 0xa2f   : > { %4174 = vrcp.f32 %v2431_v52 }
 0xa30   : > { %4176 = vrcp.f32 %v2432_v4 }
 0xa39   : > { %v4175_v19 = vpop.eup %4174 }
 0xa3a   : > { %v5902_v23 = vmul.f32 %v4175_v19, %v2419_v59  ;;  %v4177_v42 = vpop.eup %4176  ;;  %v3905_v59 = vld [vmem:[%s6883_s8 + $0x10] sm:$0xff] }
 0xa3b   : > { %v5920_v58 = vmul.f32 %v4177_v42, %v2421_v57  ;;  %v5995_v57 = vpop.permute.xlu0 %2453 }
 0xa3c   : > { %7541 = vst [vmem:[#allocation70_spill] sm:$0xff] %v5902_v23  ;;  %2460 = vrot.lane.b32.xlu0 %v5902_v23, %s7383_s11  ;;  %2441 = vrot.lane.b32.xlu1 %v5902_v23, %s7384_s21 }
 0xa3d   : > { %7544 = vst [vmem:[#allocation47_spill] sm:$0xff] %v5920_v58 }
 0xa3f   : > { %v6001_v40 = vpop.permute.xlu0 %2489 }
 0xa40   : > { %2823 = vperm.xlu0 %4081, %v5807_v13   ;;  %2478 = vrot.lane.b32.xlu1 %v5902_v23, %s7385_s0 }
 0xa43   : > { %v6009_v28 = vpop.permute.xlu0 %2507 }
 0xa44   : > { %4082 = vset.pattern.permute.xlu0 %v7542_v18  ;;  %2496 = vrot.lane.b32.xlu1 %v5902_v23, %s7387_s1 }
 0xa45   : > { %2841 = vperm.xlu0 %4082, %v5807_v13  }
 0xa47   : > { %v6017_v42 = vpop.permute.xlu0 %2525 }
 0xa48   : > { %2514 = vrot.lane.b32.xlu1 %v5902_v23, %s7239_s17 }
 0xa49   : > { %2686 = vrot.lane.b32.xlu0 %v5902_v23, %s7245_s13 }
 0xa4a   : > { %4083 = vset.pattern.permute.xlu0 %v7543_v0 }
 0xa4c   : > { %2532 = vrot.lane.b32.xlu1 %v5902_v23, %s7240_s27 }
 0xa4d   : > { %2670 = vrot.lane.b32.xlu0 %v5920_v58, %s7341_s18 }
 0xa50   : > { %2550 = vrot.lane.b32.xlu1 %v5902_v23, %s7241_s20 }
 0xa51   : > { %2859 = vperm.xlu0 %4083, %v5807_v13  }
 0xa54   : > { %2568 = vrot.lane.b32.xlu1 %v5902_v23, %s7243_s30 }
 0xa55   : > { %4084 = vset.pattern.permute.xlu0 %v7545_v27  ;;  %v6025_v27 = vpop.permute.xlu0 %2543 }
 0xa56   : > { %2877 = vperm.xlu0 %4084, %v5807_v13   ;;  %v5975_v13 = vpop.permute.xlu1 %2471 }
 0xa58   : > { %2586 = vrot.lane.b32.xlu1 %v5902_v23, %s7391_s19 }
 0xa59   : > { %v6033_v45 = vpop.permute.xlu0 %2561 }
 0xa5a   : > { %2866 = vrot.lane.b32.xlu0 %v5902_v23, %s7255_s26  ;;  %v5979_v41 = vpop.permute.xlu1 %2697 }
 0xa5b   : > { %4085 = vset.pattern.permute.xlu0 %v7494_v12  ;;  %7547 = vst [vmem:[#allocation48_spill] sm:$0xff] %v5979_v41 }
 0xa5c   : > { %2604 = vrot.lane.b32.xlu1 %v5902_v23, %s7392_s23 }
 0xa5d   : > { %v6041_v50 = vpop.permute.xlu0 %2579 }
 0xa5e   : > { %2886 = vperm.xlu0 %4085, %v3905_v59   ;;  %v5985_v36 = vpop.permute.xlu1 %2715 }
 0xa5f   : > { %7548 = vst [vmem:[#allocation65_spill] sm:$0xff] %v5985_v36 }
 0xa60   : > { %2622 = vrot.lane.b32.xlu1 %v5902_v23, %s7393_s12 }
 0xa61   : > { %v6049_v62 = vpop.permute.xlu0 %2597 }
 0xa64   : > { %2640 = vrot.lane.b32.xlu1 %v5902_v23, %s7394_s5 }
 0xa65   : > { %v6057_v24 = vpop.permute.xlu0 %2615 }
 0xa68   : > { %2668 = vrot.lane.b32.xlu1 %v5902_v23, %s7341_s18 }
 0xa69   : > { %v6065_v12 = vpop.permute.xlu0 %2633 }
 0xa6a   : > { %7555 = vst [vmem:[#allocation61_spill] sm:$0xff] %v6065_v12 }
 0xa6c   : > { %2704 = vrot.lane.b32.xlu1 %v5902_v23, %s7395_s3 }
 0xa6d   : > { %v6071_v49 = vpop.permute.xlu0 %2651 }
 0xa6e   : > { %7557 = vst [vmem:[#allocation64_spill] sm:$0xff] %v6071_v49 }
 0xa70   : > { %2722 = vrot.lane.b32.xlu1 %v5902_v23, %s7342_s15 }
 0xa71   : > { %v6077_v56 = vpop.permute.xlu0 %2661 }
 0xa72   : > { %7560 = vst [vmem:[#allocation71_spill] sm:$0xff] %v6077_v56 }
 0xa74   : > { %2740 = vrot.lane.b32.xlu1 %v5902_v23, %s7343_s24 }
 0xa75   : > { %v6081_v9 = vpop.permute.xlu0 %2679 }
 0xa76   : > { %7562 = vst [vmem:[#allocation72_spill] sm:$0xff] %v6081_v9 }
 0xa78   : > { %2758 = vrot.lane.b32.xlu1 %v5902_v23, %s7344_s25 }
 0xa7c   : > { %2776 = vrot.lane.b32.xlu1 %v5902_v23, %s7246_s28 }
 0xa80   : > { %2794 = vrot.lane.b32.xlu1 %v5902_v23, %s7247_s14 }
 0xa84   : > { %2812 = vrot.lane.b32.xlu1 %v5902_v23, %s7546_s16 }
 0xa88   : > { %2443 = vrot.lane.b32.xlu1 %v5920_v58, %s7384_s21 }
 0xa8c   : > { %2462 = vrot.lane.b32.xlu1 %v5920_v58, %s7383_s11 }
 0xa90   : > { %2480 = vrot.lane.b32.xlu1 %v5920_v58, %s7385_s0 }
 0xa94   : > { %2498 = vrot.lane.b32.xlu1 %v5920_v58, %s7387_s1 }
 0xa98   : > { %2516 = vrot.lane.b32.xlu1 %v5920_v58, %s7239_s17 }
 0xa9c   : > { %2534 = vrot.lane.b32.xlu1 %v5920_v58, %s7240_s27 }
 0xaa0   : > { %2552 = vrot.lane.b32.xlu1 %v5920_v58, %s7241_s20 }
 0xaa4   : > { %2570 = vrot.lane.b32.xlu1 %v5920_v58, %s7243_s30 }
 0xaa8   : > { %2588 = vrot.lane.b32.xlu1 %v5920_v58, %s7391_s19 }
 0xaac   : > { %2606 = vrot.lane.b32.xlu1 %v5920_v58, %s7392_s23 }
 0xaae   : > { %v5989_v33 = vpop.permute.xlu1 %2441 }
 0xaaf   : > { %v2448_v38 = vsel %vm796_vm11, 0.0, %v5989_v33 }
 0xab0   : > { %2624 = vrot.lane.b32.xlu1 %v5920_v58, %s7393_s12 }
 0xab2   : > { %v5993_v11 = vpop.permute.xlu1 %2478 }
 0xab4   : > { %2642 = vrot.lane.b32.xlu1 %v5920_v58, %s7394_s5 }
 0xab6   : > { %v5999_v25 = vpop.permute.xlu1 %2496 }
 0xab8   : > { %2830 = vrot.lane.b32.xlu1 %v5902_v23, %s7549_s2 }
 0xaba   : > { %v6005_v52 = vpop.permute.xlu1 %2514 }
 0xabc   : > { %2848 = vrot.lane.b32.xlu1 %v5902_v23, %s7550_s22  ;;  %v2503_v23 = vsel %vm7573_vm14, 0.0, %v5999_v25  ;;  %vm7580_vm14 = vcmask 146432  }
 0xabe   : > { %v6011_v19 = vpop.permute.xlu1 %2532 }
 0xac0   : > { %2688 = vrot.lane.b32.xlu1 %v5920_v58, %s7245_s13 }
 0xac2   : > { %v6015_v4 = vpop.permute.xlu1 %2550 }
 0xac4   : > { %2706 = vrot.lane.b32.xlu1 %v5920_v58, %s7395_s3 }
 0xac6   : > { %v6021_v59 = vpop.permute.xlu1 %2568 }
 0xac8   : > { %2724 = vrot.lane.b32.xlu1 %v5920_v58, %s7342_s15 }
 0xaca   : > { %v6027_v0 = vpop.permute.xlu1 %2586 }
 0xacc   : > { %2742 = vrot.lane.b32.xlu1 %v5920_v58, %s7343_s24 }
 0xace   : > { %v6031_v18 = vpop.permute.xlu1 %2604 }
 0xad0   : > { %2760 = vrot.lane.b32.xlu1 %v5920_v58, %s7344_s25 }
 0xad2   : > { %v6037_v35 = vpop.permute.xlu1 %2622 }
 0xad4   : > { %2778 = vrot.lane.b32.xlu1 %v5920_v58, %s7246_s28 }
 0xad6   : > { %v6043_v53 = vpop.permute.xlu1 %2640 }
 0xad8   : > { %2796 = vrot.lane.b32.xlu1 %v5920_v58, %s7247_s14 }
 0xada   : > { %v6047_v55 = vpop.permute.xlu1 %2668 }
 0xadb   : > { %7551 = vst [vmem:[#allocation73_spill] sm:$0xff] %v6047_v55 }
 0xadc   : > { %2814 = vrot.lane.b32.xlu1 %v5920_v58, %s7546_s16 }
 0xade   : > { %v6053_v8 = vpop.permute.xlu1 %2704 }
 0xadf   : > { %7552 = vst [vmem:[#allocation66_spill] sm:$0xff] %v6053_v8 }
 0xae0   : > { %2832 = vrot.lane.b32.xlu1 %v5920_v58, %s7549_s2  ;;  %s7654_s2 = sld [smem:[#allocation88_spill]] }
 0xae2   : > { %v6059_v48 = vpop.permute.xlu1 %2722 }
 0xae3   : > { %7553 = vst [vmem:[#allocation75_spill] sm:$0xff] %v6059_v48 }
 0xae4   : > { %2850 = vrot.lane.b32.xlu1 %v5920_v58, %s7550_s22 }
 0xae6   : > { %v6063_v6 = vpop.permute.xlu1 %2740 }
 0xae7   : > { %7554 = vst [vmem:[#allocation67_spill] sm:$0xff] %v6063_v6  ;;  %v6083_v6 = vpop.permute.xlu0 %2733 }
 0xae8   : > { %2868 = vrot.lane.b32.xlu1 %v5920_v58, %s7255_s26  ;;  %7563 = vst [vmem:[#allocation78_spill] sm:$0xff] %v6083_v6 }
 0xaea   : > { %v6069_v10 = vpop.permute.xlu1 %2758 }
 0xaeb   : > { %7556 = vst [vmem:[#allocation68_spill] sm:$0xff] %v6069_v10  ;;  %v6085_v34 = vpop.permute.xlu0 %2751 }
 0xaec   : > { %7564 = vst [vmem:[#allocation74_spill] sm:$0xff] %v6085_v34 }
 0xaee   : > { %v6073_v15 = vpop.permute.xlu1 %2776 }
 0xaef   : > { %7558 = vst [vmem:[#allocation69_spill] sm:$0xff] %v6073_v15  ;;  %v3907_v15 = vld [vmem:[%s7565_s7 + $0x10] sm:$0xff] }
 0xaf0   : > { %2909 = vperm.xlu1 %4086, %v3907_v15  }
 0xaf2   : > { %v6075_v14 = vpop.permute.xlu1 %2794 }
 0xaf3   : > { %7559 = vst [vmem:[#allocation76_spill] sm:$0xff] %v6075_v14  ;;  %v6090_v14 = vpop.permute.xlu0 %2769 }
 0xaf4   : > { %7566 = vst [vmem:[#allocation79_spill] sm:$0xff] %v6090_v14  ;;  %v2485_v14 = vsel %vm7569_vm9, 0.0, %v5993_v11  ;;  %vm7577_vm9 = vcmask 244736  }
 0xaf6   : > { %v6079_v26 = vpop.permute.xlu1 %2812 }
 0xaf7   : > { %7561 = vst [vmem:[#allocation77_spill] sm:$0xff] %v6079_v26  ;;  %v6092_v26 = vpop.permute.xlu0 %2787 }
 0xaf8   : > { %7567 = vst [vmem:[#allocation80_spill] sm:$0xff] %v6092_v26  ;;  %v7571_v26 = vld [vmem:[#allocation52_spill] sm:$0xff] }
 0xaf9   : > { %v2449_v58 = vmul.f32 %v2448_v38, %v7571_v26  ;;  %v2521_v38 = vsel %vm7577_vm9, 0.0, %v6005_v52  ;;  %v2504_v26 = vmul.f32 %v2503_v23, %v7426_v63 }
 0xafa   : > { %v2444_v36 = vpop.permute.xlu1 %2443 }
 0xafb   : > { %v6094_v8 = vpop.permute.xlu0 %2805 }
 0xafc   : > { %7568 = vst [vmem:[#allocation81_spill] sm:$0xff] %v6094_v8  ;;  %v2445_v8 = vsel %vm796_vm11, %v5989_v33, %v2444_v36  ;;  %v7578_v36 = vld [vmem:[#allocation59_spill] sm:$0xff] }
 0xafe   : > { %v2463_v43 = vpop.permute.xlu1 %2462 }
 0xaff   : > { %v2461_v7 = vpop.permute.xlu0 %2460 }
 0xb00   : > { %v2467_v34 = vsel %vm824_vm10, 0.0, %v2461_v7  ;;  %v2464_v15 = vsel %vm824_vm10, %v2461_v7, %v2463_v43  ;;  %v7575_v7 = vld [vmem:[#allocation53_spill] sm:$0xff] }
 0xb01   : > { %v2468_v55 = vmul.f32 %v2467_v34, %v7570_v3  ;;  %v2469_v49 = vmul.f32 %v2464_v15, %v7574_v39  ;;  %v2486_v43 = vmul.f32 %v2485_v14, %v7575_v7  ;;  %v2450_v34 = vmul.f32 %v2445_v8, %v7424_v16 }
 0xb02   : > { %v2481_v41 = vpop.permute.xlu1 %2480  ;;  %v2539_v14 = vsel %vm7580_vm14, 0.0, %v6011_v19 }
 0xb03   : > { %v2482_v2 = vsel %vm7572_vm8, %v5993_v11, %v2481_v41  ;;  %v2474_v41 = vmul.f32 %v5975_v13, %v2468_v55  ;;  %v2456_v11 = vmul.f32 %v5995_v57, %v2449_v58  ;;  %vm7579_vm8 = vmmov %vm7577_vm9  ;;  %v2492_v8 = vmul.f32 %v6001_v40, %v2486_v43  ;;  %v6129_v55 = vpop.permute.xlu0 %2823 }
 0xb04   : > { %v2487_v33 = vmul.f32 %v2482_v2, %v7578_v36  ;;  %v7581_v2 = vld [vmem:[#allocation55_spill] sm:$0xff]  ;;  %v2457_v58 = vmul.f32 %v5995_v57, %v2450_v34  ;;  %v2540_v43 = vmul.f32 %v2539_v14, %v4850_v22  ;;  %vm7583_vm9 = vcmask 113664  }
 0xb05   : > { %v2522_v36 = vmul.f32 %v2521_v38, %v7581_v2 }
 0xb06   : > { %v2499_v10 = vpop.permute.xlu1 %2498  ;;  %v2546_v14 = vmul.f32 %v6025_v27, %v2540_v43 }
 0xb07   : > { %v2500_v1 = vsel %vm7576_vm12, %v5999_v25, %v2499_v10  ;;  %v2475_v10 = vmul.f32 %v5975_v13, %v2469_v49  ;;  %vm7582_vm12 = vmmov %vm7580_vm14  ;;  %v2510_v13 = vmul.f32 %v6009_v28, %v2504_v26  ;;  %vm7585_vm14 = vcmask 15360  }
 0xb08   : > { %v2505_v25 = vmul.f32 %v2500_v1, %v7428_v5  ;;  %v2476_v1 = vadd.f32 %v2474_v41, %v2456_v11 }
 0xb0a   : > { %v2517_v60 = vpop.permute.xlu1 %2516  ;;  %v2511_v5 = vmul.f32 %v6009_v28, %v2505_v25 }
 0xb0b   : > { %v2518_v15 = vsel %vm7579_vm8, %v6005_v52, %v2517_v60  ;;  %v2557_v60 = vsel %vm552_vm1, 0.0, %v6015_v4  ;;  %v2493_v52 = vmul.f32 %v6001_v40, %v2487_v33  ;;  %v2494_v40 = vadd.f32 %v2492_v8, %v2476_v1  ;;  %vm7584_vm8 = vmmov %vm7583_vm9 }
 0xb0c   : > { %v2523_v49 = vmul.f32 %v2518_v15, %v4895_v61  ;;  %v2528_v33 = vmul.f32 %v6017_v42, %v2522_v36  ;;  %v2558_v26 = vmul.f32 %v2557_v60, %v4853_v30 }
 0xb0d   : > { %v2512_v15 = vadd.f32 %v2510_v13, %v2494_v40 }
 0xb0e   : > { %v2535_v48 = vpop.permute.xlu1 %2534  ;;  %v2529_v11 = vmul.f32 %v6017_v42, %v2523_v49 }
 0xb0f   : > { %v2536_v23 = vsel %vm7582_vm12, %v6011_v19, %v2535_v48  ;;  %v2575_v48 = vsel %vm465_vm0, 0.0, %v6021_v59  ;;  %v2477_v19 = vadd.f32 %v2475_v10, %v2457_v58  ;;  %v6157_v10 = vpop.permute.xlu0 %2841  ;;  %v2530_v60 = vadd.f32 %v2528_v33, %v2512_v15  ;;  %vm7586_vm12 = vmmov %vm7585_vm14 }
 0xb10   : > { %v2541_v57 = vmul.f32 %v2536_v23, %v4912_v20  ;;  %v2576_v36 = vmul.f32 %v2575_v48, %v4856_v46  ;;  %v2564_v58 = vmul.f32 %v6033_v45, %v2558_v26  ;;  %v2647_v48 = vsel %vm608_vm2, 0.0, %v6043_v53 }
 0xb11   : > { %v2548_v1 = vadd.f32 %v2546_v14, %v2530_v60  ;;  %v7587_v14 = vld [vmem:[#allocation62_spill] sm:$0xff]  ;;  %v7589_v60 = vld [vmem:[#allocation64_spill] sm:$0xff] }
 0xb12   : > { %v2553_v9 = vpop.permute.xlu1 %2552  ;;  %v2547_v8 = vmul.f32 %v6025_v27, %v2541_v57  ;;  %v2582_v13 = vmul.f32 %v6041_v50, %v2576_v36 }
 0xb13   : > { %v2554_v38 = vsel %vm552_vm1, %v6015_v4, %v2553_v9  ;;  %v2593_v9 = vsel %vm589_vm3, 0.0, %v6027_v0  ;;  %v2495_v4 = vadd.f32 %v2493_v52, %v2477_v19  ;;  %v2687_v40 = vpop.permute.xlu0 %2686 }
 0xb14   : > { %v2559_v28 = vmul.f32 %v2554_v38, %v4915_v32  ;;  %v2594_v52 = vmul.f32 %v2593_v9, %v4860_v31 }
 0xb16   : > { %v2571_v6 = vpop.permute.xlu1 %2570  ;;  %v2600_v33 = vmul.f32 %v6049_v62, %v2594_v52 }
 0xb17   : > { %v2572_v41 = vsel %vm465_vm0, %v6021_v59, %v2571_v6  ;;  %v2611_v6 = vsel %vm7583_vm9, 0.0, %v6031_v18  ;;  %v2513_v59 = vadd.f32 %v2511_v5, %v2495_v4  ;;  %v2565_v5 = vmul.f32 %v6033_v45, %v2559_v28 }
 0xb18   : > { %v2577_v42 = vmul.f32 %v2572_v41, %v4923_v44  ;;  %v2612_v43 = vmul.f32 %v2611_v6, %v4867_v17  ;;  %v2566_v45 = vadd.f32 %v2564_v58, %v2548_v1  ;;  %v7593_v1 = vld [vmem:[#allocation47_spill] sm:$0xff]  ;;  %vm7595_vm9 = vcmask 1031168  }
 0xb1a   : > { %v2589_v21 = vpop.permute.xlu1 %2588  ;;  %v2584_v4 = vadd.f32 %v2582_v13, %v2566_v45 }
 0xb1b   : > { %v2590_v25 = vsel %vm589_vm3, %v6027_v0, %v2589_v21  ;;  %v2629_v21 = vsel %vm7585_vm14, 0.0, %v6037_v35  ;;  %v2531_v0 = vadd.f32 %v2529_v11, %v2513_v59  ;;  %v2648_v11 = vmul.f32 %v2647_v48, %v7287_v54  ;;  %v7588_v59 = vld [vmem:[#allocation61_spill] sm:$0xff] }
 0xb1c   : > { %v2595_v27 = vmul.f32 %v2590_v25, %v4927_v29  ;;  %v2630_v26 = vmul.f32 %v2629_v21, %v4876_v47  ;;  %v2602_v6 = vadd.f32 %v2600_v33, %v2584_v4  ;;  %vm7603_vm14 = vcmask 932864  }
 0xb1d   : > { %v2654_v58 = vmul.f32 %v7589_v60, %v2648_v11  ;;  %v7599_v11 = vld [vmem:[#allocation57_spill] sm:$0xff] }
 0xb1e   : > { %v2607_v56 = vpop.permute.xlu1 %2606 }
 0xb1f   : > { %v2608_v49 = vsel %vm7584_vm8, %v6031_v18, %v2607_v56  ;;  %v2549_v56 = vadd.f32 %v2547_v8, %v2531_v0  ;;  %v2583_v18 = vmul.f32 %v6041_v50, %v2577_v42  ;;  %v2618_v50 = vmul.f32 %v6057_v24, %v2612_v43  ;;  %v7590_v0 = vld [vmem:[#allocation50_spill] sm:$0xff]  ;;  %vm7596_vm8 = vmmov %vm7595_vm9 }
 0xb20   : > { %v2613_v19 = vmul.f32 %v2608_v49, %v4935_v51  ;;  %v2636_v8 = vmul.f32 %v7588_v59, %v2630_v26  ;;  %v7597_v26 = vld [vmem:[#allocation33_spill] sm:$0xff] }
 0xb21   : > { %v2567_v9 = vadd.f32 %v2565_v5, %v2549_v56  ;;  %v2620_v42 = vadd.f32 %v2618_v50, %v2602_v6  ;;  %v7591_v5 = vld [vmem:[#allocation70_spill] sm:$0xff]  ;;  %v7601_v6 = vld [vmem:[#allocation36_spill] sm:$0xff] }
 0xb22   : > { %v2625_v12 = vpop.permute.xlu1 %2624  ;;  %v2619_v15 = vmul.f32 %v6057_v24, %v2613_v19  ;;  %v2658_v24 = vmul.f32 %v7591_v5, %v7590_v0 }
 0xb23   : > { %v2626_v38 = vsel %vm7586_vm12, %v6037_v35, %v2625_v12  ;;  %v2601_v12 = vmul.f32 %v6049_v62, %v2595_v27  ;;  %v2585_v28 = vadd.f32 %v2583_v18, %v2567_v9  ;;  %v2671_v62 = vpop.permute.xlu0 %2670  ;;  %v7592_v27 = vld [vmem:[#allocation14_spill] sm:$0xff]  ;;  %v2638_v43 = vadd.f32 %v2636_v8, %v2620_v42  ;;  %vm7604_vm12 = vmmov %vm7603_vm14 }
 0xb24   : > { %v2631_v35 = vmul.f32 %v2626_v38, %v4949_v37  ;;  %v2659_v13 = vmul.f32 %v7593_v1, %v7592_v27  ;;  %v7594_v38 = vld [vmem:[#allocation73_spill] sm:$0xff]  ;;  %v2675_v56 = vsel %vm637_vm4, %v2671_v62, 0.0  ;;  %v7602_v8 = vld [vmem:[#allocation66_spill] sm:$0xff] }
 0xb25   : > { %v2672_v48 = vsel %vm637_vm4, %v7594_v38, %v2671_v62  ;;  %v2656_v19 = vadd.f32 %v2654_v58, %v2638_v43  ;;  %v7608_v43 = vld [vmem:[#allocation38_spill] sm:$0xff] }
 0xb26   : > { %v2643_v39 = vpop.permute.xlu1 %2642 }
 0xb27   : > { %v2644_v41 = vsel %vm608_vm2, %v6043_v53, %v2643_v39  ;;  %v2603_v39 = vadd.f32 %v2601_v12, %v2585_v28  ;;  %v2637_v53 = vmul.f32 %v7588_v59, %v2631_v35  ;;  %v7598_v35 = vld [vmem:[#allocation71_spill] sm:$0xff]  ;;  %v2677_v28 = vmul.f32 %v2675_v56, %v7599_v11  ;;  %v7609_v56 = vld [vmem:[#allocation48_spill] sm:$0xff] }
 0xb28   : > { %v2649_v36 = vmul.f32 %v2644_v41, %v7587_v14  ;;  %v2676_v41 = vmul.f32 %v2672_v48, %v7597_v26  ;;  %v2664_v4 = vmul.f32 %v7598_v35, %v2658_v24  ;;  %v2665_v50 = vmul.f32 %v7598_v35, %v2659_v13  ;;  %v7607_v24 = vld [vmem:[#allocation28_spill] sm:$0xff] }
 0xb29   : > { %v2621_v52 = vadd.f32 %v2619_v15, %v2603_v39  ;;  %v7600_v15 = vld [vmem:[#allocation27_spill] sm:$0xff] }
 0xb2a   : > { %v6146_v34 = vpop.permute.xlu1 %2830  ;;  %v2655_v49 = vmul.f32 %v7589_v60, %v2649_v36  ;;  %v7606_v60 = vld [vmem:[#allocation75_spill] sm:$0xff] }
 0xb2b   : > { %v2639_v18 = vadd.f32 %v2637_v53, %v2621_v52  ;;  %v7605_v53 = vld [vmem:[#allocation72_spill] sm:$0xff] }
 0xb2c   : > { %v2682_v62 = vmul.f32 %v7605_v53, %v2676_v41  ;;  %v2683_v48 = vmul.f32 %v7605_v53, %v2677_v28  ;;  %v7614_v53 = vld [vmem:[#allocation68_spill] sm:$0xff] }
 0xb2d   : > { %v2657_v9 = vadd.f32 %v2655_v49, %v2639_v18 }
 0xb2e   : > { %v6166_v23 = vpop.permute.xlu1 %2848 }
 0xb2f   : > { %v2667_v42 = vadd.f32 %v2665_v50, %v2657_v9  ;;  %v7612_v9 = vld [vmem:[#allocation67_spill] sm:$0xff] }
 0xb31   : > { %v2685_v50 = vadd.f32 %v2683_v48, %v2667_v42 }
 0xb32   : > { %v2689_v57 = vpop.permute.xlu1 %2688 }
 0xb33   : > { %v2690_v45 = vsel %vm7595_vm9, %v2687_v40, %v2689_v57  ;;  %v2693_v33 = vsel %vm7596_vm8, %v2689_v57, 0.0  ;;  %v2666_v57 = vadd.f32 %v2664_v4, %v2656_v19  ;;  %v7610_v19 = vld [vmem:[#allocation49_spill] sm:$0xff]  ;;  %vm7621_vm9 = vcmask 900096  }
 0xb34   : > { %v2694_v36 = vmul.f32 %v2690_v45, %v7600_v15  ;;  %v2695_v59 = vmul.f32 %v2693_v33, %v7601_v6  ;;  %v7611_v33 = vld [vmem:[#allocation41_spill] sm:$0xff]  ;;  %vm7622_vm8 = vmmov %vm7621_vm9 }
 0xb35   : > { %v2684_v4 = vadd.f32 %v2682_v62, %v2666_v57  ;;  %v7618_v62 = vld [vmem:[#allocation63_spill] sm:$0xff] }
 0xb36   : > { %v2707_v25 = vpop.permute.xlu1 %2706  ;;  %v2700_v18 = vmul.f32 %v7609_v56, %v2694_v36 }
 0xb37   : > { %v2708_v39 = vsel %vm7603_vm14, %v7602_v8, %v2707_v25  ;;  %v2711_v40 = vsel %vm7604_vm12, %v2707_v25, 0.0  ;;  %v2701_v25 = vmul.f32 %v7609_v56, %v2695_v59  ;;  %vm7625_vm14 = vcmask 801792  }
 0xb38   : > { %v2712_v13 = vmul.f32 %v2708_v39, %v7607_v24  ;;  %v2713_v38 = vmul.f32 %v2711_v40, %v7608_v43  ;;  %v7613_v39 = vld [vmem:[#allocation65_spill] sm:$0xff]  ;;  %vm7626_vm12 = vmmov %vm7625_vm14 }
 0xb3a   : > { %v2725_v21 = vpop.permute.xlu1 %2724  ;;  %v2718_v40 = vmul.f32 %v7613_v39, %v2712_v13  ;;  %v2719_v28 = vmul.f32 %v7613_v39, %v2713_v38  ;;  %v7619_v13 = vld [vmem:[#allocation43_spill] sm:$0xff]  ;;  %v7620_v38 = vld [vmem:[#allocation69_spill] sm:$0xff] }
 0xb3b   : > { %v2726_v58 = vsel %vm656_vm5, %v7606_v60, %v2725_v21  ;;  %v2729_v52 = vsel %vm656_vm5, %v2725_v21, 0.0  ;;  %v7615_v60 = vld [vmem:[#allocation31_spill] sm:$0xff] }
 0xb3c   : > { %v2730_v45 = vmul.f32 %v2726_v58, %v7610_v19  ;;  %v2731_v41 = vmul.f32 %v2729_v52, %v7611_v33  ;;  %v7616_v52 = vld [vmem:[#allocation32_spill] sm:$0xff]  ;;  %v2702_v33 = vadd.f32 %v2700_v18, %v2684_v4  ;;  %v7617_v19 = vld [vmem:[#allocation78_spill] sm:$0xff] }
 0xb3e   : > { %v2743_v12 = vpop.permute.xlu1 %2742  ;;  %v2737_v57 = vmul.f32 %v7617_v19, %v2731_v41  ;;  %v2720_v43 = vadd.f32 %v2718_v40, %v2702_v33  ;;  %v7627_v41 = vld [vmem:[#allocation34_spill] sm:$0xff] }
 0xb3f   : > { %v2744_v35 = vsel %vm675_vm6, %v7612_v9, %v2743_v12  ;;  %v2747_v21 = vsel %vm675_vm6, %v2743_v12, 0.0  ;;  %v2703_v9 = vadd.f32 %v2701_v25, %v2685_v50  ;;  %v2736_v12 = vmul.f32 %v7617_v19, %v2730_v45  ;;  %v7624_v25 = vld [vmem:[#allocation76_spill] sm:$0xff]  ;;  %v7628_v50 = vld [vmem:[#allocation29_spill] sm:$0xff] }
 0xb40   : > { %v2748_v58 = vmul.f32 %v2744_v35, %v7615_v60  ;;  %v2749_v56 = vmul.f32 %v2747_v21, %v7616_v52  ;;  %v7623_v60 = vld [vmem:[#allocation74_spill] sm:$0xff] }
 0xb41   : > { %v2721_v35 = vadd.f32 %v2719_v28, %v2703_v9  ;;  %v7630_v28 = vld [vmem:[#allocation9_spill] sm:$0xff] }
 0xb42   : > { %v2761_v49 = vpop.permute.xlu1 %2760  ;;  %v2754_v21 = vmul.f32 %v7623_v60, %v2748_v58  ;;  %v2755_v18 = vmul.f32 %v7623_v60, %v2749_v56  ;;  %v7631_v60 = vld [vmem:[#allocation35_spill] sm:$0xff]  ;;  %v7632_v9 = vld [vmem:[#allocation77_spill] sm:$0xff] }
 0xb43   : > { %v2762_v36 = vsel %vm694_vm7, %v7614_v53, %v2761_v49  ;;  %v2765_v59 = vsel %vm694_vm7, %v2761_v49, 0.0 }
 0xb44   : > { %v2766_v42 = vmul.f32 %v2762_v36, %v7618_v62  ;;  %v2767_v48 = vmul.f32 %v2765_v59, %v7619_v13  ;;  %v2860_v59 = vpop.permute.xlu0 %2859  ;;  %v2739_v13 = vadd.f32 %v2737_v57, %v2721_v35  ;;  %v7635_v35 = vld [vmem:[#allocation37_spill] sm:$0xff] }
 0xb46   : > { %v2779_v8 = vpop.permute.xlu1 %2778 }
 0xb47   : > { %v2780_v39 = vsel %vm7621_vm9, %v7620_v38, %v2779_v8  ;;  %v2783_v53 = vsel %vm7622_vm8, %v2779_v8, 0.0  ;;  %v2738_v38 = vadd.f32 %v2736_v12, %v2720_v43  ;;  %v7629_v8 = vld [vmem:[#allocation79_spill] sm:$0xff]  ;;  %vm7637_vm9 = vcmask 785408  }
 0xb48   : > { %v2784_v4 = vmul.f32 %v2780_v39, %v7627_v41  ;;  %v2785_v36 = vmul.f32 %v2783_v53, %v7628_v50  ;;  %v2772_v62 = vmul.f32 %v7629_v8, %v2766_v42  ;;  %v2773_v33 = vmul.f32 %v7629_v8, %v2767_v48  ;;  %v7633_v53 = vld [vmem:[#allocation80_spill] sm:$0xff]  ;;  %v7634_v42 = vld [vmem:[#allocation30_spill] sm:$0xff]  ;;  %vm7638_vm8 = vmmov %vm7637_vm9 }
 0xb49   : > { %v2756_v39 = vadd.f32 %v2754_v21, %v2738_v38  ;;  %v2757_v41 = vadd.f32 %v2755_v18, %v2739_v13  ;;  %v2878_v21 = vpop.permute.xlu0 %2877  ;;  %v7639_v18 = vld [vmem:[#allocation44_spill] sm:$0xff] }
 0xb4a   : > { %v2797_v49 = vpop.permute.xlu1 %2796  ;;  %v2790_v50 = vmul.f32 %v7633_v53, %v2784_v4  ;;  %v2791_v43 = vmul.f32 %v7633_v53, %v2785_v36  ;;  %v7640_v36 = vld [vmem:[#allocation39_spill] sm:$0xff]  ;;  %v7641_v53 = vld [vmem:[#allocation45_spill] sm:$0xff] }
 0xb4b   : > { %v2798_v45 = vsel %vm7625_vm14, %v7624_v25, %v2797_v49  ;;  %v2801_v19 = vsel %vm7626_vm12, %v2797_v49, 0.0  ;;  %v2774_v12 = vadd.f32 %v2772_v62, %v2756_v39  ;;  %v2775_v57 = vadd.f32 %v2773_v33, %v2757_v41 }
 0xb4c   : > { %v2802_v58 = vmul.f32 %v2798_v45, %v7630_v28  ;;  %v2803_v56 = vmul.f32 %v2801_v19, %v7631_v60  ;;  %v7636_v28 = vld [vmem:[#allocation81_spill] sm:$0xff]  ;;  %vm7643_vm14 = vcmask 769024  }
 0xb4d   : > { %v2792_v41 = vadd.f32 %v2790_v50, %v2774_v12  ;;  %v2793_v38 = vadd.f32 %v2791_v43, %v2775_v57  ;;  %v7642_v50 = vld [vmem:[#allocation40_spill] sm:$0xff]  ;;  %v2867_v12 = vpop.permute.xlu0 %2866  ;;  %vm7644_vm12 = vmmov %vm7643_vm14 }
 0xb4e   : > { %v2815_v40 = vpop.permute.xlu1 %2814  ;;  %v2808_v19 = vmul.f32 %v7636_v28, %v2802_v58  ;;  %v2809_v60 = vmul.f32 %v7636_v28, %v2803_v56 }
 0xb4f   : > { %v2816_v25 = vsel %vm1347_vm15, %v7632_v9, %v2815_v40  ;;  %v2819_v49 = vsel %vm1347_vm15, %v2815_v40, 0.0 }
 0xb50   : > { %v2820_v48 = vmul.f32 %v2816_v25, %v7634_v42  ;;  %v2821_v8 = vmul.f32 %v2819_v49, %v7635_v35  ;;  %v2810_v58 = vadd.f32 %v2808_v19, %v2792_v41  ;;  %v2811_v49 = vadd.f32 %v2809_v60, %v2793_v38 }
 0xb52   : > { %v2833_v45 = vpop.permute.xlu1 %2832  ;;  %v2826_v33 = vmul.f32 %v6129_v55, %v2820_v48  ;;  %v2827_v9 = vmul.f32 %v6129_v55, %v2821_v8 }
 0xb53   : > { %v2834_v40 = vsel %vm7637_vm9, %v6146_v34, %v2833_v45  ;;  %v2837_v13 = vsel %vm7638_vm8, %v2833_v45, 0.0  ;;  %vm7645_vm9 = vcmask 1043456  }
 0xb54   : > { %v2838_v4 = vmul.f32 %v2834_v40, %v7639_v18  ;;  %v2839_v62 = vmul.f32 %v2837_v13, %v7640_v36  ;;  %v2828_v57 = vadd.f32 %v2826_v33, %v2810_v58  ;;  %v2829_v48 = vadd.f32 %v2827_v9, %v2811_v49  ;;  %v4232_v40 = vld [vmem:[%s7269_s4 + $0x30] ss:$0 sm:$0xff]  ;;  %vm7646_vm8 = vmmov %vm7645_vm9  ;;  %v7706_v36 = vld [vmem:[#allocation52_spill] sm:$0xff] }
 0xb56   : > { %v2851_v25 = vpop.permute.xlu1 %2850  ;;  %v2844_v56 = vmul.f32 %v6157_v10, %v2838_v4  ;;  %v2845_v39 = vmul.f32 %v6157_v10, %v2839_v62  ;;  %v4233_v10 = vld [vmem:[%s7269_s4 + $0x38] ss:$0 sm:$0xff] }
 0xb57   : > { %v2852_v28 = vsel %vm1401_vm13, %v6166_v23, %v2851_v25  ;;  %v2855_v34 = vsel %vm1401_vm13, %v2851_v25, 0.0  ;;  %v2887_v25 = vpop.permute.xlu0 %2886 }
 0xb58   : > { %v2856_v45 = vmul.f32 %v2852_v28, %v7641_v53  ;;  %v2857_v43 = vmul.f32 %v2855_v34, %v7642_v50  ;;  %v2846_v62 = vadd.f32 %v2844_v56, %v2828_v57  ;;  %v2847_v41 = vadd.f32 %v2845_v39, %v2829_v48 }
 0xb5a   : > { %v2862_v55 = vmul.f32 %v2860_v59, %v2856_v45  ;;  %v2863_v8 = vmul.f32 %v2860_v59, %v2857_v43  ;;  %v2869_v19 = vpop.permute.xlu1 %2868 }
 0xb5b   : > { %v2870_v60 = vsel %vm7643_vm14, %v2867_v12, %v2869_v19  ;;  %v2873_v23 = vsel %vm7644_vm12, %v2869_v19, 0.0  ;;  %vm7648_vm14 = vcmask 64512   ;;  %vm7692_vm12 = vmmov %vm7646_vm8 }
 0xb5c   : > { %v2874_v13 = vmul.f32 %v4232_v40, %v2870_v60  ;;  %v2875_v4 = vmul.f32 %v4233_v10, %v2873_v23  ;;  %v2864_v38 = vadd.f32 %v2862_v55, %v2846_v62  ;;  %v2865_v33 = vadd.f32 %v2863_v8, %v2847_v41  ;;  %v3906_v23 = vld [vmem:[%s7647_s29 + $0x8] sm:$0xf]  ;;  %s7653_s29 = sld [smem:[#allocation89_spill]] }
 0xb5e   : > { %v2880_v59 = vmul.f32 %v2878_v21, %v2874_v13  ;;  %v2881_v9 = vmul.f32 %v2878_v21, %v2875_v4  ;;  %v7649_v13 = vmov 0  }
 0xb60   : > { %v2882_v58 = vadd.f32 %v2880_v59, %v2864_v38  ;;  %v2883_v49 = vadd.f32 %v2881_v9, %v2865_v33 }
 0xb62   : > { %v2889_v28 = vadd.f32 %v2887_v25, %v2882_v58  ;;  %v2890_v34 = vadd.f32 %v2887_v25, %v2883_v49 }
 0xb64   : > { %v3912_v45 = vmul.f32 -1.442695, %v2889_v28  ;;  %v3913_v43 = vmul.f32 -1.442695, %v2890_v34 }
 0xb66   : > { %4178 = vpow2.f32 %v3912_v45 }
 0xb67   : > { %4180 = vpow2.f32 %v3913_v43 }
 0xb6f   : > { %v2910_v10 = vpop.permute.xlu1 %2909 }
 0xb70   : > { %v4179_v12 = vpop.eup %4178 }
 0xb71   : > { %v4181_v19 = vpop.eup %4180  ;;  %v2897_v60 = vadd.f32 1.0, %v4179_v12 }
 0xb72   : > { %v2898_v40 = vadd.f32 1.0, %v4181_v19 }
 0xb73   : > { %4182 = vrcp.f32 %v2897_v60 }
 0xb74   : > { %4184 = vrcp.f32 %v2898_v40 }
 0xb7d   : > { %v4183_v56 = vpop.eup %4182 }
 0xb7e   : > { %v4185_v39 = vpop.eup %4184  ;;  %v2903_v57 = vmul.f32 %v4183_v56, %v2889_v28  ;;  %v7651_v56 = vld [vmem:[#allocation58_spill] sm:$0xff] }
 0xb7f   : > { %v2904_v48 = vmul.f32 %v4185_v39, %v2890_v34 }
 0xb80   : > { %v2905_v21 = vpack.c.bf16 %v2903_v57, %v2903_v57  ;;  %v7652_v57 = vld [vmem:[#allocation54_spill] sm:$0xff] }
 0xb81   : > { %v2906_v55 = vpack.c.bf16 %v2904_v48, %v2904_v48 }
 0xb82   : > { %v2916_v8 = vsel %vm7645_vm9, %v2905_v21, 0  ;;  %vm7693_vm9 = vmmov %vm7646_vm8 }
 0xb83   : > { %3914 = vmatprep.subr.msk.bf16.mxu0 %vm7646_vm8, %v2906_v55  ;;  %v7655_v55 = vmov 2   ;;  %vm7694_vm8 = vcmask 588800  }
 0xb84   : > { %2922 = vmatpush1.bf16.msra.mxu0 %v2916_v8  ;;  %v7656_v8 = vmov 1  }
 0xb87   : > { %3915 = vmatmul.mubr.msk.bf16.vlgmr.msra.gmra.mrb[12].mxu0 %vm7648_vm14, %v3906_v23  ;;  %v7657_v23 = vmov 3   ;;  %vm7705_vm14 = vcmask 261120  }
 0xb88   : > { %3132 = vmatprep.mubr.bf16.mxu0 %v7649_v13 }
 0xc5a   : > { %v2955_v4 = vpop.f32.mrb[12].mxu0 }
 0xc5b   : > { %v2956_v62 = vadd.f32 %v2955_v4, %v2910_v10  ;;  %v2957_v41 = vpop.f32.mrb[13].mxu0  ;;  %v7659_v4 = vmov 4  }
 0xc5c   : > { %v2958_v38 = vadd.f32 %v2957_v41, %v2910_v10  ;;  %v2959_v33 = vpop.f32.mrb[14].mxu0  ;;  %v7658_v10 = vmov 14   ;;  %v7661_v41 = vmov 5  }
 0xc5d   : > { %v3916_v59 = vmul.f32 -1.442695, %v2956_v62  ;;  %v2960_v9 = vpop.f32.mrb[15].mxu0  ;;  %v7663_v33 = vmov 7  }
 0xc5e   : > { %v3917_v25 = vmul.f32 -1.442695, %v2958_v38  ;;  %v7665_v9 = vmov 9  }
 0xc5f   : > { %4186 = vpow2.f32 %v3916_v59  ;;  %v7664_v59 = vmov 8  }
 0xc60   : > { %4188 = vpow2.f32 %v3917_v25  ;;  %v7666_v25 = vmov 10  }
 0xc69   : > { %v4187_v58 = vpop.eup %4186 }
 0xc6a   : > { %v4189_v49 = vpop.eup %4188  ;;  %v2968_v28 = vadd.f32 1.0, %v4187_v58  ;;  %v7667_v58 = vmov 11  }
 0xc6b   : > { %v2969_v34 = vadd.f32 1.0, %v4189_v49  ;;  %v7668_v49 = vmov 12  }
 0xc6c   : > { %4190 = vrcp.f32 %v2968_v28  ;;  %v7669_v28 = vmov 13  }
 0xc6d   : > { %4192 = vrcp.f32 %v2969_v34  ;;  %v7670_v34 = vmov 16  }
 0xc76   : > { %v4191_v45 = vpop.eup %4190 }
 0xc77   : > { %v4193_v43 = vpop.eup %4192  ;;  %v2974_v12 = vmul.f32 %v4191_v45, %v2956_v62  ;;  %v7660_v62 = vmov 15   ;;  %v7671_v45 = vmov 17  }
 0xc78   : > { %v2975_v19 = vmul.f32 %v4193_v43, %v2958_v38  ;;  %v7662_v38 = vmov 6   ;;  %v7672_v43 = vmov 18  }
 0xc79   : > { %v2976_v60 = vadd.f32 %v2974_v12, %v7591_v5  ;;  %v6339_v5 = vld [vmem:[%s7653_s29 + $0x18] sm:$0xff]  ;;  %v7673_v12 = vmov 19  }
 0xc7a   : > { %v2977_v40 = vadd.f32 %v2975_v19, %v7593_v1  ;;  %v3919_v1 = vld [vmem:[%s7654_s2 + $0x18] sm:$0xff] }
 0xc7b   : > { %v6296_v39 = vadd.f32 %v2976_v60, %v7651_v56 }
 0xc7c   : > { %v6299_v48 = vadd.f32 %v2977_v40, %v7652_v57  ;;  %v7674_v40 = vmov 20  }
 0xc7d   : > { %3036 = vrot.lane.b32.xlu0 %v6296_v39, %s7341_s18  ;;  %2994 = vrot.lane.b32.xlu1 %v6296_v39, %s7241_s20 }
 0xc7e   : > { %v3947_v21 = vpack.c.bf16 %v6299_v48, %v6296_v39 }
 0xc80   : > { %3736 = vst [vmem:[%s7650_s6 + $0x20] sm:$0xff] %v3947_v21 }
 0xc81   : > { %2996 = vrot.lane.b32.xlu0 %v6299_v48, %s7241_s20  ;;  %3004 = vrot.lane.b32.xlu1 %v6296_v39, %s7243_s30 }
 0xc85   : > { %3006 = vrot.lane.b32.xlu0 %v6299_v48, %s7243_s30  ;;  %3014 = vrot.lane.b32.xlu1 %v6296_v39, %s7391_s19 }
 0xc89   : > { %3016 = vrot.lane.b32.xlu0 %v6299_v48, %s7391_s19  ;;  %3024 = vrot.lane.b32.xlu1 %v6296_v39, %s7394_s5 }
 0xc8d   : > { %3026 = vrot.lane.b32.xlu0 %v6299_v48, %s7394_s5  ;;  %3046 = vrot.lane.b32.xlu1 %v6296_v39, %s7342_s15 }
 0xc91   : > { %3056 = vrot.lane.b32.xlu0 %v6296_v39, %s7343_s24  ;;  %3038 = vrot.lane.b32.xlu1 %v6299_v48, %s7341_s18 }
 0xc95   : > { %3058 = vrot.lane.b32.xlu0 %v6299_v48, %s7343_s24  ;;  %3048 = vrot.lane.b32.xlu1 %v6299_v48, %s7342_s15 }
 0xc99   : > { %3068 = vrot.lane.b32.xlu0 %v6299_v48, %s7344_s25  ;;  %3066 = vrot.lane.b32.xlu1 %v6296_v39, %s7344_s25 }
 0xc9d   : > { %3169 = vperm.xlu0 %4085, %v6339_v5   ;;  %3088 = vperm.xlu1 %4086, %v3919_v1  }
 0xca1   : > { %4088 = vset.pattern.permute.xlu0 %v7655_v55  ;;  %4087 = vset.pattern.permute.xlu1 %v7656_v8 }
 0xca2   : > { %3205 = vperm.xlu0 %4088, %v6339_v5   ;;  %3187 = vperm.xlu1 %4087, %v6339_v5  }
 0xca6   : > { %4089 = vset.pattern.permute.xlu0 %v7657_v23  ;;  %4100 = vset.pattern.permute.xlu1 %v7658_v10  ;;  %v7675_v23 = vmov 21  }
 0xca7   : > { %3223 = vperm.xlu0 %4089, %v6339_v5   ;;  %3413 = vperm.xlu1 %4100, %v6339_v5  }
 0xcab   : > { %4090 = vset.pattern.permute.xlu0 %v7659_v4  ;;  %4101 = vset.pattern.permute.xlu1 %v7660_v62 }
 0xcac   : > { %3241 = vperm.xlu0 %4090, %v6339_v5   ;;  %3431 = vperm.xlu1 %4101, %v6339_v5  }
 0xcb0   : > { %4091 = vset.pattern.permute.xlu0 %v7661_v41  ;;  %4112 = vset.pattern.permute.xlu1 %v7649_v13  ;;  %v7676_v41 = vld [vmem:[#allocation11_spill] sm:$0xff] }
 0xcb1   : > { %3259 = vperm.xlu0 %4091, %v6339_v5  }
 0xcb5   : > { %4092 = vset.pattern.permute.xlu0 %v7662_v38 }
 0xcb6   : > { %3277 = vperm.xlu0 %4092, %v6339_v5  }
 0xcba   : > { %4093 = vset.pattern.permute.xlu0 %v7663_v33 }
 0xcbb   : > { %3295 = vperm.xlu0 %4093, %v6339_v5  }
 0xcbf   : > { %4094 = vset.pattern.permute.xlu0 %v7664_v59  ;;  %v7677_v59 = vld [vmem:[#allocation12_spill] sm:$0xff] }
 0xcc0   : > { %3313 = vperm.xlu0 %4094, %v6339_v5  }
 0xcc4   : > { %4095 = vset.pattern.permute.xlu0 %v7665_v9 }
 0xcc5   : > { %3331 = vperm.xlu0 %4095, %v6339_v5  }
 0xcc9   : > { %4096 = vset.pattern.permute.xlu0 %v7666_v25  ;;  %v7678_v25 = vld [vmem:[#allocation13_spill] sm:$0xff] }
 0xcca   : > { %3349 = vperm.xlu0 %4096, %v6339_v5  }
 0xcce   : > { %4097 = vset.pattern.permute.xlu0 %v7667_v58 }
 0xccf   : > { %3367 = vperm.xlu0 %4097, %v6339_v5  }
 0xcd3   : > { %4098 = vset.pattern.permute.xlu0 %v7668_v49  ;;  %v7679_v49 = vld [vmem:[#allocation10_spill] sm:$0xff] }
 0xcd4   : > { %3377 = vperm.xlu0 %4098, %v6339_v5  }
 0xcd8   : > { %4099 = vset.pattern.permute.xlu0 %v7669_v28 }
 0xcd9   : > { %3395 = vperm.xlu0 %4099, %v6339_v5  }
 0xcdd   : > { %4102 = vset.pattern.permute.xlu0 %v7670_v34 }
 0xcde   : > { %3449 = vperm.xlu0 %4102, %v6339_v5  }
 0xce2   : > { %4103 = vset.pattern.permute.xlu0 %v7671_v45 }
 0xce3   : > { %3467 = vperm.xlu0 %4103, %v6339_v5  }
 0xce7   : > { %4104 = vset.pattern.permute.xlu0 %v7672_v43 }
 0xce8   : > { %3485 = vperm.xlu0 %4104, %v6339_v5  }
 0xcec   : > { %4105 = vset.pattern.permute.xlu0 %v7673_v12 }
 0xced   : > { %3503 = vperm.xlu0 %4105, %v6339_v5  }
 0xcef   : > { %v3037_v19 = vpop.permute.xlu0 %3036  ;;  %v2995_v60 = vpop.permute.xlu1 %2994 }
 0xcf0   : > { %v3001_v10 = vsel %vm552_vm1, 0.0, %v2995_v60 }
 0xcf1   : > { %4106 = vset.pattern.permute.xlu0 %v7674_v40  ;;  %v3002_v28 = vmul.f32 %v3001_v10, %v7679_v49 }
 0xcf2   : > { %3521 = vperm.xlu0 %4106, %v6339_v5  }
 0xcf3   : > { %v2997_v21 = vpop.permute.xlu0 %2996  ;;  %v3005_v1 = vpop.permute.xlu1 %3004 }
 0xcf4   : > { %v3011_v55 = vsel %vm465_vm0, 0.0, %v3005_v1  ;;  %v2998_v8 = vsel %vm552_vm1, %v2995_v60, %v2997_v21 }
 0xcf5   : > { %v3012_v38 = vmul.f32 %v3011_v55, %v7676_v41  ;;  %v3003_v9 = vmul.f32 %v2998_v8, %v7677_v59  ;;  %v7681_v41 = vld [vmem:[#allocation16_spill] sm:$0xff] }
 0xcf6   : > { %4107 = vset.pattern.permute.xlu0 %v7675_v23  ;;  %v7680_v23 = vld [vmem:[#allocation15_spill] sm:$0xff] }
 0xcf7   : > { %v3007_v4 = vpop.permute.xlu0 %3006  ;;  %v3015_v62 = vpop.permute.xlu1 %3014  ;;  %v3076_v12 = vpack.c.bf16 %v3012_v38, %v3002_v28 }
 0xcf8   : > { %v3008_v33 = vsel %vm465_vm0, %v3005_v1, %v3007_v4  ;;  %v3021_v21 = vsel %vm589_vm3, 0.0, %v3015_v62 }
 0xcf9   : > { %v3013_v58 = vmul.f32 %v3008_v33, %v7678_v25  ;;  %v7682_v33 = vld [vmem:[#allocation17_spill] sm:$0xff] }
 0xcfb   : > { %v3017_v34 = vpop.permute.xlu0 %3016  ;;  %v3025_v45 = vpop.permute.xlu1 %3024  ;;  %v3077_v43 = vpack.c.bf16 %v3013_v58, %v3003_v9  ;;  %v7683_v9 = vld [vmem:[#allocation18_spill] sm:$0xff] }
 0xcfc   : > { %v3031_v40 = vsel %vm608_vm2, 0.0, %v3025_v45  ;;  %v3018_v60 = vsel %vm589_vm3, %v3015_v62, %v3017_v34  ;;  %v3022_v38 = vmul.f32 %v3021_v21, %v7683_v9 }
 0xcfd   : > { %3100 = vmatprep.subr.bf16.mxu0 %v3077_v43  ;;  %v3032_v8 = vmul.f32 %v3031_v40, %v7680_v23  ;;  %v3023_v10 = vmul.f32 %v3018_v60, %v7681_v41  ;;  %v7684_v43 = vld [vmem:[#allocation20_spill] sm:$0xff]  ;;  %v7685_v40 = vld [vmem:[#allocation21_spill] sm:$0xff]  ;;  %v7687_v60 = vld [vmem:[#allocation19_spill] sm:$0xff] }
 0xcfe   : > { %3101 = vmatpush1.bf16.msra.mxu0 %v3076_v12  ;;  %v3034_v12 = vmul.f32 %v6296_v39, %v7684_v43 }
 0xcff   : > { %v3027_v55 = vpop.permute.xlu0 %3026  ;;  %v3047_v1 = vpop.permute.xlu1 %3046  ;;  %v3078_v28 = vpack.c.bf16 %v3032_v8, %v3022_v38  ;;  %v7688_v38 = vld [vmem:[#allocation25_spill] sm:$0xff] }
 0xd00   : > { %v3028_v4 = vsel %vm608_vm2, %v3025_v45, %v3027_v55  ;;  %v7686_v45 = vld [vmem:[#allocation22_spill] sm:$0xff] }
 0xd01   : > { %v3033_v59 = vmul.f32 %v3028_v4, %v7682_v33  ;;  %v3035_v4 = vmul.f32 %v6299_v48, %v7687_v60  ;;  %v4234_v60 = vld [vmem:[%s7536_s10 + $0x18] ss:$0 sm:$0xff] }
 0xd03   : > { %v3057_v25 = vpop.permute.xlu0 %3056  ;;  %v3039_v58 = vpop.permute.xlu1 %3038  ;;  %v3079_v49 = vpack.c.bf16 %v3033_v59, %v3023_v10 }
 0xd04   : > { %v3040_v34 = vsel %vm637_vm4, %v3037_v19, %v3039_v58  ;;  %v3043_v62 = vsel %vm637_vm4, %v3039_v58, 0.0 }
 0xd05   : > { %v3044_v23 = vmul.f32 %v3040_v34, %v7685_v40  ;;  %v3045_v55 = vmul.f32 %v3043_v62, %v7686_v45  ;;  %3102 = vmatprep.subr.bf16.mxu0 %v3079_v49  ;;  %v7689_v34 = vld [vmem:[#allocation26_spill] sm:$0xff]  ;;  %v7690_v62 = vld [vmem:[#allocation23_spill] sm:$0xff]  ;;  %v7691_v40 = vld [vmem:[#allocation24_spill] sm:$0xff] }
 0xd06   : > { %3103 = vmatpush1.bf16.msra.mxu0 %v3078_v28 }
 0xd07   : > { %v3080_v21 = vpack.c.bf16 %v3044_v23, %v3034_v12  ;;  %v3059_v41 = vpop.permute.xlu0 %3058  ;;  %v3049_v10 = vpop.permute.xlu1 %3048  ;;  %v3081_v8 = vpack.c.bf16 %v3045_v55, %v3035_v4 }
 0xd08   : > { %v3060_v19 = vsel %vm675_vm6, %v3057_v25, %v3059_v41  ;;  %v3063_v33 = vsel %vm675_vm6, %v3059_v41, 0.0  ;;  %v3050_v59 = vsel %vm656_vm5, %v3047_v1, %v3049_v10  ;;  %v3053_v9 = vsel %vm656_vm5, %v3049_v10, 0.0  ;;  %v4235_v41 = vld [vmem:[%s7536_s10 + $0x10] ss:$0 sm:$0xff] }
 0xd09   : > { %v3064_v58 = vmul.f32 %v3060_v19, %v7688_v38  ;;  %v3065_v49 = vmul.f32 %v3063_v33, %v7689_v34  ;;  %v3054_v43 = vmul.f32 %v3050_v59, %v7690_v62  ;;  %v3055_v28 = vmul.f32 %v3053_v9, %v7691_v40  ;;  %3104 = vmatprep.subr.bf16.mxu0 %v3081_v8  ;;  %v3918_v33 = vld [vmem:[%s7539_s9 + $0xc] sm:$0xf] }
 0xd0a   : > { %3105 = vmatpush1.bf16.msra.mxu0 %v3080_v21 }
 0xd0b   : > { %v3082_v12 = vpack.c.bf16 %v3064_v58, %v3054_v43  ;;  %v3069_v23 = vpop.permute.xlu0 %3068  ;;  %v3067_v45 = vpop.permute.xlu1 %3066  ;;  %v3083_v25 = vpack.c.bf16 %v3065_v49, %v3055_v28 }
 0xd0c   : > { %v3073_v55 = vsel %vm694_vm7, %v3069_v23, 0.0  ;;  %v3070_v1 = vsel %vm694_vm7, %v3067_v45, %v3069_v23 }
 0xd0d   : > { %v3075_v4 = vmul.f32 %v4234_v60, %v3073_v55  ;;  %v3074_v10 = vmul.f32 %v4235_v41, %v3070_v1  ;;  %3106 = vmatprep.subr.bf16.mxu0 %v3083_v25  ;;  %v7696_v1 = vmov 22   ;;  %v7697_v41 = vmov 23  }
 0xd0e   : > { %3107 = vmatpush1.bf16.msra.mxu0 %v3082_v12 }
 0xd0f   : > { %v3085_v21 = vpack.c.bf16 %v3075_v4, %v3075_v4  ;;  %v3084_v8 = vpack.c.bf16 %v3074_v10, %v3074_v10 }
 0xd11   : > { %3924 = vmatprep.subr.msk.bf16.mxu0 %vm7692_vm12, %v3085_v21  ;;  %v3095_v19 = vsel %vm7693_vm9, %v3084_v8, 0  ;;  %vm7707_vm12 = vcmask 252928   ;;  %vm7709_vm9 = vcmask 244736  }
 0xd12   : > { %3109 = vmatpush1.bf16.msra.mxu0 %v3095_v19  ;;  %v7698_v19 = vmov 24  }
 0xd15   : > { %3925 = vmatmul.mubr.msk.bf16.vlgmr.msra.gmra.mrb[16].mxu0 %vm7694_vm8, %v3918_v33  ;;  %vm7711_vm8 = vcmask 146432  }
 0xd1c   : > { %v3089_v59 = vpop.permute.xlu1 %3088  ;;  %v6446_v4 = vpop.permute.xlu0 %3169 }
 0xd21   : > { %v6455_v21 = vpop.permute.xlu0 %3205 }
 0xd26   : > { %v6464_v8 = vpop.permute.xlu0 %3223 }
 0xd2b   : > { %v6470_v33 = vpop.permute.xlu0 %3241 }
 0xde8   : > { %v3134_v9 = vpop.f32.mrb[16].mxu0 }
 0xde9   : > { %v3135_v38 = vadd.f32 %v3134_v9, %v3089_v59  ;;  %v3136_v58 = vpop.f32.mrb[17].mxu0 }
 0xdea   : > { %v3138_v34 = vpop.f32.mrb[18].mxu0  ;;  %v3137_v43 = vadd.f32 %v3136_v58, %v3089_v59  ;;  %v6479_v59 = vpop.permute.xlu0 %3259 }
 0xdeb   : > { %v3926_v49 = vmul.f32 -1.442695, %v3135_v38  ;;  %v3139_v62 = vpop.f32.mrb[19].mxu0 }
 0xdec   : > { %v3927_v40 = vmul.f32 -1.442695, %v3137_v43 }
 0xded   : > { %4194 = vpow2.f32 %v3926_v49 }
 0xdee   : > { %4196 = vpow2.f32 %v3927_v40  ;;  %v6486_v9 = vpop.permute.xlu0 %3277 }
 0xdf7   : > { %v4195_v28 = vpop.eup %4194 }
 0xdf8   : > { %v3147_v12 = vadd.f32 1.0, %v4195_v28  ;;  %v4197_v23 = vpop.eup %4196 }
 0xdf9   : > { %v3148_v55 = vadd.f32 1.0, %v4197_v23 }
 0xdfa   : > { %4198 = vrcp.f32 %v3147_v12  ;;  %v6536_v12 = vpop.permute.xlu1 %3187 }
 0xdfb   : > { %4200 = vrcp.f32 %v3148_v55 }
 0xe04   : > { %v4199_v45 = vpop.eup %4198 }
 0xe05   : > { %v6433_v25 = vmul.f32 %v4199_v45, %v3135_v38  ;;  %v4201_v60 = vpop.eup %4200  ;;  %v6542_v45 = vpop.permute.xlu1 %3413 }
 0xe06   : > { %v6453_v10 = vmul.f32 %v4201_v60, %v3137_v43 }
 0xe07   : > { %7695 = vst [vmem:[#allocation51_spill] sm:$0xff] %v6433_v25  ;;  %3176 = vrot.lane.b32.xlu0 %v6433_v25, %s7383_s11  ;;  %3157 = vrot.lane.b32.xlu1 %v6433_v25, %s7384_s21 }
 0xe0b   : > { %3539 = vperm.xlu0 %4107, %v6339_v5   ;;  %3194 = vrot.lane.b32.xlu1 %v6433_v25, %s7385_s0 }
 0xe0f   : > { %4108 = vset.pattern.permute.xlu0 %v7696_v1  ;;  %3212 = vrot.lane.b32.xlu1 %v6433_v25, %s7387_s1  ;;  %v6550_v1 = vpop.permute.xlu1 %3431 }
 0xe10   : > { %3557 = vperm.xlu0 %4108, %v6339_v5   ;;  %7703 = vst [vmem:[#allocation64_spill] sm:$0xff] %v6550_v1  ;;  %v7727_v1 = vld [vmem:[#allocation60_spill] sm:$0xff] }
 0xe13   : > { %3230 = vrot.lane.b32.xlu1 %v6433_v25, %s7239_s17 }
 0xe14   : > { %3402 = vrot.lane.b32.xlu0 %v6433_v25, %s7245_s13 }
 0xe15   : > { %4109 = vset.pattern.permute.xlu0 %v7697_v41 }
 0xe17   : > { %3248 = vrot.lane.b32.xlu1 %v6433_v25, %s7240_s27 }
 0xe18   : > { %3386 = vrot.lane.b32.xlu0 %v6453_v10, %s7341_s18 }
 0xe1b   : > { %3266 = vrot.lane.b32.xlu1 %v6433_v25, %s7241_s20 }
 0xe1c   : > { %3575 = vperm.xlu0 %4109, %v6339_v5  }
 0xe1f   : > { %3284 = vrot.lane.b32.xlu1 %v6433_v25, %s7243_s30 }
 0xe20   : > { %4110 = vset.pattern.permute.xlu0 %v7698_v19 }
 0xe21   : > { %3593 = vperm.xlu0 %4110, %v6339_v5   ;;  %v3921_v5 = vld [vmem:[%s6883_s8 + $0x18] sm:$0xff] }
 0xe23   : > { %3302 = vrot.lane.b32.xlu1 %v6433_v25, %s7391_s19 }
 0xe25   : > { %3582 = vrot.lane.b32.xlu0 %v6433_v25, %s7255_s26 }
 0xe26   : > { %4111 = vset.pattern.permute.xlu0 %v7649_v13  ;;  %v6492_v13 = vpop.permute.xlu0 %3295 }
 0xe27   : > { %3320 = vrot.lane.b32.xlu1 %v6433_v25, %s7392_s23 }
 0xe29   : > { %3602 = vperm.xlu0 %4111, %v3921_v5  }
 0xe2a   : > { %v6496_v38 = vpop.permute.xlu0 %3313 }
 0xe2b   : > { %3338 = vrot.lane.b32.xlu1 %v6433_v25, %s7393_s12 }
 0xe2e   : > { %v6502_v58 = vpop.permute.xlu0 %3331 }
 0xe2f   : > { %3356 = vrot.lane.b32.xlu1 %v6433_v25, %s7394_s5 }
 0xe32   : > { %v6506_v34 = vpop.permute.xlu0 %3349 }
 0xe33   : > { %3384 = vrot.lane.b32.xlu1 %v6433_v25, %s7341_s18 }
 0xe36   : > { %v6512_v49 = vpop.permute.xlu0 %3367 }
 0xe37   : > { %3420 = vrot.lane.b32.xlu1 %v6433_v25, %s7395_s3 }
 0xe3a   : > { %v6516_v62 = vpop.permute.xlu0 %3377 }
 0xe3b   : > { %3438 = vrot.lane.b32.xlu1 %v6433_v25, %s7342_s15 }
 0xe3e   : > { %v6522_v43 = vpop.permute.xlu0 %3395 }
 0xe3f   : > { %3456 = vrot.lane.b32.xlu1 %v6433_v25, %s7343_s24 }
 0xe42   : > { %v6526_v40 = vpop.permute.xlu0 %3449 }
 0xe43   : > { %3474 = vrot.lane.b32.xlu1 %v6433_v25, %s7344_s25  ;;  %7699 = vst [vmem:[#allocation53_spill] sm:$0xff] %v6526_v40 }
 0xe46   : > { %v6532_v28 = vpop.permute.xlu0 %3467 }
 0xe47   : > { %3492 = vrot.lane.b32.xlu1 %v6433_v25, %s7246_s28  ;;  %7700 = vst [vmem:[#allocation55_spill] sm:$0xff] %v6532_v28 }
 0xe4a   : > { %v6538_v23 = vpop.permute.xlu0 %3485 }
 0xe4b   : > { %3510 = vrot.lane.b32.xlu1 %v6433_v25, %s7247_s14  ;;  %7701 = vst [vmem:[#allocation62_spill] sm:$0xff] %v6538_v23 }
 0xe4e   : > { %v6546_v55 = vpop.permute.xlu0 %3503 }
 0xe4f   : > { %3528 = vrot.lane.b32.xlu1 %v6433_v25, %s7546_s16  ;;  %7702 = vst [vmem:[#allocation61_spill] sm:$0xff] %v6546_v55 }
 0xe52   : > { %v6552_v60 = vpop.permute.xlu0 %3521 }
 0xe53   : > { %3159 = vrot.lane.b32.xlu1 %v6453_v10, %s7384_s21  ;;  %7704 = vst [vmem:[#allocation50_spill] sm:$0xff] %v6552_v60 }
 0xe57   : > { %3178 = vrot.lane.b32.xlu1 %v6453_v10, %s7383_s11 }
 0xe5b   : > { %3196 = vrot.lane.b32.xlu1 %v6453_v10, %s7385_s0  ;;  %s7783_s0 = sld [smem:[#allocation90_spill]] }
 0xe5f   : > { %3214 = vrot.lane.b32.xlu1 %v6453_v10, %s7387_s1 }
 0xe63   : > { %3232 = vrot.lane.b32.xlu1 %v6453_v10, %s7239_s17 }
 0xe67   : > { %3250 = vrot.lane.b32.xlu1 %v6453_v10, %s7240_s27  ;;  %s7776_s27 = sld [smem:[#allocation86_spill]] }
 0xe6b   : > { %3268 = vrot.lane.b32.xlu1 %v6453_v10, %s7241_s20  ;;  %s7717_s20 = sld [smem:[#allocation91_spill]] }
 0xe6f   : > { %3286 = vrot.lane.b32.xlu1 %v6453_v10, %s7243_s30 }
 0xe73   : > { %3304 = vrot.lane.b32.xlu1 %v6453_v10, %s7391_s19 }
 0xe77   : > { %3322 = vrot.lane.b32.xlu1 %v6453_v10, %s7392_s23 }
 0xe79   : > { %v6556_v41 = vpop.permute.xlu1 %3157  ;;  %v6558_v19 = vpop.permute.xlu0 %3176 }
 0xe7a   : > { %v3183_v57 = vsel %vm824_vm10, 0.0, %v6558_v19  ;;  %v3164_v56 = vsel %vm796_vm11, 0.0, %v6556_v41 }
 0xe7b   : > { %3340 = vrot.lane.b32.xlu1 %v6453_v10, %s7393_s12  ;;  %v3184_v53 = vmul.f32 %v3183_v57, %v7570_v3  ;;  %v3165_v18 = vmul.f32 %v3164_v56, %v7706_v36  ;;  %s7708_s12 = smov 96  }
 0xe7d   : > { %v6562_v5 = vpop.permute.xlu1 %3194  ;;  %v3190_v55 = vmul.f32 %v6536_v12, %v3184_v53  ;;  %v3172_v23 = vmul.f32 %v6446_v4, %v3165_v18 }
 0xe7e   : > { %v3201_v50 = vsel %vm7705_vm14, 0.0, %v6562_v5  ;;  %vm7714_vm14 = vcmask 113664  }
 0xe7f   : > { %3358 = vrot.lane.b32.xlu1 %v6453_v10, %s7394_s5  ;;  %v3202_v42 = vmul.f32 %v3201_v50, %v7575_v7  ;;  %s7710_s5 = smov 95   ;;  %v3192_v7 = vadd.f32 %v3190_v55, %v3172_v23 }
 0xe81   : > { %v6574_v60 = vpop.permute.xlu1 %3212  ;;  %v3208_v36 = vmul.f32 %v6455_v21, %v3202_v42 }
 0xe82   : > { %v3219_v35 = vsel %vm7707_vm12, 0.0, %v6574_v60  ;;  %vm7715_vm12 = vcmask 15360  }
 0xe83   : > { %3546 = vrot.lane.b32.xlu1 %v6433_v25, %s7708_s12  ;;  %v3220_v28 = vmul.f32 %v3219_v35, %v7426_v63  ;;  %v3210_v35 = vadd.f32 %v3208_v36, %v3192_v7 }
 0xe85   : > { %v6584_v40 = vpop.permute.xlu1 %3230  ;;  %v3226_v50 = vmul.f32 %v6464_v8, %v3220_v28 }
 0xe86   : > { %v3237_v3 = vsel %vm7709_vm9, 0.0, %v6584_v40  ;;  %vm7723_vm9 = vcmask 261120  }
 0xe87   : > { %v3238_v56 = vmul.f32 %v3237_v3, %v7581_v2  ;;  %3564 = vrot.lane.b32.xlu1 %v6433_v25, %s7710_s5  ;;  %v3228_v2 = vadd.f32 %v3226_v50, %v3210_v35 }
 0xe89   : > { %v6593_v53 = vpop.permute.xlu1 %3248  ;;  %v3244_v18 = vmul.f32 %v6470_v33, %v3238_v56 }
 0xe8a   : > { %v3255_v63 = vsel %vm7711_vm8, 0.0, %v6593_v53  ;;  %v6612_v7 = vpop.permute.xlu0 %3539  ;;  %vm7725_vm8 = vcmask 252928  }
 0xe8b   : > { %v3256_v57 = vmul.f32 %v3255_v63, %v4850_v22  ;;  %3404 = vrot.lane.b32.xlu1 %v6453_v10, %s7245_s13  ;;  %v3246_v23 = vadd.f32 %v3244_v18, %v3228_v2  ;;  %7712 = vst [vmem:[#allocation70_spill] sm:$0xff] %v6612_v7 }
 0xe8d   : > { %v3262_v42 = vmul.f32 %v6479_v59, %v3256_v57  ;;  %v6602_v3 = vpop.permute.xlu1 %3266 }
 0xe8e   : > { %v3273_v28 = vsel %vm552_vm1, 0.0, %v6602_v3 }
 0xe8f   : > { %v3274_v55 = vmul.f32 %v3273_v28, %v4853_v30  ;;  %3422 = vrot.lane.b32.xlu1 %v6453_v10, %s7395_s3  ;;  %v3264_v36 = vadd.f32 %v3262_v42, %v3246_v23  ;;  %v6625_v57 = vpop.permute.xlu0 %3557 }
 0xe90   : > { %7713 = vst [vmem:[#allocation14_spill] sm:$0xff] %v6625_v57 }
 0xe91   : > { %v3280_v22 = vmul.f32 %v6486_v9, %v3274_v55  ;;  %v6610_v56 = vpop.permute.xlu1 %3284 }
 0xe92   : > { %v3291_v63 = vsel %vm465_vm0, 0.0, %v6610_v56 }
 0xe93   : > { %v3282_v50 = vadd.f32 %v3280_v22, %v3264_v36  ;;  %3440 = vrot.lane.b32.xlu1 %v6453_v10, %s7342_s15  ;;  %v3292_v18 = vmul.f32 %v3291_v63, %v4856_v46  ;;  %v6641_v63 = vpop.permute.xlu0 %3402 }
 0xe95   : > { %v6618_v35 = vpop.permute.xlu1 %3302  ;;  %v3298_v23 = vmul.f32 %v6492_v13, %v3292_v18 }
 0xe96   : > { %v3309_v30 = vsel %vm589_vm3, 0.0, %v6618_v35 }
 0xe97   : > { %3458 = vrot.lane.b32.xlu1 %v6453_v10, %s7343_s24  ;;  %v3310_v2 = vmul.f32 %v3309_v30, %v4860_v31  ;;  %v3300_v31 = vadd.f32 %v3298_v23, %v3282_v50  ;;  %v3374_v50 = vmul.f32 %v6433_v25, %v7590_v0  ;;  %s7779_s24 = sld [smem:[#allocation8_spill]] }
 0xe99   : > { %v6628_v42 = vpop.permute.xlu1 %3320  ;;  %v3316_v46 = vmul.f32 %v6496_v38, %v3310_v2 }
 0xe9a   : > { %v3327_v28 = vsel %vm7714_vm14, 0.0, %v6628_v42 }
 0xe9b   : > { %v3328_v55 = vmul.f32 %v3327_v28, %v4867_v17  ;;  %3476 = vrot.lane.b32.xlu1 %v6453_v10, %s7344_s25  ;;  %v3318_v17 = vadd.f32 %v3316_v46, %v3300_v31  ;;  %v3380_v31 = vmul.f32 %v6516_v62, %v3374_v50  ;;  %s7782_s25 = sld [smem:[#allocation3_spill]] }
 0xe9d   : > { %v6637_v36 = vpop.permute.xlu1 %3338  ;;  %v3334_v30 = vmul.f32 %v6502_v58, %v3328_v55 }
 0xe9e   : > { %v3345_v22 = vsel %vm7715_vm12, 0.0, %v6637_v36 }
 0xe9f   : > { %v3346_v57 = vmul.f32 %v3345_v22, %v4876_v47  ;;  %3494 = vrot.lane.b32.xlu1 %v6453_v10, %s7246_s28  ;;  %v3336_v23 = vadd.f32 %v3334_v30, %v3318_v17  ;;  %v6657_v47 = vpop.permute.xlu0 %3386  ;;  %s7719_s28 = sld [smem:[#allocation84_spill]] }
 0xea1   : > { %v3352_v18 = vmul.f32 %v6506_v34, %v3346_v57  ;;  %v6648_v28 = vpop.permute.xlu1 %3356  ;;  %s7789_s1 = smul.u32 48, %s7782_s25 }
 0xea2   : > { %v3363_v2 = vsel %vm608_vm2, 0.0, %v6648_v28 }
 0xea3   : > { %v3364_v7 = vmul.f32 %v3363_v2, %v7287_v54  ;;  %3512 = vrot.lane.b32.xlu1 %v6453_v10, %s7247_s14  ;;  %v3354_v55 = vadd.f32 %v3352_v18, %v3336_v23 }
 0xea5   : > { %v3370_v46 = vmul.f32 %v6512_v49, %v3364_v7  ;;  %v3385_v57 = vpop.permute.xlu1 %3384  ;;  %v448_v50 = vld [vmem:[%s7719_s28] sm:$0xff] }
 0xea6   : > { %v3388_v22 = vsel %vm637_vm4, %v3385_v57, %v6657_v47 }
 0xea7   : > { %v3372_v52 = vadd.f32 %v3370_v46, %v3354_v55  ;;  %v3392_v0 = vmul.f32 %v3388_v22, %v7597_v26  ;;  %3530 = vrot.lane.b32.xlu1 %v6453_v10, %s7546_s16  ;;  %v3923_v26 = vld [vmem:[%s7717_s20 + $0x18] sm:$0xff]  ;;  %s7790_s16 = sld [smem:[#allocation93_spill]] }
 0xea9   : > { %v3382_v54 = vadd.f32 %v3380_v31, %v3372_v52  ;;  %v3398_v30 = vmul.f32 %v6522_v43, %v3392_v0  ;;  %v6667_v17 = vpop.permute.xlu1 %3420 }
 0xeab   : > { %v6669_v18 = vadd.f32 %v3398_v30, %v3382_v54  ;;  %3548 = vrot.lane.b32.xlu1 %v6453_v10, %s7708_s12 }
 0xead   : > { %7716 = vst [vmem:[#allocation47_spill] sm:$0xff] %v6669_v18  ;;  %v6673_v7 = vpop.permute.xlu1 %3438  ;;  %s6853_s4 = scalar_lea.vmem %s7790_s16, %s7789_s1 }
 0xeaf   : > { %3566 = vrot.lane.b32.xlu1 %v6453_v10, %s7710_s5 }
 0xeb1   : > { %v6677_v2 = vpop.permute.xlu1 %3456 }
 0xeb3   : > { %3584 = vrot.lane.b32.xlu1 %v6453_v10, %s7255_s26 }
 0xeb5   : > { %v6684_v52 = vpop.permute.xlu1 %3474 }
 0xeb6   : > { %7718 = vst [vmem:[#allocation73_spill] sm:$0xff] %v6684_v52 }
 0xeb7   : > { %3625 = vperm.xlu1 %4112, %v3923_v26   ;;  %v7724_v26 = vld [vmem:[#allocation56_spill] sm:$0xff] }
 0xeb9   : > { %v6689_v23 = vpop.permute.xlu1 %3492 }
 0xeba   : > { %7720 = vst [vmem:[#allocation33_spill] sm:$0xff] %v6689_v23 }
 0xebb   : > { %452 = vperm.xlu1 %4112, %v448_v50  }
 0xebd   : > { %v6691_v55 = vpop.permute.xlu1 %3510 }
 0xebe   : > { %7721 = vst [vmem:[#allocation71_spill] sm:$0xff] %v6691_v55  ;;  %v7726_v55 = vld [vmem:[#allocation59_spill] sm:$0xff] }
 0xec1   : > { %v6693_v46 = vpop.permute.xlu1 %3528 }
 0xec2   : > { %7722 = vst [vmem:[#allocation57_spill] sm:$0xff] %v6693_v46 }
 0xec5   : > { %v3160_v57 = vpop.permute.xlu1 %3159 }
 0xec6   : > { %v3161_v54 = vsel %vm796_vm11, %v6556_v41, %v3160_v57  ;;  %vm7729_vm11 = vcmask 146432  }
 0xec7   : > { %v3166_v46 = vmul.f32 %v3161_v54, %v7424_v16 }
 0xec9   : > { %v3179_v22 = vpop.permute.xlu1 %3178 }
 0xeca   : > { %v3180_v0 = vsel %vm824_vm10, %v6558_v19, %v3179_v22  ;;  %vm7728_vm10 = vcmask 244736  }
 0xecb   : > { %v3185_v25 = vmul.f32 %v3180_v0, %v7724_v26 }
 0xecd   : > { %v3197_v31 = vpop.permute.xlu1 %3196  ;;  %v3191_v52 = vmul.f32 %v6536_v12, %v3185_v25 }
 0xece   : > { %v3198_v30 = vsel %vm7723_vm9, %v6562_v5, %v3197_v31  ;;  %v3173_v5 = vmul.f32 %v6446_v4, %v3166_v46  ;;  %v7730_v46 = vld [vmem:[#allocation6_spill] sm:$0xff] }
 0xecf   : > { %v3203_v18 = vmul.f32 %v3198_v30, %v7726_v55 }
 0xed0   : > { %v3193_v0 = vadd.f32 %v3191_v52, %v3173_v5 }
 0xed1   : > { %v3215_v23 = vpop.permute.xlu1 %3214  ;;  %v3209_v57 = vmul.f32 %v6455_v21, %v3203_v18  ;;  %v7731_v21 = vld [vmem:[#allocation7_spill] sm:$0xff] }
 0xed2   : > { %v3216_v50 = vsel %vm7725_vm8, %v6574_v60, %v3215_v23  ;;  %v3741_v18 = vadd.f32 %v7731_v21, %v7730_v46  ;;  %vm7766_vm8 = vcmask 785408  }
 0xed3   : > { %v3221_v19 = vmul.f32 %v3216_v50, %v7727_v1  ;;  %v3211_v25 = vadd.f32 %v3209_v57, %v3193_v0 }
 0xed5   : > { %v3233_v22 = vpop.permute.xlu1 %3232  ;;  %v3227_v60 = vmul.f32 %v6464_v8, %v3221_v19 }
 0xed6   : > { %v3234_v41 = vsel %vm7728_vm10, %v6584_v40, %v3233_v22  ;;  %vm7774_vm10 = vcmask 769024  }
 0xed7   : > { %v3239_v31 = vmul.f32 %v3234_v41, %v4895_v61  ;;  %v3229_v55 = vadd.f32 %v3227_v60, %v3211_v25 }
 0xed9   : > { %v3251_v16 = vpop.permute.xlu1 %3250  ;;  %v3245_v12 = vmul.f32 %v6470_v33, %v3239_v31 }
 0xeda   : > { %v3252_v23 = vsel %vm7729_vm11, %v6593_v53, %v3251_v16  ;;  %vm7775_vm11 = vmmov %vm7774_vm10 }
 0xedb   : > { %v3257_v1 = vmul.f32 %v3252_v23, %v4912_v20  ;;  %v3247_v8 = vadd.f32 %v3245_v12, %v3229_v55  ;;  %v3750_v20 = vadd.f32 %v6299_v48, %v6296_v39 }
 0xedd   : > { %v3263_v40 = vmul.f32 %v6479_v59, %v3257_v1  ;;  %v3269_v4 = vpop.permute.xlu1 %3268 }
 0xede   : > { %v3270_v61 = vsel %vm552_vm1, %v6602_v3, %v3269_v4  ;;  %vm7732_vm1 = vmmov %vm7714_vm14 }
 0xedf   : > { %v3275_v52 = vmul.f32 %v3270_v61, %v4915_v32  ;;  %3742 = vadd.xlane.f32.xlu1 %v3741_v18  ;;  %v3265_v53 = vadd.f32 %v3263_v40, %v3247_v8  ;;  %vm7733_vm14 = vmmov %vm7715_vm12  ;;  %vm7736_vm12 = vcmask 932864   ;;  %v7738_v8 = vld [vmem:[#allocation38_spill] sm:$0xff] }
 0xee1   : > { %v3281_v54 = vmul.f32 %v6486_v9, %v3275_v52  ;;  %v3287_v33 = vpop.permute.xlu1 %3286 }
 0xee2   : > { %v3288_v3 = vsel %vm465_vm0, %v6610_v56, %v3287_v33  ;;  %vm7734_vm0 = vcmask 1031168  }
 0xee3   : > { %v3283_v30 = vadd.f32 %v3281_v54, %v3265_v53  ;;  %3751 = vadd.xlane.f32.xlu1 %v3750_v20  ;;  %v3293_v9 = vmul.f32 %v3288_v3, %v4923_v44  ;;  %v7740_v54 = vld [vmem:[#allocation41_spill] sm:$0xff]  ;;  %v7743_v3 = vld [vmem:[#allocation31_spill] sm:$0xff] }
 0xee5   : > { %v3305_v59 = vpop.permute.xlu1 %3304  ;;  %v3299_v0 = vmul.f32 %v6492_v13, %v3293_v9  ;;  %v7744_v9 = vld [vmem:[#allocation32_spill] sm:$0xff] }
 0xee6   : > { %v3306_v32 = vsel %vm589_vm3, %v6618_v35, %v3305_v59  ;;  %vm7735_vm3 = vmmov %vm7734_vm0 }
 0xee7   : > { %v3311_v57 = vmul.f32 %v3306_v32, %v4927_v29  ;;  %v3301_v23 = vadd.f32 %v3299_v0, %v3283_v30  ;;  %v7746_v0 = vld [vmem:[#allocation53_spill] sm:$0xff] }
 0xee9   : > { %v3323_v26 = vpop.permute.xlu1 %3322  ;;  %v3317_v44 = vmul.f32 %v6496_v38, %v3311_v57  ;;  %v3391_v38 = vsel %vm637_vm4, %v6657_v47, 0.0  ;;  %vm7737_vm4 = vmmov %vm7736_vm12  ;;  %v7745_v57 = vld [vmem:[#allocation47_spill] sm:$0xff] }
 0xeea   : > { %v3324_v5 = vsel %vm7732_vm1, %v6628_v42, %v3323_v26  ;;  %v3393_v4 = vmul.f32 %v3391_v38, %v7599_v11  ;;  %v7753_v38 = vld [vmem:[#allocation71_spill] sm:$0xff] }
 0xeeb   : > { %v3329_v60 = vmul.f32 %v3324_v5, %v4935_v51  ;;  %v3319_v12 = vadd.f32 %v3317_v44, %v3301_v23 }
 0xeed   : > { %v3341_v50 = vpop.permute.xlu1 %3340  ;;  %v3335_v42 = vmul.f32 %v6502_v58, %v3329_v60 }
 0xeee   : > { %v3342_v31 = vsel %vm7733_vm14, %v6637_v36, %v3341_v50  ;;  %vm7784_vm14 = vcmask 64512  }
 0xeef   : > { %v3347_v16 = vmul.f32 %v3342_v31, %v4949_v37  ;;  %v3337_v13 = vadd.f32 %v3335_v42, %v3319_v12  ;;  %v7749_v42 = vld [vmem:[#allocation33_spill] sm:$0xff] }
 0xef1   : > { %v3359_v19 = vpop.permute.xlu1 %3358  ;;  %v3353_v36 = vmul.f32 %v6506_v34, %v3347_v16  ;;  %v7748_v16 = vld [vmem:[#allocation43_spill] sm:$0xff] }
 0xef2   : > { %v3360_v35 = vsel %vm608_vm2, %v6648_v28, %v3359_v19  ;;  %v3375_v28 = vmul.f32 %v6453_v10, %v7592_v27 }
 0xef3   : > { %v3365_v29 = vmul.f32 %v3360_v35, %v7587_v14  ;;  %v3355_v37 = vadd.f32 %v3353_v36, %v3337_v13  ;;  %v7747_v35 = vld [vmem:[#allocation63_spill] sm:$0xff] }
 0xef4   : > { %v3381_v34 = vmul.f32 %v6516_v62, %v3375_v28 }
 0xef5   : > { %v6727_v22 = vpop.permute.xlu1 %3546  ;;  %v3371_v51 = vmul.f32 %v6512_v49, %v3365_v29 }
 0xef7   : > { %v3373_v55 = vadd.f32 %v3371_v51, %v3355_v37  ;;  %v7752_v51 = vld [vmem:[#allocation55_spill] sm:$0xff] }
 0xef9   : > { %v6734_v41 = vpop.permute.xlu1 %3564  ;;  %v3383_v21 = vadd.f32 %v3381_v34, %v3373_v55 }
 0xefd   : > { %v3405_v56 = vpop.permute.xlu1 %3404 }
 0xefe   : > { %v3406_v58 = vsel %vm7734_vm0, %v6641_v63, %v3405_v56  ;;  %v3409_v14 = vsel %vm7735_vm3, %v3405_v56, 0.0 }
 0xeff   : > { %v3410_v49 = vmul.f32 %v3406_v58, %v7600_v15  ;;  %v3411_v46 = vmul.f32 %v3409_v14, %v7601_v6  ;;  %v3399_v15 = vmul.f32 %v6522_v43, %v3393_v4  ;;  %v7742_v43 = vld [vmem:[#allocation73_spill] sm:$0xff]  ;;  %v7756_v14 = vld [vmem:[#allocation34_spill] sm:$0xff]  ;;  %v3576_v4 = vpop.permute.xlu0 %3575 }
 0xf01   : > { %v3423_v25 = vpop.permute.xlu1 %3422  ;;  %v3416_v6 = vmul.f32 %v6542_v45, %v3410_v49  ;;  %v3417_v52 = vmul.f32 %v6542_v45, %v3411_v46  ;;  %v3401_v30 = vadd.f32 %v3399_v15, %v3383_v21 }
 0xf02   : > { %v3424_v27 = vsel %vm7736_vm12, %v6667_v17, %v3423_v25  ;;  %v3427_v47 = vsel %vm7737_vm4, %v3423_v25, 0.0  ;;  %v7739_v17 = vld [vmem:[#allocation49_spill] sm:$0xff] }
 0xf03   : > { %v3428_v62 = vmul.f32 %v3424_v27, %v7607_v24  ;;  %v3429_v11 = vmul.f32 %v3427_v47, %v7738_v8  ;;  %v7741_v24 = vld [vmem:[#allocation64_spill] sm:$0xff]  ;;  %v3418_v31 = vadd.f32 %v3416_v6, %v7745_v57  ;;  %v7758_v27 = vld [vmem:[#allocation62_spill] sm:$0xff] }
 0xf05   : > { %v3441_v1 = vpop.permute.xlu1 %3440  ;;  %v3434_v26 = vmul.f32 %v7741_v24, %v3428_v62  ;;  %v3435_v50 = vmul.f32 %v7741_v24, %v3429_v11  ;;  %v7760_v62 = vld [vmem:[#allocation35_spill] sm:$0xff]  ;;  %v7761_v11 = vld [vmem:[#allocation57_spill] sm:$0xff] }
 0xf06   : > { %v3442_v63 = vsel %vm656_vm5, %v6673_v7, %v3441_v1  ;;  %v3445_v18 = vsel %vm656_vm5, %v3441_v1, 0.0  ;;  %vm7750_vm5 = vcmask 900096   ;;  %v7764_v24 = vld [vmem:[#allocation37_spill] sm:$0xff] }
 0xf07   : > { %v3446_v53 = vmul.f32 %v3442_v63, %v7739_v17  ;;  %v3447_v33 = vmul.f32 %v3445_v18, %v7740_v54  ;;  %v3436_v36 = vadd.f32 %v3434_v26, %v3418_v31  ;;  %v7759_v18 = vld [vmem:[#allocation9_spill] sm:$0xff]  ;;  %v7769_v31 = vld [vmem:[#allocation39_spill] sm:$0xff] }
 0xf09   : > { %v3459_v40 = vpop.permute.xlu1 %3458  ;;  %v3452_v60 = vmul.f32 %v7746_v0, %v3446_v53  ;;  %v3453_v56 = vmul.f32 %v7746_v0, %v3447_v33  ;;  %v7762_v53 = vld [vmem:[#allocation61_spill] sm:$0xff] }
 0xf0a   : > { %v3460_v7 = vsel %vm675_vm6, %v6677_v2, %v3459_v40  ;;  %v3463_v20 = vsel %vm675_vm6, %v3459_v40, 0.0  ;;  %v3419_v2 = vadd.f32 %v3417_v52, %v3401_v30  ;;  %vm7751_vm6 = vmmov %vm7750_vm5  ;;  %v7757_v40 = vld [vmem:[#allocation29_spill] sm:$0xff]  ;;  %v7763_v30 = vld [vmem:[#allocation30_spill] sm:$0xff] }
 0xf0b   : > { %v3464_v32 = vmul.f32 %v3460_v7, %v7743_v3  ;;  %v3465_v5 = vmul.f32 %v3463_v20, %v7744_v9  ;;  %v3454_v49 = vadd.f32 %v3452_v60, %v3436_v36  ;;  %v3594_v9 = vpop.permute.xlu0 %3593 }
 0xf0c   : > { %v3437_v13 = vadd.f32 %v3435_v50, %v3419_v2 }
 0xf0d   : > { %v3477_v61 = vpop.permute.xlu1 %3476  ;;  %v3470_v1 = vmul.f32 %v7752_v51, %v3464_v32  ;;  %v3471_v28 = vmul.f32 %v7752_v51, %v3465_v5  ;;  %v7768_v5 = vld [vmem:[#allocation44_spill] sm:$0xff] }
 0xf0e   : > { %v3478_v19 = vsel %vm694_vm7, %v7742_v43, %v3477_v61  ;;  %v3481_v45 = vsel %vm694_vm7, %v3477_v61, 0.0  ;;  %vm7754_vm7 = vcmask 801792   ;;  %v3455_v46 = vadd.f32 %v3453_v56, %v3437_v13  ;;  %v7765_v43 = vld [vmem:[#allocation50_spill] sm:$0xff]  ;;  %v7772_v13 = vld [vmem:[#allocation45_spill] sm:$0xff] }
 0xf0f   : > { %v3482_v44 = vmul.f32 %v3478_v19, %v7747_v35  ;;  %v3483_v23 = vmul.f32 %v3481_v45, %v7748_v16  ;;  %vm7755_vm9 = vmmov %vm7754_vm7  ;;  %v3472_v52 = vadd.f32 %v3470_v1, %v3454_v49  ;;  %v7770_v56 = vld [vmem:[#allocation70_spill] sm:$0xff]  ;;  %v7773_v1 = vld [vmem:[#allocation40_spill] sm:$0xff] }
 0xf10   : > { %v3473_v17 = vadd.f32 %v3471_v28, %v3455_v46 }
 0xf11   : > { %v3495_v59 = vpop.permute.xlu1 %3494  ;;  %v3488_v47 = vmul.f32 %v7758_v27, %v3482_v44  ;;  %v3489_v21 = vmul.f32 %v7758_v27, %v3483_v23  ;;  %v4236_v27 = vld [vmem:[%s7776_s27 + $0x30] ss:$0 sm:$0xff] }
 0xf12   : > { %v3496_v29 = vsel %vm7750_vm5, %v7749_v42, %v3495_v59  ;;  %v3499_v25 = vsel %vm7751_vm6, %v3495_v59, 0.0 }
 0xf13   : > { %v3500_v55 = vmul.f32 %v3496_v29, %v7756_v14  ;;  %v3501_v34 = vmul.f32 %v3499_v25, %v7757_v40  ;;  %v3490_v7 = vadd.f32 %v3488_v47, %v3472_v52  ;;  %v3491_v20 = vadd.f32 %v3489_v21, %v3473_v17  ;;  %v7771_v25 = vld [vmem:[#allocation14_spill] sm:$0xff]  ;;  %v4237_v21 = vld [vmem:[%s7776_s27 + $0x38] ss:$0 sm:$0xff] }
 0xf15   : > { %v3513_v12 = vpop.permute.xlu1 %3512  ;;  %v3506_v54 = vmul.f32 %v7762_v53, %v3500_v55  ;;  %v3507_v33 = vmul.f32 %v7762_v53, %v3501_v34 }
 0xf16   : > { %v3514_v37 = vsel %vm7754_vm7, %v7753_v38, %v3513_v12  ;;  %v3517_v58 = vsel %vm7755_vm9, %v3513_v12, 0.0  ;;  %v3583_v38 = vpop.permute.xlu0 %3582 }
 0xf17   : > { %v3518_v61 = vmul.f32 %v3514_v37, %v7759_v18  ;;  %v3519_v8 = vmul.f32 %v3517_v58, %v7760_v62  ;;  %v3508_v0 = vadd.f32 %v3506_v54, %v3490_v7  ;;  %v3509_v60 = vadd.f32 %v3507_v33, %v3491_v20  ;;  %v7777_v20 = vld [vmem:[#allocation4_spill] sm:$0xff] }
 0xf19   : > { %v3531_v63 = vpop.permute.xlu1 %3530  ;;  %v3524_v19 = vmul.f32 %v7765_v43, %v3518_v61  ;;  %v3525_v45 = vmul.f32 %v7765_v43, %v3519_v8 }
 0xf1a   : > { %v3532_v15 = vsel %vm1347_vm15, %v7761_v11, %v3531_v63  ;;  %v3535_v6 = vsel %vm1347_vm15, %v3531_v63, 0.0  ;;  %vm7767_vm15 = vmmov %vm7766_vm8  ;;  %v3603_v8 = vpop.permute.xlu0 %3602 }
 0xf1b   : > { %v3536_v59 = vmul.f32 %v3532_v15, %v7763_v30  ;;  %v3537_v26 = vmul.f32 %v3535_v6, %v7764_v24  ;;  %v3526_v23 = vadd.f32 %v3524_v19, %v3508_v0  ;;  %v3527_v42 = vadd.f32 %v3525_v45, %v3509_v60 }
 0xf1d   : > { %v3549_v50 = vpop.permute.xlu1 %3548  ;;  %v3542_v35 = vmul.f32 %v7770_v56, %v3536_v59  ;;  %v3543_v44 = vmul.f32 %v7770_v56, %v3537_v26  ;;  %v7778_v59 = vld [vmem:[#allocation5_spill] sm:$0xff] }
 0xf1e   : > { %v3550_v3 = vsel %vm7766_vm8, %v6727_v22, %v3549_v50  ;;  %v3553_v32 = vsel %vm7767_vm15, %v3549_v50, 0.0 }
 0xf1f   : > { %v3554_v57 = vmul.f32 %v3550_v3, %v7768_v5  ;;  %v3555_v2 = vmul.f32 %v3553_v32, %v7769_v31  ;;  %v3544_v37 = vadd.f32 %v3542_v35, %v3526_v23  ;;  %v3545_v58 = vadd.f32 %v3543_v44, %v3527_v42  ;;  %v3922_v44 = vld [vmem:[%s7783_s0 + $0xc] sm:$0xf] }
 0xf21   : > { %v3567_v16 = vpop.permute.xlu1 %3566  ;;  %v3560_v12 = vmul.f32 %v7771_v25, %v3554_v57  ;;  %v3561_v36 = vmul.f32 %v7771_v25, %v3555_v2 }
 0xf22   : > { %v3568_v29 = vsel %vm1401_vm13, %v6734_v41, %v3567_v16  ;;  %v3571_v22 = vsel %vm1401_vm13, %v3567_v16, 0.0  ;;  %vm7780_vm13 = vcmask 1043456  }
 0xf23   : > { %v3572_v51 = vmul.f32 %v3568_v29, %v7772_v13  ;;  %v3573_v28 = vmul.f32 %v3571_v22, %v7773_v1  ;;  %v3562_v49 = vadd.f32 %v3560_v12, %v3544_v37  ;;  %v3563_v46 = vadd.f32 %v3561_v36, %v3545_v58  ;;  %vm7781_vm1 = vmmov %vm7780_vm13  ;;  %v7785_v12 = vld [vmem:[#allocation46_spill] sm:$0xff] }
 0xf24   : > { %v7786_v36 = vld [vmem:[#allocation42_spill] sm:$0xff] }
 0xf25   : > { %v3578_v14 = vmul.f32 %v3576_v4, %v3572_v51  ;;  %v3579_v55 = vmul.f32 %v3576_v4, %v3573_v28  ;;  %v3585_v40 = vpop.permute.xlu1 %3584  ;;  %v3744_v13 = vadd.f32 %v7786_v36, %v7785_v12  ;;  %v7787_v51 = vld [vmem:[#allocation58_spill] sm:$0xff] }
 0xf26   : > { %v3586_v34 = vsel %vm7774_vm10, %v3583_v38, %v3585_v40  ;;  %v3589_v41 = vsel %vm7775_vm11, %v3585_v40, 0.0  ;;  %v7788_v1 = vld [vmem:[#allocation54_spill] sm:$0xff] }
 0xf27   : > { %v3590_v47 = vmul.f32 %v4236_v27, %v3586_v34  ;;  %v3591_v63 = vmul.f32 %v4237_v21, %v3589_v41  ;;  %v3580_v4 = vadd.f32 %v3578_v14, %v3562_v49  ;;  %v3581_v62 = vadd.f32 %v3579_v55, %v3563_v46 }
 0xf28   : > { %v3747_v28 = vadd.f32 %v7788_v1, %v7787_v51 }
 0xf29   : > { %v3596_v18 = vmul.f32 %v3594_v9, %v3590_v47  ;;  %v3597_v61 = vmul.f32 %v3594_v9, %v3591_v63 }
 0xf2b   : > { %v3598_v11 = vadd.f32 %v3596_v18, %v3580_v4  ;;  %v3599_v15 = vadd.f32 %v3597_v61, %v3581_v62 }
 0xf2d   : > { %v3605_v6 = vadd.f32 %v3603_v8, %v3598_v11  ;;  %v3606_v52 = vadd.f32 %v3603_v8, %v3599_v15 }
 0xf2f   : > { %v3928_v17 = vmul.f32 -1.442695, %v3605_v6  ;;  %v3929_v53 = vmul.f32 -1.442695, %v3606_v52 }
 0xf31   : > { %4202 = vpow2.f32 %v3928_v17 }
 0xf32   : > { %4204 = vpow2.f32 %v3929_v53 }
 0xf36   : > { %v3626_v54 = vpop.permute.xlu1 %3625 }
 0xf3a   : > { %v453_v33 = vpop.permute.xlu1 %452 }
 0xf3b   : > { %v4203_v7 = vpop.eup %4202  ;;  %v504_v30 = vadd.f32 %v7777_v20, %v453_v33  ;;  %v506_v24 = vadd.f32 %v7778_v59, %v453_v33 }
 0xf3c   : > { %v4205_v26 = vpop.eup %4204  ;;  %v3613_v50 = vadd.f32 1.0, %v4203_v7  ;;  %v7791_v7 = vld [vmem:[#allocation51_spill] sm:$0xff] }
 0xf3d   : > { %v3614_v43 = vadd.f32 1.0, %v4205_v26  ;;  %v3868_v19 = vmul.f32 -1.442695, %v504_v30  ;;  %v3869_v45 = vmul.f32 -1.442695, %v506_v24 }
 0xf3e   : > { %4206 = vrcp.f32 %v3613_v50 }
 0xf3f   : > { %4208 = vrcp.f32 %v3614_v43 }
 0xf40   : > { %4210 = vpow2.f32 %v3868_v19 }
 0xf41   : > { %4212 = vpow2.f32 %v3869_v45 }
 0xf48   : > { %v4207_v3 = vpop.eup %4206 }
 0xf49   : > { %v4209_v32 = vpop.eup %4208  ;;  %v3619_v9 = vmul.f32 %v4207_v3, %v3605_v6 }
 0xf4a   : > { %v4211_v5 = vpop.eup %4210  ;;  %v3620_v57 = vmul.f32 %v4209_v32, %v3606_v52 }
 0xf4b   : > { %v4213_v31 = vpop.eup %4212  ;;  %v3621_v2 = vpack.c.bf16 %v3619_v9, %v3619_v9  ;;  %v524_v0 = vadd.f32 1.0, %v4211_v5 }
 0xf4c   : > { %v3622_v60 = vpack.c.bf16 %v3620_v57, %v3620_v57  ;;  %v525_v56 = vadd.f32 1.0, %v4213_v31 }
 0xf4d   : > { %4214 = vrcp.f32 %v524_v0  ;;  %v3632_v35 = vsel %vm7780_vm13, %v3621_v2, 0 }
 0xf4e   : > { %4216 = vrcp.f32 %v525_v56  ;;  %3930 = vmatprep.subr.msk.bf16.mxu1 %vm7781_vm1, %v3622_v60 }
 0xf4f   : > { %3638 = vmatpush1.bf16.msra.mxu1 %v3632_v35 }
 0xf52   : > { %3931 = vmatmul.mubr.msk.bf16.vlgmr.msra.gmra.mrb[12].mxu1 %vm7784_vm14, %v3922_v44 }
 0xf57   : > { %v4215_v16 = vpop.eup %4214 }
 0xf58   : > { %v4217_v23 = vpop.eup %4216  ;;  %v536_v42 = vmul.f32 %v4215_v16, %v504_v30 }
 0xf59   : > { %v537_v29 = vmul.f32 %v4217_v23, %v506_v24 }
 0xf5b   : > { %v3943_v22 = vpack.c.bf16 %v537_v29, %v536_v42  ;;  %v3738_v25 = vadd.f32 %v537_v29, %v536_v42 }
 0xf5d   : > { %3732 = vst [vmem:[%s7779_s24] sm:$0xff] %v3943_v22  ;;  %3739 = vadd.xlane.f32.xlu0 %v3738_v25 }
 0xf61   : > { %3745 = vadd.xlane.f32.xlu0 %v3744_v13 }
 0xf65   : > { %3748 = vadd.xlane.f32.xlu0 %v3747_v28 }
 0xf6c   : > { %v3743_v38 = vpop.xlane.xlu1 %3742 }
 0xf6d   : > { %v3758_v37 = vmul.f32 0.00390625, %v3743_v38 }
 0xf6f   : > { %3764 = vst.msk [vmem:[%s6853_s4 + $0x8] sm:$0xff] %vm608_vm2, %v3758_v37 }
 0xf70   : > { %v3752_v58 = vpop.xlane.xlu1 %3751 }
 0xf71   : > { %v3761_v14 = vmul.f32 0.00390625, %v3752_v58 }
 0xf73   : > { %3767 = vst.msk [vmem:[%s6853_s4 + $0x20] sm:$0xff] %vm608_vm2, %v3761_v14 }
 0xfea   : > { %v3740_v55 = vpop.xlane.xlu0 %3739 }
 0xfeb   : > { %v3757_v40 = vmul.f32 0.00390625, %v3740_v55 }
 0xfed   : > { %3763 = vst.msk [vmem:[%s6853_s4] sm:$0xff] %vm608_vm2, %v3757_v40 }
 0xfee   : > { %v3746_v34 = vpop.xlane.xlu0 %3745 }
 0xfef   : > { %v3759_v41 = vmul.f32 0.00390625, %v3746_v34 }
 0xff1   : > { %3765 = vst.msk [vmem:[%s6853_s4 + $0x10] sm:$0xff] %vm608_vm2, %v3759_v41 }
 0xff2   : > { %v3749_v49 = vpop.xlane.xlu0 %3748 }
 0xff3   : > { %v3760_v46 = vmul.f32 0.00390625, %v3749_v49 }
 0xff5   : > { %3766 = vst.msk [vmem:[%s6853_s4 + $0x18] sm:$0xff] %vm608_vm2, %v3760_v46 }
0x1025   : > { %v3671_v27 = vpop.f32.mrb[12].mxu1 }
0x1026   : > { %v3672_v47 = vadd.f32 %v3671_v27, %v3626_v54  ;;  %v3673_v21 = vpop.f32.mrb[13].mxu1 }
0x1027   : > { %v3674_v63 = vadd.f32 %v3673_v21, %v3626_v54  ;;  %v3675_v18 = vpop.f32.mrb[14].mxu1 }
0x1028   : > { %v3932_v61 = vmul.f32 -1.442695, %v3672_v47  ;;  %v3676_v4 = vpop.f32.mrb[15].mxu1 }
0x1029   : > { %v3933_v62 = vmul.f32 -1.442695, %v3674_v63 }
0x102a   : > { %4218 = vpow2.f32 %v3932_v61 }
0x102b   : > { %4220 = vpow2.f32 %v3933_v62 }
0x1034   : > { %v4219_v8 = vpop.eup %4218 }
0x1035   : > { %v4221_v11 = vpop.eup %4220  ;;  %v3684_v15 = vadd.f32 1.0, %v4219_v8 }
0x1036   : > { %v3685_v6 = vadd.f32 1.0, %v4221_v11 }
0x1037   : > { %4222 = vrcp.f32 %v3684_v15 }
0x1038   : > { %4224 = vrcp.f32 %v3685_v6 }
0x1041   : > { %v4223_v52 = vpop.eup %4222 }
0x1042   : > { %v4225_v17 = vpop.eup %4224  ;;  %v3690_v53 = vmul.f32 %v4223_v52, %v3672_v47 }
0x1043   : > { %v3691_v33 = vmul.f32 %v4225_v17, %v3674_v63 }
0x1044   : > { %v3692_v54 = vadd.f32 %v3690_v53, %v7791_v7 }
0x1045   : > { %v3693_v20 = vadd.f32 %v3691_v33, %v6453_v10 }
0x1046   : > { %v3694_v30 = vadd.f32 %v3692_v54, %v6296_v39 }
0x1047   : > { %v3695_v59 = vadd.f32 %v3693_v20, %v6299_v48 }
0x1049   : > { %v3753_v24 = vadd.f32 %v3695_v59, %v3694_v30  ;;  %v3948_v26 = vpack.c.bf16 %v3695_v59, %v3694_v30 }
0x104b   : > { %3754 = vadd.xlane.f32.xlu0 %v3753_v24  ;;  %3737 = vst [vmem:[%s7779_s24 + $0x28] sm:$0xff] %v3948_v26 }
0x10d8   : > { %v3755_v50 = vpop.xlane.xlu0 %3754 }
0x10d9   : > { %v3762_v43 = vmul.f32 0.00390625, %v3755_v50 }
0x10db   : > { %3768 = vst.msk [vmem:[%s6853_s4 + $0x28] sm:$0xff] %vm608_vm2, %v3762_v43 }
0x10dc PF: > { %s7792_s2 = sld [smem:[#allocation2_spill]] }
0x10e2   : > { %s23_s21 = sadd.s32 1, %s7792_s2  }
0x10e3   : > { %p20_p4 = scmp.ge.s32.totalorder %s23_s21, 4  }
0x10e5   :  { %22 = sbr.rel (!%p20_p4) target bundleno = 13 (0xd), region = 124 }

</bundles_post_ra>
